<compile_context>
chip_gen: v7x
topology: tpu7x:2x2x1
jax: 0.10.0
libtpu: 0.0.40
codegen_flags: <defaults>
</compile_context>

<pallas_src>
import functools

import jax
import jax.numpy as jnp
from jax.experimental import pallas as pl
from jax.experimental.pallas import tpu as pltpu


INPUT_DIM = 768
HIDDEN = [512, 256, 128, 64]
OUTPUT_DIM = 768

MIN_LANE = 128          # pad interior feature dims below this up to it
DEFAULT_TM = 512        # batch tile for large batches
_ROW_QUANTUM = 16       # bf16 sublane packing -> keep batch tiles multiple of 16


def _round_up(v, m):
    return -(-v // m) * m


def _layer_dims():
    """Return [(in, out), ...] for every Linear layer in forward order."""
    dims = [(INPUT_DIM, HIDDEN[0])]
    for i in range(len(HIDDEN) - 1):
        dims.append((HIDDEN[i], HIDDEN[i + 1]))
    for i in range(len(HIDDEN) - 1, 0, -1):
        dims.append((HIDDEN[i], HIDDEN[i - 1]))
    dims.append((HIDDEN[0], OUTPUT_DIM))
    return dims


def _activation_dtype():
    """bf16 inter-layer activations on chips with a bf16 VPU/EUP; f32 otherwise."""
    try:
        kind = jax.devices()[0].device_kind.lower()
    except Exception:
        kind = ""
    if any(tag in kind for tag in ("v2", "v3", "v4", "v5")):
        return jnp.float32
    return jnp.bfloat16


# --------------------------------------------------------------------------- #
# Kernel
# --------------------------------------------------------------------------- #
def autoencoder_kernel(*refs):
    """Fused forward pass for one (TM, INPUT_DIM) batch tile.

    refs = (x_ref, w0, b0, w1, b1, ..., w7, b7, out_ref)
    Weights are bf16 (in, out) and VMEM-resident; biases are (1, out) in the
    activation dtype.  Last layer uses tanh, all others ReLU (matches PyTorch).
    """
    x_ref = refs[0]
    out_ref = refs[-1]
    param_refs = refs[1:-1]
    n_layers = len(param_refs) // 2

    h = x_ref[...]
    for li in range(n_layers):
        w = param_refs[2 * li][...]            # bf16 weights (resident)
        b = param_refs[2 * li + 1][...]        # (1, out) bias in act dtype
        z = jnp.dot(h.astype(jnp.bfloat16), w,
                    preferred_element_type=jnp.float32)   # f32 MXU accum
        z = z.astype(b.dtype) + b              # bias add / act in act dtype
        if li == n_layers - 1:
            h = jnp.tanh(z)                     # decoder final activation
        else:
            h = jnp.maximum(z, 0.0)             # ReLU
    out_ref[...] = h.astype(out_ref.dtype)


# --------------------------------------------------------------------------- #
# pallas_call wrapper
# --------------------------------------------------------------------------- #
@functools.partial(jax.jit, static_argnames=("tm", "single_buffer_params"))
def _autoencoder_pallas(x_padded, kparams, *, tm, single_buffer_params):
    """x_padded: (B_pad, INPUT_DIM) with B_pad % tm == 0. Output is bf16."""
    b_pad = x_padded.shape[0]
    grid = (b_pad // tm,)

    x_spec = pl.BlockSpec((tm, INPUT_DIM), lambda i: (i, 0))
    # Constant index_map -> parameters stay VMEM resident across grid steps.
    if single_buffer_params:
        param_specs = [
            pl.BlockSpec(p.shape, lambda i: (0, 0), pipeline_mode=pl.Buffered(1))
            for p in kparams
        ]
    else:
        param_specs = [pl.BlockSpec(p.shape, lambda i: (0, 0)) for p in kparams]

    return pl.pallas_call(
        autoencoder_kernel,
        out_shape=jax.ShapeDtypeStruct((b_pad, OUTPUT_DIM), jnp.bfloat16),
        grid_spec=pltpu.PrefetchScalarGridSpec(
            num_scalar_prefetch=0,
            grid=grid,
            in_specs=[x_spec] + param_specs,
            out_specs=pl.BlockSpec((tm, OUTPUT_DIM), lambda i: (i, 0)),
        ),
        compiler_params=pltpu.CompilerParams(
            dimension_semantics=("parallel",),       # shard batch over 2 TCs (v7x)
            vmem_limit_bytes=40 * 1024 * 1024,
        ),
    )(x_padded, *kparams)


def _pick_tm(batch):
    """Batch tile: big batches use DEFAULT_TM; mid batches split into >=2 tiles
    so both TensorCores of a 2-TC chip get work; tiny batches use one tile."""
    if batch >= 2 * DEFAULT_TM:
        return DEFAULT_TM
    if batch > 256:
        return min(DEFAULT_TM, _round_up((batch + 1) // 2, 128))
    if batch >= 2 * _ROW_QUANTUM:
        return _round_up((batch + 1) // 2, _ROW_QUANTUM)
    return _round_up(max(batch, 1), _ROW_QUANTUM)


def autoencoder_forward(x, kparams, *, tm=None):
    """x: (B, INPUT_DIM) float array (bf16 preferred; passed through unmodified,
    no wrapper-side cast).  kparams: flat list from prepare_kernel_params.
    Returns (B, OUTPUT_DIM) bf16."""
    batch = x.shape[0]
    if tm is None:
        tm = _pick_tm(batch)
    b_pad = _round_up(batch, tm)
    if b_pad != batch:
        x = jnp.pad(x, ((0, b_pad - batch), (0, 0)))
    kparams = tuple(kparams)
    try:
        out = _autoencoder_pallas(x, kparams, tm=tm, single_buffer_params=True)
    except Exception:
        # pl.Buffered(1) unsupported on this jax build -> default 2-deep pipeline.
        out = _autoencoder_pallas(x, kparams, tm=tm, single_buffer_params=False)
    return out[:batch]


# --------------------------------------------------------------------------- #
# Parameters
# --------------------------------------------------------------------------- #
def init_params(key):
    """Deterministic init mimicking PyTorch Linear default (U[-1/sqrt(in), 1/sqrt(in)]).

    Weights are stored already transposed to (in, out); biases as (1, out).
    These are the *reference* (f32, unpadded) parameters.
    """
    params = []
    for (d_in, d_out) in _layer_dims():
        key, kw, kb = jax.random.split(key, 3)
        bound = 1.0 / jnp.sqrt(float(d_in))
        w = jax.random.uniform(kw, (d_in, d_out), jnp.float32, -bound, bound)
        b = jax.random.uniform(kb, (1, d_out), jnp.float32, -bound, bound)
        params.extend([w, b])
    return params


def prepare_kernel_params(params, act_dtype):
    """Cast weights to bf16, biases to act_dtype, and zero-pad interior dims
    below 128 up to 128 (lane-dense, semantics preserving: padded columns get
    zero weight/bias -> relu(0)=0, padded input rows are zero -> add 0)."""
    n_layers = len(params) // 2
    kparams = []
    for li in range(n_layers):
        w = params[2 * li]
        b = params[2 * li + 1]
        d_in, d_out = w.shape
        p_in = d_in if li == 0 else max(d_in, MIN_LANE)
        p_out = d_out if li == n_layers - 1 else max(d_out, MIN_LANE)
        if (p_in, p_out) != (d_in, d_out):
            w = jnp.pad(w, ((0, p_in - d_in), (0, p_out - d_out)))
            b = jnp.pad(b, ((0, 0), (0, p_out - d_out)))
        kparams.append(w.astype(jnp.bfloat16))
        kparams.append(b.astype(act_dtype))
    return kparams


def reference_forward(x, params, act_dtype):
    """Pure-JAX reference mirroring the kernel's bf16-MXU / act-dtype path."""
    h = x
    n_layers = len(params) // 2
    for li in range(n_layers):
        w = params[2 * li].astype(jnp.bfloat16)
        b = params[2 * li + 1].astype(act_dtype)
        z = jnp.dot(h.astype(jnp.bfloat16), w,
                    preferred_element_type=jnp.float32)
        z = z.astype(act_dtype) + b
        h = jnp.tanh(z) if li == n_layers - 1 else jnp.maximum(z, 0.0)
    return h


# --------------------------------------------------------------------------- #
# Demo / correctness check
# --------------------------------------------------------------------------- #
if __name__ == "__main__":
    key = jax.random.PRNGKey(0)
    key, kx = jax.random.split(key)

    batch = 32  # small demo batch; feature dims fixed by the module (768 in/out)
    # Producer supplies bf16 directly -> no wrapper-side f32->bf16 cast needed.
    x = jax.random.normal(kx, (batch, INPUT_DIM), dtype=jnp.bfloat16)

    act_dtype = _activation_dtype()
    params = init_params(key)                            # f32 reference params
    kparams = prepare_kernel_params(params, act_dtype)   # bf16 + lane-padded

    out = autoencoder_forward(x, kparams)
    out = jax.block_until_ready(out)

    ref = reference_forward(x, params, act_dtype)
    assert out.shape == (batch, OUTPUT_DIM), out.shape
    max_err = float(jnp.max(jnp.abs(out.astype(jnp.float32) -
                                    ref.astype(jnp.float32))))
    assert max_err < 3e-2, f"max abs err {max_err}"

    print("KERNEL_OK")
</pallas_src>

<mosaic_0001>
module attributes {stable_mosaic.version = 11 : i64} {
  func.func @autoencoder_kernel(%arg0: i32, %arg1: memref<16x768xbf16, #tpu.memory_space<vmem>>, %arg2: memref<768x512xbf16, #tpu.memory_space<vmem>>, %arg3: memref<1x512xbf16, #tpu.memory_space<vmem>>, %arg4: memref<512x256xbf16, #tpu.memory_space<vmem>>, %arg5: memref<1x256xbf16, #tpu.memory_space<vmem>>, %arg6: memref<256x128xbf16, #tpu.memory_space<vmem>>, %arg7: memref<1x128xbf16, #tpu.memory_space<vmem>>, %arg8: memref<128x128xbf16, #tpu.memory_space<vmem>>, %arg9: memref<1x128xbf16, #tpu.memory_space<vmem>>, %arg10: memref<128x128xbf16, #tpu.memory_space<vmem>>, %arg11: memref<1x128xbf16, #tpu.memory_space<vmem>>, %arg12: memref<128x256xbf16, #tpu.memory_space<vmem>>, %arg13: memref<1x256xbf16, #tpu.memory_space<vmem>>, %arg14: memref<256x512xbf16, #tpu.memory_space<vmem>>, %arg15: memref<1x512xbf16, #tpu.memory_space<vmem>>, %arg16: memref<512x768xbf16, #tpu.memory_space<vmem>>, %arg17: memref<1x768xbf16, #tpu.memory_space<vmem>>, %arg18: memref<16x768xbf16, #tpu.memory_space<vmem>>) attributes {dimension_semantics = [#tpu.dimension_semantics<parallel>], iteration_bounds = array<i64: 2>, scalar_prefetch = 0 : i64, scratch_operands = 0 : i64, tpu.core_type = #tpu.core_type<tc>, window_params = [{transform_indices = @transform_0, window_bounds = array<i64: 16, 768>}, {pipeline_mode = #tpu.pipeline_mode<synchronous>, transform_indices = @transform_1, window_bounds = array<i64: 768, 512>}, {pipeline_mode = #tpu.pipeline_mode<synchronous>, transform_indices = @transform_2, window_bounds = array<i64: 1, 512>}, {pipeline_mode = #tpu.pipeline_mode<synchronous>, transform_indices = @transform_3, window_bounds = array<i64: 512, 256>}, {pipeline_mode = #tpu.pipeline_mode<synchronous>, transform_indices = @transform_4, window_bounds = array<i64: 1, 256>}, {pipeline_mode = #tpu.pipeline_mode<synchronous>, transform_indices = @transform_5, window_bounds = array<i64: 256, 128>}, {pipeline_mode = #tpu.pipeline_mode<synchronous>, transform_indices = @transform_6, window_bounds = array<i64: 1, 128>}, {pipeline_mode = #tpu.pipeline_mode<synchronous>, transform_indices = @transform_7, window_bounds = array<i64: 128, 128>}, {pipeline_mode = #tpu.pipeline_mode<synchronous>, transform_indices = @transform_8, window_bounds = array<i64: 1, 128>}, {pipeline_mode = #tpu.pipeline_mode<synchronous>, transform_indices = @transform_9, window_bounds = array<i64: 128, 128>}, {pipeline_mode = #tpu.pipeline_mode<synchronous>, transform_indices = @transform_10, window_bounds = array<i64: 1, 128>}, {pipeline_mode = #tpu.pipeline_mode<synchronous>, transform_indices = @transform_11, window_bounds = array<i64: 128, 256>}, {pipeline_mode = #tpu.pipeline_mode<synchronous>, transform_indices = @transform_12, window_bounds = array<i64: 1, 256>}, {pipeline_mode = #tpu.pipeline_mode<synchronous>, transform_indices = @transform_13, window_bounds = array<i64: 256, 512>}, {pipeline_mode = #tpu.pipeline_mode<synchronous>, transform_indices = @transform_14, window_bounds = array<i64: 1, 512>}, {pipeline_mode = #tpu.pipeline_mode<synchronous>, transform_indices = @transform_15, window_bounds = array<i64: 512, 768>}, {pipeline_mode = #tpu.pipeline_mode<synchronous>, transform_indices = @transform_16, window_bounds = array<i64: 1, 768>}, {transform_indices = @transform_17, window_bounds = array<i64: 16, 768>}]} {
    %c0 = arith.constant 0 : index
    %c0_0 = arith.constant 0 : index
    %0 = vector.load %arg1[%c0, %c0_0] : memref<16x768xbf16, #tpu.memory_space<vmem>>, vector<16x768xbf16>
    %c0_1 = arith.constant 0 : index
    %c0_2 = arith.constant 0 : index
    %1 = vector.load %arg2[%c0_1, %c0_2] : memref<768x512xbf16, #tpu.memory_space<vmem>>, vector<768x512xbf16>
    %c0_3 = arith.constant 0 : index
    %c0_4 = arith.constant 0 : index
    %2 = vector.load %arg3[%c0_3, %c0_4] : memref<1x512xbf16, #tpu.memory_space<vmem>>, vector<1x512xbf16>
    %cst = arith.constant dense<0.000000e+00> : vector<16x512xf32>
    %3 = tpu.matmul %0, %1, %cst {dimension_numbers = #tpu.dot_dimension_numbers<[1], [0], [0], [1], [0, 0, 1, 1], [], []>} : vector<16x768xbf16>, vector<768x512xbf16>, vector<16x512xf32> -> vector<16x512xf32>
    %4 = arith.truncf %3 : vector<16x512xf32> to vector<16x512xbf16>
    %5 = vector.broadcast %2 : vector<1x512xbf16> to vector<16x512xbf16>
    %6 = arith.addf %4, %5 : vector<16x512xbf16>
    %cst_5 = arith.constant 0.000000e+00 : bf16
    %7 = vector.broadcast %cst_5 : bf16 to vector<16x512xbf16>
    %8 = arith.maximumf %6, %7 : vector<16x512xbf16>
    %c0_6 = arith.constant 0 : index
    %c0_7 = arith.constant 0 : index
    %9 = vector.load %arg4[%c0_6, %c0_7] : memref<512x256xbf16, #tpu.memory_space<vmem>>, vector<512x256xbf16>
    %c0_8 = arith.constant 0 : index
    %c0_9 = arith.constant 0 : index
    %10 = vector.load %arg5[%c0_8, %c0_9] : memref<1x256xbf16, #tpu.memory_space<vmem>>, vector<1x256xbf16>
    %cst_10 = arith.constant dense<0.000000e+00> : vector<16x256xf32>
    %11 = tpu.matmul %8, %9, %cst_10 {dimension_numbers = #tpu.dot_dimension_numbers<[1], [0], [0], [1], [0, 0, 1, 1], [], []>} : vector<16x512xbf16>, vector<512x256xbf16>, vector<16x256xf32> -> vector<16x256xf32>
    %12 = arith.truncf %11 : vector<16x256xf32> to vector<16x256xbf16>
    %13 = vector.broadcast %10 : vector<1x256xbf16> to vector<16x256xbf16>
    %14 = arith.addf %12, %13 : vector<16x256xbf16>
    %cst_11 = arith.constant 0.000000e+00 : bf16
    %15 = vector.broadcast %cst_11 : bf16 to vector<16x256xbf16>
    %16 = arith.maximumf %14, %15 : vector<16x256xbf16>
    %c0_12 = arith.constant 0 : index
    %c0_13 = arith.constant 0 : index
    %17 = vector.load %arg6[%c0_12, %c0_13] : memref<256x128xbf16, #tpu.memory_space<vmem>>, vector<256x128xbf16>
    %c0_14 = arith.constant 0 : index
    %c0_15 = arith.constant 0 : index
    %18 = vector.load %arg7[%c0_14, %c0_15] : memref<1x128xbf16, #tpu.memory_space<vmem>>, vector<1x128xbf16>
    %cst_16 = arith.constant dense<0.000000e+00> : vector<16x128xf32>
    %19 = tpu.matmul %16, %17, %cst_16 {dimension_numbers = #tpu.dot_dimension_numbers<[1], [0], [0], [1], [0, 0, 1, 1], [], []>} : vector<16x256xbf16>, vector<256x128xbf16>, vector<16x128xf32> -> vector<16x128xf32>
    %20 = arith.truncf %19 : vector<16x128xf32> to vector<16x128xbf16>
    %21 = vector.broadcast %18 : vector<1x128xbf16> to vector<16x128xbf16>
    %22 = arith.addf %20, %21 : vector<16x128xbf16>
    %cst_17 = arith.constant 0.000000e+00 : bf16
    %23 = vector.broadcast %cst_17 : bf16 to vector<16x128xbf16>
    %24 = arith.maximumf %22, %23 : vector<16x128xbf16>
    %c0_18 = arith.constant 0 : index
    %c0_19 = arith.constant 0 : index
    %25 = vector.load %arg8[%c0_18, %c0_19] : memref<128x128xbf16, #tpu.memory_space<vmem>>, vector<128x128xbf16>
    %c0_20 = arith.constant 0 : index
    %c0_21 = arith.constant 0 : index
    %26 = vector.load %arg9[%c0_20, %c0_21] : memref<1x128xbf16, #tpu.memory_space<vmem>>, vector<1x128xbf16>
    %cst_22 = arith.constant dense<0.000000e+00> : vector<16x128xf32>
    %27 = tpu.matmul %24, %25, %cst_22 {dimension_numbers = #tpu.dot_dimension_numbers<[1], [0], [0], [1], [0, 0, 1, 1], [], []>} : vector<16x128xbf16>, vector<128x128xbf16>, vector<16x128xf32> -> vector<16x128xf32>
    %28 = arith.truncf %27 : vector<16x128xf32> to vector<16x128xbf16>
    %29 = vector.broadcast %26 : vector<1x128xbf16> to vector<16x128xbf16>
    %30 = arith.addf %28, %29 : vector<16x128xbf16>
    %cst_23 = arith.constant 0.000000e+00 : bf16
    %31 = vector.broadcast %cst_23 : bf16 to vector<16x128xbf16>
    %32 = arith.maximumf %30, %31 : vector<16x128xbf16>
    %c0_24 = arith.constant 0 : index
    %c0_25 = arith.constant 0 : index
    %33 = vector.load %arg10[%c0_24, %c0_25] : memref<128x128xbf16, #tpu.memory_space<vmem>>, vector<128x128xbf16>
    %c0_26 = arith.constant 0 : index
    %c0_27 = arith.constant 0 : index
    %34 = vector.load %arg11[%c0_26, %c0_27] : memref<1x128xbf16, #tpu.memory_space<vmem>>, vector<1x128xbf16>
    %cst_28 = arith.constant dense<0.000000e+00> : vector<16x128xf32>
    %35 = tpu.matmul %32, %33, %cst_28 {dimension_numbers = #tpu.dot_dimension_numbers<[1], [0], [0], [1], [0, 0, 1, 1], [], []>} : vector<16x128xbf16>, vector<128x128xbf16>, vector<16x128xf32> -> vector<16x128xf32>
    %36 = arith.truncf %35 : vector<16x128xf32> to vector<16x128xbf16>
    %37 = vector.broadcast %34 : vector<1x128xbf16> to vector<16x128xbf16>
    %38 = arith.addf %36, %37 : vector<16x128xbf16>
    %cst_29 = arith.constant 0.000000e+00 : bf16
    %39 = vector.broadcast %cst_29 : bf16 to vector<16x128xbf16>
    %40 = arith.maximumf %38, %39 : vector<16x128xbf16>
    %c0_30 = arith.constant 0 : index
    %c0_31 = arith.constant 0 : index
    %41 = vector.load %arg12[%c0_30, %c0_31] : memref<128x256xbf16, #tpu.memory_space<vmem>>, vector<128x256xbf16>
    %c0_32 = arith.constant 0 : index
    %c0_33 = arith.constant 0 : index
    %42 = vector.load %arg13[%c0_32, %c0_33] : memref<1x256xbf16, #tpu.memory_space<vmem>>, vector<1x256xbf16>
    %cst_34 = arith.constant dense<0.000000e+00> : vector<16x256xf32>
    %43 = tpu.matmul %40, %41, %cst_34 {dimension_numbers = #tpu.dot_dimension_numbers<[1], [0], [0], [1], [0, 0, 1, 1], [], []>} : vector<16x128xbf16>, vector<128x256xbf16>, vector<16x256xf32> -> vector<16x256xf32>
    %44 = arith.truncf %43 : vector<16x256xf32> to vector<16x256xbf16>
    %45 = vector.broadcast %42 : vector<1x256xbf16> to vector<16x256xbf16>
    %46 = arith.addf %44, %45 : vector<16x256xbf16>
    %cst_35 = arith.constant 0.000000e+00 : bf16
    %47 = vector.broadcast %cst_35 : bf16 to vector<16x256xbf16>
    %48 = arith.maximumf %46, %47 : vector<16x256xbf16>
    %c0_36 = arith.constant 0 : index
    %c0_37 = arith.constant 0 : index
    %49 = vector.load %arg14[%c0_36, %c0_37] : memref<256x512xbf16, #tpu.memory_space<vmem>>, vector<256x512xbf16>
    %c0_38 = arith.constant 0 : index
    %c0_39 = arith.constant 0 : index
    %50 = vector.load %arg15[%c0_38, %c0_39] : memref<1x512xbf16, #tpu.memory_space<vmem>>, vector<1x512xbf16>
    %cst_40 = arith.constant dense<0.000000e+00> : vector<16x512xf32>
    %51 = tpu.matmul %48, %49, %cst_40 {dimension_numbers = #tpu.dot_dimension_numbers<[1], [0], [0], [1], [0, 0, 1, 1], [], []>} : vector<16x256xbf16>, vector<256x512xbf16>, vector<16x512xf32> -> vector<16x512xf32>
    %52 = arith.truncf %51 : vector<16x512xf32> to vector<16x512xbf16>
    %53 = vector.broadcast %50 : vector<1x512xbf16> to vector<16x512xbf16>
    %54 = arith.addf %52, %53 : vector<16x512xbf16>
    %cst_41 = arith.constant 0.000000e+00 : bf16
    %55 = vector.broadcast %cst_41 : bf16 to vector<16x512xbf16>
    %56 = arith.maximumf %54, %55 : vector<16x512xbf16>
    %c0_42 = arith.constant 0 : index
    %c0_43 = arith.constant 0 : index
    %57 = vector.load %arg16[%c0_42, %c0_43] : memref<512x768xbf16, #tpu.memory_space<vmem>>, vector<512x768xbf16>
    %c0_44 = arith.constant 0 : index
    %c0_45 = arith.constant 0 : index
    %58 = vector.load %arg17[%c0_44, %c0_45] : memref<1x768xbf16, #tpu.memory_space<vmem>>, vector<1x768xbf16>
    %cst_46 = arith.constant dense<0.000000e+00> : vector<16x768xf32>
    %59 = tpu.matmul %56, %57, %cst_46 {dimension_numbers = #tpu.dot_dimension_numbers<[1], [0], [0], [1], [0, 0, 1, 1], [], []>} : vector<16x512xbf16>, vector<512x768xbf16>, vector<16x768xf32> -> vector<16x768xf32>
    %60 = arith.truncf %59 : vector<16x768xf32> to vector<16x768xbf16>
    %61 = vector.broadcast %58 : vector<1x768xbf16> to vector<16x768xbf16>
    %62 = arith.addf %60, %61 : vector<16x768xbf16>
    %63 = math.tanh %62 : vector<16x768xbf16>
    %c0_47 = arith.constant 0 : index
    %c0_48 = arith.constant 0 : index
    %64 = vector.load %arg18[%c0_47, %c0_48] : memref<16x768xbf16, #tpu.memory_space<vmem>>, vector<16x768xbf16>
    tpu.vector_store %arg18[%c0_47, %c0_48], %63 {strides = array<i32>} : memref<16x768xbf16, #tpu.memory_space<vmem>>, vector<16x768xbf16>,
    return
  }
  func.func @transform_0(%arg0: i32) -> (i32, i32) {
    %c0_i32 = arith.constant 0 : i32
    %c0_i32_0 = arith.constant 0 : i32
    return %arg0, %c0_i32 : i32, i32
  }
  func.func @transform_1(%arg0: i32) -> (i32, i32) {
    %c0_i32 = arith.constant 0 : i32
    %c0_i32_0 = arith.constant 0 : i32
    %c0_i32_1 = arith.constant 0 : i32
    return %c0_i32, %c0_i32_0 : i32, i32
  }
  func.func @transform_2(%arg0: i32) -> (i32, i32) {
    %c0_i32 = arith.constant 0 : i32
    %c0_i32_0 = arith.constant 0 : i32
    %c0_i32_1 = arith.constant 0 : i32
    return %c0_i32, %c0_i32_0 : i32, i32
  }
  func.func @transform_3(%arg0: i32) -> (i32, i32) {
    %c0_i32 = arith.constant 0 : i32
    %c0_i32_0 = arith.constant 0 : i32
    %c0_i32_1 = arith.constant 0 : i32
    return %c0_i32, %c0_i32_0 : i32, i32
  }
  func.func @transform_4(%arg0: i32) -> (i32, i32) {
    %c0_i32 = arith.constant 0 : i32
    %c0_i32_0 = arith.constant 0 : i32
    %c0_i32_1 = arith.constant 0 : i32
    return %c0_i32, %c0_i32_0 : i32, i32
  }
  func.func @transform_5(%arg0: i32) -> (i32, i32) {
    %c0_i32 = arith.constant 0 : i32
    %c0_i32_0 = arith.constant 0 : i32
    %c0_i32_1 = arith.constant 0 : i32
    return %c0_i32, %c0_i32_0 : i32, i32
  }
  func.func @transform_6(%arg0: i32) -> (i32, i32) {
    %c0_i32 = arith.constant 0 : i32
    %c0_i32_0 = arith.constant 0 : i32
    %c0_i32_1 = arith.constant 0 : i32
    return %c0_i32, %c0_i32_0 : i32, i32
  }
  func.func @transform_7(%arg0: i32) -> (i32, i32) {
    %c0_i32 = arith.constant 0 : i32
    %c0_i32_0 = arith.constant 0 : i32
    %c0_i32_1 = arith.constant 0 : i32
    return %c0_i32, %c0_i32_0 : i32, i32
  }
  func.func @transform_8(%arg0: i32) -> (i32, i32) {
    %c0_i32 = arith.constant 0 : i32
    %c0_i32_0 = arith.constant 0 : i32
    %c0_i32_1 = arith.constant 0 : i32
    return %c0_i32, %c0_i32_0 : i32, i32
  }
  func.func @transform_9(%arg0: i32) -> (i32, i32) {
    %c0_i32 = arith.constant 0 : i32
    %c0_i32_0 = arith.constant 0 : i32
    %c0_i32_1 = arith.constant 0 : i32
    return %c0_i32, %c0_i32_0 : i32, i32
  }
  func.func @transform_10(%arg0: i32) -> (i32, i32) {
    %c0_i32 = arith.constant 0 : i32
    %c0_i32_0 = arith.constant 0 : i32
    %c0_i32_1 = arith.constant 0 : i32
    return %c0_i32, %c0_i32_0 : i32, i32
  }
  func.func @transform_11(%arg0: i32) -> (i32, i32) {
    %c0_i32 = arith.constant 0 : i32
    %c0_i32_0 = arith.constant 0 : i32
    %c0_i32_1 = arith.constant 0 : i32
    return %c0_i32, %c0_i32_0 : i32, i32
  }
  func.func @transform_12(%arg0: i32) -> (i32, i32) {
    %c0_i32 = arith.constant 0 : i32
    %c0_i32_0 = arith.constant 0 : i32
    %c0_i32_1 = arith.constant 0 : i32
    return %c0_i32, %c0_i32_0 : i32, i32
  }
  func.func @transform_13(%arg0: i32) -> (i32, i32) {
    %c0_i32 = arith.constant 0 : i32
    %c0_i32_0 = arith.constant 0 : i32
    %c0_i32_1 = arith.constant 0 : i32
    return %c0_i32, %c0_i32_0 : i32, i32
  }
  func.func @transform_14(%arg0: i32) -> (i32, i32) {
    %c0_i32 = arith.constant 0 : i32
    %c0_i32_0 = arith.constant 0 : i32
    %c0_i32_1 = arith.constant 0 : i32
    return %c0_i32, %c0_i32_0 : i32, i32
  }
  func.func @transform_15(%arg0: i32) -> (i32, i32) {
    %c0_i32 = arith.constant 0 : i32
    %c0_i32_0 = arith.constant 0 : i32
    %c0_i32_1 = arith.constant 0 : i32
    return %c0_i32, %c0_i32_0 : i32, i32
  }
  func.func @transform_16(%arg0: i32) -> (i32, i32) {
    %c0_i32 = arith.constant 0 : i32
    %c0_i32_0 = arith.constant 0 : i32
    %c0_i32_1 = arith.constant 0 : i32
    return %c0_i32, %c0_i32_0 : i32, i32
  }
  func.func @transform_17(%arg0: i32) -> (i32, i32) {
    %c0_i32 = arith.constant 0 : i32
    %c0_i32_0 = arith.constant 0 : i32
    return %arg0, %c0_i32 : i32, i32
  }
}

module attributes {stable_mosaic.version = 11 : i64} {
  func.func @autoencoder_kernel(%arg0: i32, %arg1: memref<16x768xbf16, #tpu.memory_space<vmem>>, %arg2: memref<768x512xbf16, #tpu.memory_space<vmem>>, %arg3: memref<1x512xbf16, #tpu.memory_space<vmem>>, %arg4: memref<512x256xbf16, #tpu.memory_space<vmem>>, %arg5: memref<1x256xbf16, #tpu.memory_space<vmem>>, %arg6: memref<256x128xbf16, #tpu.memory_space<vmem>>, %arg7: memref<1x128xbf16, #tpu.memory_space<vmem>>, %arg8: memref<128x128xbf16, #tpu.memory_space<vmem>>, %arg9: memref<1x128xbf16, #tpu.memory_space<vmem>>, %arg10: memref<128x128xbf16, #tpu.memory_space<vmem>>, %arg11: memref<1x128xbf16, #tpu.memory_space<vmem>>, %arg12: memref<128x256xbf16, #tpu.memory_space<vmem>>, %arg13: memref<1x256xbf16, #tpu.memory_space<vmem>>, %arg14: memref<256x512xbf16, #tpu.memory_space<vmem>>, %arg15: memref<1x512xbf16, #tpu.memory_space<vmem>>, %arg16: memref<512x768xbf16, #tpu.memory_space<vmem>>, %arg17: memref<1x768xbf16, #tpu.memory_space<vmem>>, %arg18: memref<16x768xbf16, #tpu.memory_space<vmem>>) attributes {dimension_semantics = [#tpu.dimension_semantics<parallel>], iteration_bounds = array<i64: 2>, scalar_prefetch = 0 : i64, scratch_operands = 0 : i64, tpu.core_type = #tpu.core_type<tc>, window_params = [{transform_indices = @transform_0, window_bounds = array<i64: 16, 768>}, {pipeline_mode = #tpu.pipeline_mode<synchronous>, transform_indices = @transform_1, window_bounds = array<i64: 768, 512>}, {pipeline_mode = #tpu.pipeline_mode<synchronous>, transform_indices = @transform_2, window_bounds = array<i64: 1, 512>}, {pipeline_mode = #tpu.pipeline_mode<synchronous>, transform_indices = @transform_3, window_bounds = array<i64: 512, 256>}, {pipeline_mode = #tpu.pipeline_mode<synchronous>, transform_indices = @transform_4, window_bounds = array<i64: 1, 256>}, {pipeline_mode = #tpu.pipeline_mode<synchronous>, transform_indices = @transform_5, window_bounds = array<i64: 256, 128>}, {pipeline_mode = #tpu.pipeline_mode<synchronous>, transform_indices = @transform_6, window_bounds = array<i64: 1, 128>}, {pipeline_mode = #tpu.pipeline_mode<synchronous>, transform_indices = @transform_7, window_bounds = array<i64: 128, 128>}, {pipeline_mode = #tpu.pipeline_mode<synchronous>, transform_indices = @transform_8, window_bounds = array<i64: 1, 128>}, {pipeline_mode = #tpu.pipeline_mode<synchronous>, transform_indices = @transform_9, window_bounds = array<i64: 128, 128>}, {pipeline_mode = #tpu.pipeline_mode<synchronous>, transform_indices = @transform_10, window_bounds = array<i64: 1, 128>}, {pipeline_mode = #tpu.pipeline_mode<synchronous>, transform_indices = @transform_11, window_bounds = array<i64: 128, 256>}, {pipeline_mode = #tpu.pipeline_mode<synchronous>, transform_indices = @transform_12, window_bounds = array<i64: 1, 256>}, {pipeline_mode = #tpu.pipeline_mode<synchronous>, transform_indices = @transform_13, window_bounds = array<i64: 256, 512>}, {pipeline_mode = #tpu.pipeline_mode<synchronous>, transform_indices = @transform_14, window_bounds = array<i64: 1, 512>}, {pipeline_mode = #tpu.pipeline_mode<synchronous>, transform_indices = @transform_15, window_bounds = array<i64: 512, 768>}, {pipeline_mode = #tpu.pipeline_mode<synchronous>, transform_indices = @transform_16, window_bounds = array<i64: 1, 768>}, {transform_indices = @transform_17, window_bounds = array<i64: 16, 768>}]} {
    %c0 = arith.constant 0 : index
    %c0_0 = arith.constant 0 : index
    %0 = vector.load %arg1[%c0, %c0_0] : memref<16x768xbf16, #tpu.memory_space<vmem>>, vector<16x768xbf16>
    %c0_1 = arith.constant 0 : index
    %c0_2 = arith.constant 0 : index
    %1 = vector.load %arg2[%c0_1, %c0_2] : memref<768x512xbf16, #tpu.memory_space<vmem>>, vector<768x512xbf16>
    %c0_3 = arith.constant 0 : index
    %c0_4 = arith.constant 0 : index
    %2 = vector.load %arg3[%c0_3, %c0_4] : memref<1x512xbf16, #tpu.memory_space<vmem>>, vector<1x512xbf16>
    %cst = arith.constant dense<0.000000e+00> : vector<16x512xf32>
    %3 = tpu.matmul %0, %1, %cst {dimension_numbers = #tpu.dot_dimension_numbers<[1], [0], [0], [1], [0, 0, 1, 1], [], []>} : vector<16x768xbf16>, vector<768x512xbf16>, vector<16x512xf32> -> vector<16x512xf32>
    %4 = arith.truncf %3 : vector<16x512xf32> to vector<16x512xbf16>
    %5 = vector.broadcast %2 : vector<1x512xbf16> to vector<16x512xbf16>
    %6 = arith.addf %4, %5 : vector<16x512xbf16>
    %cst_5 = arith.constant 0.000000e+00 : bf16
    %7 = vector.broadcast %cst_5 : bf16 to vector<16x512xbf16>
    %8 = arith.maximumf %6, %7 : vector<16x512xbf16>
    %c0_6 = arith.constant 0 : index
    %c0_7 = arith.constant 0 : index
    %9 = vector.load %arg4[%c0_6, %c0_7] : memref<512x256xbf16, #tpu.memory_space<vmem>>, vector<512x256xbf16>
    %c0_8 = arith.constant 0 : index
    %c0_9 = arith.constant 0 : index
    %10 = vector.load %arg5[%c0_8, %c0_9] : memref<1x256xbf16, #tpu.memory_space<vmem>>, vector<1x256xbf16>
    %cst_10 = arith.constant dense<0.000000e+00> : vector<16x256xf32>
    %11 = tpu.matmul %8, %9, %cst_10 {dimension_numbers = #tpu.dot_dimension_numbers<[1], [0], [0], [1], [0, 0, 1, 1], [], []>} : vector<16x512xbf16>, vector<512x256xbf16>, vector<16x256xf32> -> vector<16x256xf32>
    %12 = arith.truncf %11 : vector<16x256xf32> to vector<16x256xbf16>
    %13 = vector.broadcast %10 : vector<1x256xbf16> to vector<16x256xbf16>
    %14 = arith.addf %12, %13 : vector<16x256xbf16>
    %cst_11 = arith.constant 0.000000e+00 : bf16
    %15 = vector.broadcast %cst_11 : bf16 to vector<16x256xbf16>
    %16 = arith.maximumf %14, %15 : vector<16x256xbf16>
    %c0_12 = arith.constant 0 : index
    %c0_13 = arith.constant 0 : index
    %17 = vector.load %arg6[%c0_12, %c0_13] : memref<256x128xbf16, #tpu.memory_space<vmem>>, vector<256x128xbf16>
    %c0_14 = arith.constant 0 : index
    %c0_15 = arith.constant 0 : index
    %18 = vector.load %arg7[%c0_14, %c0_15] : memref<1x128xbf16, #tpu.memory_space<vmem>>, vector<1x128xbf16>
    %cst_16 = arith.constant dense<0.000000e+00> : vector<16x128xf32>
    %19 = tpu.matmul %16, %17, %cst_16 {dimension_numbers = #tpu.dot_dimension_numbers<[1], [0], [0], [1], [0, 0, 1, 1], [], []>} : vector<16x256xbf16>, vector<256x128xbf16>, vector<16x128xf32> -> vector<16x128xf32>
    %20 = arith.truncf %19 : vector<16x128xf32> to vector<16x128xbf16>
    %21 = vector.broadcast %18 : vector<1x128xbf16> to vector<16x128xbf16>
    %22 = arith.addf %20, %21 : vector<16x128xbf16>
    %cst_17 = arith.constant 0.000000e+00 : bf16
    %23 = vector.broadcast %cst_17 : bf16 to vector<16x128xbf16>
    %24 = arith.maximumf %22, %23 : vector<16x128xbf16>
    %c0_18 = arith.constant 0 : index
    %c0_19 = arith.constant 0 : index
    %25 = vector.load %arg8[%c0_18, %c0_19] : memref<128x128xbf16, #tpu.memory_space<vmem>>, vector<128x128xbf16>
    %c0_20 = arith.constant 0 : index
    %c0_21 = arith.constant 0 : index
    %26 = vector.load %arg9[%c0_20, %c0_21] : memref<1x128xbf16, #tpu.memory_space<vmem>>, vector<1x128xbf16>
    %cst_22 = arith.constant dense<0.000000e+00> : vector<16x128xf32>
    %27 = tpu.matmul %24, %25, %cst_22 {dimension_numbers = #tpu.dot_dimension_numbers<[1], [0], [0], [1], [0, 0, 1, 1], [], []>} : vector<16x128xbf16>, vector<128x128xbf16>, vector<16x128xf32> -> vector<16x128xf32>
    %28 = arith.truncf %27 : vector<16x128xf32> to vector<16x128xbf16>
    %29 = vector.broadcast %26 : vector<1x128xbf16> to vector<16x128xbf16>
    %30 = arith.addf %28, %29 : vector<16x128xbf16>
    %cst_23 = arith.constant 0.000000e+00 : bf16
    %31 = vector.broadcast %cst_23 : bf16 to vector<16x128xbf16>
    %32 = arith.maximumf %30, %31 : vector<16x128xbf16>
    %c0_24 = arith.constant 0 : index
    %c0_25 = arith.constant 0 : index
    %33 = vector.load %arg10[%c0_24, %c0_25] : memref<128x128xbf16, #tpu.memory_space<vmem>>, vector<128x128xbf16>
    %c0_26 = arith.constant 0 : index
    %c0_27 = arith.constant 0 : index
    %34 = vector.load %arg11[%c0_26, %c0_27] : memref<1x128xbf16, #tpu.memory_space<vmem>>, vector<1x128xbf16>
    %cst_28 = arith.constant dense<0.000000e+00> : vector<16x128xf32>
    %35 = tpu.matmul %32, %33, %cst_28 {dimension_numbers = #tpu.dot_dimension_numbers<[1], [0], [0], [1], [0, 0, 1, 1], [], []>} : vector<16x128xbf16>, vector<128x128xbf16>, vector<16x128xf32> -> vector<16x128xf32>
    %36 = arith.truncf %35 : vector<16x128xf32> to vector<16x128xbf16>
    %37 = vector.broadcast %34 : vector<1x128xbf16> to vector<16x128xbf16>
    %38 = arith.addf %36, %37 : vector<16x128xbf16>
    %cst_29 = arith.constant 0.000000e+00 : bf16
    %39 = vector.broadcast %cst_29 : bf16 to vector<16x128xbf16>
    %40 = arith.maximumf %38, %39 : vector<16x128xbf16>
    %c0_30 = arith.constant 0 : index
    %c0_31 = arith.constant 0 : index
    %41 = vector.load %arg12[%c0_30, %c0_31] : memref<128x256xbf16, #tpu.memory_space<vmem>>, vector<128x256xbf16>
    %c0_32 = arith.constant 0 : index
    %c0_33 = arith.constant 0 : index
    %42 = vector.load %arg13[%c0_32, %c0_33] : memref<1x256xbf16, #tpu.memory_space<vmem>>, vector<1x256xbf16>
    %cst_34 = arith.constant dense<0.000000e+00> : vector<16x256xf32>
    %43 = tpu.matmul %40, %41, %cst_34 {dimension_numbers = #tpu.dot_dimension_numbers<[1], [0], [0], [1], [0, 0, 1, 1], [], []>} : vector<16x128xbf16>, vector<128x256xbf16>, vector<16x256xf32> -> vector<16x256xf32>
    %44 = arith.truncf %43 : vector<16x256xf32> to vector<16x256xbf16>
    %45 = vector.broadcast %42 : vector<1x256xbf16> to vector<16x256xbf16>
    %46 = arith.addf %44, %45 : vector<16x256xbf16>
    %cst_35 = arith.constant 0.000000e+00 : bf16
    %47 = vector.broadcast %cst_35 : bf16 to vector<16x256xbf16>
    %48 = arith.maximumf %46, %47 : vector<16x256xbf16>
    %c0_36 = arith.constant 0 : index
    %c0_37 = arith.constant 0 : index
    %49 = vector.load %arg14[%c0_36, %c0_37] : memref<256x512xbf16, #tpu.memory_space<vmem>>, vector<256x512xbf16>
    %c0_38 = arith.constant 0 : index
    %c0_39 = arith.constant 0 : index
    %50 = vector.load %arg15[%c0_38, %c0_39] : memref<1x512xbf16, #tpu.memory_space<vmem>>, vector<1x512xbf16>
    %cst_40 = arith.constant dense<0.000000e+00> : vector<16x512xf32>
    %51 = tpu.matmul %48, %49, %cst_40 {dimension_numbers = #tpu.dot_dimension_numbers<[1], [0], [0], [1], [0, 0, 1, 1], [], []>} : vector<16x256xbf16>, vector<256x512xbf16>, vector<16x512xf32> -> vector<16x512xf32>
    %52 = arith.truncf %51 : vector<16x512xf32> to vector<16x512xbf16>
    %53 = vector.broadcast %50 : vector<1x512xbf16> to vector<16x512xbf16>
    %54 = arith.addf %52, %53 : vector<16x512xbf16>
    %cst_41 = arith.constant 0.000000e+00 : bf16
    %55 = vector.broadcast %cst_41 : bf16 to vector<16x512xbf16>
    %56 = arith.maximumf %54, %55 : vector<16x512xbf16>
    %c0_42 = arith.constant 0 : index
    %c0_43 = arith.constant 0 : index
    %57 = vector.load %arg16[%c0_42, %c0_43] : memref<512x768xbf16, #tpu.memory_space<vmem>>, vector<512x768xbf16>
    %c0_44 = arith.constant 0 : index
    %c0_45 = arith.constant 0 : index
    %58 = vector.load %arg17[%c0_44, %c0_45] : memref<1x768xbf16, #tpu.memory_space<vmem>>, vector<1x768xbf16>
    %cst_46 = arith.constant dense<0.000000e+00> : vector<16x768xf32>
    %59 = tpu.matmul %56, %57, %cst_46 {dimension_numbers = #tpu.dot_dimension_numbers<[1], [0], [0], [1], [0, 0, 1, 1], [], []>} : vector<16x512xbf16>, vector<512x768xbf16>, vector<16x768xf32> -> vector<16x768xf32>
    %60 = arith.truncf %59 : vector<16x768xf32> to vector<16x768xbf16>
    %61 = vector.broadcast %58 : vector<1x768xbf16> to vector<16x768xbf16>
    %62 = arith.addf %60, %61 : vector<16x768xbf16>
    %63 = math.tanh %62 : vector<16x768xbf16>
    %c0_47 = arith.constant 0 : index
    %c0_48 = arith.constant 0 : index
    %64 = vector.load %arg18[%c0_47, %c0_48] : memref<16x768xbf16, #tpu.memory_space<vmem>>, vector<16x768xbf16>
    tpu.vector_store %arg18[%c0_47, %c0_48], %63 {strides = array<i32>} : memref<16x768xbf16, #tpu.memory_space<vmem>>, vector<16x768xbf16>,
    return
  }
  func.func @transform_0(%arg0: i32) -> (i32, i32) {
    %c0_i32 = arith.constant 0 : i32
    %c0_i32_0 = arith.constant 0 : i32
    return %arg0, %c0_i32 : i32, i32
  }
  func.func @transform_1(%arg0: i32) -> (i32, i32) {
    %c0_i32 = arith.constant 0 : i32
    %c0_i32_0 = arith.constant 0 : i32
    %c0_i32_1 = arith.constant 0 : i32
    return %c0_i32, %c0_i32_0 : i32, i32
  }
  func.func @transform_2(%arg0: i32) -> (i32, i32) {
    %c0_i32 = arith.constant 0 : i32
    %c0_i32_0 = arith.constant 0 : i32
    %c0_i32_1 = arith.constant 0 : i32
    return %c0_i32, %c0_i32_0 : i32, i32
  }
  func.func @transform_3(%arg0: i32) -> (i32, i32) {
    %c0_i32 = arith.constant 0 : i32
    %c0_i32_0 = arith.constant 0 : i32
    %c0_i32_1 = arith.constant 0 : i32
    return %c0_i32, %c0_i32_0 : i32, i32
  }
  func.func @transform_4(%arg0: i32) -> (i32, i32) {
    %c0_i32 = arith.constant 0 : i32
    %c0_i32_0 = arith.constant 0 : i32
    %c0_i32_1 = arith.constant 0 : i32
    return %c0_i32, %c0_i32_0 : i32, i32
  }
  func.func @transform_5(%arg0: i32) -> (i32, i32) {
    %c0_i32 = arith.constant 0 : i32
    %c0_i32_0 = arith.constant 0 : i32
    %c0_i32_1 = arith.constant 0 : i32
    return %c0_i32, %c0_i32_0 : i32, i32
  }
  func.func @transform_6(%arg0: i32) -> (i32, i32) {
    %c0_i32 = arith.constant 0 : i32
    %c0_i32_0 = arith.constant 0 : i32
    %c0_i32_1 = arith.constant 0 : i32
    return %c0_i32, %c0_i32_0 : i32, i32
  }
  func.func @transform_7(%arg0: i32) -> (i32, i32) {
    %c0_i32 = arith.constant 0 : i32
    %c0_i32_0 = arith.constant 0 : i32
    %c0_i32_1 = arith.constant 0 : i32
    return %c0_i32, %c0_i32_0 : i32, i32
  }
  func.func @transform_8(%arg0: i32) -> (i32, i32) {
    %c0_i32 = arith.constant 0 : i32
    %c0_i32_0 = arith.constant 0 : i32
    %c0_i32_1 = arith.constant 0 : i32
    return %c0_i32, %c0_i32_0 : i32, i32
  }
  func.func @transform_9(%arg0: i32) -> (i32, i32) {
    %c0_i32 = arith.constant 0 : i32
    %c0_i32_0 = arith.constant 0 : i32
    %c0_i32_1 = arith.constant 0 : i32
    return %c0_i32, %c0_i32_0 : i32, i32
  }
  func.func @transform_10(%arg0: i32) -> (i32, i32) {
    %c0_i32 = arith.constant 0 : i32
    %c0_i32_0 = arith.constant 0 : i32
    %c0_i32_1 = arith.constant 0 : i32
    return %c0_i32, %c0_i32_0 : i32, i32
  }
  func.func @transform_11(%arg0: i32) -> (i32, i32) {
    %c0_i32 = arith.constant 0 : i32
    %c0_i32_0 = arith.constant 0 : i32
    %c0_i32_1 = arith.constant 0 : i32
    return %c0_i32, %c0_i32_0 : i32, i32
  }
  func.func @transform_12(%arg0: i32) -> (i32, i32) {
    %c0_i32 = arith.constant 0 : i32
    %c0_i32_0 = arith.constant 0 : i32
    %c0_i32_1 = arith.constant 0 : i32
    return %c0_i32, %c0_i32_0 : i32, i32
  }
  func.func @transform_13(%arg0: i32) -> (i32, i32) {
    %c0_i32 = arith.constant 0 : i32
    %c0_i32_0 = arith.constant 0 : i32
    %c0_i32_1 = arith.constant 0 : i32
    return %c0_i32, %c0_i32_0 : i32, i32
  }
  func.func @transform_14(%arg0: i32) -> (i32, i32) {
    %c0_i32 = arith.constant 0 : i32
    %c0_i32_0 = arith.constant 0 : i32
    %c0_i32_1 = arith.constant 0 : i32
    return %c0_i32, %c0_i32_0 : i32, i32
  }
  func.func @transform_15(%arg0: i32) -> (i32, i32) {
    %c0_i32 = arith.constant 0 : i32
    %c0_i32_0 = arith.constant 0 : i32
    %c0_i32_1 = arith.constant 0 : i32
    return %c0_i32, %c0_i32_0 : i32, i32
  }
  func.func @transform_16(%arg0: i32) -> (i32, i32) {
    %c0_i32 = arith.constant 0 : i32
    %c0_i32_0 = arith.constant 0 : i32
    %c0_i32_1 = arith.constant 0 : i32
    return %c0_i32, %c0_i32_0 : i32, i32
  }
  func.func @transform_17(%arg0: i32) -> (i32, i32) {
    %c0_i32 = arith.constant 0 : i32
    %c0_i32_0 = arith.constant 0 : i32
    return %arg0, %c0_i32 : i32, i32
  }
}

</mosaic_0001>

<bundles_post_ra>
// kernel: _autoencoder_pallas.1
= control target key start
LH: loop header
LB: loop body
LE: loop exit
PB: predicated region body
PF: predicated region fallthrough
CT: control target
= control target key end

     0   :  { %s8368_s0 = inlined_call_operand.hbm [shape: bf16[32,768], index: 0, kind: input, shape index: {}]   ;;  %s8369_s1 = inlined_call_operand.hbm [shape: bf16[768,512], index: 1, kind: input, shape index: {}]   ;;  %s8370_s2 = inlined_call_operand.vmem [shape: bf16[1,512], index: 2, kind: input, shape index: {}]   ;;  %s8371_s3 = inlined_call_operand.hbm [shape: bf16[512,256], index: 3, kind: input, shape index: {}]   ;;  %s8372_s4 = inlined_call_operand.hbm [shape: bf16[1,256], index: 4, kind: input, shape index: {}]   ;;  %s8373_s5 = inlined_call_operand.hbm [shape: bf16[256,128], index: 5, kind: input, shape index: {}]   ;;  %s8374_s6 = inlined_call_operand.vmem [shape: bf16[1,128], index: 6, kind: input, shape index: {}]   ;;  %s8375_s7 = inlined_call_operand.hbm [shape: bf16[128,128], index: 7, kind: input, shape index: {}]   ;;  %s8376_s8 = inlined_call_operand.vmem [shape: bf16[1,128], index: 8, kind: input, shape index: {}]   ;;  %s8377_s9 = inlined_call_operand.hbm [shape: bf16[128,128], index: 9, kind: input, shape index: {}]   ;;  %s8378_s10 = inlined_call_operand.vmem [shape: bf16[1,128], index: 10, kind: input, shape index: {}]   ;;  %s8379_s11 = inlined_call_operand.hbm [shape: bf16[128,256], index: 11, kind: input, shape index: {}]   ;;  %s8380_s12 = inlined_call_operand.vmem [shape: bf16[1,256], index: 12, kind: input, shape index: {}]   ;;  %s8381_s13 = inlined_call_operand.hbm [shape: bf16[256,512], index: 13, kind: input, shape index: {}]   ;;  %s8382_s14 = inlined_call_operand.vmem [shape: bf16[1,512], index: 14, kind: input, shape index: {}]   ;;  %s8383_s15 = inlined_call_operand.hbm [shape: bf16[512,768], index: 15, kind: input, shape index: {}]   ;;  %s8384_s16 = inlined_call_operand.vmem [shape: bf16[1,768], index: 16, kind: input, shape index: {}]   ;;  %s8385_s17 = inlined_call_operand.hbm [shape: bf16[32,768], index: 17, kind: output, shape index: {}]  }
   0x1   :  { %8399 = sst [smem:[#allocation27_spill]] %s8368_s0 }
   0x2   :  { %8400 = sst [smem:[#allocation28_spill]] %s8369_s1 }
   0x3   :  { %8401 = sst [smem:[#allocation29_spill]] %s8370_s2 }
   0x4   :  { %8402 = sst [smem:[#allocation30_spill]] %s8371_s3 }
   0x5   :  { %8403 = sst [smem:[#allocation31_spill]] %s8372_s4 }
   0x6   :  { %8404 = sst [smem:[#allocation32_spill]] %s8374_s6 }
   0x7   :  { %8405 = sst [smem:[#allocation33_spill]] %s8376_s8 }
   0x8   :  { %8406 = sst [smem:[#allocation34_spill]] %s8378_s10 }
   0x9   :  { %8407 = sst [smem:[#allocation35_spill]] %s8380_s12 }
   0xa   :  { %8408 = sst [smem:[#allocation36_spill]] %s8382_s14 }
   0xb   :  { %8409 = sst [smem:[#allocation37_spill]] %s8384_s16 }
   0xc   :  { %8410 = sst [smem:[#allocation38_spill]] %s8385_s17 }
   0xd   :  { %22 = vsyncpa [#allocation3], 0 }
   0xe   :  { %24 = vsyncpa [#allocation3 + $0x1], 0 }
   0xf   :  { %25 = vsyncpa [#allocation6], 0 }
  0x10   :  { %26 = vsyncpa [#allocation9], 0 }
  0x11   :  { %27 = vsyncpa [#allocation12], 0 }
  0x12   :  { %28 = vsyncpa [#allocation15], 0 }
  0x13   :  { %29 = vsyncpa [#allocation18], 0 }
  0x14   :  { %30 = vsyncpa [#allocation4], 0 }
  0x15   :  { %32 = vsyncpa [#allocation4 + $0x1], 0  ;;  %s7792_s24 = smov 0   ;;  %s7794_s25 = smov 0  }
  0x16   :  { %s7796_s26 = smov 0   ;;  %s7798_s27 = smov 0  }
  0x17 LB: > { %s7677_s28 = smov [#allocation5]   ;;  %s7813_s0 = sadd.s32 4294967295, %s7675_s27   ;;  %s7675_s27 = sphi %s7798_s27, %s8453_s27   ;;  %s7671_s26 = sphi %s7796_s26, %s8452_s26   ;;  %s7667_s25 = sphi %s7794_s25, %s8451_s25   ;;  %s7663_s24 = sphi %s7792_s24, %s8450_s24  }
  0x18   : > { %s443_s29 = sshll.u32 %s7677_s28, 4  ;;  %p5587_p0 = scmp.ge.s32.totalorder %s7675_s27, 1  ;;  %s7818_s29 = int_to_ptr.vmem [resolvable:$true] %s443_s29 }
  0x19   : > { %p8389_p1 = scmp.eq.s32.totalorder %s7813_s0, 0  ;;  %p431_p2 = scmp.lt.s32.totalorder %s7675_s27, 3 }
  0x1a   : > { %s7678_s18 = smov [#allocation8]   ;;  %s7679_s20 = smov [#allocation11]  }
  0x1b   : > { %p7820_p3 = pnand %p5587_p0, %p431_p2  ;;  %s473_s19 = sshll.u32 %s7678_s18, 4  ;;  %s7833_s19 = int_to_ptr.vmem [resolvable:$true] %s473_s19 }
  0x1c   : > { %s7835_s21 = sshll.u32 %s7679_s20, 4  ;;  %s8413_s28 = sld [smem:[#allocation28_spill]]  ;;  %s500_s21 = int_to_ptr.vmem [resolvable:$true] %s7835_s21 }
  0x1d   : > { %s8411_s30 = scalar_select %p7820_p3, 1, 0 }
  0x1e   : > { %p6348_p5 = pneg %p7820_p3 }
  0x20   : > { %p7829_p6 = pnand %p6348_p5, %p8389_p1 }
  0x22   : > { %s7307_s17 = scalar_lea.hbm %s8413_s28, 24576  ;;  %p7845_p8 = pneg %p7829_p6 }
  0x23   : > { %p7308_p7 = scmp.ne.s32.totalorder %s8413_s28, %s7307_s17  ;;  %p7314_p11 = scmp.lt.u32.totalorder %s7307_s17, %s8413_s28 }
  0x25   : > { %p7310_p9 = pnand %p7845_p8, %p7308_p7 }
  0x27   : > { %p7311_p10 = pneg %p7310_p9 }
  0x29   : > { %p7316_p12 = pnand %p7314_p11, %p7311_p10 }
  0x2b   : > { %7319 = shalt.err (!%p7316_p12)
}
  0x2c   : > { %s7320_s14 = scalar_lea.vmem %s7818_s29, 24576  ;;  %p7328_p5 = scmp.lt.s32.totalorder %s7818_s29, %s7818_s29 }
  0x2d   : > { %p7321_p13 = scmp.ne.s32.totalorder %s7818_s29, %s7320_s14  ;;  %p7329_p4 = scmp.lt.s32.totalorder %s7320_s14, %s7320_s14 }
  0x2f   : > { %p7323_p0 = pnand %p7321_p13, %p7845_p8  ;;  %p7330_p7 = por %p7329_p4, %p7328_p5 }
  0x31   : > { %p7324_p2 = pneg %p7323_p0 }
  0x33   : > { %p7331_p9 = pnand %p7330_p7, %p7324_p2 }
  0x35   : > { %7334 = shalt.err (!%p7331_p9)
}
  0x36   : > { %s8391_s16 = smov 256   ;;  %s8392_s12 = smov 16  }
  0x37   : > { %6351 = dma.hbm_to_vmem [thread:$0]  (!%p7829_p6), %s8413_s28, 24576, %s7818_s29, [#allocation6], %s8391_s16, %s8391_s16, %s8392_s12  }
  0x38   : > { %s8415_s4 = sld [smem:[#allocation31_spill]] }
  0x3e   : > { %s7335_s14 = scalar_lea.hbm %s8415_s4, 32 }
  0x3f   : > { %p7336_p4 = scmp.ne.s32.totalorder %s8415_s4, %s7335_s14  ;;  %p7342_p12 = scmp.lt.u32.totalorder %s7335_s14, %s8415_s4 }
  0x41   : > { %p7338_p10 = pnand %p7336_p4, %p7845_p8 }
  0x43   : > { %p7339_p11 = pneg %p7338_p10 }
  0x45   : > { %p7344_p13 = pnand %p7342_p12, %p7339_p11 }
  0x47   : > { %7347 = shalt.err (!%p7344_p13)
}
  0x48   : > { %s7348_s29 = scalar_lea.vmem %s7833_s19, 32  ;;  %p7356_p7 = scmp.lt.s32.totalorder %s7833_s19, %s7833_s19 }
  0x49   : > { %p7349_p0 = scmp.ne.s32.totalorder %s7833_s19, %s7348_s29  ;;  %p7357_p9 = scmp.lt.s32.totalorder %s7348_s29, %s7348_s29 }
  0x4b   : > { %p7351_p2 = pnand %p7349_p0, %p7845_p8  ;;  %p7358_p4 = por %p7357_p9, %p7356_p7 }
  0x4d   : > { %p7352_p5 = pneg %p7351_p2 }
  0x4f   : > { %p7359_p10 = pnand %p7358_p4, %p7352_p5 }
  0x51   : > { %7362 = shalt.err (!%p7359_p10)
}
  0x52   : > { %6357 = dma.hbm_to_vmem [thread:$0]  (!%p7829_p6), %s8415_s4, 32, %s7833_s19, [#allocation9]  }
  0x53   : > { %s7363_s17 = scalar_lea.hbm %s8375_s7, 1024 }
  0x54   : > { %p7364_p11 = scmp.ne.s32.totalorder %s8375_s7, %s7363_s17  ;;  %p7370_p0 = scmp.lt.u32.totalorder %s7363_s17, %s8375_s7 }
  0x56   : > { %p7366_p12 = pnand %p7364_p11, %p7845_p8 }
  0x58   : > { %p7367_p13 = pneg %p7366_p12 }
  0x5a   : > { %p7372_p2 = pnand %p7370_p0, %p7367_p13 }
  0x5c   : > { %7375 = shalt.err (!%p7372_p2)
}
  0x5d   : > { %s7376_s29 = scalar_lea.vmem %s500_s21, 1024  ;;  %p7384_p4 = scmp.lt.s32.totalorder %s500_s21, %s500_s21 }
  0x5e   : > { %p7377_p5 = scmp.ne.s32.totalorder %s500_s21, %s7376_s29  ;;  %p7385_p10 = scmp.lt.s32.totalorder %s7376_s29, %s7376_s29 }
  0x60   : > { %p7379_p7 = pnand %p7377_p5, %p7845_p8  ;;  %p7386_p1 = por %p7385_p10, %p7384_p4 }
  0x62   : > { %p7380_p9 = pneg %p7379_p7 }
  0x64   : > { %p7387_p3 = pnand %p7386_p1, %p7380_p9 }
  0x66   : > { %7390 = shalt.err (!%p7387_p3)
}
  0x67   : > { %s8394_s19 = smov 64   ;;  %s7683_s2 = smov 4  }
  0x68   : > { %6363 = dma.hbm_to_vmem [thread:$0]  (!%p7829_p6), %s8375_s7, 1024, %s500_s21, [#allocation12], %s8394_s19, %s8394_s19, %s7683_s2  }
  0x69   : > { %s7684_s10 = smov [#allocation14]   ;;  %s7685_s22 = smov [#allocation7]  }
  0x6a   : > { %s531_s17 = sshll.u32 %s7684_s10, 4  ;;  %s459_s23 = sshll.u32 %s7685_s22, 4  ;;  %s532_s17 = int_to_ptr.vmem [resolvable:$true] %s531_s17  ;;  %s460_s23 = int_to_ptr.vmem [resolvable:$true] %s459_s23 }
  0x6b   : > { %s7391_s29 = scalar_lea.hbm %s8379_s11, 2048 }
  0x6c   : > { %p7392_p1 = scmp.ne.s32.totalorder %s8379_s11, %s7391_s29  ;;  %p7398_p12 = scmp.lt.u32.totalorder %s7391_s29, %s8379_s11 }
  0x6e   : > { %p7394_p3 = pnand %p7392_p1, %p7845_p8 }
  0x70   : > { %p7395_p11 = pneg %p7394_p3 }
  0x72   : > { %p7400_p13 = pnand %p7398_p12, %p7395_p11 }
  0x74   : > { %7403 = shalt.err (!%p7400_p13)
}
  0x75   : > { %s7404_s21 = scalar_lea.vmem %s532_s17, 2048  ;;  %p7412_p7 = scmp.lt.s32.totalorder %s532_s17, %s532_s17 }
  0x76   : > { %p7405_p0 = scmp.ne.s32.totalorder %s532_s17, %s7404_s21  ;;  %p7413_p9 = scmp.lt.s32.totalorder %s7404_s21, %s7404_s21 }
  0x78   : > { %p7407_p2 = pnand %p7405_p0, %p7845_p8  ;;  %p7414_p4 = por %p7413_p9, %p7412_p7 }
  0x7a   : > { %p7408_p5 = pneg %p7407_p2 }
  0x7c   : > { %p7415_p10 = pnand %p7414_p4, %p7408_p5 }
  0x7e   : > { %7418 = shalt.err (!%p7415_p10)
}
  0x7f   : > { %s7686_s16 = smov 128   ;;  %s7687_s12 = smov 8  }
  0x80   : > { %6369 = dma.hbm_to_vmem [thread:$0]  (!%p7829_p6), %s8379_s11, 2048, %s532_s17, [#allocation15], %s7686_s16, %s7686_s16, %s7687_s12  }
  0x81   : > { %s8416_s3 = sld [smem:[#allocation30_spill]] }
  0x87   : > { %s7419_s10 = scalar_lea.hbm %s8416_s3, 8192 }
  0x88   : > { %p7420_p1 = scmp.ne.s32.totalorder %s8416_s3, %s7419_s10  ;;  %p7426_p12 = scmp.lt.u32.totalorder %s7419_s10, %s8416_s3 }
  0x8a   : > { %p7422_p3 = pnand %p7420_p1, %p7845_p8 }
  0x8c   : > { %p7423_p11 = pneg %p7422_p3 }
  0x8e   : > { %p7428_p13 = pnand %p7426_p12, %p7423_p11 }
  0x90   : > { %7431 = shalt.err (!%p7428_p13)
}
  0x91   : > { %s7432_s21 = scalar_lea.vmem %s460_s23, 8192  ;;  %p7440_p7 = scmp.lt.s32.totalorder %s460_s23, %s460_s23 }
  0x92   : > { %p7433_p0 = scmp.ne.s32.totalorder %s460_s23, %s7432_s21  ;;  %p7441_p9 = scmp.lt.s32.totalorder %s7432_s21, %s7432_s21 }
  0x94   : > { %p7435_p2 = pnand %p7433_p0, %p7845_p8  ;;  %p7442_p4 = por %p7441_p9, %p7440_p7 }
  0x96   : > { %p7436_p5 = pneg %p7435_p2 }
  0x98   : > { %p7443_p10 = pnand %p7442_p4, %p7436_p5 }
  0x9a   : > { %7446 = shalt.err (!%p7443_p10)
}
  0x9b   : > { %6354 = dma.hbm_to_vmem [thread:$0]  (!%p7829_p6), %s8416_s3, 8192, %s460_s23, [#allocation6], %s7686_s16, %s7686_s16, %s7687_s12  }
  0x9c   : > { %s7688_s28 = smov [#allocation10]   ;;  %s7689_s8 = smov [#allocation13]  }
  0x9d   : > { %s483_s6 = sshll.u32 %s7688_s28, 4  ;;  %s515_s10 = sshll.u32 %s7689_s8, 4  ;;  %s484_s6 = int_to_ptr.vmem [resolvable:$true] %s483_s6  ;;  %s516_s10 = int_to_ptr.vmem [resolvable:$true] %s515_s10 }
  0x9e   : > { %s7447_s14 = scalar_lea.hbm %s8373_s5, 2048 }
  0x9f   : > { %p7448_p1 = scmp.ne.s32.totalorder %s8373_s5, %s7447_s14  ;;  %p7454_p12 = scmp.lt.u32.totalorder %s7447_s14, %s8373_s5 }
  0xa1   : > { %p7450_p3 = pnand %p7448_p1, %p7845_p8 }
  0xa3   : > { %p7451_p11 = pneg %p7450_p3 }
  0xa5   : > { %p7456_p13 = pnand %p7454_p12, %p7451_p11 }
  0xa7   : > { %7459 = shalt.err (!%p7456_p13)
}
  0xa8   : > { %s7460_s23 = scalar_lea.vmem %s484_s6, 2048  ;;  %p7468_p7 = scmp.lt.s32.totalorder %s484_s6, %s484_s6 }
  0xa9   : > { %p7461_p0 = scmp.ne.s32.totalorder %s484_s6, %s7460_s23  ;;  %p7469_p9 = scmp.lt.s32.totalorder %s7460_s23, %s7460_s23 }
  0xab   : > { %p7463_p2 = pnand %p7461_p0, %p7845_p8  ;;  %p7470_p4 = por %p7469_p9, %p7468_p7 }
  0xad   : > { %p7464_p5 = pneg %p7463_p2 }
  0xaf   : > { %p7471_p10 = pnand %p7470_p4, %p7464_p5 }
  0xb1   : > { %7474 = shalt.err (!%p7471_p10)
}
  0xb2   : > { %s8417_s16 = smov 64   ;;  %s7475_s8 = scalar_lea.hbm %s8377_s9, 1024 }
  0xb3   : > { %6360 = dma.hbm_to_vmem [thread:$0]  (!%p7829_p6), %s8373_s5, 2048, %s484_s6, [#allocation9], %s8417_s16, %s8417_s16, %s7683_s2  }
  0xb4   : > { %p7476_p1 = scmp.ne.s32.totalorder %s8377_s9, %s7475_s8  ;;  %p7482_p12 = scmp.lt.u32.totalorder %s7475_s8, %s8377_s9 }
  0xb6   : > { %p7478_p3 = pnand %p7476_p1, %p7845_p8 }
  0xb8   : > { %p7479_p11 = pneg %p7478_p3 }
  0xba   : > { %p7484_p13 = pnand %p7482_p12, %p7479_p11 }
  0xbc   : > { %7487 = shalt.err (!%p7484_p13)
}
  0xbd   : > { %s7488_s21 = scalar_lea.vmem %s516_s10, 1024  ;;  %p7496_p7 = scmp.lt.s32.totalorder %s516_s10, %s516_s10 }
  0xbe   : > { %p7489_p0 = scmp.ne.s32.totalorder %s516_s10, %s7488_s21  ;;  %p7497_p9 = scmp.lt.s32.totalorder %s7488_s21, %s7488_s21 }
  0xc0   : > { %p7491_p2 = pnand %p7489_p0, %p7845_p8  ;;  %p7498_p4 = por %p7497_p9, %p7496_p7 }
  0xc2   : > { %p7492_p5 = pneg %p7491_p2 }
  0xc4   : > { %p7499_p10 = pnand %p7498_p4, %p7492_p5 }
  0xc6   : > { %7502 = shalt.err (!%p7499_p10)
}
  0xc7   : > { %6366 = dma.hbm_to_vmem [thread:$0]  (!%p7829_p6), %s8377_s9, 1024, %s516_s10, [#allocation12], %s8417_s16, %s8417_s16, %s7683_s2  }
  0xc8   : > { %s7690_s23 = smov [#allocation16]   ;;  %s7691_s12 = smov [#allocation17]  }
  0xc9   : > { %s547_s19 = sshll.u32 %s7690_s23, 4  ;;  %s563_s4 = sshll.u32 %s7691_s12, 4  ;;  %s548_s19 = int_to_ptr.vmem [resolvable:$true] %s547_s19  ;;  %s564_s4 = int_to_ptr.vmem [resolvable:$true] %s563_s4 }
  0xca   : > { %s7503_s22 = scalar_lea.hbm %s8381_s13, 8192 }
  0xcb   : > { %p7504_p1 = scmp.ne.s32.totalorder %s8381_s13, %s7503_s22  ;;  %p7510_p12 = scmp.lt.u32.totalorder %s7503_s22, %s8381_s13 }
  0xcd   : > { %p7506_p3 = pnand %p7504_p1, %p7845_p8 }
  0xcf   : > { %p7507_p11 = pneg %p7506_p3 }
  0xd1   : > { %p7512_p13 = pnand %p7510_p12, %p7507_p11 }
  0xd3   : > { %7515 = shalt.err (!%p7512_p13)
}
  0xd4   : > { %s7516_s2 = scalar_lea.vmem %s548_s19, 8192  ;;  %p7524_p7 = scmp.lt.s32.totalorder %s548_s19, %s548_s19 }
  0xd5   : > { %p7517_p0 = scmp.ne.s32.totalorder %s548_s19, %s7516_s2  ;;  %p7525_p9 = scmp.lt.s32.totalorder %s7516_s2, %s7516_s2 }
  0xd7   : > { %p7519_p2 = pnand %p7517_p0, %p7845_p8  ;;  %p7526_p4 = por %p7525_p9, %p7524_p7 }
  0xd9   : > { %p7520_p5 = pneg %p7519_p2 }
  0xdb   : > { %p7527_p10 = pnand %p7526_p4, %p7520_p5 }
  0xdd   : > { %7530 = shalt.err (!%p7527_p10)
}
  0xde   : > { %s8418_s10 = smov 16   ;;  %s8419_s16 = smov 256  }
  0xdf   : > { %6372 = dma.hbm_to_vmem [thread:$0]  (!%p7829_p6), %s8381_s13, 8192, %s548_s19, [#allocation15], %s8419_s16, %s8419_s16, %s8418_s10  }
  0xe0   : > { %s7531_s28 = scalar_lea.hbm %s8383_s15, 24576 }
  0xe1   : > { %p7532_p1 = scmp.ne.s32.totalorder %s8383_s15, %s7531_s28  ;;  %p7538_p12 = scmp.lt.u32.totalorder %s7531_s28, %s8383_s15 }
  0xe3   : > { %p7534_p3 = pnand %p7532_p1, %p7845_p8 }
  0xe5   : > { %p7535_p11 = pneg %p7534_p3 }
  0xe7   : > { %p7540_p13 = pnand %p7538_p12, %p7535_p11 }
  0xe9   : > { %7543 = shalt.err (!%p7540_p13)
}
  0xea   : > { %s7544_s29 = scalar_lea.vmem %s564_s4, 24576  ;;  %p7552_p7 = scmp.lt.s32.totalorder %s564_s4, %s564_s4 }
  0xeb   : > { %p7545_p0 = scmp.ne.s32.totalorder %s564_s4, %s7544_s29  ;;  %p7553_p9 = scmp.lt.s32.totalorder %s7544_s29, %s7544_s29 }
  0xed   : > { %p7547_p2 = pnand %p7545_p0, %p7845_p8  ;;  %p7554_p4 = por %p7553_p9, %p7552_p7 }
  0xef   : > { %p7548_p5 = pneg %p7547_p2 }
  0xf1   : > { %p7555_p10 = pnand %p7554_p4, %p7548_p5 }
  0xf3   : > { %7558 = shalt.err (!%p7555_p10)
}
  0xf4   : > { %s8396_s19 = smov 384   ;;  %s8397_s18 = smov 24  }
  0xf5   : > { %6375 = dma.hbm_to_vmem [thread:$0]  (!%p7829_p6), %s8383_s15, 24576, %s564_s4, [#allocation18], %s8396_s19, %s8396_s19, %s8397_s18  }
  0xf6   : > { %s5586_s10 = sadd.s32 4294967294, %s7675_s27   ;;  %s8036_s16 = sadd.s32 1, %s7675_s27  }
  0xf7   : > { %s45_s6 = sadd.s32 1, %s7671_s26  ;;  %s42_s17 = ssub.s32 %s7675_s27, %s8036_s16 }
  0xf8   : > { %p52_p8 = scmp.ne.s32.totalorder %s7671_s26, %s7667_s25  ;;  %p43_p1 = scmp.eq.s32.totalorder %s42_s17, 0 }
  0xf9   : > { %p53_p3 = scmp.eq.s32.totalorder %s7675_s27, 0  ;;  %p58_p11 = scmp.ne.s32.totalorder %s7667_s25, %s7663_s24 }
  0xfa   : > { %p418_p12 = scmp.eq.s32.totalorder %s7813_s0, 1  ;;  %p8420_p0 = scmp.eq.s32.totalorder %s7813_s0, 0 }
  0xfb   : > { %s8048_s1 = scalar_select %p43_p1, %s7671_s26, %s45_s6  }
  0xfc   : > { %p54_p13 = por %p53_p3, %p52_p8  ;;  %p8052_p2 = por %p8420_p0, %p58_p11 }
  0xfd   : > { %p8056_p6 = por %p418_p12, %p52_p8  ;;  %p424_p5 = scmp.eq.s32.totalorder %s5586_s10, 1 }
  0xfe   : > { %p6393_p7 = scmp.lt.s32.totalorder %s7675_s27, 2  ;;  %s580_s12 = sand.u32 1, %s7671_s26  }
  0xff   : > { %s8422_s4 = scalar_select %p8056_p6, 1, 0 }
 0x100   : > { %p8062_p9 = por %p424_p5, %p58_p11  ;;  %s6304_s8 = smul.u32 48, %s580_s12 }
 0x101   : > { %p8066_p4 = pnand %p6393_p7, %p54_p13  ;;  %s6305_s20 = smul.u32 768, %s7675_s27 }
 0x102   : > { %s8423_s28 = scalar_select %p8062_p9, 1, 0 }
 0x103   : > { %s8425_s21 = sld [smem:[#allocation27_spill]]  ;;  %s584_s10 = scalar_lea.vmem [#allocation2], %s6304_s8 }
 0x104   : > { %s592_s6 = sshll.u32 %s584_s10, 4  ;;  %s8078_s17 = scalar_lea.sflag [#allocation3], %s580_s12  ;;  %s8076_s6 = int_to_ptr.vmem [resolvable:$true] %s592_s6 }
 0x105   : > { %p7561_p8 = pneg %p8066_p4 }
 0x109   : > { %s8074_s2 = scalar_lea.hbm %s8425_s21, %s6305_s20  ;;  %s7564_s29 = scalar_lea.hbm %s8425_s21, 1536 }
 0x10a   : > { %s7559_s19 = scalar_lea.hbm %s8074_s2, 768  ;;  %p7565_p11 = scmp.lt.u32.totalorder %s8074_s2, %s8425_s21 }
 0x10b   : > { %p7560_p10 = scmp.ne.s32.totalorder %s8074_s2, %s7559_s19  ;;  %p7566_p12 = scmp.lt.u32.totalorder %s7564_s29, %s7559_s19 }
 0x10c   : > { %p7568_p0 = scmp.lt.u32.totalorder %s7559_s19, %s8074_s2 }
 0x10d   : > { %p7562_p1 = pnand %p7561_p8, %p7560_p10  ;;  %p7567_p13 = por %p7566_p12, %p7565_p11 }
 0x10f   : > { %p7563_p3 = pneg %p7562_p1  ;;  %p7569_p5 = por %p7568_p0, %p7567_p13 }
 0x111   : > { %p7570_p7 = pnand %p7569_p5, %p7563_p3 }
 0x113   : > { %7573 = shalt.err (!%p7570_p7)
}
 0x114   : > { %s7574_s12 = scalar_lea.vmem %s8076_s6, 768  ;;  %s7694_s8 = smov [#allocation2]  }
 0x115   : > { %p7575_p10 = scmp.ne.s32.totalorder %s8076_s6, %s7574_s12  ;;  %s7579_s10 = sshll.u32 %s7694_s8, 4  ;;  %s7580_s10 = int_to_ptr.vmem [resolvable:$false] %s7579_s10 }
 0x116   : > { %s7581_s3 = scalar_lea.vmem %s7580_s10, 1536  ;;  %p7582_p6 = scmp.lt.s32.totalorder %s8076_s6, %s7580_s10 }
 0x117   : > { %p7577_p1 = pnand %p7575_p10, %p7561_p8  ;;  %p7583_p11 = scmp.lt.s32.totalorder %s7581_s3, %s7574_s12 }
 0x119   : > { %p7578_p9 = pneg %p7577_p1  ;;  %p7584_p12 = por %p7583_p11, %p7582_p6 }
 0x11b   : > { %p7585_p13 = pnand %p7584_p12, %p7578_p9 }
 0x11d   : > { %7588 = shalt.err (!%p7585_p13)
}
 0x11e   : > { %s8426_s19 = smov 24   ;;  %s8427_s18 = smov 384  }
 0x11f   : > { %6379 = dma.hbm_to_vmem [thread:$0]  (!%p8066_p4), %s8074_s2, 768, %s8076_s6, %s8078_s17, %s8427_s18, %s8427_s18, %s8426_s19  }
 0x120   : > { %p8428_p8 = scmp.ne.s32.totalorder %s8411_s30, 0 }
 0x121   : > { %s8112_s20 = sand.u32 (!%p8428_p8), 1, %s7667_s25  }
 0x122   : > { %604 = sbr.rel (%p8428_p8) target bundleno = 2562 (0xa02), region = 88  ;;  %s607_s29 = scalar_lea.sflag (!%p8428_p8), [#allocation3], %s8112_s20 }
 0x123   : > { %s6306_s14 = smul.u32 (!%p8428_p8), 48, %s8112_s20 }
 0x125   : > { %s8118_s22 = scalar_lea.vmem (!%p8428_p8), [#allocation2], %s6306_s14 }
 0x129   : > { %7634 = dma.done.wait (%p8052_p2), %s607_s29, 768  }
 0x12a   : > { %7636 = vsyncadd (%p8052_p2), %s607_s29, 4294966528  ;;  %p8429_p6 = scmp.eq.s32.totalorder %s7813_s0, 0 }
 0x12c   : > { %7638 = dma.done.wait (%p8429_p6), [#allocation6], 32768   ;;  %p8430_p9 = pmov %p8429_p6 }
 0x12d   : > { %p8431_p4 = pmov %p8429_p6 }
 0x12e   : > { %7640 = vsyncadd (%p8430_p9), [#allocation6], 4294934528 }
 0x12f   : > { %7642 = dma.done.wait (%p8431_p4), [#allocation9], 2080   ;;  %p8432_p3 = pmov %p8431_p4 }
 0x131   : > { %7644 = vsyncadd (%p8432_p3), [#allocation9], 4294965216  ;;  %p8433_p0 = pmov %p8432_p3 }
 0x133   : > { %7646 = dma.done.wait (%p8433_p0), [#allocation12], 2048   ;;  %p8434_p5 = pmov %p8433_p0 }
 0x134   : > { %p8435_p2 = pmov %p8433_p0 }
 0x135   : > { %7648 = vsyncadd (%p8434_p5), [#allocation12], 4294965248 }
 0x136   : > { %7650 = dma.done.wait (%p8435_p2), [#allocation15], 10240   ;;  %p8436_p7 = pmov %p8433_p0 }
 0x137   : > { %p8437_p10 = pmov %p8433_p0 }
 0x138   : > { %7652 = vsyncadd (%p8436_p7), [#allocation15], 4294957056 }
 0x139   : > { %7654 = dma.done.wait (%p8437_p10), [#allocation18], 24576   ;;  %p8438_p1 = pmov %p8433_p0 }
 0x13a   : > { %v6459_v0 = vld [vmem:[#allocation5 + $0x4] ss:$16 sps:$4 sm:$0xff]   ;;  %v6463_v2 = vld [vmem:[#allocation5] ss:$16 sps:$4 sm:$0xff]   ;;  %s8439_s2 = sld [smem:[#allocation29_spill]]  ;;  %vm7698_vm0 = vmmov 0  }
 0x13b   : > { %7656 = vsyncadd (%p8438_p1), [#allocation18], 4294942720  ;;  %v6461_v1 = vld [vmem:[#allocation5 + $0x204] ss:$16 sps:$4 sm:$0xff]   ;;  %1889 = vmatprep.subr.bf16.mxu1 %v6459_v0  ;;  %v6464_v3 = vld [vmem:[#allocation5 + $0x200] ss:$16 sps:$4 sm:$0xff]  }
 0x13c   : > { %1932 = vmatprep.subr.bf16.mxu0 %v6461_v1  ;;  %v6465_v4 = vld [vmem:[#allocation5 + $0x24] ss:$16 sps:$4 sm:$0xff]   ;;  %1890 = vmatpush1.bf16.msra.mxu1 %v6463_v2  ;;  %v6469_v6 = vld [vmem:[#allocation5 + $0x20] ss:$16 sps:$4 sm:$0xff]   ;;  %s8440_s12 = sld [smem:[#allocation32_spill]]  ;;  %s8441_s3 = sld [smem:[#allocation33_spill]] }
 0x13d   : > { %1933 = vmatpush1.bf16.msra.mxu0 %v6464_v3  ;;  %v6467_v5 = vld [vmem:[#allocation5 + $0x224] ss:$16 sps:$4 sm:$0xff]   ;;  %1891 = vmatprep.subr.bf16.mxu1 %v6465_v4  ;;  %v6470_v7 = vld [vmem:[#allocation5 + $0x220] ss:$16 sps:$4 sm:$0xff]   ;;  %v6566_v3 = vld [vmem:[#allocation5 + $0xc] ss:$16 sps:$4 sm:$0xff]  }
 0x13e   : > { %1934 = vmatprep.subr.bf16.mxu0 %v6467_v5  ;;  %v6471_v8 = vld [vmem:[#allocation5 + $0x44] ss:$16 sps:$4 sm:$0xff]   ;;  %v6475_v10 = vld [vmem:[#allocation5 + $0x40] ss:$16 sps:$4 sm:$0xff]   ;;  %s8442_s29 = sld [smem:[#allocation34_spill]]  ;;  %s8443_s23 = sld [smem:[#allocation35_spill]] }
 0x13f   : > { %v6473_v9 = vld [vmem:[#allocation5 + $0x244] ss:$16 sps:$4 sm:$0xff]   ;;  %v6476_v11 = vld [vmem:[#allocation5 + $0x240] ss:$16 sps:$4 sm:$0xff]   ;;  %s8444_s17 = sld [smem:[#allocation36_spill]]  ;;  %s8445_s10 = sld [smem:[#allocation37_spill]] }
 0x140   : > { %1892 = vmatpush1.bf16.msra.mxu1 %v6469_v6  ;;  %v6477_v12 = vld [vmem:[#allocation5 + $0x64] ss:$16 sps:$4 sm:$0xff]   ;;  %v6481_v14 = vld [vmem:[#allocation5 + $0x60] ss:$16 sps:$4 sm:$0xff]   ;;  %p8447_p12 = scmp.ne.s32.totalorder %s8422_s4, 0 }
 0x141   : > { %1935 = vmatpush1.bf16.msra.mxu0 %v6470_v7  ;;  %1893 = vmatprep.subr.bf16.mxu1 %v6471_v8  ;;  %v6479_v13 = vld [vmem:[#allocation5 + $0x264] ss:$16 sps:$4 sm:$0xff]   ;;  %v6482_v15 = vld [vmem:[#allocation5 + $0x260] ss:$16 sps:$4 sm:$0xff]   ;;  %v6564_v7 = vld [vmem:[#allocation5 + $0x8] ss:$16 sps:$4 sm:$0xff]  }
 0x142   : > { %1936 = vmatprep.subr.bf16.mxu0 %v6473_v9  ;;  %v6483_v16 = vld [vmem:[#allocation5 + $0x84] ss:$16 sps:$4 sm:$0xff]   ;;  %v6487_v18 = vld [vmem:[#allocation5 + $0x80] ss:$16 sps:$4 sm:$0xff]   ;;  %v6572_v9 = vld [vmem:[#allocation5 + $0x2c] ss:$16 sps:$4 sm:$0xff]  }
 0x143   : > { %v6485_v17 = vld [vmem:[#allocation5 + $0x284] ss:$16 sps:$4 sm:$0xff]   ;;  %v6488_v19 = vld [vmem:[#allocation5 + $0x280] ss:$16 sps:$4 sm:$0xff]  }
 0x144   : > { %1894 = vmatpush1.bf16.msra.mxu1 %v6475_v10  ;;  %v6489_v20 = vld [vmem:[#allocation5 + $0xa4] ss:$16 sps:$4 sm:$0xff]   ;;  %v6493_v22 = vld [vmem:[#allocation5 + $0xa0] ss:$16 sps:$4 sm:$0xff]  }
 0x145   : > { %1937 = vmatpush1.bf16.msra.mxu0 %v6476_v11  ;;  %1895 = vmatprep.subr.bf16.mxu1 %v6477_v12  ;;  %v6491_v21 = vld [vmem:[#allocation5 + $0x2a4] ss:$16 sps:$4 sm:$0xff]   ;;  %v6494_v23 = vld [vmem:[#allocation5 + $0x2a0] ss:$16 sps:$4 sm:$0xff]   ;;  %v6570_v11 = vld [vmem:[#allocation5 + $0x28] ss:$16 sps:$4 sm:$0xff]  }
 0x146   : > { %1938 = vmatprep.subr.bf16.mxu0 %v6479_v13  ;;  %v6495_v24 = vld [vmem:[#allocation5 + $0xc4] ss:$16 sps:$4 sm:$0xff]   ;;  %v6499_v26 = vld [vmem:[#allocation5 + $0xc0] ss:$16 sps:$4 sm:$0xff]   ;;  %v6578_v13 = vld [vmem:[#allocation5 + $0x4c] ss:$16 sps:$4 sm:$0xff]  }
 0x147   : > { %v6497_v25 = vld [vmem:[#allocation5 + $0x2c4] ss:$16 sps:$4 sm:$0xff]   ;;  %v6500_v27 = vld [vmem:[#allocation5 + $0x2c0] ss:$16 sps:$4 sm:$0xff]  }
 0x148   : > { %1896 = vmatpush1.bf16.msra.mxu1 %v6481_v14  ;;  %v6501_v28 = vld [vmem:[#allocation5 + $0xe4] ss:$16 sps:$4 sm:$0xff]   ;;  %v6505_v30 = vld [vmem:[#allocation5 + $0xe0] ss:$16 sps:$4 sm:$0xff]  }
 0x149   : > { %1939 = vmatpush1.bf16.msra.mxu0 %v6482_v15  ;;  %1897 = vmatprep.subr.bf16.mxu1 %v6483_v16  ;;  %v6503_v29 = vld [vmem:[#allocation5 + $0x2e4] ss:$16 sps:$4 sm:$0xff]   ;;  %v6506_v31 = vld [vmem:[#allocation5 + $0x2e0] ss:$16 sps:$4 sm:$0xff]   ;;  %v6576_v15 = vld [vmem:[#allocation5 + $0x48] ss:$16 sps:$4 sm:$0xff]  }
 0x14a   : > { %1940 = vmatprep.subr.bf16.mxu0 %v6485_v17  ;;  %v6507_v32 = vld [vmem:[#allocation5 + $0x104] ss:$16 sps:$4 sm:$0xff]   ;;  %v6511_v34 = vld [vmem:[#allocation5 + $0x100] ss:$16 sps:$4 sm:$0xff]   ;;  %v6584_v17 = vld [vmem:[#allocation5 + $0x6c] ss:$16 sps:$4 sm:$0xff]  }
 0x14b   : > { %v6509_v33 = vld [vmem:[#allocation5 + $0x304] ss:$16 sps:$4 sm:$0xff]   ;;  %v6512_v35 = vld [vmem:[#allocation5 + $0x300] ss:$16 sps:$4 sm:$0xff]  }
 0x14c   : > { %1898 = vmatpush1.bf16.msra.mxu1 %v6487_v18  ;;  %v6513_v36 = vld [vmem:[#allocation5 + $0x124] ss:$16 sps:$4 sm:$0xff]   ;;  %v6517_v38 = vld [vmem:[#allocation5 + $0x120] ss:$16 sps:$4 sm:$0xff]  }
 0x14d   : > { %1941 = vmatpush1.bf16.msra.mxu0 %v6488_v19  ;;  %1899 = vmatprep.subr.bf16.mxu1 %v6489_v20  ;;  %v6515_v37 = vld [vmem:[#allocation5 + $0x324] ss:$16 sps:$4 sm:$0xff]   ;;  %v6518_v39 = vld [vmem:[#allocation5 + $0x320] ss:$16 sps:$4 sm:$0xff]   ;;  %v6582_v19 = vld [vmem:[#allocation5 + $0x68] ss:$16 sps:$4 sm:$0xff]  }
 0x14e   : > { %1942 = vmatprep.subr.bf16.mxu0 %v6491_v21  ;;  %v6519_v40 = vld [vmem:[#allocation5 + $0x144] ss:$16 sps:$4 sm:$0xff]   ;;  %v6523_v42 = vld [vmem:[#allocation5 + $0x140] ss:$16 sps:$4 sm:$0xff]   ;;  %v6590_v21 = vld [vmem:[#allocation5 + $0x8c] ss:$16 sps:$4 sm:$0xff]  }
 0x14f   : > { %v6521_v41 = vld [vmem:[#allocation5 + $0x344] ss:$16 sps:$4 sm:$0xff]   ;;  %v6524_v43 = vld [vmem:[#allocation5 + $0x340] ss:$16 sps:$4 sm:$0xff]  }
 0x150   : > { %1900 = vmatpush1.bf16.msra.mxu1 %v6493_v22  ;;  %v6525_v44 = vld [vmem:[#allocation5 + $0x164] ss:$16 sps:$4 sm:$0xff]   ;;  %v6529_v46 = vld [vmem:[#allocation5 + $0x160] ss:$16 sps:$4 sm:$0xff]  }
 0x151   : > { %1943 = vmatpush1.bf16.msra.mxu0 %v6494_v23  ;;  %1901 = vmatprep.subr.bf16.mxu1 %v6495_v24  ;;  %v6527_v45 = vld [vmem:[#allocation5 + $0x364] ss:$16 sps:$4 sm:$0xff]   ;;  %v6530_v47 = vld [vmem:[#allocation5 + $0x360] ss:$16 sps:$4 sm:$0xff]   ;;  %v6588_v23 = vld [vmem:[#allocation5 + $0x88] ss:$16 sps:$4 sm:$0xff]  }
 0x152   : > { %1944 = vmatprep.subr.bf16.mxu0 %v6497_v25  ;;  %v6531_v48 = vld [vmem:[#allocation5 + $0x184] ss:$16 sps:$4 sm:$0xff]   ;;  %v6535_v52 = vld [vmem:[#allocation5 + $0x180] ss:$16 sps:$4 sm:$0xff]   ;;  %v6596_v25 = vld [vmem:[#allocation5 + $0xac] ss:$16 sps:$4 sm:$0xff]  }
 0x153   : > { %v6557_v49 = vld [vmem:[%s8118_s22 + $0x4] ss:$24 sps:$4 sm:$0xff]   ;;  %v6536_v53 = vld [vmem:[#allocation5 + $0x380] ss:$16 sps:$4 sm:$0xff]  }
 0x154   : > { %1902 = vmatpush1.bf16.msra.mxu1 %v6499_v26  ;;  %v6533_v50 = vld [vmem:[#allocation5 + $0x384] ss:$16 sps:$4 sm:$0xff]   ;;  %1921 = vmatprep.mubr.bf16.mxu1 %v6557_v49  ;;  %v6541_v56 = vld [vmem:[#allocation5 + $0x1a0] ss:$16 sps:$4 sm:$0xff]  }
 0x155   : > { %1945 = vmatpush1.bf16.msra.mxu0 %v6500_v27  ;;  %1903 = vmatprep.subr.bf16.mxu1 %v6501_v28  ;;  %v8146_v51 = vld [vmem:[%s8118_s22 + $0xc] ss:$24 sps:$4 sm:$0xff]   ;;  %v6542_v57 = vld [vmem:[#allocation5 + $0x3a0] ss:$16 sps:$4 sm:$0xff]   ;;  %v6594_v27 = vld [vmem:[#allocation5 + $0xa8] ss:$16 sps:$4 sm:$0xff]  }
 0x156   : > { %1946 = vmatprep.subr.bf16.mxu0 %v6503_v29  ;;  %1964 = vmatprep.mubr.bf16.mxu0 %v8146_v51  ;;  %v6537_v54 = vld [vmem:[#allocation5 + $0x1a4] ss:$16 sps:$4 sm:$0xff]   ;;  %v6547_v60 = vld [vmem:[#allocation5 + $0x1c0] ss:$16 sps:$4 sm:$0xff]   ;;  %v6602_v29 = vld [vmem:[#allocation5 + $0xcc] ss:$16 sps:$4 sm:$0xff]  }
 0x157   : > { %v6539_v55 = vld [vmem:[#allocation5 + $0x3a4] ss:$16 sps:$4 sm:$0xff]   ;;  %v6548_v61 = vld [vmem:[#allocation5 + $0x3c0] ss:$16 sps:$4 sm:$0xff]  }
 0x158   : > { %1904 = vmatpush1.bf16.msra.mxu1 %v6505_v30  ;;  %v6543_v58 = vld [vmem:[#allocation5 + $0x1c4] ss:$16 sps:$4 sm:$0xff]   ;;  %v6553_v0 = vld [vmem:[#allocation5 + $0x1e0] ss:$16 sps:$4 sm:$0xff]  }
 0x159   : > { %1947 = vmatpush1.bf16.msra.mxu0 %v6506_v31  ;;  %1905 = vmatprep.subr.bf16.mxu1 %v6507_v32  ;;  %v6545_v59 = vld [vmem:[#allocation5 + $0x3c4] ss:$16 sps:$4 sm:$0xff]   ;;  %v6554_v1 = vld [vmem:[#allocation5 + $0x3e0] ss:$16 sps:$4 sm:$0xff]   ;;  %v6600_v31 = vld [vmem:[#allocation5 + $0xc8] ss:$16 sps:$4 sm:$0xff]  }
 0x15a   : > { %1948 = vmatprep.subr.bf16.mxu0 %v6509_v33  ;;  %v6549_v62 = vld [vmem:[#allocation5 + $0x1e4] ss:$16 sps:$4 sm:$0xff]   ;;  %v8150_v4 = vld [vmem:[%s8118_s22] ss:$24 sps:$4 sm:$0xff]   ;;  %v6608_v33 = vld [vmem:[#allocation5 + $0xec] ss:$16 sps:$4 sm:$0xff]  }
 0x15b   : > { %v6551_v63 = vld [vmem:[#allocation5 + $0x3e4] ss:$16 sps:$4 sm:$0xff]   ;;  %v6558_v5 = vld [vmem:[%s8118_s22 + $0x8] ss:$24 sps:$4 sm:$0xff]  }
 0x15c   : > { %1906 = vmatpush1.bf16.msra.mxu1 %v6511_v34  ;;  %v6563_v2 = vld [vmem:[#allocation5 + $0x404] ss:$16 sps:$4 sm:$0xff]   ;;  %v6561_v6 = vld [vmem:[#allocation5 + $0x400] ss:$16 sps:$4 sm:$0xff]  }
 0x15d   : > { %1949 = vmatpush1.bf16.msra.mxu0 %v6512_v35  ;;  %1907 = vmatprep.subr.bf16.mxu1 %v6513_v36  ;;  %v6569_v8 = vld [vmem:[#allocation5 + $0x424] ss:$16 sps:$4 sm:$0xff]   ;;  %v6567_v10 = vld [vmem:[#allocation5 + $0x420] ss:$16 sps:$4 sm:$0xff]   ;;  %v6606_v36 = vld [vmem:[#allocation5 + $0xe8] ss:$16 sps:$4 sm:$0xff]  }
 0x15e   : > { %1950 = vmatprep.subr.bf16.mxu0 %v6515_v37  ;;  %v6575_v12 = vld [vmem:[#allocation5 + $0x444] ss:$16 sps:$4 sm:$0xff]   ;;  %v6573_v14 = vld [vmem:[#allocation5 + $0x440] ss:$16 sps:$4 sm:$0xff]  }
 0x15f   : > { %v6581_v16 = vld [vmem:[#allocation5 + $0x464] ss:$16 sps:$4 sm:$0xff]   ;;  %v6579_v18 = vld [vmem:[#allocation5 + $0x460] ss:$16 sps:$4 sm:$0xff]  }
 0x160   : > { %1908 = vmatpush1.bf16.msra.mxu1 %v6517_v38  ;;  %v6587_v20 = vld [vmem:[#allocation5 + $0x484] ss:$16 sps:$4 sm:$0xff]   ;;  %v6585_v22 = vld [vmem:[#allocation5 + $0x480] ss:$16 sps:$4 sm:$0xff]   ;;  %v6614_v38 = vld [vmem:[#allocation5 + $0x10c] ss:$16 sps:$4 sm:$0xff]  }
 0x161   : > { %1951 = vmatpush1.bf16.msra.mxu0 %v6518_v39  ;;  %1909 = vmatprep.subr.bf16.mxu1 %v6519_v40  ;;  %v6593_v24 = vld [vmem:[#allocation5 + $0x4a4] ss:$16 sps:$4 sm:$0xff]   ;;  %v6591_v26 = vld [vmem:[#allocation5 + $0x4a0] ss:$16 sps:$4 sm:$0xff]   ;;  %v6612_v40 = vld [vmem:[#allocation5 + $0x108] ss:$16 sps:$4 sm:$0xff]  }
 0x162   : > { %1952 = vmatprep.subr.bf16.mxu0 %v6521_v41  ;;  %v6599_v28 = vld [vmem:[#allocation5 + $0x4c4] ss:$16 sps:$4 sm:$0xff]   ;;  %v6597_v30 = vld [vmem:[#allocation5 + $0x4c0] ss:$16 sps:$4 sm:$0xff]  }
 0x163   : > { %v6605_v32 = vld [vmem:[#allocation5 + $0x4e4] ss:$16 sps:$4 sm:$0xff]   ;;  %v6603_v35 = vld [vmem:[#allocation5 + $0x4e0] ss:$16 sps:$4 sm:$0xff]  }
 0x164   : > { %1910 = vmatpush1.bf16.msra.mxu1 %v6523_v42  ;;  %v8155_v34 = vld [vmem:[%s8118_s22 + $0x14] ss:$24 sps:$4 sm:$0xff]   ;;  %v6609_v39 = vld [vmem:[#allocation5 + $0x500] ss:$16 sps:$4 sm:$0xff]  }
 0x165   : > { %1953 = vmatpush1.bf16.msra.mxu0 %v6524_v43  ;;  %1911 = vmatprep.subr.bf16.mxu1 %v6525_v44  ;;  %v6611_v37 = vld [vmem:[#allocation5 + $0x504] ss:$16 sps:$4 sm:$0xff]   ;;  %v6620_v42 = vld [vmem:[#allocation5 + $0x12c] ss:$16 sps:$4 sm:$0xff]   ;;  %v6615_v43 = vld [vmem:[#allocation5 + $0x520] ss:$16 sps:$4 sm:$0xff]  }
 0x166   : > { %1954 = vmatprep.subr.bf16.mxu0 %v6527_v45  ;;  %v6617_v41 = vld [vmem:[#allocation5 + $0x524] ss:$16 sps:$4 sm:$0xff]   ;;  %v6618_v44 = vld [vmem:[#allocation5 + $0x128] ss:$16 sps:$4 sm:$0xff]  }
 0x167   : > { %v6623_v45 = vld [vmem:[#allocation5 + $0x544] ss:$16 sps:$4 sm:$0xff]  }
 0x168   : > { %1912 = vmatpush1.bf16.msra.mxu1 %v6529_v46  ;;  %v6626_v46 = vld [vmem:[#allocation5 + $0x14c] ss:$16 sps:$4 sm:$0xff]  }
 0x169   : > { %1955 = vmatpush1.bf16.msra.mxu0 %v6530_v47  ;;  %1913 = vmatprep.subr.bf16.mxu1 %v6531_v48  ;;  %v6621_v47 = vld [vmem:[#allocation5 + $0x540] ss:$16 sps:$4 sm:$0xff]   ;;  %v6624_v48 = vld [vmem:[#allocation5 + $0x148] ss:$16 sps:$4 sm:$0xff]  }
 0x16a   : > { %1956 = vmatprep.subr.bf16.mxu0 %v6533_v50  ;;  %v6632_v50 = vld [vmem:[#allocation5 + $0x16c] ss:$16 sps:$4 sm:$0xff]  }
 0x16c   : > { %1914 = vmatpush1.bf16.msra.mxu1 %v6535_v52  ;;  %v6627_v52 = vld [vmem:[#allocation5 + $0x560] ss:$16 sps:$4 sm:$0xff]  }
 0x16d   : > { %1957 = vmatpush1.bf16.msra.mxu0 %v6536_v53  ;;  %1915 = vmatprep.subr.bf16.mxu1 %v6537_v54  ;;  %v6630_v53 = vld [vmem:[#allocation5 + $0x168] ss:$16 sps:$4 sm:$0xff]   ;;  %v6635_v54 = vld [vmem:[#allocation5 + $0x584] ss:$16 sps:$4 sm:$0xff]  }
 0x16e   : > { %1958 = vmatprep.subr.bf16.mxu0 %v6539_v55  ;;  %v6638_v55 = vld [vmem:[#allocation5 + $0x18c] ss:$16 sps:$4 sm:$0xff]  }
 0x170   : > { %1916 = vmatpush1.bf16.msra.mxu1 %v6541_v56  ;;  %v6633_v56 = vld [vmem:[#allocation5 + $0x580] ss:$16 sps:$4 sm:$0xff]  }
 0x171   : > { %1959 = vmatpush1.bf16.msra.mxu0 %v6542_v57  ;;  %1917 = vmatprep.subr.bf16.mxu1 %v6543_v58  ;;  %v6636_v57 = vld [vmem:[#allocation5 + $0x188] ss:$16 sps:$4 sm:$0xff]   ;;  %v6641_v58 = vld [vmem:[#allocation5 + $0x5a4] ss:$16 sps:$4 sm:$0xff]  }
 0x172   : > { %1960 = vmatprep.subr.bf16.mxu0 %v6545_v59  ;;  %v6644_v59 = vld [vmem:[#allocation5 + $0x1ac] ss:$16 sps:$4 sm:$0xff]  }
 0x174   : > { %1918 = vmatpush1.bf16.msra.mxu1 %v6547_v60  ;;  %v6639_v60 = vld [vmem:[#allocation5 + $0x5a0] ss:$16 sps:$4 sm:$0xff]  }
 0x175   : > { %1961 = vmatpush1.bf16.msra.mxu0 %v6548_v61  ;;  %1919 = vmatprep.subr.bf16.mxu1 %v6549_v62  ;;  %v6642_v61 = vld [vmem:[#allocation5 + $0x1a8] ss:$16 sps:$4 sm:$0xff]   ;;  %v6647_v62 = vld [vmem:[#allocation5 + $0x5c4] ss:$16 sps:$4 sm:$0xff]  }
 0x176   : > { %1962 = vmatprep.subr.bf16.mxu0 %v6551_v63  ;;  %v6650_v63 = vld [vmem:[#allocation5 + $0x1cc] ss:$16 sps:$4 sm:$0xff]  }
 0x178   : > { %1920 = vmatpush1.bf16.msra.mxu1 %v6553_v0  ;;  %v6645_v0 = vld [vmem:[#allocation5 + $0x5c0] ss:$16 sps:$4 sm:$0xff]  }
 0x179   : > { %1963 = vmatpush1.bf16.msra.mxu0 %v6554_v1  ;;  %2018 = vmatprep.subr.bf16.mxu1 %v6566_v3  ;;  %v6648_v1 = vld [vmem:[#allocation5 + $0x1c8] ss:$16 sps:$4 sm:$0xff]   ;;  %v6656_v3 = vld [vmem:[#allocation5 + $0x1ec] ss:$16 sps:$4 sm:$0xff]  }
 0x17a   : > { %1975 = vmatprep.subr.bf16.mxu0 %v6563_v2  ;;  %v6653_v2 = vld [vmem:[#allocation5 + $0x5e4] ss:$16 sps:$4 sm:$0xff]  }
 0x17b   : > { %1922 = vmatmul.mubr.bf16.vlgmr.msra.gmra.mrb[0].mxu1 %v8150_v4 }
 0x17c   : > { %1965 = vmatmul.mubr.bf16.vlgmr.msra.gmra.mrb[0].mxu0 %v6558_v5  ;;  %2019 = vmatpush1.bf16.msra.mxu1 %v6564_v7  ;;  %v6651_v5 = vld [vmem:[#allocation5 + $0x5e0] ss:$16 sps:$4 sm:$0xff]   ;;  %v6662_v7 = vld [vmem:[#allocation5 + $0x20c] ss:$16 sps:$4 sm:$0xff]  }
 0x17d   : > { %1976 = vmatpush1.bf16.msra.mxu0 %v6561_v6  ;;  %2020 = vmatprep.subr.bf16.mxu1 %v6572_v9  ;;  %v6654_v6 = vld [vmem:[#allocation5 + $0x1e8] ss:$16 sps:$4 sm:$0xff]  }
 0x17e   : > { %1977 = vmatprep.subr.bf16.mxu0 %v6569_v8  ;;  %2050 = vmatprep.mubr.bf16.mxu1 %v6557_v49  ;;  %v6629_v49 = vld [vmem:[#allocation5 + $0x564] ss:$16 sps:$4 sm:$0xff]   ;;  %v6657_v8 = vld [vmem:[%s8118_s22 + $0x10] ss:$24 sps:$4 sm:$0xff]  }
 0x17f   : > { %2007 = vmatprep.mubr.bf16.mxu0 %v8155_v34  ;;  %v6660_v9 = vld [vmem:[#allocation5 + $0x208] ss:$16 sps:$4 sm:$0xff]  }
 0x180   : > { %2021 = vmatpush1.bf16.msra.mxu1 %v6570_v11  ;;  %v6663_v11 = vld [vmem:[#allocation5 + $0x228] ss:$16 sps:$4 sm:$0xff]  }
 0x181   : > { %1978 = vmatpush1.bf16.msra.mxu0 %v6567_v10  ;;  %2022 = vmatprep.subr.bf16.mxu1 %v6578_v13  ;;  %v6665_v10 = vld [vmem:[#allocation5 + $0x22c] ss:$16 sps:$4 sm:$0xff]   ;;  %v6666_v13 = vld [vmem:[#allocation5 + $0x248] ss:$16 sps:$4 sm:$0xff]  }
 0x182   : > { %1979 = vmatprep.subr.bf16.mxu0 %v6575_v12  ;;  %v6668_v12 = vld [vmem:[#allocation5 + $0x24c] ss:$16 sps:$4 sm:$0xff]  }
 0x184   : > { %2023 = vmatpush1.bf16.msra.mxu1 %v6576_v15  ;;  %v6669_v15 = vld [vmem:[#allocation5 + $0x268] ss:$16 sps:$4 sm:$0xff]  }
 0x185   : > { %1980 = vmatpush1.bf16.msra.mxu0 %v6573_v14  ;;  %2024 = vmatprep.subr.bf16.mxu1 %v6584_v17  ;;  %v6671_v14 = vld [vmem:[#allocation5 + $0x26c] ss:$16 sps:$4 sm:$0xff]   ;;  %v6672_v17 = vld [vmem:[#allocation5 + $0x288] ss:$16 sps:$4 sm:$0xff]  }
 0x186   : > { %1981 = vmatprep.subr.bf16.mxu0 %v6581_v16  ;;  %v6674_v16 = vld [vmem:[#allocation5 + $0x28c] ss:$16 sps:$4 sm:$0xff]  }
 0x188   : > { %2025 = vmatpush1.bf16.msra.mxu1 %v6582_v19  ;;  %v6675_v19 = vld [vmem:[#allocation5 + $0x2a8] ss:$16 sps:$4 sm:$0xff]  }
 0x189   : > { %1982 = vmatpush1.bf16.msra.mxu0 %v6579_v18  ;;  %2026 = vmatprep.subr.bf16.mxu1 %v6590_v21  ;;  %v6677_v18 = vld [vmem:[#allocation5 + $0x2ac] ss:$16 sps:$4 sm:$0xff]   ;;  %v6756_v21 = vld [vmem:[#allocation7] ss:$8 sps:$4 sm:$0xff]  }
 0x18a   : > { %1983 = vmatprep.subr.bf16.mxu0 %v6587_v20  ;;  %v6678_v20 = vld [vmem:[#allocation5 + $0x2c8] ss:$16 sps:$4 sm:$0xff]  }
 0x18c   : > { %2027 = vmatpush1.bf16.msra.mxu1 %v6588_v23  ;;  %v6761_v23 = vld [vmem:[#allocation7 + $0x14] ss:$8 sps:$4 sm:$0xff]  }
 0x18d   : > { %1984 = vmatpush1.bf16.msra.mxu0 %v6585_v22  ;;  %2028 = vmatprep.subr.bf16.mxu1 %v6596_v25  ;;  %v6758_v22 = vld [vmem:[#allocation7 + $0x4] ss:$8 sps:$4 sm:$0xff]   ;;  %v6759_v25 = vld [vmem:[#allocation7 + $0x10] ss:$8 sps:$4 sm:$0xff]  }
 0x18e   : > { %1985 = vmatprep.subr.bf16.mxu0 %v6593_v24  ;;  %v6681_v24 = vld [vmem:[#allocation5 + $0x2e8] ss:$16 sps:$4 sm:$0xff]  }
 0x190   : > { %2029 = vmatpush1.bf16.msra.mxu1 %v6594_v27  ;;  %v6764_v27 = vld [vmem:[#allocation7 + $0x24] ss:$8 sps:$4 sm:$0xff]  }
 0x191   : > { %1986 = vmatpush1.bf16.msra.mxu0 %v6591_v26  ;;  %2030 = vmatprep.subr.bf16.mxu1 %v6602_v29  ;;  %v6686_v26 = vld [vmem:[#allocation5 + $0x30c] ss:$16 sps:$4 sm:$0xff]   ;;  %v6762_v29 = vld [vmem:[#allocation7 + $0x20] ss:$8 sps:$4 sm:$0xff]  }
 0x192   : > { %1987 = vmatprep.subr.bf16.mxu0 %v6599_v28  ;;  %v6684_v28 = vld [vmem:[#allocation5 + $0x308] ss:$16 sps:$4 sm:$0xff]  }
 0x194   : > { %2031 = vmatpush1.bf16.msra.mxu1 %v6600_v31  ;;  %v6767_v31 = vld [vmem:[#allocation7 + $0x34] ss:$8 sps:$4 sm:$0xff]  }
 0x195   : > { %1988 = vmatpush1.bf16.msra.mxu0 %v6597_v30  ;;  %2032 = vmatprep.subr.bf16.mxu1 %v6608_v33  ;;  %v6689_v30 = vld [vmem:[#allocation5 + $0x32c] ss:$16 sps:$4 sm:$0xff]   ;;  %v6765_v33 = vld [vmem:[#allocation7 + $0x30] ss:$8 sps:$4 sm:$0xff]  }
 0x196   : > { %1989 = vmatprep.subr.bf16.mxu0 %v6605_v32  ;;  %v6687_v32 = vld [vmem:[#allocation5 + $0x328] ss:$16 sps:$4 sm:$0xff]  }
 0x198   : > { %2033 = vmatpush1.bf16.msra.mxu1 %v6606_v36  ;;  %v6770_v36 = vld [vmem:[#allocation7 + $0x44] ss:$8 sps:$4 sm:$0xff]  }
 0x199   : > { %1990 = vmatpush1.bf16.msra.mxu0 %v6603_v35  ;;  %2034 = vmatprep.subr.bf16.mxu1 %v6614_v38  ;;  %v6692_v35 = vld [vmem:[#allocation5 + $0x34c] ss:$16 sps:$4 sm:$0xff]   ;;  %v6768_v38 = vld [vmem:[#allocation7 + $0x40] ss:$8 sps:$4 sm:$0xff]  }
 0x19a   : > { %1991 = vmatprep.subr.bf16.mxu0 %v6611_v37  ;;  %v6690_v37 = vld [vmem:[#allocation5 + $0x348] ss:$16 sps:$4 sm:$0xff]  }
 0x19c   : > { %2035 = vmatpush1.bf16.msra.mxu1 %v6612_v40  ;;  %v6773_v40 = vld [vmem:[#allocation7 + $0x54] ss:$8 sps:$4 sm:$0xff]  }
 0x19d   : > { %1992 = vmatpush1.bf16.msra.mxu0 %v6609_v39  ;;  %2036 = vmatprep.subr.bf16.mxu1 %v6620_v42  ;;  %v6695_v39 = vld [vmem:[#allocation5 + $0x36c] ss:$16 sps:$4 sm:$0xff]   ;;  %v6771_v42 = vld [vmem:[#allocation7 + $0x50] ss:$8 sps:$4 sm:$0xff]  }
 0x19e   : > { %1993 = vmatprep.subr.bf16.mxu0 %v6617_v41  ;;  %v6693_v41 = vld [vmem:[#allocation5 + $0x368] ss:$16 sps:$4 sm:$0xff]  }
 0x1a0   : > { %2037 = vmatpush1.bf16.msra.mxu1 %v6618_v44  ;;  %v6776_v44 = vld [vmem:[#allocation7 + $0x64] ss:$8 sps:$4 sm:$0xff]  }
 0x1a1   : > { %1994 = vmatpush1.bf16.msra.mxu0 %v6615_v43  ;;  %2038 = vmatprep.subr.bf16.mxu1 %v6626_v46  ;;  %v6698_v43 = vld [vmem:[#allocation5 + $0x38c] ss:$16 sps:$4 sm:$0xff]   ;;  %v6774_v46 = vld [vmem:[#allocation7 + $0x60] ss:$8 sps:$4 sm:$0xff]  }
 0x1a2   : > { %1995 = vmatprep.subr.bf16.mxu0 %v6623_v45  ;;  %v6696_v45 = vld [vmem:[#allocation5 + $0x388] ss:$16 sps:$4 sm:$0xff]  }
 0x1a4   : > { %2039 = vmatpush1.bf16.msra.mxu1 %v6624_v48  ;;  %v6779_v48 = vld [vmem:[#allocation7 + $0x74] ss:$8 sps:$4 sm:$0xff]  }
 0x1a5   : > { %1996 = vmatpush1.bf16.msra.mxu0 %v6621_v47  ;;  %2040 = vmatprep.subr.bf16.mxu1 %v6632_v50  ;;  %v6701_v47 = vld [vmem:[#allocation5 + $0x3ac] ss:$16 sps:$4 sm:$0xff]   ;;  %v6777_v50 = vld [vmem:[#allocation7 + $0x70] ss:$8 sps:$4 sm:$0xff]  }
 0x1a6   : > { %1997 = vmatprep.subr.bf16.mxu0 %v6629_v49  ;;  %v6699_v49 = vld [vmem:[#allocation5 + $0x3a8] ss:$16 sps:$4 sm:$0xff]  }
 0x1a8   : > { %2041 = vmatpush1.bf16.msra.mxu1 %v6630_v53  ;;  %v6782_v53 = vld [vmem:[#allocation7 + $0x84] ss:$8 sps:$4 sm:$0xff]  }
 0x1a9   : > { %1998 = vmatpush1.bf16.msra.mxu0 %v6627_v52  ;;  %2042 = vmatprep.subr.bf16.mxu1 %v6638_v55  ;;  %v6704_v52 = vld [vmem:[#allocation5 + $0x3cc] ss:$16 sps:$4 sm:$0xff]   ;;  %v6780_v55 = vld [vmem:[#allocation7 + $0x80] ss:$8 sps:$4 sm:$0xff]  }
 0x1aa   : > { %1999 = vmatprep.subr.bf16.mxu0 %v6635_v54  ;;  %v6702_v54 = vld [vmem:[#allocation5 + $0x3c8] ss:$16 sps:$4 sm:$0xff]  }
 0x1ac   : > { %2043 = vmatpush1.bf16.msra.mxu1 %v6636_v57  ;;  %v6785_v57 = vld [vmem:[#allocation7 + $0x94] ss:$8 sps:$4 sm:$0xff]  }
 0x1ad   : > { %2000 = vmatpush1.bf16.msra.mxu0 %v6633_v56  ;;  %2044 = vmatprep.subr.bf16.mxu1 %v6644_v59  ;;  %v6707_v56 = vld [vmem:[#allocation5 + $0x3ec] ss:$16 sps:$4 sm:$0xff]   ;;  %v6783_v59 = vld [vmem:[#allocation7 + $0x90] ss:$8 sps:$4 sm:$0xff]  }
 0x1ae   : > { %2001 = vmatprep.subr.bf16.mxu0 %v6641_v58  ;;  %v6705_v58 = vld [vmem:[#allocation5 + $0x3e8] ss:$16 sps:$4 sm:$0xff]  }
 0x1b0   : > { %2045 = vmatpush1.bf16.msra.mxu1 %v6642_v61  ;;  %v6788_v61 = vld [vmem:[#allocation7 + $0xa4] ss:$8 sps:$4 sm:$0xff]  }
 0x1b1   : > { %2002 = vmatpush1.bf16.msra.mxu0 %v6639_v60  ;;  %2046 = vmatprep.subr.bf16.mxu1 %v6650_v63  ;;  %v6710_v60 = vld [vmem:[#allocation5 + $0x40c] ss:$16 sps:$4 sm:$0xff]  }
 0x1b2   : > { %2003 = vmatprep.subr.bf16.mxu0 %v6647_v62  ;;  %v6708_v62 = vld [vmem:[#allocation5 + $0x408] ss:$16 sps:$4 sm:$0xff]   ;;  %v6713_v63 = vld [vmem:[#allocation5 + $0x42c] ss:$16 sps:$4 sm:$0xff]  }
 0x1b4   : > { %2047 = vmatpush1.bf16.msra.mxu1 %v6648_v1  ;;  %v6791_v1 = vld [vmem:[#allocation7 + $0xb4] ss:$8 sps:$4 sm:$0xff]  }
 0x1b5   : > { %2004 = vmatpush1.bf16.msra.mxu0 %v6645_v0  ;;  %2048 = vmatprep.subr.bf16.mxu1 %v6656_v3  ;;  %v6786_v0 = vld [vmem:[#allocation7 + $0xa0] ss:$8 sps:$4 sm:$0xff]  }
 0x1b6   : > { %2005 = vmatprep.subr.bf16.mxu0 %v6653_v2  ;;  %v6711_v2 = vld [vmem:[#allocation5 + $0x428] ss:$16 sps:$4 sm:$0xff]  }
 0x1b7   : > { %v7305_v3 = vld [vmem:[%s8118_s22 + $0x8] ss:$24 sps:$4 sm:$0xff]  }
 0x1b8   : > { %2049 = vmatpush1.bf16.msra.mxu1 %v6654_v6  ;;  %v6789_v6 = vld [vmem:[#allocation7 + $0xb0] ss:$8 sps:$4 sm:$0xff]  }
 0x1b9   : > { %2006 = vmatpush1.bf16.msra.mxu0 %v6651_v5  ;;  %2061 = vmatprep.subr.bf16.mxu1 %v6662_v7  ;;  %v6716_v5 = vld [vmem:[#allocation5 + $0x44c] ss:$16 sps:$4 sm:$0xff]  }
 0x1ba   : > { %2597 = vmatprep.subr.bf16.mxu0 %v6758_v22  ;;  %v6794_v7 = vld [vmem:[#allocation7 + $0xc4] ss:$8 sps:$4 sm:$0xff]   ;;  %v6803_v22 = vld [vmem:[#allocation7 + $0xf4] ss:$8 sps:$4 sm:$0xff]  }
 0x1bb   : > { %2051 = vmatmul.mubr.bf16.vlgmr.msra.gmra.mrb[4].mxu1 %v8150_v4  ;;  %v6680_v4 = vld [vmem:[#allocation5 + $0x2cc] ss:$16 sps:$4 sm:$0xff]  }
 0x1bc   : > { %2008 = vmatmul.mubr.bf16.vlgmr.msra.gmra.mrb[0].mxu0 %v6657_v8  ;;  %2062 = vmatpush1.bf16.msra.mxu1 %v6660_v9  ;;  %v6714_v8 = vld [vmem:[#allocation5 + $0x448] ss:$16 sps:$4 sm:$0xff]   ;;  %v6719_v9 = vld [vmem:[#allocation5 + $0x46c] ss:$16 sps:$4 sm:$0xff]  }
 0x1bd   : > { %2093 = vmatprep.mubr.bf16.mxu1 %v8146_v51  ;;  %2063 = vmatprep.subr.bf16.mxu1 %v6665_v10  ;;  %v6683_v51 = vld [vmem:[#allocation5 + $0x2ec] ss:$16 sps:$4 sm:$0xff]   ;;  %v6792_v10 = vld [vmem:[#allocation7 + $0xc0] ss:$8 sps:$4 sm:$0xff]  }
 0x1be   : > { %2598 = vmatpush1.bf16.msra.mxu0 %v6756_v21  ;;  %v6734_v21 = vld [vmem:[#allocation5 + $0x50c] ss:$16 sps:$4 sm:$0xff]  }
 0x1bf   : > { %2599 = vmatprep.subr.bf16.mxu0 %v6761_v23  ;;  %v6732_v23 = vld [vmem:[#allocation5 + $0x508] ss:$16 sps:$4 sm:$0xff]  }
 0x1c0   : > { %2064 = vmatpush1.bf16.msra.mxu1 %v6663_v11  ;;  %v6717_v11 = vld [vmem:[#allocation5 + $0x468] ss:$16 sps:$4 sm:$0xff]  }
 0x1c1   : > { %2065 = vmatprep.subr.bf16.mxu1 %v6668_v12  ;;  %v6722_v12 = vld [vmem:[#allocation5 + $0x48c] ss:$16 sps:$4 sm:$0xff]  }
 0x1c2   : > { %2600 = vmatpush1.bf16.msra.mxu0 %v6759_v25  ;;  %v6737_v25 = vld [vmem:[#allocation5 + $0x52c] ss:$16 sps:$4 sm:$0xff]  }
 0x1c3   : > { %2601 = vmatprep.subr.bf16.mxu0 %v6764_v27  ;;  %v6735_v27 = vld [vmem:[#allocation5 + $0x528] ss:$16 sps:$4 sm:$0xff]  }
 0x1c4   : > { %2066 = vmatpush1.bf16.msra.mxu1 %v6666_v13  ;;  %v6720_v13 = vld [vmem:[#allocation5 + $0x488] ss:$16 sps:$4 sm:$0xff]  }
 0x1c5   : > { %2067 = vmatprep.subr.bf16.mxu1 %v6671_v14  ;;  %v6725_v14 = vld [vmem:[#allocation5 + $0x4ac] ss:$16 sps:$4 sm:$0xff]  }
 0x1c6   : > { %2602 = vmatpush1.bf16.msra.mxu0 %v6762_v29  ;;  %v6738_v29 = vld [vmem:[#allocation5 + $0x548] ss:$16 sps:$4 sm:$0xff]  }
 0x1c7   : > { %2603 = vmatprep.subr.bf16.mxu0 %v6767_v31  ;;  %v6741_v31 = vld [vmem:[#allocation5 + $0x568] ss:$16 sps:$4 sm:$0xff]  }
 0x1c8   : > { %2068 = vmatpush1.bf16.msra.mxu1 %v6669_v15  ;;  %v6728_v15 = vld [vmem:[#allocation5 + $0x4cc] ss:$16 sps:$4 sm:$0xff]  }
 0x1c9   : > { %2069 = vmatprep.subr.bf16.mxu1 %v6674_v16  ;;  %v6797_v16 = vld [vmem:[#allocation7 + $0xd4] ss:$8 sps:$4 sm:$0xff]  }
 0x1ca   : > { %2604 = vmatpush1.bf16.msra.mxu0 %v6765_v33  ;;  %v6744_v33 = vld [vmem:[#allocation5 + $0x588] ss:$16 sps:$4 sm:$0xff]  }
 0x1cb   : > { %2605 = vmatprep.subr.bf16.mxu0 %v6770_v36  ;;  %v6747_v36 = vld [vmem:[#allocation5 + $0x5a8] ss:$16 sps:$4 sm:$0xff]  }
 0x1cc   : > { %2070 = vmatpush1.bf16.msra.mxu1 %v6672_v17  ;;  %v6726_v17 = vld [vmem:[#allocation5 + $0x4c8] ss:$16 sps:$4 sm:$0xff]  }
 0x1cd   : > { %2071 = vmatprep.subr.bf16.mxu1 %v6677_v18  ;;  %v6795_v18 = vld [vmem:[#allocation7 + $0xd0] ss:$8 sps:$4 sm:$0xff]  }
 0x1ce   : > { %2606 = vmatpush1.bf16.msra.mxu0 %v6768_v38  ;;  %v6750_v38 = vld [vmem:[#allocation5 + $0x5c8] ss:$16 sps:$4 sm:$0xff]  }
 0x1cf   : > { %2607 = vmatprep.subr.bf16.mxu0 %v6773_v40  ;;  %v6753_v40 = vld [vmem:[#allocation5 + $0x5e8] ss:$16 sps:$4 sm:$0xff]  }
 0x1d0   : > { %2072 = vmatpush1.bf16.msra.mxu1 %v6675_v19  ;;  %v6731_v19 = vld [vmem:[#allocation5 + $0x4ec] ss:$16 sps:$4 sm:$0xff]  }
 0x1d1   : > { %2073 = vmatprep.subr.bf16.mxu1 %v6680_v4  ;;  %v6800_v4 = vld [vmem:[#allocation7 + $0xe4] ss:$8 sps:$4 sm:$0xff]  }
 0x1d2   : > { %2608 = vmatpush1.bf16.msra.mxu0 %v6771_v42 }
 0x1d3   : > { %2609 = vmatprep.subr.bf16.mxu0 %v6776_v44 }
 0x1d4   : > { %2074 = vmatpush1.bf16.msra.mxu1 %v6678_v20  ;;  %v6729_v20 = vld [vmem:[#allocation5 + $0x4e8] ss:$16 sps:$4 sm:$0xff]  }
 0x1d5   : > { %2075 = vmatprep.subr.bf16.mxu1 %v6683_v51  ;;  %v6798_v51 = vld [vmem:[#allocation7 + $0xe0] ss:$8 sps:$4 sm:$0xff]  }
 0x1d6   : > { %2610 = vmatpush1.bf16.msra.mxu0 %v6774_v46  ;;  %v7695_v46 = vmov 1966171168  }
 0x1d7   : > { %2611 = vmatprep.subr.bf16.mxu0 %v6779_v48  ;;  %v2163_v48 = vlaneseq }
 0x1d8   : > { %2076 = vmatpush1.bf16.msra.mxu1 %v6681_v24  ;;  %v6801_v24 = vld [vmem:[#allocation7 + $0xf0] ss:$8 sps:$4 sm:$0xff]  }
 0x1d9   : > { %2077 = vmatprep.subr.bf16.mxu1 %v6686_v26  ;;  %v6806_v26 = vld [vmem:[#allocation7 + $0x104] ss:$8 sps:$4 sm:$0xff]  }
 0x1da   : > { %2612 = vmatpush1.bf16.msra.mxu0 %v6777_v50  ;;  %v2164_v50 = vshrl.u32 %v2163_v48, 7  ;;  %v6845_v48 = vld [vmem:[#allocation7 + $0x1d4] ss:$8 sps:$4 sm:$0xff]  }
 0x1db   : > { %2613 = vmatprep.subr.bf16.mxu0 %v6782_v53 }
 0x1dc   : > { %2078 = vmatpush1.bf16.msra.mxu1 %v6684_v28  ;;  %v6740_v28 = vld [vmem:[#allocation5 + $0x54c] ss:$16 sps:$4 sm:$0xff]  }
 0x1dd   : > { %2079 = vmatprep.subr.bf16.mxu1 %v6689_v30  ;;  %v6743_v30 = vld [vmem:[#allocation5 + $0x56c] ss:$16 sps:$4 sm:$0xff]  }
 0x1de   : > { %2614 = vmatpush1.bf16.msra.mxu0 %v6780_v55 }
 0x1df   : > { %2615 = vmatprep.subr.bf16.mxu0 %v6785_v57 }
 0x1e0   : > { %2080 = vmatpush1.bf16.msra.mxu1 %v6687_v32  ;;  %v6746_v32 = vld [vmem:[#allocation5 + $0x58c] ss:$16 sps:$4 sm:$0xff]  }
 0x1e1   : > { %2081 = vmatprep.subr.bf16.mxu1 %v6692_v35  ;;  %v6749_v35 = vld [vmem:[#allocation5 + $0x5ac] ss:$16 sps:$4 sm:$0xff]  }
 0x1e2   : > { %2616 = vmatpush1.bf16.msra.mxu0 %v6783_v59 }
 0x1e3   : > { %2617 = vmatprep.subr.bf16.mxu0 %v6788_v61 }
 0x1e4   : > { %2082 = vmatpush1.bf16.msra.mxu1 %v6690_v37  ;;  %v6752_v37 = vld [vmem:[#allocation5 + $0x5cc] ss:$16 sps:$4 sm:$0xff]  }
 0x1e5   : > { %2083 = vmatprep.subr.bf16.mxu1 %v6695_v39  ;;  %v6755_v39 = vld [vmem:[#allocation5 + $0x5ec] ss:$16 sps:$4 sm:$0xff]  }
 0x1e6   : > { %2618 = vmatpush1.bf16.msra.mxu0 %v6786_v0 }
 0x1e7   : > { %2619 = vmatprep.subr.bf16.mxu0 %v6791_v1 }
 0x1e8   : > { %2084 = vmatpush1.bf16.msra.mxu1 %v6693_v41  ;;  %v7306_v41 = vld [vmem:[%s8118_s22 + $0x10] ss:$24 sps:$4 sm:$0xff]   ;;  %s8446_s22 = sld [smem:[#allocation38_spill]] }
 0x1e9   : > { %2085 = vmatprep.subr.bf16.mxu1 %v6698_v43 }
 0x1ea   : > { %2620 = vmatpush1.bf16.msra.mxu0 %v6789_v6 }
 0x1eb   : > { %2621 = vmatprep.subr.bf16.mxu0 %v6794_v7 }
 0x1ec   : > { %2086 = vmatpush1.bf16.msra.mxu1 %v6696_v45 }
 0x1ed   : > { %2087 = vmatprep.subr.bf16.mxu1 %v6701_v47  ;;  %v2161_v47 = vunpack.c.l.s4 %v7695_v46  ;;  %v6842_v46 = vld [vmem:[#allocation7 + $0x1c4] ss:$8 sps:$4 sm:$0xff]  }
 0x1ee   : > { %2622 = vmatpush1.bf16.msra.mxu0 %v6792_v10 }
 0x1ef   : > { %2623 = vmatprep.subr.bf16.mxu0 %v6797_v16  ;;  %v6853_v16 = vld [vmem:[#allocation10] sm:$0xff]  }
 0x1f0   : > { %2088 = vmatpush1.bf16.msra.mxu1 %v6699_v49  ;;  %v2162_v49 = vunpack.c.0.s8 %v2161_v47  ;;  %v6840_v47 = vld [vmem:[#allocation7 + $0x1c0] ss:$8 sps:$4 sm:$0xff]  }
 0x1f1   : > { %2089 = vmatprep.subr.bf16.mxu1 %v6704_v52  ;;  %v5809_v52 = vld.sshfl [vmem:[%s8439_s2] sm:$0x33 pattern:$0x75316420] }
 0x1f2   : > { %2624 = vmatpush1.bf16.msra.mxu0 %v6795_v18  ;;  %v8167_v53 = vsub.s32 %v2162_v49, %v2164_v50  ;;  %v6807_v18 = vld [vmem:[#allocation7 + $0x110] ss:$8 sps:$4 sm:$0xff]  }
 0x1f3   : > { %2625 = vmatprep.subr.bf16.mxu0 %v6800_v4  ;;  %v6812_v4 = vld [vmem:[#allocation7 + $0x124] ss:$8 sps:$4 sm:$0xff]   ;;  %v6843_v49 = vld [vmem:[#allocation7 + $0x1d0] ss:$8 sps:$4 sm:$0xff]  }
 0x1f4   : > { %2090 = vmatpush1.bf16.msra.mxu1 %v6702_v54  ;;  %v2159_v54 = vcombine.high %v5809_v52, %v5809_v52  ;;  %v8170_v55 = vrot.slane %v5809_v52, %v8167_v53  ;;  %v6846_v52 = vld [vmem:[#allocation7 + $0x1e0] ss:$8 sps:$4 sm:$0xff]  }
 0x1f5   : > { %2091 = vmatprep.subr.bf16.mxu1 %v6707_v56 }
 0x1f6   : > { %2626 = vmatpush1.bf16.msra.mxu0 %v6798_v51  ;;  %v8173_v56 = vrot.slane %v2159_v54, %v8167_v53  ;;  %v2177_v57 = vpack.i.b16 %v8170_v55, %v8170_v55  ;;  %v6810_v51 = vld [vmem:[#allocation7 + $0x120] ss:$8 sps:$4 sm:$0xff]   ;;  %v6851_v54 = vld [vmem:[#allocation7 + $0x1f4] ss:$8 sps:$4 sm:$0xff]  }
 0x1f7   : > { %2627 = vmatprep.subr.bf16.mxu0 %v6803_v22  ;;  %v6815_v22 = vld [vmem:[#allocation7 + $0x134] ss:$8 sps:$4 sm:$0xff]  }
 0x1f8   : > { %2092 = vmatpush1.bf16.msra.mxu1 %v6705_v58  ;;  %v8177_v58 = vsub.s32 0, %v2164_v50  ;;  %v6848_v50 = vld [vmem:[#allocation7 + $0x1e4] ss:$8 sps:$4 sm:$0xff]  }
 0x1f9   : > { %2104 = vmatprep.subr.bf16.mxu1 %v6710_v60  ;;  %v2184_v60 = vpack.i.b16 %v8173_v56, %v8173_v56 }
 0x1fa   : > { %2628 = vmatpush1.bf16.msra.mxu0 %v6801_v24  ;;  %v6813_v24 = vld [vmem:[#allocation7 + $0x130] ss:$8 sps:$4 sm:$0xff]  }
 0x1fb   : > { %2094 = vmatmul.mubr.bf16.vlgmr.msra.gmra.mrb[4].mxu1 %v7305_v3  ;;  %2640 = vmatprep.subr.bf16.mxu0 %v6806_v26  ;;  %v2189_v6 = vrot.slane %v2184_v60, %v8177_v58  ;;  %v6818_v26 = vld [vmem:[#allocation7 + $0x144] ss:$8 sps:$4 sm:$0xff]   ;;  %v2175_v60 = vcombine.high %v8173_v56, %v8173_v56 }
 0x1fc   : > { %2105 = vmatpush1.bf16.msra.mxu1 %v6708_v62  ;;  %2136 = vmatprep.mubr.bf16.mxu1 %v8155_v34  ;;  %v6723_v34 = vld [vmem:[#allocation5 + $0x4a8] ss:$16 sps:$4 sm:$0xff]  }
 0x1fd   : > { %2106 = vmatprep.subr.bf16.mxu1 %v6713_v63  ;;  %v6863_v56 = vld [vmem:[#allocation10 + $0x28] sm:$0xff]  }
 0x200   : > { %2107 = vmatpush1.bf16.msra.mxu1 %v6711_v2  ;;  %v2182_v2 = vrot.slane %v2177_v57, %v8177_v58  ;;  %v6849_v57 = vld [vmem:[#allocation7 + $0x1f0] ss:$8 sps:$4 sm:$0xff]  }
 0x201   : > { %2108 = vmatprep.subr.bf16.mxu1 %v6716_v5 }
 0x204   : > { %2109 = vmatpush1.bf16.msra.mxu1 %v6714_v8 }
 0x205   : > { %2110 = vmatprep.subr.bf16.mxu1 %v6719_v9 }
 0x208   : > { %2111 = vmatpush1.bf16.msra.mxu1 %v6717_v11  ;;  %v7696_v11 = vmov 0  }
 0x209   : > { %2112 = vmatprep.subr.bf16.mxu1 %v6722_v12 }
 0x20c   : > { %2113 = vmatpush1.bf16.msra.mxu1 %v6720_v13  ;;  %v6804_v13 = vld [vmem:[#allocation7 + $0x100] ss:$8 sps:$4 sm:$0xff]  }
 0x20d   : > { %2114 = vmatprep.subr.bf16.mxu1 %v6725_v14  ;;  %v6809_v14 = vld [vmem:[#allocation7 + $0x114] ss:$8 sps:$4 sm:$0xff]  }
 0x210   : > { %2115 = vmatpush1.bf16.msra.mxu1 %v6723_v34 }
 0x211   : > { %2116 = vmatprep.subr.bf16.mxu1 %v6728_v15  ;;  %v6852_v15 = vld [vmem:[#allocation10 + $0x40] sm:$0xff]  }
 0x214   : > { %2117 = vmatpush1.bf16.msra.mxu1 %v6726_v17  ;;  %v6854_v17 = vld [vmem:[#allocation10 + $0x48] sm:$0xff]  }
 0x215   : > { %2118 = vmatprep.subr.bf16.mxu1 %v6731_v19  ;;  %v6855_v19 = vld [vmem:[#allocation10 + $0x8] sm:$0xff]  }
 0x218   : > { %2119 = vmatpush1.bf16.msra.mxu1 %v6729_v20  ;;  %v6856_v20 = vld [vmem:[#allocation10 + $0x50] sm:$0xff]  }
 0x219   : > { %2120 = vmatprep.subr.bf16.mxu1 %v6734_v21  ;;  %v6857_v21 = vld [vmem:[#allocation10 + $0x10] sm:$0xff]  }
 0x21c   : > { %2121 = vmatpush1.bf16.msra.mxu1 %v6732_v23  ;;  %v6858_v23 = vld [vmem:[#allocation10 + $0x58] sm:$0xff]  }
 0x21d   : > { %2122 = vmatprep.subr.bf16.mxu1 %v6737_v25  ;;  %v6859_v25 = vld [vmem:[#allocation10 + $0x18] sm:$0xff]  }
 0x220   : > { %2123 = vmatpush1.bf16.msra.mxu1 %v6735_v27  ;;  %v6860_v27 = vld [vmem:[#allocation10 + $0x60] sm:$0xff]  }
 0x221   : > { %2124 = vmatprep.subr.bf16.mxu1 %v6740_v28  ;;  %v6816_v28 = vld [vmem:[#allocation7 + $0x140] ss:$8 sps:$4 sm:$0xff]  }
 0x224   : > { %2125 = vmatpush1.bf16.msra.mxu1 %v6738_v29  ;;  %v6861_v29 = vld [vmem:[#allocation10 + $0x20] sm:$0xff]  }
 0x225   : > { %2126 = vmatprep.subr.bf16.mxu1 %v6743_v30  ;;  %v6821_v30 = vld [vmem:[#allocation7 + $0x154] ss:$8 sps:$4 sm:$0xff]  }
 0x228   : > { %2127 = vmatpush1.bf16.msra.mxu1 %v6741_v31  ;;  %v6862_v31 = vld [vmem:[#allocation10 + $0x68] sm:$0xff]  }
 0x229   : > { %2128 = vmatprep.subr.bf16.mxu1 %v6746_v32  ;;  %v6819_v32 = vld [vmem:[#allocation7 + $0x150] ss:$8 sps:$4 sm:$0xff]  }
 0x22c   : > { %2129 = vmatpush1.bf16.msra.mxu1 %v6744_v33  ;;  %v6824_v33 = vld [vmem:[#allocation7 + $0x164] ss:$8 sps:$4 sm:$0xff]  }
 0x22d   : > { %2130 = vmatprep.subr.bf16.mxu1 %v6749_v35  ;;  %v6822_v35 = vld [vmem:[#allocation7 + $0x160] ss:$8 sps:$4 sm:$0xff]  }
 0x230   : > { %2131 = vmatpush1.bf16.msra.mxu1 %v6747_v36  ;;  %v6827_v36 = vld [vmem:[#allocation7 + $0x174] ss:$8 sps:$4 sm:$0xff]  }
 0x231   : > { %2132 = vmatprep.subr.bf16.mxu1 %v6752_v37  ;;  %v6825_v37 = vld [vmem:[#allocation7 + $0x170] ss:$8 sps:$4 sm:$0xff]  }
 0x234   : > { %2133 = vmatpush1.bf16.msra.mxu1 %v6750_v38  ;;  %v6830_v38 = vld [vmem:[#allocation7 + $0x184] ss:$8 sps:$4 sm:$0xff]  }
 0x235   : > { %2134 = vmatprep.subr.bf16.mxu1 %v6755_v39  ;;  %v6828_v39 = vld [vmem:[#allocation7 + $0x180] ss:$8 sps:$4 sm:$0xff]  }
 0x238   : > { %2135 = vmatpush1.bf16.msra.mxu1 %v6753_v40  ;;  %v6833_v40 = vld [vmem:[#allocation7 + $0x194] ss:$8 sps:$4 sm:$0xff]  }
 0x239   : > { %6192 = vmatprep.subr.bf16.mxu1 %v6852_v15  ;;  %v7697_v15 = vmov 0.0  }
 0x23b   : > { %2137 = vmatmul.mubr.bf16.vlgmr.msra.gmra.mrb[4].mxu1 %v7306_v41  ;;  %v6831_v41 = vld [vmem:[#allocation7 + $0x190] ss:$8 sps:$4 sm:$0xff]  }
 0x23c   : > { %6193 = vmatpush3.bf16.msra.mxu1 %v6853_v16  ;;  %v5874_v16 = vld.sshfl [vmem:[#allocation8] sm:$0x11 pattern:$0x75316420] }
 0x23d   : > { %6194 = vmatprep.subr.bf16.mxu1 %v6854_v17  ;;  %v2693_v17 = vcombine.high %v5874_v16, %v5874_v16 }
 0x240   : > { %6195 = vmatpush3.bf16.msra.mxu1 %v6855_v19  ;;  %v2707_v19 = vrot.slane %v2693_v17, %v8167_v53  ;;  %v6895_v17 = vld [vmem:[#allocation14 + $0x34] ss:$8 sps:$4 sm:$0xff]  }
 0x241   : > { %6196 = vmatprep.subr.bf16.mxu1 %v6856_v20 }
 0x242   : > { %v2716_v20 = vpack.i.b16 %v2707_v19, %v2707_v19  ;;  %v6898_v19 = vld [vmem:[#allocation14 + $0x44] ss:$8 sps:$4 sm:$0xff]  }
 0x244   : > { %6197 = vmatpush3.bf16.msra.mxu1 %v6857_v21 }
 0x245   : > { %6198 = vmatprep.subr.bf16.mxu1 %v6858_v23 }
 0x248   : > { %6199 = vmatpush3.bf16.msra.mxu1 %v6859_v25 }
 0x249   : > { %6200 = vmatprep.subr.bf16.mxu1 %v6860_v27 }
 0x24c   : > { %6201 = vmatpush3.bf16.msra.mxu1 %v6861_v29 }
 0x24d   : > { %6202 = vmatprep.subr.bf16.mxu1 %v6862_v31  ;;  %v6868_v31 = vld [vmem:[#allocation11] sm:$0xff]  }
 0x24e   : > { %v1923_v42 = vpop.f32.mrb[0].mxu1 }
 0x24f   : > { %v1925_v43 = vpop.f32.mrb[1].mxu1 }
 0x250   : > { %v1927_v44 = vpop.f32.mrb[2].mxu1  ;;  %6203 = vmatpush3.bf16.msra.mxu1 %v6863_v56 }
 0x251   : > { %v1929_v45 = vpop.f32.mrb[3].mxu1 }
 0x28f   : > { %v2009_v59 = vpop.f32.mrb[0].mxu0 }
 0x290   : > { %v6272_v61 = vadd.f32 %v2009_v59, %v1923_v42  ;;  %v2011_v62 = vpop.f32.mrb[1].mxu0  ;;  %v6836_v42 = vld [vmem:[#allocation7 + $0x1a4] ss:$8 sps:$4 sm:$0xff]   ;;  %v2174_v59 = vcombine.high %v8170_v55, %v8170_v55 }
 0x291   : > { %v6273_v63 = vadd.f32 %v2011_v62, %v1925_v43  ;;  %v2013_v0 = vpop.f32.mrb[2].mxu0  ;;  %v6834_v43 = vld [vmem:[#allocation7 + $0x1a0] ss:$8 sps:$4 sm:$0xff]   ;;  %v2198_v62 = vpack.i.b16 %v2175_v60, %v2175_v60  ;;  %v6878_v60 = vld [vmem:[#allocation13 + $0x10] sm:$0xff]  }
 0x292   : > { %v6274_v1 = vadd.f32 %v2013_v0, %v1927_v44  ;;  %v2015_v3 = vpop.f32.mrb[3].mxu0  ;;  %v6839_v44 = vld [vmem:[#allocation7 + $0x1b4] ss:$8 sps:$4 sm:$0xff]  }
 0x293   : > { %v6275_v5 = vadd.f32 %v2015_v3, %v1929_v45  ;;  %v6837_v45 = vld [vmem:[#allocation7 + $0x1b0] ss:$8 sps:$4 sm:$0xff]   ;;  %v2203_v3 = vrot.slane %v2198_v62, %v8177_v58  ;;  %v6880_v62 = vld [vmem:[#allocation13 + $0x20] sm:$0xff]  }
 0x294   : > { %v2147_v7 = vpack.c.bf16 %v6274_v1, %v6272_v61  ;;  %v2191_v61 = vpack.i.b16 %v2174_v59, %v2174_v59  ;;  %v6877_v59 = vld [vmem:[#allocation13 + $0x8] sm:$0xff]  }
 0x295   : > { %v2148_v8 = vpack.c.bf16 %v6275_v5, %v6273_v63 }
 0x296   : > { %v2204_v9 = vadd.bf16 %v2182_v2, %v2147_v7  ;;  %v2196_v1 = vrot.slane %v2191_v61, %v8177_v58  ;;  %v6879_v61 = vld [vmem:[#allocation13 + $0x18] sm:$0xff]  }
 0x297   : > { %v2205_v10 = vadd.bf16 %v2189_v6, %v2148_v8 }
 0x298   : > { %v2208_v34 = vmax.bf16 %v7696_v11, %v2204_v9 }
 0x299   : > { %v2209_v12 = vmax.bf16 %v7696_v11, %v2205_v10 }
 0x29b   : > { %2629 = vmatprep.mubr.bf16.mxu0 %v2209_v12  ;;  %v6864_v12 = vld [vmem:[#allocation10 + $0x70] sm:$0xff]  }
 0x29c   : > { %2630 = vmatmul.mubr.bf16.vlgmr.msra.gmra.mrb[4].mxu0 %v2208_v34  ;;  %6204 = vmatprep.subr.bf16.mxu1 %v6864_v12  ;;  %v6867_v34 = vld [vmem:[#allocation10 + $0x38] sm:$0xff]   ;;  %v6884_v12 = vld [vmem:[#allocation14] ss:$8 sps:$4 sm:$0xff]  }
 0x29d   : > { %2641 = vmatpush1.bf16.msra.mxu0 %v6804_v13  ;;  %v6865_v13 = vld [vmem:[#allocation10 + $0x30] sm:$0xff]  }
 0x29e   : > { %2642 = vmatprep.subr.bf16.mxu0 %v6809_v14  ;;  %6205 = vmatpush3.bf16.msra.mxu1 %v6865_v13  ;;  %v6866_v14 = vld [vmem:[#allocation10 + $0x78] sm:$0xff]  }
 0x29f   : > { %6206 = vmatprep.subr.bf16.mxu1 %v6866_v14  ;;  %v6889_v14 = vld [vmem:[#allocation14 + $0x14] ss:$8 sps:$4 sm:$0xff]  }
 0x2a1   : > { %2643 = vmatpush1.bf16.msra.mxu0 %v6807_v18  ;;  %v2700_v18 = vrot.slane %v5874_v16, %v8167_v53  ;;  %v6890_v16 = vld [vmem:[#allocation14 + $0x20] ss:$8 sps:$4 sm:$0xff]  }
 0x2a2   : > { %2644 = vmatprep.subr.bf16.mxu0 %v6812_v4  ;;  %6207 = vmatpush3.bf16.msra.mxu1 %v6867_v34  ;;  %v6887_v34 = vld [vmem:[#allocation14 + $0x10] ss:$8 sps:$4 sm:$0xff]  }
 0x2a3   : > { %6232 = vmatprep.subr.bf16.mxu1 %v7697_v15  ;;  %v2709_v4 = vpack.i.b16 %v2700_v18, %v2700_v18  ;;  %v6893_v18 = vld [vmem:[#allocation14 + $0x30] ss:$8 sps:$4 sm:$0xff]  }
 0x2a5   : > { %2645 = vmatpush1.bf16.msra.mxu0 %v6810_v51 }
 0x2a6   : > { %2646 = vmatprep.subr.bf16.mxu0 %v6815_v22  ;;  %v2714_v22 = vrot.slane %v2709_v4, %v8177_v58  ;;  %v6896_v4 = vld [vmem:[#allocation14 + $0x40] ss:$8 sps:$4 sm:$0xff]  }
 0x2a9   : > { %2647 = vmatpush1.bf16.msra.mxu0 %v6813_v24  ;;  %v2721_v24 = vrot.slane %v2716_v20, %v8177_v58  ;;  %v6901_v20 = vld [vmem:[#allocation14 + $0x54] ss:$8 sps:$4 sm:$0xff]  }
 0x2aa   : > { %2648 = vmatprep.subr.bf16.mxu0 %v6818_v26 }
 0x2ad   : > { %2649 = vmatpush1.bf16.msra.mxu0 %v6816_v28 }
 0x2ae   : > { %2650 = vmatprep.subr.bf16.mxu0 %v6821_v30 }
 0x2b1   : > { %2651 = vmatpush1.bf16.msra.mxu0 %v6819_v32 }
 0x2b2   : > { %2652 = vmatprep.subr.bf16.mxu0 %v6824_v33  ;;  %v6869_v33 = vld [vmem:[#allocation11 + $0x8] sm:$0xff]  }
 0x2b5   : > { %2653 = vmatpush1.bf16.msra.mxu0 %v6822_v35  ;;  %v6870_v35 = vld [vmem:[#allocation11 + $0x10] sm:$0xff]  }
 0x2b6   : > { %2654 = vmatprep.subr.bf16.mxu0 %v6827_v36  ;;  %v6871_v36 = vld [vmem:[#allocation11 + $0x18] sm:$0xff]  }
 0x2b9   : > { %2655 = vmatpush1.bf16.msra.mxu0 %v6825_v37  ;;  %v6872_v37 = vld [vmem:[#allocation11 + $0x20] sm:$0xff]  }
 0x2ba   : > { %2656 = vmatprep.subr.bf16.mxu0 %v6830_v38  ;;  %v6873_v38 = vld [vmem:[#allocation11 + $0x28] sm:$0xff]  }
 0x2bd   : > { %2657 = vmatpush1.bf16.msra.mxu0 %v6828_v39  ;;  %v6874_v39 = vld [vmem:[#allocation11 + $0x30] sm:$0xff]  }
 0x2be   : > { %2658 = vmatprep.subr.bf16.mxu0 %v6833_v40  ;;  %v6875_v40 = vld [vmem:[#allocation11 + $0x38] sm:$0xff]  }
 0x2c1   : > { %2659 = vmatpush1.bf16.msra.mxu0 %v6831_v41  ;;  %v2758_v41 = vld [vmem:[%s8440_s12] sm:$0x1] }
 0x2c2   : > { %2660 = vmatprep.subr.bf16.mxu0 %v6836_v42 }
 0x2c5   : > { %2661 = vmatpush1.bf16.msra.mxu0 %v6834_v43  ;;  %v2898_v43 = vpack.i.b16 %v2758_v41, %v2758_v41  ;;  %v6952_v41 = vld [vmem:[#allocation16 + $0xe4] ss:$16 sps:$4 sm:$0xff]  }
 0x2c6   : > { %2662 = vmatprep.subr.bf16.mxu0 %v6839_v44 }
 0x2c9   : > { %2663 = vmatpush1.bf16.msra.mxu0 %v6837_v45 }
 0x2ca   : > { %2664 = vmatprep.subr.bf16.mxu0 %v6842_v46 }
 0x2cd   : > { %2665 = vmatpush1.bf16.msra.mxu0 %v6840_v47 }
 0x2ce   : > { %2666 = vmatprep.subr.bf16.mxu0 %v6845_v48 }
 0x2d1   : > { %2667 = vmatpush1.bf16.msra.mxu0 %v6843_v49  ;;  %v2903_v49 = vrot.slane %v2898_v43, %v8177_v58  ;;  %v6958_v43 = vld [vmem:[#allocation16 + $0x104] ss:$16 sps:$4 sm:$0xff]  }
 0x2d2   : > { %2668 = vmatprep.subr.bf16.mxu0 %v6848_v50 }
 0x2d5   : > { %2669 = vmatpush1.bf16.msra.mxu0 %v6846_v52 }
 0x2d6   : > { %2670 = vmatprep.subr.bf16.mxu0 %v6851_v54  ;;  %v6876_v54 = vld [vmem:[#allocation13] sm:$0xff]  }
 0x2d9   : > { %2671 = vmatpush1.bf16.msra.mxu0 %v6849_v57 }
 0x30e   : > { %v2138_v63 = vpop.f32.mrb[4].mxu1 }
 0x30f   : > { %v2140_v0 = vpop.f32.mrb[5].mxu1 }
 0x310   : > { %v2142_v2 = vpop.f32.mrb[6].mxu1 }
 0x311   : > { %v2149_v5 = vpack.c.bf16 %v2142_v2, %v2138_v63  ;;  %v2144_v6 = vpop.f32.mrb[7].mxu1  ;;  %v6881_v63 = vld [vmem:[#allocation13 + $0x28] sm:$0xff]  }
 0x312   : > { %v2150_v7 = vpack.c.bf16 %v2144_v6, %v2140_v0  ;;  %v6882_v0 = vld [vmem:[#allocation13 + $0x30] sm:$0xff]   ;;  %v6886_v2 = vld [vmem:[#allocation14 + $0x4] ss:$8 sps:$4 sm:$0xff]  }
 0x313   : > { %v2206_v8 = vadd.bf16 %v2196_v1, %v2149_v5  ;;  %v6883_v1 = vld [vmem:[#allocation13 + $0x38] sm:$0xff]  }
 0x314   : > { %v2207_v9 = vadd.bf16 %v2203_v3, %v2150_v7  ;;  %v2922_v3 = vld [vmem:[%s8441_s3] sm:$0x1]  ;;  %s8304_s3 = scalar_lea.vmem [#allocation19], %s6306_s14  ;;  %s6307_s14 = smul.u32 768, %s7813_s0 }
 0x315   : > { %v2210_v55 = vmax.bf16 %v7696_v11, %v2206_v8  ;;  %v3014_v5 = vpack.i.b16 %v2922_v3, %v2922_v3  ;;  %s5427_s19 = sshll.u32 %s8304_s3, 4  ;;  %s7699_s0 = smov [#allocation19]   ;;  %s8322_s19 = int_to_ptr.vmem [resolvable:$true] %s5427_s19 }
 0x316   : > { %v2211_v10 = vmax.bf16 %v7696_v11, %v2207_v9  ;;  %s8320_s30 = scalar_lea.hbm %s8446_s22, %s6307_s14  ;;  %s7589_s2 = scalar_lea.vmem %s8322_s19, 768 }
 0x317   : > { %v3019_v8 = vrot.slane %v3014_v5, %v8177_v58  ;;  %p7590_p11 = scmp.ne.s32.totalorder %s8322_s19, %s7589_s2  ;;  %s7593_s6 = sshll.u32 %s7699_s0, 4  ;;  %s7594_s6 = int_to_ptr.vmem [resolvable:$false] %s7593_s6 }
 0x318   : > { %2672 = vmatprep.mubr.bf16.mxu0 %v2211_v10  ;;  %p7596_p6 = scmp.lt.s32.totalorder %s8322_s19, %s7594_s6 }
 0x319   : > { %2673 = vmatmul.mubr.bf16.vlgmr.msra.gmra.mrb[4].mxu0 %v2210_v55  ;;  %p7591_p13 = pnand %p7590_p11, %p8447_p12 }
 0x31b   : > { %p7592_p8 = pneg %p7591_p13 }
 0x3ec   : > { %v2674_v51 = vpop.f32.mrb[4].mxu0 }
 0x3ed   : > { %v2676_v21 = vpop.f32.mrb[5].mxu0 }
 0x3ee   : > { %v2678_v23 = vpop.f32.mrb[6].mxu0 }
 0x3ef   : > { %v2683_v25 = vpack.c.bf16 %v2678_v23, %v2674_v51  ;;  %v2680_v26 = vpop.f32.mrb[7].mxu0  ;;  %v6899_v51 = vld [vmem:[#allocation14 + $0x50] ss:$8 sps:$4 sm:$0xff]   ;;  %v6907_v23 = vld [vmem:[#allocation14 + $0x74] ss:$8 sps:$4 sm:$0xff]  }
 0x3f0   : > { %v2684_v27 = vpack.c.bf16 %v2680_v26, %v2676_v21  ;;  %v6904_v21 = vld [vmem:[#allocation14 + $0x64] ss:$8 sps:$4 sm:$0xff]  }
 0x3f1   : > { %v2722_v28 = vadd.bf16 %v2714_v22, %v2683_v25  ;;  %v6902_v22 = vld [vmem:[#allocation14 + $0x60] ss:$8 sps:$4 sm:$0xff]   ;;  %v6910_v26 = vld [vmem:[#allocation16 + $0x4] ss:$16 sps:$4 sm:$0xff]  }
 0x3f2   : > { %v2723_v29 = vadd.bf16 %v2721_v24, %v2684_v27  ;;  %v6905_v24 = vld [vmem:[#allocation14 + $0x70] ss:$8 sps:$4 sm:$0xff]   ;;  %v6913_v27 = vld [vmem:[#allocation16 + $0xc] ss:$16 sps:$4 sm:$0xff]   ;;  %3706 = vmatprep.subr.bf16.mxu0 %v6910_v26 }
 0x3f3   : > { %v2724_v32 = vmax.bf16 %v7696_v11, %v2722_v28  ;;  %v6908_v25 = vld [vmem:[#allocation16] ss:$16 sps:$4 sm:$0xff]   ;;  %v6916_v28 = vld [vmem:[#allocation16 + $0x24] ss:$16 sps:$4 sm:$0xff]   ;;  %v6985_v26 = vld [vmem:[#allocation16 + $0x18c] ss:$16 sps:$4 sm:$0xff]  }
 0x3f4   : > { %v2725_v30 = vmax.bf16 %v7696_v11, %v2723_v29  ;;  %3707 = vmatpush1.bf16.msra.mxu0 %v6908_v25  ;;  %v6914_v29 = vld [vmem:[#allocation16 + $0x20] ss:$16 sps:$4 sm:$0xff]   ;;  %v6977_v25 = vld [vmem:[#allocation16 + $0x168] ss:$16 sps:$4 sm:$0xff]  }
 0x3f5   : > { %3708 = vmatprep.subr.bf16.mxu0 %v6916_v28  ;;  %v6991_v28 = vld [vmem:[#allocation16 + $0x1ac] ss:$16 sps:$4 sm:$0xff]  }
 0x3f6   : > { %2887 = vmatprep.mubr.bf16.mxu1 %v2725_v30  ;;  %v6922_v30 = vld [vmem:[#allocation16 + $0x44] ss:$16 sps:$4 sm:$0xff]  }
 0x3f7   : > { %2888 = vmatmul.mubr.bf16.vlgmr.msra.gmra.mrb[8].mxu1 %v2724_v32  ;;  %v6928_v32 = vld [vmem:[#allocation16 + $0x64] ss:$16 sps:$4 sm:$0xff]  }
 0x3f8   : > { %6233 = vmatpush3.bf16.msra.mxu1 %v6868_v31  ;;  %6248 = vmatprep.mubr.msk.bf16.mxu1 %vm7698_vm0, %v7697_v15  ;;  %v6920_v31 = vld [vmem:[#allocation16 + $0x40] ss:$16 sps:$4 sm:$0xff]  }
 0x3f9   : > { %6234 = vmatprep.subr.bf16.mxu1 %v7697_v15  ;;  %3709 = vmatpush1.bf16.msra.mxu0 %v6914_v29  ;;  %v6989_v29 = vld [vmem:[#allocation16 + $0x1a8] ss:$16 sps:$4 sm:$0xff]  }
 0x3fa   : > { %3710 = vmatprep.subr.bf16.mxu0 %v6922_v30  ;;  %v6994_v30 = vld [vmem:[#allocation16 + $0x1c4] ss:$16 sps:$4 sm:$0xff]  }
 0x3fc   : > { %6235 = vmatpush3.bf16.msra.mxu1 %v6869_v33  ;;  %v6926_v33 = vld [vmem:[#allocation16 + $0x60] ss:$16 sps:$4 sm:$0xff]  }
 0x3fd   : > { %6236 = vmatprep.subr.bf16.mxu1 %v7697_v15  ;;  %3711 = vmatpush1.bf16.msra.mxu0 %v6920_v31  ;;  %v6997_v31 = vld [vmem:[#allocation16 + $0x1cc] ss:$16 sps:$4 sm:$0xff]  }
 0x3fe   : > { %3712 = vmatprep.subr.bf16.mxu0 %v6928_v32  ;;  %v6992_v32 = vld [vmem:[#allocation16 + $0x1c0] ss:$16 sps:$4 sm:$0xff]  }
 0x400   : > { %6237 = vmatpush3.bf16.msra.mxu1 %v6870_v35  ;;  %v6934_v35 = vld [vmem:[#allocation16 + $0x84] ss:$16 sps:$4 sm:$0xff]  }
 0x401   : > { %6238 = vmatprep.subr.bf16.mxu1 %v7697_v15  ;;  %3713 = vmatpush1.bf16.msra.mxu0 %v6926_v33  ;;  %v6995_v33 = vld [vmem:[#allocation16 + $0x1c8] ss:$16 sps:$4 sm:$0xff]  }
 0x402   : > { %3714 = vmatprep.subr.bf16.mxu0 %v6934_v35  ;;  %v7000_v35 = vld [vmem:[#allocation16 + $0x1e4] ss:$16 sps:$4 sm:$0xff]  }
 0x404   : > { %6239 = vmatpush3.bf16.msra.mxu1 %v6871_v36  ;;  %v6932_v36 = vld [vmem:[#allocation16 + $0x80] ss:$16 sps:$4 sm:$0xff]  }
 0x405   : > { %6240 = vmatprep.subr.bf16.mxu1 %v7697_v15  ;;  %3715 = vmatpush1.bf16.msra.mxu0 %v6932_v36  ;;  %v7003_v36 = vld [vmem:[#allocation16 + $0x1ec] ss:$16 sps:$4 sm:$0xff]  }
 0x408   : > { %6241 = vmatpush3.bf16.msra.mxu1 %v6872_v37  ;;  %v6940_v37 = vld [vmem:[#allocation16 + $0xa4] ss:$16 sps:$4 sm:$0xff]  }
 0x409   : > { %6242 = vmatprep.subr.bf16.mxu1 %v7697_v15  ;;  %3716 = vmatprep.subr.bf16.mxu0 %v6940_v37  ;;  %v6998_v37 = vld [vmem:[#allocation16 + $0x1e0] ss:$16 sps:$4 sm:$0xff]  }
 0x40c   : > { %6243 = vmatpush3.bf16.msra.mxu1 %v6873_v38  ;;  %v6938_v38 = vld [vmem:[#allocation16 + $0xa0] ss:$16 sps:$4 sm:$0xff]  }
 0x40d   : > { %6244 = vmatprep.subr.bf16.mxu1 %v7697_v15  ;;  %3717 = vmatpush1.bf16.msra.mxu0 %v6938_v38  ;;  %v7001_v38 = vld [vmem:[#allocation16 + $0x1e8] ss:$16 sps:$4 sm:$0xff]  }
 0x410   : > { %6245 = vmatpush3.bf16.msra.mxu1 %v6874_v39  ;;  %v6946_v39 = vld [vmem:[#allocation16 + $0xc4] ss:$16 sps:$4 sm:$0xff]  }
 0x411   : > { %6246 = vmatprep.subr.bf16.mxu1 %v7697_v15  ;;  %3718 = vmatprep.subr.bf16.mxu0 %v6946_v39  ;;  %v7006_v39 = vld [vmem:[#allocation17 + $0x4] ss:$24 sps:$4 sm:$0xff]  }
 0x414   : > { %6247 = vmatpush3.bf16.msra.mxu1 %v6875_v40  ;;  %v6944_v40 = vld [vmem:[#allocation16 + $0xc0] ss:$16 sps:$4 sm:$0xff]  }
 0x415   : > { %6252 = vmatprep.subr.bf16.mxu1 %v7697_v15  ;;  %3719 = vmatpush1.bf16.msra.mxu0 %v6944_v40  ;;  %v7009_v40 = vld [vmem:[#allocation17 + $0xc] ss:$24 sps:$4 sm:$0xff]  }
 0x416   : > { %3720 = vmatprep.subr.bf16.mxu0 %v6952_v41  ;;  %v5923_v41 = vld.sshfl [vmem:[%s8443_s23] sm:$0x11 pattern:$0x75316420]  ;;  %s5413_s23 = scalar_lea.sflag [#allocation4], %s8112_s20 }
 0x4ca   : > { %v6208_v42 = vpop.f32.mrb[8].mxu1 }
 0x4cb   : > { %v6209_v44 = vpop.f32.mrb[9].mxu1 }
 0x4cc   : > { %v6210_v45 = vadd.f32 %v6209_v44, %v6208_v42  ;;  %v6211_v46 = vpop.f32.mrb[10].mxu1  ;;  %v6950_v42 = vld [vmem:[#allocation16 + $0xe0] ss:$16 sps:$4 sm:$0xff]  }
 0x4cd   : > { %v6212_v47 = vpop.f32.mrb[11].mxu1  ;;  %3721 = vmatpush1.bf16.msra.mxu0 %v6950_v42  ;;  %v6956_v44 = vld [vmem:[#allocation16 + $0x100] ss:$16 sps:$4 sm:$0xff]   ;;  %v3288_v42 = vcombine.high %v5923_v41, %v5923_v41 }
 0x4ce   : > { %v6213_v48 = vadd.f32 %v6212_v47, %v6211_v46  ;;  %3722 = vmatprep.subr.bf16.mxu0 %v6958_v43  ;;  %v6962_v46 = vld [vmem:[#allocation16 + $0x120] ss:$16 sps:$4 sm:$0xff]   ;;  %v6970_v47 = vld [vmem:[#allocation16 + $0x144] ss:$16 sps:$4 sm:$0xff]   ;;  %v3295_v43 = vrot.slane %v5923_v41, %v8167_v53 }
 0x4cf   : > { %v7075_v41 = vld [vmem:[#allocation17 + $0x21c] ss:$24 sps:$4 sm:$0xff]  }
 0x4d0   : > { %v2896_v50 = vpack.c.bf16 %v6213_v48, %v6210_v45  ;;  %v6964_v45 = vld [vmem:[#allocation16 + $0x124] ss:$16 sps:$4 sm:$0xff]   ;;  %v6968_v48 = vld [vmem:[#allocation16 + $0x140] ss:$16 sps:$4 sm:$0xff]  }
 0x4d1   : > { %3723 = vmatpush1.bf16.msra.mxu0 %v6956_v44  ;;  %v3302_v44 = vrot.slane %v3288_v42, %v8167_v53  ;;  %v7070_v42 = vld [vmem:[#allocation17 + $0x210] ss:$24 sps:$4 sm:$0xff]  }
 0x4d2   : > { %v2904_v52 = vadd.bf16 %v2903_v49, %v2896_v50  ;;  %3724 = vmatprep.subr.bf16.mxu0 %v6964_v45  ;;  %v6976_v49 = vld [vmem:[#allocation16 + $0x164] ss:$16 sps:$4 sm:$0xff]   ;;  %v6974_v50 = vld [vmem:[#allocation16 + $0x160] ss:$16 sps:$4 sm:$0xff]   ;;  %v3304_v45 = vpack.i.b16 %v3295_v43, %v3295_v43 }
 0x4d3   : > { %v7073_v43 = vld [vmem:[#allocation17 + $0x218] ss:$24 sps:$4 sm:$0xff]  }
 0x4d4   : > { %v2905_v57 = vmax.bf16 %v7696_v11, %v2904_v52  ;;  %v6982_v52 = vld [vmem:[#allocation16 + $0x184] ss:$16 sps:$4 sm:$0xff]  }
 0x4d5   : > { %3725 = vmatpush1.bf16.msra.mxu0 %v6962_v46  ;;  %v3311_v46 = vpack.i.b16 %v3302_v44, %v3302_v44  ;;  %v7078_v44 = vld [vmem:[#allocation17 + $0x244] ss:$24 sps:$4 sm:$0xff]  }
 0x4d6   : > { %6249 = vmatmul.mubr.bf16.vlgmr.msra.gmra.mrb[12].mxu1 %v2905_v57  ;;  %3726 = vmatprep.subr.bf16.mxu0 %v6970_v47  ;;  %v6988_v57 = vld [vmem:[#allocation16 + $0x1a4] ss:$16 sps:$4 sm:$0xff]  }
 0x4d7   : > { %6253 = vmatpush3.bf16.msra.mxu1 %v6876_v54  ;;  %6268 = vmatprep.mubr.msk.bf16.mxu1 %vm7698_vm0, %v7697_v15  ;;  %v6980_v54 = vld [vmem:[#allocation16 + $0x180] ss:$16 sps:$4 sm:$0xff]  }
 0x4d8   : > { %6254 = vmatprep.subr.bf16.mxu1 %v7697_v15 }
 0x4d9   : > { %3727 = vmatpush1.bf16.msra.mxu0 %v6968_v48 }
 0x4da   : > { %3728 = vmatprep.subr.bf16.mxu0 %v6976_v49  ;;  %v3309_v49 = vrot.slane %v3304_v45, %v8177_v58  ;;  %v7081_v45 = vld [vmem:[#allocation17 + $0x24c] ss:$24 sps:$4 sm:$0xff]  }
 0x4db   : > { %6255 = vmatpush3.bf16.msra.mxu1 %v6877_v59  ;;  %v6986_v59 = vld [vmem:[#allocation16 + $0x1a0] ss:$16 sps:$4 sm:$0xff]  }
 0x4dc   : > { %6256 = vmatprep.subr.bf16.mxu1 %v7697_v15 }
 0x4dd   : > { %3729 = vmatpush1.bf16.msra.mxu0 %v6974_v50 }
 0x4de   : > { %3730 = vmatprep.subr.bf16.mxu0 %v6982_v52  ;;  %v3316_v52 = vrot.slane %v3311_v46, %v8177_v58  ;;  %v7076_v46 = vld [vmem:[#allocation17 + $0x240] ss:$24 sps:$4 sm:$0xff]  }
 0x4df   : > { %6257 = vmatpush3.bf16.msra.mxu1 %v6878_v60  ;;  %v3038_v60 = vld [vmem:[%s8442_s29] sm:$0x1] }
 0x4e0   : > { %6258 = vmatprep.subr.bf16.mxu1 %v7697_v15 }
 0x4e1   : > { %3731 = vmatpush1.bf16.msra.mxu0 %v6980_v54 }
 0x4e2   : > { %3732 = vmatprep.subr.bf16.mxu0 %v6988_v57 }
 0x4e3   : > { %6259 = vmatpush3.bf16.msra.mxu1 %v6879_v61  ;;  %v3130_v61 = vpack.i.b16 %v3038_v60, %v3038_v60 }
 0x4e4   : > { %6260 = vmatprep.subr.bf16.mxu1 %v7697_v15 }
 0x4e5   : > { %3733 = vmatpush1.bf16.msra.mxu0 %v6986_v59 }
 0x4e6   : > { %3734 = vmatprep.subr.bf16.mxu0 %v6994_v30  ;;  %v7055_v30 = vld [vmem:[#allocation17 + $0x188] ss:$24 sps:$4 sm:$0xff]  }
 0x4e7   : > { %6261 = vmatpush3.bf16.msra.mxu1 %v6880_v62 }
 0x4e8   : > { %6262 = vmatprep.subr.bf16.mxu1 %v7697_v15 }
 0x4e9   : > { %3735 = vmatpush1.bf16.msra.mxu0 %v6992_v32  ;;  %v7063_v32 = vld [vmem:[#allocation17 + $0x1bc] ss:$24 sps:$4 sm:$0xff]  }
 0x4ea   : > { %3736 = vmatprep.subr.bf16.mxu0 %v7000_v35  ;;  %v7061_v35 = vld [vmem:[#allocation17 + $0x1b8] ss:$24 sps:$4 sm:$0xff]  }
 0x4eb   : > { %6263 = vmatpush3.bf16.msra.mxu1 %v6881_v63 }
 0x4ec   : > { %6264 = vmatprep.subr.bf16.mxu1 %v7697_v15 }
 0x4ed   : > { %3737 = vmatpush1.bf16.msra.mxu0 %v6998_v37  ;;  %v7069_v37 = vld [vmem:[#allocation17 + $0x1ec] ss:$24 sps:$4 sm:$0xff]  }
 0x4ee   : > { %5010 = vmatprep.subr.bf16.mxu0 %v7006_v39  ;;  %v7067_v39 = vld [vmem:[#allocation17 + $0x1e8] ss:$24 sps:$4 sm:$0xff]  }
 0x4ef   : > { %6265 = vmatpush3.bf16.msra.mxu1 %v6882_v0  ;;  %v3135_v0 = vrot.slane %v3130_v61, %v8177_v58 }
 0x4f0   : > { %6266 = vmatprep.subr.bf16.mxu1 %v7697_v15  ;;  %v6892_v15 = vld [vmem:[#allocation14 + $0x24] ss:$8 sps:$4 sm:$0xff]  }
 0x4f3   : > { %6267 = vmatpush3.bf16.msra.mxu1 %v6883_v1 }
 0x4f4   : > { %3235 = vmatprep.subr.bf16.mxu1 %v6886_v2 }
 0x5a9   : > { %v3005_v6 = vpop.f32.mrb[12].mxu1 }
 0x5aa   : > { %v6250_v7 = vpop.f32.mrb[13].mxu1 }
 0x5ab   : > { %v3008_v9 = vpop.f32.mrb[14].mxu1 }
 0x5ac   : > { %v3012_v10 = vpack.c.bf16 %v3008_v9, %v3005_v6  ;;  %v6251_v55 = vpop.f32.mrb[15].mxu1  ;;  %v6911_v6 = vld [vmem:[#allocation16 + $0x8] ss:$16 sps:$4 sm:$0xff]  }
 0x5ad   : > { %v6917_v9 = vld [vmem:[#allocation16 + $0x28] ss:$16 sps:$4 sm:$0xff]  }
 0x5ae   : > { %v3020_v56 = vadd.bf16 %v3019_v8, %v3012_v10  ;;  %v6919_v8 = vld [vmem:[#allocation16 + $0x2c] ss:$16 sps:$4 sm:$0xff]   ;;  %v6923_v55 = vld [vmem:[#allocation16 + $0x48] ss:$16 sps:$4 sm:$0xff]  }
 0x5af   : > { %v6925_v10 = vld [vmem:[#allocation16 + $0x4c] ss:$16 sps:$4 sm:$0xff]  }
 0x5b0   : > { %v3021_v13 = vmax.bf16 %v7696_v11, %v3020_v56  ;;  %v6931_v56 = vld [vmem:[#allocation16 + $0x6c] ss:$16 sps:$4 sm:$0xff]  }
 0x5b2   : > { %6269 = vmatmul.mubr.bf16.vlgmr.msra.gmra.mrb[16].mxu1 %v3021_v13  ;;  %v6937_v13 = vld [vmem:[#allocation16 + $0x8c] ss:$16 sps:$4 sm:$0xff]  }
 0x5b3   : > { %3236 = vmatpush1.bf16.msra.mxu1 %v6884_v12  ;;  %3267 = vmatprep.mubr.bf16.mxu1 %v7696_v11  ;;  %v6929_v12 = vld [vmem:[#allocation16 + $0x68] ss:$16 sps:$4 sm:$0xff]  }
 0x5b4   : > { %3237 = vmatprep.subr.bf16.mxu1 %v6889_v14  ;;  %v6935_v14 = vld [vmem:[#allocation16 + $0x88] ss:$16 sps:$4 sm:$0xff]  }
 0x5b7   : > { %3238 = vmatpush1.bf16.msra.mxu1 %v6887_v34  ;;  %v6943_v34 = vld [vmem:[#allocation16 + $0xac] ss:$16 sps:$4 sm:$0xff]  }
 0x5b8   : > { %3239 = vmatprep.subr.bf16.mxu1 %v6892_v15  ;;  %v6941_v15 = vld [vmem:[#allocation16 + $0xa8] ss:$16 sps:$4 sm:$0xff]  }
 0x5bb   : > { %3240 = vmatpush1.bf16.msra.mxu1 %v6890_v16  ;;  %v6949_v16 = vld [vmem:[#allocation16 + $0xcc] ss:$16 sps:$4 sm:$0xff]  }
 0x5bc   : > { %3241 = vmatprep.subr.bf16.mxu1 %v6895_v17  ;;  %v6947_v17 = vld [vmem:[#allocation16 + $0xc8] ss:$16 sps:$4 sm:$0xff]  }
 0x5bf   : > { %3242 = vmatpush1.bf16.msra.mxu1 %v6893_v18  ;;  %v6955_v18 = vld [vmem:[#allocation16 + $0xec] ss:$16 sps:$4 sm:$0xff]  }
 0x5c0   : > { %3243 = vmatprep.subr.bf16.mxu1 %v6898_v19  ;;  %v6953_v19 = vld [vmem:[#allocation16 + $0xe8] ss:$16 sps:$4 sm:$0xff]  }
 0x5c3   : > { %3244 = vmatpush1.bf16.msra.mxu1 %v6896_v4  ;;  %v6961_v4 = vld [vmem:[#allocation16 + $0x10c] ss:$16 sps:$4 sm:$0xff]  }
 0x5c4   : > { %3245 = vmatprep.subr.bf16.mxu1 %v6901_v20  ;;  %v6959_v20 = vld [vmem:[#allocation16 + $0x108] ss:$16 sps:$4 sm:$0xff]  }
 0x5c7   : > { %3246 = vmatpush1.bf16.msra.mxu1 %v6899_v51  ;;  %v6967_v51 = vld [vmem:[#allocation16 + $0x12c] ss:$16 sps:$4 sm:$0xff]  }
 0x5c8   : > { %3247 = vmatprep.subr.bf16.mxu1 %v6904_v21  ;;  %v6965_v21 = vld [vmem:[#allocation16 + $0x128] ss:$16 sps:$4 sm:$0xff]  }
 0x5cb   : > { %3248 = vmatpush1.bf16.msra.mxu1 %v6902_v22  ;;  %v6973_v22 = vld [vmem:[#allocation16 + $0x14c] ss:$16 sps:$4 sm:$0xff]  }
 0x5cc   : > { %3249 = vmatprep.subr.bf16.mxu1 %v6907_v23  ;;  %v6971_v23 = vld [vmem:[#allocation16 + $0x148] ss:$16 sps:$4 sm:$0xff]  }
 0x5cf   : > { %3250 = vmatpush1.bf16.msra.mxu1 %v6905_v24  ;;  %v6979_v24 = vld [vmem:[#allocation16 + $0x16c] ss:$16 sps:$4 sm:$0xff]  }
 0x5d0   : > { %3749 = vmatprep.subr.bf16.mxu1 %v6913_v27  ;;  %v6983_v27 = vld [vmem:[#allocation16 + $0x188] ss:$16 sps:$4 sm:$0xff]  }
 0x685   : > { %v3121_v62 = vpop.f32.mrb[16].mxu1 }
 0x686   : > { %v6270_v63 = vpop.f32.mrb[17].mxu1 }
 0x687   : > { %v3124_v1 = vpop.f32.mrb[18].mxu1  ;;  %v7004_v63 = vld [vmem:[#allocation17] ss:$24 sps:$4 sm:$0xff]  }
 0x688   : > { %v3128_v2 = vpack.c.bf16 %v3124_v1, %v3121_v62  ;;  %v6271_v3 = vpop.f32.mrb[19].mxu1 }
 0x689   : > { %v7015_v3 = vld [vmem:[#allocation17 + $0x3c] ss:$24 sps:$4 sm:$0xff]  }
 0x68a   : > { %v3136_v5 = vadd.bf16 %v3135_v0, %v3128_v2  ;;  %v7007_v0 = vld [vmem:[#allocation17 + $0x8] ss:$24 sps:$4 sm:$0xff]   ;;  %v7012_v2 = vld [vmem:[#allocation17 + $0x34] ss:$24 sps:$4 sm:$0xff]  }
 0x68c   : > { %v3137_v7 = vmax.bf16 %v7696_v11, %v3136_v5  ;;  %v7010_v5 = vld [vmem:[#allocation17 + $0x30] ss:$24 sps:$4 sm:$0xff]  }
 0x68e   : > { %3268 = vmatmul.mubr.bf16.vlgmr.msra.gmra.mrb[20].mxu1 %v3137_v7  ;;  %v7018_v7 = vld [vmem:[#allocation17 + $0x64] ss:$24 sps:$4 sm:$0xff]  }
 0x68f   : > { %3750 = vmatpush1.bf16.msra.mxu1 %v6911_v6  ;;  %v7013_v6 = vld [vmem:[#allocation17 + $0x38] ss:$24 sps:$4 sm:$0xff]  }
 0x690   : > { %3751 = vmatprep.subr.bf16.mxu1 %v6919_v8  ;;  %v7021_v8 = vld [vmem:[#allocation17 + $0x6c] ss:$24 sps:$4 sm:$0xff]  }
 0x693   : > { %3752 = vmatpush1.bf16.msra.mxu1 %v6917_v9  ;;  %v7016_v9 = vld [vmem:[#allocation17 + $0x60] ss:$24 sps:$4 sm:$0xff]  }
 0x694   : > { %3753 = vmatprep.subr.bf16.mxu1 %v6925_v10  ;;  %v7019_v10 = vld [vmem:[#allocation17 + $0x68] ss:$24 sps:$4 sm:$0xff]  }
 0x697   : > { %3754 = vmatpush1.bf16.msra.mxu1 %v6923_v55  ;;  %v7024_v55 = vld [vmem:[#allocation17 + $0x94] ss:$24 sps:$4 sm:$0xff]  }
 0x698   : > { %3755 = vmatprep.subr.bf16.mxu1 %v6931_v56  ;;  %v7027_v56 = vld [vmem:[#allocation17 + $0x9c] ss:$24 sps:$4 sm:$0xff]  }
 0x69b   : > { %3756 = vmatpush1.bf16.msra.mxu1 %v6929_v12  ;;  %v7022_v12 = vld [vmem:[#allocation17 + $0x90] ss:$24 sps:$4 sm:$0xff]  }
 0x69c   : > { %3757 = vmatprep.subr.bf16.mxu1 %v6937_v13  ;;  %v7025_v13 = vld [vmem:[#allocation17 + $0x98] ss:$24 sps:$4 sm:$0xff]  }
 0x69f   : > { %3758 = vmatpush1.bf16.msra.mxu1 %v6935_v14  ;;  %v7030_v14 = vld [vmem:[#allocation17 + $0xc4] ss:$24 sps:$4 sm:$0xff]  }
 0x6a0   : > { %3759 = vmatprep.subr.bf16.mxu1 %v6943_v34  ;;  %v7033_v34 = vld [vmem:[#allocation17 + $0xcc] ss:$24 sps:$4 sm:$0xff]  }
 0x6a3   : > { %3760 = vmatpush1.bf16.msra.mxu1 %v6941_v15  ;;  %v7028_v15 = vld [vmem:[#allocation17 + $0xc0] ss:$24 sps:$4 sm:$0xff]  }
 0x6a4   : > { %3761 = vmatprep.subr.bf16.mxu1 %v6949_v16  ;;  %v7031_v16 = vld [vmem:[#allocation17 + $0xc8] ss:$24 sps:$4 sm:$0xff]  }
 0x6a7   : > { %3762 = vmatpush1.bf16.msra.mxu1 %v6947_v17  ;;  %v7036_v17 = vld [vmem:[#allocation17 + $0xf4] ss:$24 sps:$4 sm:$0xff]  }
 0x6a8   : > { %3763 = vmatprep.subr.bf16.mxu1 %v6955_v18  ;;  %v7039_v18 = vld [vmem:[#allocation17 + $0xfc] ss:$24 sps:$4 sm:$0xff]  }
 0x6ab   : > { %3764 = vmatpush1.bf16.msra.mxu1 %v6953_v19  ;;  %v7034_v19 = vld [vmem:[#allocation17 + $0xf0] ss:$24 sps:$4 sm:$0xff]  }
 0x6ac   : > { %3765 = vmatprep.subr.bf16.mxu1 %v6961_v4  ;;  %v7037_v4 = vld [vmem:[#allocation17 + $0xf8] ss:$24 sps:$4 sm:$0xff]  }
 0x6af   : > { %3766 = vmatpush1.bf16.msra.mxu1 %v6959_v20  ;;  %v7042_v20 = vld [vmem:[#allocation17 + $0x124] ss:$24 sps:$4 sm:$0xff]  }
 0x6b0   : > { %3767 = vmatprep.subr.bf16.mxu1 %v6967_v51  ;;  %v7045_v51 = vld [vmem:[#allocation17 + $0x12c] ss:$24 sps:$4 sm:$0xff]  }
 0x6b3   : > { %3768 = vmatpush1.bf16.msra.mxu1 %v6965_v21  ;;  %v7040_v21 = vld [vmem:[#allocation17 + $0x120] ss:$24 sps:$4 sm:$0xff]  }
 0x6b4   : > { %3769 = vmatprep.subr.bf16.mxu1 %v6973_v22  ;;  %v7043_v22 = vld [vmem:[#allocation17 + $0x128] ss:$24 sps:$4 sm:$0xff]  }
 0x6b7   : > { %3770 = vmatpush1.bf16.msra.mxu1 %v6971_v23  ;;  %v7048_v23 = vld [vmem:[#allocation17 + $0x154] ss:$24 sps:$4 sm:$0xff]  }
 0x6b8   : > { %3771 = vmatprep.subr.bf16.mxu1 %v6979_v24  ;;  %v7051_v24 = vld [vmem:[#allocation17 + $0x15c] ss:$24 sps:$4 sm:$0xff]  }
 0x6bb   : > { %3772 = vmatpush1.bf16.msra.mxu1 %v6977_v25  ;;  %v7046_v25 = vld [vmem:[#allocation17 + $0x150] ss:$24 sps:$4 sm:$0xff]  }
 0x6bc   : > { %3773 = vmatprep.subr.bf16.mxu1 %v6985_v26  ;;  %v7049_v26 = vld [vmem:[#allocation17 + $0x158] ss:$24 sps:$4 sm:$0xff]  }
 0x6bf   : > { %3774 = vmatpush1.bf16.msra.mxu1 %v6983_v27  ;;  %v7054_v27 = vld [vmem:[#allocation17 + $0x184] ss:$24 sps:$4 sm:$0xff]  }
 0x6c0   : > { %3775 = vmatprep.subr.bf16.mxu1 %v6991_v28  ;;  %v7057_v28 = vld [vmem:[#allocation17 + $0x18c] ss:$24 sps:$4 sm:$0xff]  }
 0x6c3   : > { %3776 = vmatpush1.bf16.msra.mxu1 %v6989_v29  ;;  %v7052_v29 = vld [vmem:[#allocation17 + $0x180] ss:$24 sps:$4 sm:$0xff]  }
 0x6c4   : > { %3777 = vmatprep.subr.bf16.mxu1 %v6997_v31  ;;  %v7060_v31 = vld [vmem:[#allocation17 + $0x1b4] ss:$24 sps:$4 sm:$0xff]  }
 0x6c7   : > { %3778 = vmatpush1.bf16.msra.mxu1 %v6995_v33  ;;  %v7058_v33 = vld [vmem:[#allocation17 + $0x1b0] ss:$24 sps:$4 sm:$0xff]  }
 0x6c8   : > { %3779 = vmatprep.subr.bf16.mxu1 %v7003_v36  ;;  %v7066_v36 = vld [vmem:[#allocation17 + $0x1e4] ss:$24 sps:$4 sm:$0xff]  }
 0x6cb   : > { %3780 = vmatpush1.bf16.msra.mxu1 %v7001_v38  ;;  %v7064_v38 = vld [vmem:[#allocation17 + $0x1e0] ss:$24 sps:$4 sm:$0xff]  }
 0x6cc   : > { %5096 = vmatprep.subr.bf16.mxu1 %v7009_v40  ;;  %v7072_v40 = vld [vmem:[#allocation17 + $0x214] ss:$24 sps:$4 sm:$0xff]  }
 0x761   : > { %v3269_v47 = vpop.f32.mrb[20].mxu1 }
 0x762   : > { %v3271_v48 = vpop.f32.mrb[21].mxu1 }
 0x763   : > { %v3273_v50 = vpop.f32.mrb[22].mxu1 }
 0x764   : > { %v3278_v54 = vpack.c.bf16 %v3273_v50, %v3269_v47  ;;  %v3275_v57 = vpop.f32.mrb[23].mxu1  ;;  %v7079_v47 = vld [vmem:[#allocation17 + $0x248] ss:$24 sps:$4 sm:$0xff]  }
 0x765   : > { %v3279_v59 = vpack.c.bf16 %v3275_v57, %v3271_v48  ;;  %v7084_v48 = vld [vmem:[#allocation17 + $0x274] ss:$24 sps:$4 sm:$0xff]   ;;  %v7082_v50 = vld [vmem:[#allocation17 + $0x270] ss:$24 sps:$4 sm:$0xff]  }
 0x766   : > { %v3317_v60 = vadd.bf16 %v3309_v49, %v3278_v54  ;;  %v7087_v49 = vld [vmem:[#allocation17 + $0x27c] ss:$24 sps:$4 sm:$0xff]   ;;  %v7093_v57 = vld [vmem:[#allocation17 + $0x2ac] ss:$24 sps:$4 sm:$0xff]  }
 0x767   : > { %v3318_v61 = vadd.bf16 %v3316_v52, %v3279_v59  ;;  %v7085_v52 = vld [vmem:[#allocation17 + $0x278] ss:$24 sps:$4 sm:$0xff]   ;;  %v7090_v54 = vld [vmem:[#allocation17 + $0x2a4] ss:$24 sps:$4 sm:$0xff]  }
 0x768   : > { %v3319_v1 = vmax.bf16 %v7696_v11, %v3317_v60  ;;  %v7088_v59 = vld [vmem:[#allocation17 + $0x2a0] ss:$24 sps:$4 sm:$0xff]  }
 0x769   : > { %v3320_v62 = vmax.bf16 %v7696_v11, %v3318_v61  ;;  %v7091_v60 = vld [vmem:[#allocation17 + $0x2a8] ss:$24 sps:$4 sm:$0xff]   ;;  %v7096_v61 = vld [vmem:[#allocation17 + $0x2d4] ss:$24 sps:$4 sm:$0xff]  }
 0x76b   : > { %3738 = vmatprep.mubr.bf16.mxu0 %v3320_v62  ;;  %3781 = vmatprep.mubr.bf16.mxu1 %v3320_v62  ;;  %v7099_v62 = vld [vmem:[#allocation17 + $0x2dc] ss:$24 sps:$4 sm:$0xff]  }
 0x76c   : > { %3739 = vmatmul.mubr.bf16.vlgmr.msra.gmra.mrb[8].mxu0 %v3319_v1  ;;  %3782 = vmatmul.mubr.bf16.vlgmr.msra.gmra.mrb[24].mxu1 %v3319_v1  ;;  %v7102_v1 = vld [vmem:[#allocation17 + $0x304] ss:$24 sps:$4 sm:$0xff]  }
 0x76d   : > { %5011 = vmatpush1.bf16.msra.mxu0 %v7004_v63  ;;  %5097 = vmatpush1.bf16.msra.mxu1 %v7007_v0  ;;  %v7094_v63 = vld [vmem:[#allocation17 + $0x2d0] ss:$24 sps:$4 sm:$0xff]  }
 0x76e   : > { %5012 = vmatprep.subr.bf16.mxu0 %v7012_v2  ;;  %5098 = vmatprep.subr.bf16.mxu1 %v7015_v3  ;;  %v7097_v0 = vld [vmem:[#allocation17 + $0x2d8] ss:$24 sps:$4 sm:$0xff]   ;;  %v7105_v2 = vld [vmem:[#allocation17 + $0x30c] ss:$24 sps:$4 sm:$0xff]  }
 0x76f   : > { %v5988_v3 = vld.sshfl [vmem:[%s8444_s17] sm:$0x33 pattern:$0x75316420]  ;;  %s7595_s17 = scalar_lea.vmem %s7594_s6, 1536 }
 0x770   : > { %p7597_p9 = scmp.lt.s32.totalorder %s7595_s17, %s7589_s2 }
 0x771   : > { %5013 = vmatpush1.bf16.msra.mxu0 %v7010_v5  ;;  %5099 = vmatpush1.bf16.msra.mxu1 %v7013_v6  ;;  %v3804_v5 = vcombine.high %v5988_v3, %v5988_v3 }
 0x772   : > { %5014 = vmatprep.subr.bf16.mxu0 %v7018_v7  ;;  %5100 = vmatprep.subr.bf16.mxu1 %v7021_v8  ;;  %v8249_v7 = vrot.slane %v5988_v3, %v8167_v53  ;;  %v7148_v3 = vld [vmem:[#allocation17 + $0x480] ss:$24 sps:$4 sm:$0xff]   ;;  %p7598_p4 = por %p7597_p9, %p7596_p6 }
 0x773   : > { %v3818_v6 = vrot.slane %v3804_v5, %v8167_v53  ;;  %v7151_v5 = vld [vmem:[#allocation17 + $0x488] ss:$24 sps:$4 sm:$0xff]  }
 0x774   : > { %p7599_p3 = pnand %p7598_p4, %p7592_p8 }
 0x775   : > { %5015 = vmatpush1.bf16.msra.mxu0 %v7016_v9  ;;  %5101 = vmatpush1.bf16.msra.mxu1 %v7019_v10  ;;  %v3820_v8 = vcombine.high %v3818_v6, %v3818_v6  ;;  %v3822_v9 = vpack.i.b16 %v8249_v7, %v8249_v7  ;;  %v3829_v10 = vpack.i.b16 %v3818_v6, %v3818_v6  ;;  %v7156_v6 = vld [vmem:[#allocation17 + $0x4b4] ss:$24 sps:$4 sm:$0xff]  }
 0x776   : > { %5016 = vmatprep.subr.bf16.mxu0 %v7024_v55  ;;  %5102 = vmatprep.subr.bf16.mxu1 %v7027_v56 }
 0x777   : > { %v3843_v55 = vpack.i.b16 %v3820_v8, %v3820_v8  ;;  %v7159_v8 = vld [vmem:[#allocation17 + $0x4bc] ss:$24 sps:$4 sm:$0xff]  }
 0x779   : > { %5017 = vmatpush1.bf16.msra.mxu0 %v7022_v12  ;;  %5103 = vmatpush1.bf16.msra.mxu1 %v7025_v13 }
 0x77a   : > { %5018 = vmatprep.subr.bf16.mxu0 %v7030_v14  ;;  %5104 = vmatprep.subr.bf16.mxu1 %v7033_v34  ;;  %v3827_v34 = vrot.slane %v3822_v9, %v8177_v58  ;;  %v7154_v9 = vld [vmem:[#allocation17 + $0x4b0] ss:$24 sps:$4 sm:$0xff]  }
 0x77d   : > { %5019 = vmatpush1.bf16.msra.mxu0 %v7028_v15  ;;  %5105 = vmatpush1.bf16.msra.mxu1 %v7031_v16 }
 0x77e   : > { %5020 = vmatprep.subr.bf16.mxu0 %v7036_v17  ;;  %5106 = vmatprep.subr.bf16.mxu1 %v7039_v18  ;;  %v3834_v17 = vrot.slane %v3829_v10, %v8177_v58  ;;  %v7157_v10 = vld [vmem:[#allocation17 + $0x4b8] ss:$24 sps:$4 sm:$0xff]  }
 0x781   : > { %5021 = vmatpush1.bf16.msra.mxu0 %v7034_v19  ;;  %5107 = vmatpush1.bf16.msra.mxu1 %v7037_v4 }
 0x782   : > { %5022 = vmatprep.subr.bf16.mxu0 %v7042_v20  ;;  %5108 = vmatprep.subr.bf16.mxu1 %v7045_v51  ;;  %v3848_v51 = vrot.slane %v3843_v55, %v8177_v58  ;;  %v7162_v55 = vld [vmem:[#allocation17 + $0x4e4] ss:$24 sps:$4 sm:$0xff]  }
 0x785   : > { %5023 = vmatpush1.bf16.msra.mxu0 %v7040_v21  ;;  %5109 = vmatpush1.bf16.msra.mxu1 %v7043_v22 }
 0x786   : > { %5024 = vmatprep.subr.bf16.mxu0 %v7048_v23  ;;  %5110 = vmatprep.subr.bf16.mxu1 %v7051_v24 }
 0x789   : > { %5025 = vmatpush1.bf16.msra.mxu0 %v7046_v25  ;;  %5111 = vmatpush1.bf16.msra.mxu1 %v7049_v26 }
 0x78a   : > { %5026 = vmatprep.subr.bf16.mxu0 %v7054_v27  ;;  %5112 = vmatprep.subr.bf16.mxu1 %v7057_v28  ;;  %v7100_v27 = vld [vmem:[#allocation17 + $0x300] ss:$24 sps:$4 sm:$0xff]  }
 0x78b   : > { %v7103_v28 = vld [vmem:[#allocation17 + $0x308] ss:$24 sps:$4 sm:$0xff]  }
 0x78d   : > { %5027 = vmatpush1.bf16.msra.mxu0 %v7052_v29  ;;  %5113 = vmatpush1.bf16.msra.mxu1 %v7055_v30  ;;  %v7108_v30 = vld [vmem:[#allocation17 + $0x334] ss:$24 sps:$4 sm:$0xff]  }
 0x78e   : > { %5028 = vmatprep.subr.bf16.mxu0 %v7060_v31  ;;  %5114 = vmatprep.subr.bf16.mxu1 %v7063_v32  ;;  %v7111_v31 = vld [vmem:[#allocation17 + $0x33c] ss:$24 sps:$4 sm:$0xff]  }
 0x791   : > { %5029 = vmatpush1.bf16.msra.mxu0 %v7058_v33  ;;  %5115 = vmatpush1.bf16.msra.mxu1 %v7061_v35  ;;  %v7106_v33 = vld [vmem:[#allocation17 + $0x330] ss:$24 sps:$4 sm:$0xff]  }
 0x792   : > { %5030 = vmatprep.subr.bf16.mxu0 %v7066_v36  ;;  %5116 = vmatprep.subr.bf16.mxu1 %v7069_v37  ;;  %v7109_v35 = vld [vmem:[#allocation17 + $0x338] ss:$24 sps:$4 sm:$0xff]   ;;  %v7114_v36 = vld [vmem:[#allocation17 + $0x364] ss:$24 sps:$4 sm:$0xff]  }
 0x793   : > { %v7117_v37 = vld [vmem:[#allocation17 + $0x36c] ss:$24 sps:$4 sm:$0xff]  }
 0x795   : > { %5031 = vmatpush1.bf16.msra.mxu0 %v7064_v38  ;;  %5117 = vmatpush1.bf16.msra.mxu1 %v7067_v39  ;;  %v7112_v38 = vld [vmem:[#allocation17 + $0x360] ss:$24 sps:$4 sm:$0xff]  }
 0x796   : > { %5032 = vmatprep.subr.bf16.mxu0 %v7072_v40  ;;  %5118 = vmatprep.subr.bf16.mxu1 %v7075_v41  ;;  %v7115_v39 = vld [vmem:[#allocation17 + $0x368] ss:$24 sps:$4 sm:$0xff]   ;;  %v7120_v40 = vld [vmem:[#allocation17 + $0x394] ss:$24 sps:$4 sm:$0xff]  }
 0x797   : > { %v7123_v41 = vld [vmem:[#allocation17 + $0x39c] ss:$24 sps:$4 sm:$0xff]  }
 0x799   : > { %5033 = vmatpush1.bf16.msra.mxu0 %v7070_v42  ;;  %5119 = vmatpush1.bf16.msra.mxu1 %v7073_v43  ;;  %v7118_v42 = vld [vmem:[#allocation17 + $0x390] ss:$24 sps:$4 sm:$0xff]  }
 0x79a   : > { %5034 = vmatprep.subr.bf16.mxu0 %v7078_v44  ;;  %5120 = vmatprep.subr.bf16.mxu1 %v7081_v45  ;;  %v7121_v43 = vld [vmem:[#allocation17 + $0x398] ss:$24 sps:$4 sm:$0xff]   ;;  %v7126_v44 = vld [vmem:[#allocation17 + $0x3c4] ss:$24 sps:$4 sm:$0xff]  }
 0x79b   : > { %v7129_v45 = vld [vmem:[#allocation17 + $0x3cc] ss:$24 sps:$4 sm:$0xff]  }
 0x79d   : > { %5035 = vmatpush1.bf16.msra.mxu0 %v7076_v46  ;;  %5121 = vmatpush1.bf16.msra.mxu1 %v7079_v47  ;;  %v7124_v46 = vld [vmem:[#allocation17 + $0x3c0] ss:$24 sps:$4 sm:$0xff]  }
 0x79e   : > { %5036 = vmatprep.subr.bf16.mxu0 %v7084_v48  ;;  %5122 = vmatprep.subr.bf16.mxu1 %v7087_v49  ;;  %v7127_v47 = vld [vmem:[#allocation17 + $0x3c8] ss:$24 sps:$4 sm:$0xff]   ;;  %v7132_v48 = vld [vmem:[#allocation17 + $0x3f4] ss:$24 sps:$4 sm:$0xff]  }
 0x79f   : > { %v7135_v49 = vld [vmem:[#allocation17 + $0x3fc] ss:$24 sps:$4 sm:$0xff]  }
 0x7a1   : > { %5037 = vmatpush1.bf16.msra.mxu0 %v7082_v50  ;;  %5123 = vmatpush1.bf16.msra.mxu1 %v7085_v52  ;;  %v7130_v50 = vld [vmem:[#allocation17 + $0x3f0] ss:$24 sps:$4 sm:$0xff]  }
 0x7a2   : > { %5038 = vmatprep.subr.bf16.mxu0 %v7090_v54  ;;  %5124 = vmatprep.subr.bf16.mxu1 %v7093_v57  ;;  %v7133_v52 = vld [vmem:[#allocation17 + $0x3f8] ss:$24 sps:$4 sm:$0xff]   ;;  %v7138_v54 = vld [vmem:[#allocation17 + $0x424] ss:$24 sps:$4 sm:$0xff]  }
 0x7a3   : > { %v7141_v57 = vld [vmem:[#allocation17 + $0x42c] ss:$24 sps:$4 sm:$0xff]  }
 0x7a5   : > { %5039 = vmatpush1.bf16.msra.mxu0 %v7088_v59  ;;  %5125 = vmatpush1.bf16.msra.mxu1 %v7091_v60  ;;  %v7136_v59 = vld [vmem:[#allocation17 + $0x420] ss:$24 sps:$4 sm:$0xff]  }
 0x7a6   : > { %5040 = vmatprep.subr.bf16.mxu0 %v7096_v61  ;;  %5126 = vmatprep.subr.bf16.mxu1 %v7099_v62  ;;  %v7139_v60 = vld [vmem:[#allocation17 + $0x428] ss:$24 sps:$4 sm:$0xff]   ;;  %v7144_v61 = vld [vmem:[#allocation17 + $0x454] ss:$24 sps:$4 sm:$0xff]  }
 0x7a7   : > { %v7147_v62 = vld [vmem:[#allocation17 + $0x45c] ss:$24 sps:$4 sm:$0xff]  }
 0x7a9   : > { %5041 = vmatpush1.bf16.msra.mxu0 %v7094_v63  ;;  %5127 = vmatpush1.bf16.msra.mxu1 %v7097_v0  ;;  %v7142_v63 = vld [vmem:[#allocation17 + $0x450] ss:$24 sps:$4 sm:$0xff]  }
 0x7aa   : > { %5053 = vmatprep.subr.bf16.mxu0 %v7102_v1  ;;  %5139 = vmatprep.subr.bf16.mxu1 %v7105_v2  ;;  %v7145_v0 = vld [vmem:[#allocation17 + $0x458] ss:$24 sps:$4 sm:$0xff]   ;;  %v7150_v1 = vld [vmem:[#allocation17 + $0x484] ss:$24 sps:$4 sm:$0xff]  }
 0x7ab   : > { %v7153_v2 = vld [vmem:[#allocation17 + $0x48c] ss:$24 sps:$4 sm:$0xff]  }
 0x83f   : > { %v3740_v56 = vpop.f32.mrb[8].mxu0  ;;  %v8253_v12 = vpop.f32.mrb[24].mxu1 }
 0x840   : > { %v3742_v13 = vpop.f32.mrb[9].mxu0  ;;  %v3785_v14 = vpop.f32.mrb[25].mxu1 }
 0x841   : > { %v3744_v15 = vpop.f32.mrb[10].mxu0  ;;  %v8256_v16 = vpop.f32.mrb[26].mxu1 }
 0x842   : > { %v3792_v18 = vpack.c.bf16 %v3744_v15, %v3740_v56  ;;  %v3794_v19 = vpack.c.bf16 %v8256_v16, %v8253_v12  ;;  %v3746_v4 = vpop.f32.mrb[11].mxu0  ;;  %v3789_v20 = vpop.f32.mrb[27].mxu1  ;;  %v7165_v56 = vld [vmem:[#allocation17 + $0x4ec] ss:$24 sps:$4 sm:$0xff]   ;;  %v7171_v15 = vld [vmem:[#allocation17 + $0x51c] ss:$24 sps:$4 sm:$0xff]  }
 0x843   : > { %v3793_v21 = vpack.c.bf16 %v3746_v4, %v3742_v13  ;;  %v3795_v22 = vpack.c.bf16 %v3789_v20, %v3785_v14  ;;  %v7160_v13 = vld [vmem:[#allocation17 + $0x4e0] ss:$24 sps:$4 sm:$0xff]   ;;  %v7174_v4 = vld [vmem:[#allocation17 + $0x544] ss:$24 sps:$4 sm:$0xff]   ;;  %v7204_v16 = vld [vmem:[#allocation17 + $0x74] ss:$24 sps:$4 sm:$0xff]  }
 0x844   : > { %v3849_v23 = vadd.bf16 %v3827_v34, %v3792_v18  ;;  %v7163_v14 = vld [vmem:[#allocation17 + $0x4e8] ss:$24 sps:$4 sm:$0xff]   ;;  %v7168_v34 = vld [vmem:[#allocation17 + $0x514] ss:$24 sps:$4 sm:$0xff]   ;;  %v7169_v18 = vld [vmem:[#allocation17 + $0x518] ss:$24 sps:$4 sm:$0xff]  }
 0x845   : > { %v3850_v24 = vadd.bf16 %v3834_v17, %v3793_v21  ;;  %v3852_v25 = vadd.bf16 %v3848_v51, %v3795_v22  ;;  %v7166_v17 = vld [vmem:[#allocation17 + $0x510] ss:$24 sps:$4 sm:$0xff]   ;;  %v7177_v20 = vld [vmem:[#allocation17 + $0x54c] ss:$24 sps:$4 sm:$0xff]   ;;  %v7172_v51 = vld [vmem:[#allocation17 + $0x540] ss:$24 sps:$4 sm:$0xff]   ;;  %v3819_v22 = vcombine.high %v8249_v7, %v8249_v7 }
 0x846   : > { %v8266_v29 = vmax.bf16 %v7696_v11, %v3849_v23  ;;  %v7175_v21 = vld [vmem:[#allocation17 + $0x548] ss:$24 sps:$4 sm:$0xff]   ;;  %v7180_v23 = vld [vmem:[#allocation17 + $0x574] ss:$24 sps:$4 sm:$0xff]  }
 0x847   : > { %v8263_v26 = vmax.bf16 %v7696_v11, %v3850_v24  ;;  %v8273_v32 = vmax.bf16 %v7696_v11, %v3852_v25  ;;  %v7183_v24 = vld [vmem:[#allocation17 + $0x57c] ss:$24 sps:$4 sm:$0xff]   ;;  %v7178_v25 = vld [vmem:[#allocation17 + $0x570] ss:$24 sps:$4 sm:$0xff]   ;;  %v7199_v12 = vld [vmem:[#allocation17 + $0x40] ss:$24 sps:$4 sm:$0xff]  }
 0x848   : > { %v7192_v7 = vld [vmem:[#allocation17 + $0x5d4] ss:$24 sps:$4 sm:$0xff]  }
 0x849   : > { %5042 = vmatprep.mubr.bf16.mxu0 %v8263_v26  ;;  %5128 = vmatprep.mubr.bf16.mxu1 %v8263_v26 }
 0x84a   : > { %5043 = vmatmul.mubr.bf16.vlgmr.msra.gmra.mrb[12].mxu0 %v8266_v29  ;;  %5129 = vmatmul.mubr.bf16.vlgmr.msra.gmra.mrb[28].mxu1 %v8266_v29 }
 0x84b   : > { %5054 = vmatpush1.bf16.msra.mxu0 %v7100_v27  ;;  %5140 = vmatpush1.bf16.msra.mxu1 %v7103_v28  ;;  %v7181_v27 = vld [vmem:[#allocation17 + $0x578] ss:$24 sps:$4 sm:$0xff]   ;;  %v3836_v28 = vpack.i.b16 %v3819_v22, %v3819_v22  ;;  %v7264_v22 = vld [vmem:[#allocation17 + $0x434] ss:$24 sps:$4 sm:$0xff]  }
 0x84c   : > { %5085 = vmatprep.mubr.bf16.mxu0 %v8273_v32  ;;  %5171 = vmatprep.mubr.bf16.mxu1 %v8273_v32 }
 0x84d   : > { %5055 = vmatprep.subr.bf16.mxu0 %v7108_v30  ;;  %5141 = vmatprep.subr.bf16.mxu1 %v7111_v31  ;;  %v7186_v30 = vld [vmem:[#allocation17 + $0x5a4] ss:$24 sps:$4 sm:$0xff]  }
 0x84e   : > { %v7189_v31 = vld [vmem:[#allocation17 + $0x5ac] ss:$24 sps:$4 sm:$0xff]  }
 0x84f   : > { %5056 = vmatpush1.bf16.msra.mxu0 %v7106_v33  ;;  %5142 = vmatpush1.bf16.msra.mxu1 %v7109_v35  ;;  %v7184_v33 = vld [vmem:[#allocation17 + $0x5a0] ss:$24 sps:$4 sm:$0xff]  }
 0x850   : > { %5057 = vmatprep.subr.bf16.mxu0 %v7114_v36  ;;  %5143 = vmatprep.subr.bf16.mxu1 %v7117_v37  ;;  %v7187_v35 = vld [vmem:[#allocation17 + $0x5a8] ss:$24 sps:$4 sm:$0xff]   ;;  %v3841_v36 = vrot.slane %v3836_v28, %v8177_v58  ;;  %v7195_v37 = vld [vmem:[#allocation17 + $0x5dc] ss:$24 sps:$4 sm:$0xff]  }
 0x851   : > { %v7273_v28 = vld [vmem:[#allocation17 + $0x4c4] ss:$24 sps:$4 sm:$0xff]  }
 0x853   : > { %5058 = vmatpush1.bf16.msra.mxu0 %v7112_v38  ;;  %5144 = vmatpush1.bf16.msra.mxu1 %v7115_v39  ;;  %v7190_v38 = vld [vmem:[#allocation17 + $0x5d0] ss:$24 sps:$4 sm:$0xff]  }
 0x854   : > { %5059 = vmatprep.subr.bf16.mxu0 %v7120_v40  ;;  %5145 = vmatprep.subr.bf16.mxu1 %v7123_v41  ;;  %v7193_v39 = vld [vmem:[#allocation17 + $0x5d8] ss:$24 sps:$4 sm:$0xff]   ;;  %v3851_v40 = vadd.bf16 %v3841_v36, %v3794_v19  ;;  %v7198_v41 = vld [vmem:[#allocation17 + $0x14] ss:$24 sps:$4 sm:$0xff]  }
 0x855   : > { %v7202_v19 = vld [vmem:[#allocation17 + $0x70] ss:$24 sps:$4 sm:$0xff]   ;;  %v7277_v36 = vld [vmem:[#allocation17 + $0x520] ss:$24 sps:$4 sm:$0xff]  }
 0x857   : > { %5060 = vmatpush1.bf16.msra.mxu0 %v7118_v42  ;;  %5146 = vmatpush1.bf16.msra.mxu1 %v7121_v43  ;;  %v7196_v42 = vld [vmem:[#allocation17 + $0x10] ss:$24 sps:$4 sm:$0xff]   ;;  %v8284_v43 = vmax.bf16 %v7696_v11, %v3851_v40  ;;  %v7210_v11 = vld [vmem:[#allocation17 + $0xd4] ss:$24 sps:$4 sm:$0xff]  }
 0x858   : > { %5061 = vmatprep.subr.bf16.mxu0 %v7126_v44  ;;  %5147 = vmatprep.subr.bf16.mxu1 %v7129_v45  ;;  %v7201_v44 = vld [vmem:[#allocation17 + $0x44] ss:$24 sps:$4 sm:$0xff]   ;;  %v7288_v40 = vld [vmem:[#allocation17 + $0x5b4] ss:$24 sps:$4 sm:$0xff]  }
 0x859   : > { %v7207_v45 = vld [vmem:[#allocation17 + $0xa4] ss:$24 sps:$4 sm:$0xff]  }
 0x85b   : > { %5062 = vmatpush1.bf16.msra.mxu0 %v7124_v46  ;;  %5148 = vmatpush1.bf16.msra.mxu1 %v7127_v47  ;;  %v7205_v46 = vld [vmem:[#allocation17 + $0xa0] ss:$24 sps:$4 sm:$0xff]   ;;  %v7208_v47 = vld [vmem:[#allocation17 + $0xd0] ss:$24 sps:$4 sm:$0xff]  }
 0x85c   : > { %5063 = vmatprep.subr.bf16.mxu0 %v7132_v48  ;;  %5149 = vmatprep.subr.bf16.mxu1 %v7135_v49  ;;  %v7213_v48 = vld [vmem:[#allocation17 + $0x104] ss:$24 sps:$4 sm:$0xff]   ;;  %v7211_v49 = vld [vmem:[#allocation17 + $0x100] ss:$24 sps:$4 sm:$0xff]  }
 0x85f   : > { %5064 = vmatpush1.bf16.msra.mxu0 %v7130_v50  ;;  %5150 = vmatpush1.bf16.msra.mxu1 %v7133_v52  ;;  %v7216_v50 = vld [vmem:[#allocation17 + $0x134] ss:$24 sps:$4 sm:$0xff]   ;;  %v7219_v52 = vld [vmem:[#allocation17 + $0x164] ss:$24 sps:$4 sm:$0xff]  }
 0x860   : > { %5065 = vmatprep.subr.bf16.mxu0 %v7138_v54  ;;  %5151 = vmatprep.subr.bf16.mxu1 %v7141_v57  ;;  %v7217_v54 = vld [vmem:[#allocation17 + $0x160] ss:$24 sps:$4 sm:$0xff]   ;;  %v7222_v57 = vld [vmem:[#allocation17 + $0x194] ss:$24 sps:$4 sm:$0xff]  }
 0x863   : > { %5066 = vmatpush1.bf16.msra.mxu0 %v7136_v59  ;;  %5152 = vmatpush1.bf16.msra.mxu1 %v7139_v60  ;;  %v7220_v59 = vld [vmem:[#allocation17 + $0x190] ss:$24 sps:$4 sm:$0xff]   ;;  %v7225_v60 = vld [vmem:[#allocation17 + $0x1c4] ss:$24 sps:$4 sm:$0xff]  }
 0x864   : > { %5067 = vmatprep.subr.bf16.mxu0 %v7144_v61  ;;  %5153 = vmatprep.subr.bf16.mxu1 %v7147_v62  ;;  %v7223_v61 = vld [vmem:[#allocation17 + $0x1c0] ss:$24 sps:$4 sm:$0xff]   ;;  %v7228_v62 = vld [vmem:[#allocation17 + $0x1f4] ss:$24 sps:$4 sm:$0xff]  }
 0x867   : > { %5068 = vmatpush1.bf16.msra.mxu0 %v7142_v63  ;;  %5154 = vmatpush1.bf16.msra.mxu1 %v7145_v0  ;;  %v7226_v63 = vld [vmem:[#allocation17 + $0x1f0] ss:$24 sps:$4 sm:$0xff]   ;;  %v7231_v0 = vld [vmem:[#allocation17 + $0x224] ss:$24 sps:$4 sm:$0xff]  }
 0x868   : > { %5069 = vmatprep.subr.bf16.mxu0 %v7150_v1  ;;  %5155 = vmatprep.subr.bf16.mxu1 %v7153_v2  ;;  %v7229_v1 = vld [vmem:[#allocation17 + $0x220] ss:$24 sps:$4 sm:$0xff]   ;;  %v7234_v2 = vld [vmem:[#allocation17 + $0x254] ss:$24 sps:$4 sm:$0xff]  }
 0x86b   : > { %5070 = vmatpush1.bf16.msra.mxu0 %v7148_v3  ;;  %5156 = vmatpush1.bf16.msra.mxu1 %v7151_v5  ;;  %v7232_v3 = vld [vmem:[#allocation17 + $0x250] ss:$24 sps:$4 sm:$0xff]   ;;  %v7237_v5 = vld [vmem:[#allocation17 + $0x284] ss:$24 sps:$4 sm:$0xff]  }
 0x86c   : > { %5071 = vmatprep.subr.bf16.mxu0 %v7156_v6  ;;  %5157 = vmatprep.subr.bf16.mxu1 %v7159_v8  ;;  %v7235_v6 = vld [vmem:[#allocation17 + $0x280] ss:$24 sps:$4 sm:$0xff]   ;;  %v7240_v8 = vld [vmem:[#allocation17 + $0x2b4] ss:$24 sps:$4 sm:$0xff]  }
 0x86f   : > { %5072 = vmatpush1.bf16.msra.mxu0 %v7154_v9  ;;  %5158 = vmatpush1.bf16.msra.mxu1 %v7157_v10  ;;  %v7238_v9 = vld [vmem:[#allocation17 + $0x2b0] ss:$24 sps:$4 sm:$0xff]   ;;  %v7243_v10 = vld [vmem:[#allocation17 + $0x2e4] ss:$24 sps:$4 sm:$0xff]  }
 0x870   : > { %5073 = vmatprep.subr.bf16.mxu0 %v7162_v55  ;;  %5159 = vmatprep.subr.bf16.mxu1 %v7165_v56  ;;  %v7241_v55 = vld [vmem:[#allocation17 + $0x2e0] ss:$24 sps:$4 sm:$0xff]   ;;  %v7246_v56 = vld [vmem:[#allocation17 + $0x314] ss:$24 sps:$4 sm:$0xff]  }
 0x873   : > { %5074 = vmatpush1.bf16.msra.mxu0 %v7160_v13  ;;  %5160 = vmatpush1.bf16.msra.mxu1 %v7163_v14  ;;  %v7244_v13 = vld [vmem:[#allocation17 + $0x310] ss:$24 sps:$4 sm:$0xff]   ;;  %v7249_v14 = vld [vmem:[#allocation17 + $0x344] ss:$24 sps:$4 sm:$0xff]  }
 0x874   : > { %5075 = vmatprep.subr.bf16.mxu0 %v7168_v34  ;;  %5161 = vmatprep.subr.bf16.mxu1 %v7171_v15  ;;  %v7247_v34 = vld [vmem:[#allocation17 + $0x340] ss:$24 sps:$4 sm:$0xff]   ;;  %v7252_v15 = vld [vmem:[#allocation17 + $0x374] ss:$24 sps:$4 sm:$0xff]  }
 0x877   : > { %5076 = vmatpush1.bf16.msra.mxu0 %v7166_v17  ;;  %5162 = vmatpush1.bf16.msra.mxu1 %v7169_v18  ;;  %v7250_v17 = vld [vmem:[#allocation17 + $0x370] ss:$24 sps:$4 sm:$0xff]   ;;  %v7255_v18 = vld [vmem:[#allocation17 + $0x3a4] ss:$24 sps:$4 sm:$0xff]  }
 0x878   : > { %5077 = vmatprep.subr.bf16.mxu0 %v7174_v4  ;;  %5163 = vmatprep.subr.bf16.mxu1 %v7177_v20  ;;  %v7253_v4 = vld [vmem:[#allocation17 + $0x3a0] ss:$24 sps:$4 sm:$0xff]   ;;  %v7258_v20 = vld [vmem:[#allocation17 + $0x3d4] ss:$24 sps:$4 sm:$0xff]  }
 0x87b   : > { %5078 = vmatpush1.bf16.msra.mxu0 %v7172_v51  ;;  %5164 = vmatpush1.bf16.msra.mxu1 %v7175_v21  ;;  %v7256_v51 = vld [vmem:[#allocation17 + $0x3d0] ss:$24 sps:$4 sm:$0xff]   ;;  %v7261_v21 = vld [vmem:[#allocation17 + $0x404] ss:$24 sps:$4 sm:$0xff]  }
 0x87c   : > { %5079 = vmatprep.subr.bf16.mxu0 %v7180_v23  ;;  %5165 = vmatprep.subr.bf16.mxu1 %v7183_v24  ;;  %v7267_v23 = vld [vmem:[#allocation17 + $0x464] ss:$24 sps:$4 sm:$0xff]   ;;  %v7265_v24 = vld [vmem:[#allocation17 + $0x460] ss:$24 sps:$4 sm:$0xff]  }
 0x87f   : > { %5080 = vmatpush1.bf16.msra.mxu0 %v7178_v25  ;;  %5166 = vmatpush1.bf16.msra.mxu1 %v7181_v27  ;;  %v7270_v25 = vld [vmem:[#allocation17 + $0x494] ss:$24 sps:$4 sm:$0xff]   ;;  %v7268_v27 = vld [vmem:[#allocation17 + $0x490] ss:$24 sps:$4 sm:$0xff]  }
 0x880   : > { %5081 = vmatprep.subr.bf16.mxu0 %v7186_v30  ;;  %5167 = vmatprep.subr.bf16.mxu1 %v7189_v31  ;;  %v7271_v30 = vld [vmem:[#allocation17 + $0x4c0] ss:$24 sps:$4 sm:$0xff]   ;;  %v7276_v31 = vld [vmem:[#allocation17 + $0x4f4] ss:$24 sps:$4 sm:$0xff]  }
 0x883   : > { %5082 = vmatpush1.bf16.msra.mxu0 %v7184_v33  ;;  %5168 = vmatpush1.bf16.msra.mxu1 %v7187_v35  ;;  %v7274_v33 = vld [vmem:[#allocation17 + $0x4f0] ss:$24 sps:$4 sm:$0xff]   ;;  %v7279_v35 = vld [vmem:[#allocation17 + $0x524] ss:$24 sps:$4 sm:$0xff]  }
 0x884   : > { %5083 = vmatprep.subr.bf16.mxu0 %v7192_v7  ;;  %5169 = vmatprep.subr.bf16.mxu1 %v7195_v37  ;;  %v7282_v7 = vld [vmem:[#allocation17 + $0x554] ss:$24 sps:$4 sm:$0xff]   ;;  %v7280_v37 = vld [vmem:[#allocation17 + $0x550] ss:$24 sps:$4 sm:$0xff]  }
 0x887   : > { %5084 = vmatpush1.bf16.msra.mxu0 %v7190_v38  ;;  %5170 = vmatpush1.bf16.msra.mxu1 %v7193_v39  ;;  %v7285_v38 = vld [vmem:[#allocation17 + $0x584] ss:$24 sps:$4 sm:$0xff]   ;;  %v7283_v39 = vld [vmem:[#allocation17 + $0x580] ss:$24 sps:$4 sm:$0xff]  }
 0x888   : > { %5182 = vmatprep.subr.bf16.mxu0 %v7198_v41  ;;  %v7286_v41 = vld [vmem:[#allocation17 + $0x5b0] ss:$24 sps:$4 sm:$0xff]  }
 0x88a   : > { %5086 = vmatmul.mubr.bf16.vlgmr.msra.gmra.mrb[12].mxu0 %v8284_v43  ;;  %5172 = vmatmul.mubr.bf16.vlgmr.msra.gmra.mrb[28].mxu1 %v8284_v43 }
 0x88b   : > { %5183 = vmatpush1.bf16.msra.mxu0 %v7196_v42  ;;  %5214 = vmatprep.mubr.bf16.mxu0 %v8263_v26  ;;  %v7214_v26 = vld [vmem:[#allocation17 + $0x130] ss:$24 sps:$4 sm:$0xff]   ;;  %v7291_v42 = vld [vmem:[#allocation17 + $0x5e4] ss:$24 sps:$4 sm:$0xff]  }
 0x88c   : > { %5184 = vmatprep.subr.bf16.mxu0 %v7201_v44  ;;  %v7289_v44 = vld [vmem:[#allocation17 + $0x5e0] ss:$24 sps:$4 sm:$0xff]  }
 0x88f   : > { %5185 = vmatpush1.bf16.msra.mxu0 %v7199_v12  ;;  %v4049_v12 = vld [vmem:[%s8445_s10] sm:$0x3f] }
 0x890   : > { %5186 = vmatprep.subr.bf16.mxu0 %v7204_v16  ;;  %v5282_v16 = vrot.slane %v4049_v12, %v8167_v53 }
 0x893   : > { %5187 = vmatpush1.bf16.msra.mxu0 %v7202_v19  ;;  %v5290_v19 = vcombine.high %v5282_v16, %v5282_v16 }
 0x894   : > { %5188 = vmatprep.subr.bf16.mxu0 %v7207_v45  ;;  %v5298_v45 = vrot.slane %v5282_v16, %v8167_v53 }
 0x897   : > { %5189 = vmatpush1.bf16.msra.mxu0 %v7205_v46  ;;  %v5312_v46 = vrot.slane %v5290_v19, %v8167_v53 }
 0x898   : > { %5190 = vmatprep.subr.bf16.mxu0 %v7210_v11  ;;  %v5320_v11 = vcombine.high %v5298_v45, %v5298_v45 }
 0x89b   : > { %5191 = vmatpush1.bf16.msra.mxu0 %v7208_v47  ;;  %v5321_v47 = vcombine.high %v5312_v46, %v5312_v46 }
 0x89c   : > { %5192 = vmatprep.subr.bf16.mxu0 %v7213_v48  ;;  %v5323_v48 = vpack.i.b16 %v5298_v45, %v5298_v45 }
 0x89f   : > { %5193 = vmatpush1.bf16.msra.mxu0 %v7211_v49  ;;  %v5337_v49 = vpack.i.b16 %v5320_v11, %v5320_v11 }
 0x8a0   : > { %5194 = vmatprep.subr.bf16.mxu0 %v7216_v50  ;;  %v5330_v50 = vpack.i.b16 %v5312_v46, %v5312_v46 }
 0x8a3   : > { %5195 = vmatpush1.bf16.msra.mxu0 %v7214_v26  ;;  %v5344_v26 = vpack.i.b16 %v5321_v47, %v5321_v47 }
 0x8a4   : > { %5196 = vmatprep.subr.bf16.mxu0 %v7219_v52 }
 0x8a7   : > { %5197 = vmatpush1.bf16.msra.mxu0 %v7217_v54 }
 0x8a8   : > { %5198 = vmatprep.subr.bf16.mxu0 %v7222_v57 }
 0x8ab   : > { %5199 = vmatpush1.bf16.msra.mxu0 %v7220_v59  ;;  %v5328_v59 = vrot.slane %v5323_v48, %v8177_v58 }
 0x8ac   : > { %5200 = vmatprep.subr.bf16.mxu0 %v7225_v60  ;;  %v5342_v60 = vrot.slane %v5337_v49, %v8177_v58 }
 0x8af   : > { %5201 = vmatpush1.bf16.msra.mxu0 %v7223_v61 }
 0x8b0   : > { %5202 = vmatprep.subr.bf16.mxu0 %v7228_v62 }
 0x8b3   : > { %5203 = vmatpush1.bf16.msra.mxu0 %v7226_v63  ;;  %v5335_v63 = vrot.slane %v5330_v50, %v8177_v58 }
 0x8b4   : > { %5204 = vmatprep.subr.bf16.mxu0 %v7231_v0  ;;  %v5349_v0 = vrot.slane %v5344_v26, %v8177_v58 }
 0x8b7   : > { %5205 = vmatpush1.bf16.msra.mxu0 %v7229_v1 }
 0x8b8   : > { %5206 = vmatprep.subr.bf16.mxu0 %v7234_v2 }
 0x8bb   : > { %5207 = vmatpush1.bf16.msra.mxu0 %v7232_v3 }
 0x8bc   : > { %5208 = vmatprep.subr.bf16.mxu0 %v7237_v5 }
 0x8bf   : > { %5209 = vmatpush1.bf16.msra.mxu0 %v7235_v6 }
 0x8c0   : > { %5210 = vmatprep.subr.bf16.mxu0 %v7240_v8 }
 0x8c3   : > { %5211 = vmatpush1.bf16.msra.mxu0 %v7238_v9 }
 0x8c4   : > { %5212 = vmatprep.subr.bf16.mxu0 %v7243_v10 }
 0x8c7   : > { %5213 = vmatpush1.bf16.msra.mxu0 %v7241_v55 }
 0x8c8   : > { %5225 = vmatprep.subr.bf16.mxu0 %v7246_v56 }
 0x8ca   : > { %5215 = vmatmul.mubr.bf16.vlgmr.msra.gmra.mrb[16].mxu0 %v8266_v29  ;;  %v7259_v29 = vld [vmem:[#allocation17 + $0x400] ss:$24 sps:$4 sm:$0xff]  }
 0x8cb   : > { %5226 = vmatpush1.bf16.msra.mxu0 %v7244_v13  ;;  %5257 = vmatprep.mubr.bf16.mxu0 %v8273_v32  ;;  %v7262_v32 = vld [vmem:[#allocation17 + $0x430] ss:$24 sps:$4 sm:$0xff]  }
 0x8cc   : > { %5227 = vmatprep.subr.bf16.mxu0 %v7249_v14 }
 0x8cf   : > { %5228 = vmatpush1.bf16.msra.mxu0 %v7247_v34 }
 0x8d0   : > { %5229 = vmatprep.subr.bf16.mxu0 %v7252_v15 }
 0x8d3   : > { %5230 = vmatpush1.bf16.msra.mxu0 %v7250_v17 }
 0x8d4   : > { %5231 = vmatprep.subr.bf16.mxu0 %v7255_v18 }
 0x8d7   : > { %5232 = vmatpush1.bf16.msra.mxu0 %v7253_v4 }
 0x8d8   : > { %5233 = vmatprep.subr.bf16.mxu0 %v7258_v20 }
 0x8db   : > { %5234 = vmatpush1.bf16.msra.mxu0 %v7256_v51  ;;  %v5275_v51 = vcombine.high %v4049_v12, %v4049_v12 }
 0x8dc   : > { %5235 = vmatprep.subr.bf16.mxu0 %v7261_v21 }
 0x8dd   : > { %v5289_v21 = vrot.slane %v5275_v51, %v8167_v53 }
 0x8df   : > { %5236 = vmatpush1.bf16.msra.mxu0 %v7259_v29  ;;  %v5291_v29 = vcombine.high %v5289_v21, %v5289_v21 }
 0x8e0   : > { %5237 = vmatprep.subr.bf16.mxu0 %v7264_v22  ;;  %v5305_v22 = vrot.slane %v5289_v21, %v8167_v53 }
 0x8e3   : > { %5238 = vmatpush1.bf16.msra.mxu0 %v7262_v32  ;;  %v5319_v32 = vrot.slane %v5291_v29, %v8167_v53 }
 0x8e4   : > { %5239 = vmatprep.subr.bf16.mxu0 %v7267_v23  ;;  %v5351_v23 = vpack.i.b16 %v5305_v22, %v5305_v22 }
 0x8e7   : > { %5240 = vmatpush1.bf16.msra.mxu0 %v7265_v24  ;;  %v5358_v24 = vpack.i.b16 %v5319_v32, %v5319_v32 }
 0x8e8   : > { %5241 = vmatprep.subr.bf16.mxu0 %v7270_v25 }
 0x8eb   : > { %5242 = vmatpush1.bf16.msra.mxu0 %v7268_v27 }
 0x8ec   : > { %5243 = vmatprep.subr.bf16.mxu0 %v7273_v28  ;;  %v5356_v28 = vrot.slane %v5351_v23, %v8177_v58 }
 0x8ef   : > { %5244 = vmatpush1.bf16.msra.mxu0 %v7271_v30 }
 0x8f0   : > { %5245 = vmatprep.subr.bf16.mxu0 %v7276_v31  ;;  %v5363_v31 = vrot.slane %v5358_v24, %v8177_v58 }
 0x8f3   : > { %5246 = vmatpush1.bf16.msra.mxu0 %v7274_v33 }
 0x8f4   : > { %5247 = vmatprep.subr.bf16.mxu0 %v7279_v35 }
 0x8f7   : > { %5248 = vmatpush1.bf16.msra.mxu0 %v7277_v36 }
 0x8f8   : > { %5249 = vmatprep.subr.bf16.mxu0 %v7282_v7 }
 0x8fb   : > { %5250 = vmatpush1.bf16.msra.mxu0 %v7280_v37 }
 0x8fc   : > { %5251 = vmatprep.subr.bf16.mxu0 %v7285_v38 }
 0x8ff   : > { %5252 = vmatpush1.bf16.msra.mxu0 %v7283_v39 }
 0x900   : > { %5253 = vmatprep.subr.bf16.mxu0 %v7288_v40 }
 0x903   : > { %5254 = vmatpush1.bf16.msra.mxu0 %v7286_v41 }
 0x904   : > { %5255 = vmatprep.subr.bf16.mxu0 %v7291_v42 }
 0x907   : > { %5256 = vmatpush1.bf16.msra.mxu0 %v7289_v44 }
 0x90a   : > { %5258 = vmatmul.mubr.bf16.vlgmr.msra.gmra.mrb[16].mxu0 %v8284_v43 }
 0x95d   : > { %v5087_v52 = vpop.f32.mrb[12].mxu0  ;;  %v5173_v54 = vpop.f32.mrb[28].mxu1 }
 0x95e   : > { %v5089_v43 = vpop.f32.mrb[13].mxu0  ;;  %v5175_v57 = vpop.f32.mrb[29].mxu1 }
 0x95f   : > { %v5091_v61 = vpop.f32.mrb[14].mxu0  ;;  %v5177_v62 = vpop.f32.mrb[30].mxu1 }
 0x960   : > { %v5268_v1 = vpack.c.bf16 %v5091_v61, %v5087_v52  ;;  %v5270_v2 = vpack.c.bf16 %v5177_v62, %v5173_v54  ;;  %v5093_v3 = vpop.f32.mrb[15].mxu0  ;;  %v5179_v5 = vpop.f32.mrb[31].mxu1 }
 0x961   : > { %v5269_v6 = vpack.c.bf16 %v5093_v3, %v5089_v43  ;;  %v5271_v8 = vpack.c.bf16 %v5179_v5, %v5175_v57 }
 0x962   : > { %v5364_v9 = vadd.bf16 %v5328_v59, %v5268_v1  ;;  %v5366_v10 = vadd.bf16 %v5342_v60, %v5270_v2 }
 0x963   : > { %v5365_v55 = vadd.bf16 %v5335_v63, %v5269_v6  ;;  %v5367_v56 = vadd.bf16 %v5349_v0, %v5271_v8 }
 0x964   : > { %7293 = vtanh.bf16 %v5364_v9 }
 0x965   : > { %7295 = vtanh.bf16 %v5366_v10 }
 0x966   : > { %7297 = vtanh.bf16 %v5365_v55 }
 0x967   : > { %7299 = vtanh.bf16 %v5367_v56 }
 0x96f   : > { %v7294_v13 = vpop.eup %7293 }
 0x970   : > { %v7296_v14 = vpop.eup %7295 }
 0x971   : > { %v7298_v34 = vpop.eup %7297 }
 0x972   : > { %v7300_v15 = vpop.eup %7299  ;;  %v6181_v17 = vcombine.low %v7294_v13, %v7298_v34  ;;  %v6184_v18 = vcombine.high %v7294_v13, %v7298_v34 }
 0x973   : > { %v6182_v4 = vcombine.low %v7296_v14, %v7300_v15  ;;  %v6185_v20 = vcombine.high %v7296_v14, %v7300_v15 }
 0x974   : > { %5406 = vst [vmem:[%s8304_s3] sm:$0xff] %v6181_v17  ;;  %5409 = vst [vmem:[%s8304_s3 + $0x18] sm:$0xff] %v6184_v18 }
 0x975   : > { %5407 = vst [vmem:[%s8304_s3 + $0x8] sm:$0xff] %v6182_v4  ;;  %5410 = vst [vmem:[%s8304_s3 + $0x20] sm:$0xff] %v6185_v20 }
 0x9dd   : > { %v5259_v25 = vpop.f32.mrb[16].mxu0 }
 0x9de   : > { %v5261_v27 = vpop.f32.mrb[17].mxu0 }
 0x9df   : > { %v5263_v30 = vpop.f32.mrb[18].mxu0 }
 0x9e0   : > { %v5272_v33 = vpack.c.bf16 %v5263_v30, %v5259_v25  ;;  %v5265_v35 = vpop.f32.mrb[19].mxu0 }
 0x9e1   : > { %v5273_v36 = vpack.c.bf16 %v5265_v35, %v5261_v27 }
 0x9e2   : > { %v5368_v7 = vadd.bf16 %v5356_v28, %v5272_v33 }
 0x9e3   : > { %v5369_v37 = vadd.bf16 %v5363_v31, %v5273_v36 }
 0x9e4   : > { %7301 = vtanh.bf16 %v5368_v7 }
 0x9e5   : > { %7303 = vtanh.bf16 %v5369_v37 }
 0x9ef   : > { %v7302_v53 = vpop.eup %7301 }
 0x9f0   : > { %v7304_v38 = vpop.eup %7303 }
 0x9f1   : > { %v6183_v58 = vcombine.low %v7302_v53, %v7304_v38  ;;  %v6186_v39 = vcombine.high %v7302_v53, %v7304_v38 }
 0x9f3   : > { %5408 = vst [vmem:[%s8304_s3 + $0x10] sm:$0xff] %v6183_v58  ;;  %5411 = vst [vmem:[%s8304_s3 + $0x28] sm:$0xff] %v6186_v39 }
 0x9f4   : > { %7602 = shalt.err (!%p7599_p3)
}
 0x9f5   : > { %s7603_s12 = scalar_lea.hbm %s8320_s30, 768  ;;  %s7607_s3 = scalar_lea.hbm %s8446_s22, 1536 }
 0x9f6   : > { %p7604_p0 = scmp.ne.s32.totalorder %s8320_s30, %s7603_s12  ;;  %p7608_p7 = scmp.lt.u32.totalorder %s8320_s30, %s8446_s22 }
 0x9f7   : > { %p7609_p10 = scmp.lt.u32.totalorder %s7607_s3, %s7603_s12  ;;  %p7611_p11 = scmp.lt.u32.totalorder %s7603_s12, %s8320_s30 }
 0x9f8   : > { %p7605_p5 = pnand %p7604_p0, %p8447_p12 }
 0x9f9   : > { %p7610_p1 = por %p7609_p10, %p7608_p7 }
 0x9fa   : > { %p7606_p2 = pneg %p7605_p5 }
 0x9fb   : > { %p7612_p13 = por %p7611_p11, %p7610_p1 }
 0x9fd   : > { %p7613_p8 = pnand %p7612_p13, %p7606_p2 }
 0x9ff   : > { %7616 = shalt.err (!%p7613_p8)
}
 0xa00   : > { %s7700_s29 = smov 384   ;;  %s7701_s2 = smov 24  }
 0xa01   : > { %6346 = dma.vmem_to_hbm [thread:$0]  (%p8447_p12), %s8322_s19, 768, %s8320_s30, %s5413_s23, %s7700_s29, %s7700_s29, %s7701_s2  }
 0xa02 PF: > { %s5442_s0 = sand.u32 1, %s7663_s24   ;;  %p8448_p6 = scmp.ne.s32.totalorder %s8423_s28, 0 }
 0xa03   : > { %p8449_p9 = scmp.ge.s32.totalorder %s7675_s27, 2  ;;  %s5443_s6 = scalar_lea.sflag [#allocation4], %s5442_s0 }
 0xa05   : > { %p6381_p4 = pnand %p8449_p9, %p8448_p6 }
 0xa07   : > { %7658 = dma.done.wait (!%p6381_p4), %s5443_s6, 768  }
 0xa08   : > { %7660 = vsyncadd (!%p6381_p4), %s5443_s6, 4294966528  ;;  %p35_p3 = scmp.ge.s32.totalorder %s8036_s16, 4   ;;  %s8450_s24 = smov %s7667_s25 }
 0xa09   : > { %s8451_s25 = smov %s7671_s26  ;;  %s8452_s26 = smov %s8048_s1 }
 0xa0a   : > { %s8453_s27 = smov %s8036_s16  ;;  %37 = sbr.rel (!%p35_p3) target bundleno = 23 (0x17), region = 169 }
 0xa11   :  { %5448 = vsyncpa [#allocation3], 1 }
 0xa12   :  { %5450 = vsyncpa [#allocation3 + $0x1], 1 }
 0xa13   :  { %5451 = vsyncpa [#allocation6], 1 }
 0xa14   :  { %5452 = vsyncpa [#allocation9], 1 }
 0xa15   :  { %5453 = vsyncpa [#allocation12], 1 }
 0xa16   :  { %5454 = vsyncpa [#allocation15], 1 }
 0xa17   :  { %5455 = vsyncpa [#allocation18], 1 }
 0xa18   :  { %5456 = vsyncpa [#allocation4], 1 }
 0xa19   :  { %5458 = vsyncpa [#allocation4 + $0x1], 1 }

// kernel: _autoencoder_pallas.1
= control target key start
LH: loop header
LB: loop body
LE: loop exit
PB: predicated region body
PF: predicated region fallthrough
CT: control target
= control target key end

     0   :  { %s8368_s0 = inlined_call_operand.hbm [shape: bf16[32,768], index: 0, kind: input, shape index: {}]   ;;  %s8369_s1 = inlined_call_operand.hbm [shape: bf16[768,512], index: 1, kind: input, shape index: {}]   ;;  %s8370_s2 = inlined_call_operand.vmem [shape: bf16[1,512], index: 2, kind: input, shape index: {}]   ;;  %s8371_s3 = inlined_call_operand.hbm [shape: bf16[512,256], index: 3, kind: input, shape index: {}]   ;;  %s8372_s4 = inlined_call_operand.hbm [shape: bf16[1,256], index: 4, kind: input, shape index: {}]   ;;  %s8373_s5 = inlined_call_operand.hbm [shape: bf16[256,128], index: 5, kind: input, shape index: {}]   ;;  %s8374_s6 = inlined_call_operand.vmem [shape: bf16[1,128], index: 6, kind: input, shape index: {}]   ;;  %s8375_s7 = inlined_call_operand.hbm [shape: bf16[128,128], index: 7, kind: input, shape index: {}]   ;;  %s8376_s8 = inlined_call_operand.vmem [shape: bf16[1,128], index: 8, kind: input, shape index: {}]   ;;  %s8377_s9 = inlined_call_operand.hbm [shape: bf16[128,128], index: 9, kind: input, shape index: {}]   ;;  %s8378_s10 = inlined_call_operand.vmem [shape: bf16[1,128], index: 10, kind: input, shape index: {}]   ;;  %s8379_s11 = inlined_call_operand.hbm [shape: bf16[128,256], index: 11, kind: input, shape index: {}]   ;;  %s8380_s12 = inlined_call_operand.vmem [shape: bf16[1,256], index: 12, kind: input, shape index: {}]   ;;  %s8381_s13 = inlined_call_operand.hbm [shape: bf16[256,512], index: 13, kind: input, shape index: {}]   ;;  %s8382_s14 = inlined_call_operand.vmem [shape: bf16[1,512], index: 14, kind: input, shape index: {}]   ;;  %s8383_s15 = inlined_call_operand.hbm [shape: bf16[512,768], index: 15, kind: input, shape index: {}]   ;;  %s8384_s16 = inlined_call_operand.vmem [shape: bf16[1,768], index: 16, kind: input, shape index: {}]   ;;  %s8385_s17 = inlined_call_operand.hbm [shape: bf16[32,768], index: 17, kind: output, shape index: {}]  }
   0x1   :  { %8399 = sst [smem:[#allocation27_spill]] %s8368_s0 }
   0x2   :  { %8400 = sst [smem:[#allocation28_spill]] %s8369_s1 }
   0x3   :  { %8401 = sst [smem:[#allocation29_spill]] %s8370_s2 }
   0x4   :  { %8402 = sst [smem:[#allocation30_spill]] %s8371_s3 }
   0x5   :  { %8403 = sst [smem:[#allocation31_spill]] %s8372_s4 }
   0x6   :  { %8404 = sst [smem:[#allocation32_spill]] %s8374_s6 }
   0x7   :  { %8405 = sst [smem:[#allocation33_spill]] %s8376_s8 }
   0x8   :  { %8406 = sst [smem:[#allocation34_spill]] %s8378_s10 }
   0x9   :  { %8407 = sst [smem:[#allocation35_spill]] %s8380_s12 }
   0xa   :  { %8408 = sst [smem:[#allocation36_spill]] %s8382_s14 }
   0xb   :  { %8409 = sst [smem:[#allocation37_spill]] %s8384_s16 }
   0xc   :  { %8410 = sst [smem:[#allocation38_spill]] %s8385_s17 }
   0xd   :  { %22 = vsyncpa [#allocation3], 0 }
   0xe   :  { %24 = vsyncpa [#allocation3 + $0x1], 0 }
   0xf   :  { %25 = vsyncpa [#allocation6], 0 }
  0x10   :  { %26 = vsyncpa [#allocation9], 0 }
  0x11   :  { %27 = vsyncpa [#allocation12], 0 }
  0x12   :  { %28 = vsyncpa [#allocation15], 0 }
  0x13   :  { %29 = vsyncpa [#allocation18], 0 }
  0x14   :  { %30 = vsyncpa [#allocation4], 0 }
  0x15   :  { %32 = vsyncpa [#allocation4 + $0x1], 0  ;;  %s7792_s24 = smov 0   ;;  %s7794_s25 = smov 0  }
  0x16   :  { %s7796_s26 = smov 0   ;;  %s7798_s27 = smov 0  }
  0x17 LB: > { %s7677_s28 = smov [#allocation5]   ;;  %s7813_s0 = sadd.s32 4294967295, %s7675_s27   ;;  %s7675_s27 = sphi %s7798_s27, %s8453_s27   ;;  %s7671_s26 = sphi %s7796_s26, %s8452_s26   ;;  %s7667_s25 = sphi %s7794_s25, %s8451_s25   ;;  %s7663_s24 = sphi %s7792_s24, %s8450_s24  }
  0x18   : > { %s443_s29 = sshll.u32 %s7677_s28, 4  ;;  %p5587_p0 = scmp.ge.s32.totalorder %s7675_s27, 1  ;;  %s7818_s29 = int_to_ptr.vmem [resolvable:$true] %s443_s29 }
  0x19   : > { %p8389_p1 = scmp.eq.s32.totalorder %s7813_s0, 0  ;;  %p431_p2 = scmp.lt.s32.totalorder %s7675_s27, 3 }
  0x1a   : > { %s7678_s18 = smov [#allocation8]   ;;  %s7679_s20 = smov [#allocation11]  }
  0x1b   : > { %p7820_p3 = pnand %p5587_p0, %p431_p2  ;;  %s473_s19 = sshll.u32 %s7678_s18, 4  ;;  %s7833_s19 = int_to_ptr.vmem [resolvable:$true] %s473_s19 }
  0x1c   : > { %s7835_s21 = sshll.u32 %s7679_s20, 4  ;;  %s8413_s28 = sld [smem:[#allocation28_spill]]  ;;  %s500_s21 = int_to_ptr.vmem [resolvable:$true] %s7835_s21 }
  0x1d   : > { %s8411_s30 = scalar_select %p7820_p3, 1, 0 }
  0x1e   : > { %p6348_p5 = pneg %p7820_p3 }
  0x20   : > { %p7829_p6 = pnand %p6348_p5, %p8389_p1 }
  0x22   : > { %s7307_s17 = scalar_lea.hbm %s8413_s28, 24576  ;;  %p7845_p8 = pneg %p7829_p6 }
  0x23   : > { %p7308_p7 = scmp.ne.s32.totalorder %s8413_s28, %s7307_s17  ;;  %p7314_p11 = scmp.lt.u32.totalorder %s7307_s17, %s8413_s28 }
  0x25   : > { %p7310_p9 = pnand %p7845_p8, %p7308_p7 }
  0x27   : > { %p7311_p10 = pneg %p7310_p9 }
  0x29   : > { %p7316_p12 = pnand %p7314_p11, %p7311_p10 }
  0x2b   : > { %7319 = shalt.err (!%p7316_p12)
}
  0x2c   : > { %s7320_s14 = scalar_lea.vmem %s7818_s29, 24576  ;;  %p7328_p5 = scmp.lt.s32.totalorder %s7818_s29, %s7818_s29 }
  0x2d   : > { %p7321_p13 = scmp.ne.s32.totalorder %s7818_s29, %s7320_s14  ;;  %p7329_p4 = scmp.lt.s32.totalorder %s7320_s14, %s7320_s14 }
  0x2f   : > { %p7323_p0 = pnand %p7321_p13, %p7845_p8  ;;  %p7330_p7 = por %p7329_p4, %p7328_p5 }
  0x31   : > { %p7324_p2 = pneg %p7323_p0 }
  0x33   : > { %p7331_p9 = pnand %p7330_p7, %p7324_p2 }
  0x35   : > { %7334 = shalt.err (!%p7331_p9)
}
  0x36   : > { %s8391_s16 = smov 256   ;;  %s8392_s12 = smov 16  }
  0x37   : > { %6351 = dma.hbm_to_vmem [thread:$0]  (!%p7829_p6), %s8413_s28, 24576, %s7818_s29, [#allocation6], %s8391_s16, %s8391_s16, %s8392_s12  }
  0x38   : > { %s8415_s4 = sld [smem:[#allocation31_spill]] }
  0x3e   : > { %s7335_s14 = scalar_lea.hbm %s8415_s4, 32 }
  0x3f   : > { %p7336_p4 = scmp.ne.s32.totalorder %s8415_s4, %s7335_s14  ;;  %p7342_p12 = scmp.lt.u32.totalorder %s7335_s14, %s8415_s4 }
  0x41   : > { %p7338_p10 = pnand %p7336_p4, %p7845_p8 }
  0x43   : > { %p7339_p11 = pneg %p7338_p10 }
  0x45   : > { %p7344_p13 = pnand %p7342_p12, %p7339_p11 }
  0x47   : > { %7347 = shalt.err (!%p7344_p13)
}
  0x48   : > { %s7348_s29 = scalar_lea.vmem %s7833_s19, 32  ;;  %p7356_p7 = scmp.lt.s32.totalorder %s7833_s19, %s7833_s19 }
  0x49   : > { %p7349_p0 = scmp.ne.s32.totalorder %s7833_s19, %s7348_s29  ;;  %p7357_p9 = scmp.lt.s32.totalorder %s7348_s29, %s7348_s29 }
  0x4b   : > { %p7351_p2 = pnand %p7349_p0, %p7845_p8  ;;  %p7358_p4 = por %p7357_p9, %p7356_p7 }
  0x4d   : > { %p7352_p5 = pneg %p7351_p2 }
  0x4f   : > { %p7359_p10 = pnand %p7358_p4, %p7352_p5 }
  0x51   : > { %7362 = shalt.err (!%p7359_p10)
}
  0x52   : > { %6357 = dma.hbm_to_vmem [thread:$0]  (!%p7829_p6), %s8415_s4, 32, %s7833_s19, [#allocation9]  }
  0x53   : > { %s7363_s17 = scalar_lea.hbm %s8375_s7, 1024 }
  0x54   : > { %p7364_p11 = scmp.ne.s32.totalorder %s8375_s7, %s7363_s17  ;;  %p7370_p0 = scmp.lt.u32.totalorder %s7363_s17, %s8375_s7 }
  0x56   : > { %p7366_p12 = pnand %p7364_p11, %p7845_p8 }
  0x58   : > { %p7367_p13 = pneg %p7366_p12 }
  0x5a   : > { %p7372_p2 = pnand %p7370_p0, %p7367_p13 }
  0x5c   : > { %7375 = shalt.err (!%p7372_p2)
}
  0x5d   : > { %s7376_s29 = scalar_lea.vmem %s500_s21, 1024  ;;  %p7384_p4 = scmp.lt.s32.totalorder %s500_s21, %s500_s21 }
  0x5e   : > { %p7377_p5 = scmp.ne.s32.totalorder %s500_s21, %s7376_s29  ;;  %p7385_p10 = scmp.lt.s32.totalorder %s7376_s29, %s7376_s29 }
  0x60   : > { %p7379_p7 = pnand %p7377_p5, %p7845_p8  ;;  %p7386_p1 = por %p7385_p10, %p7384_p4 }
  0x62   : > { %p7380_p9 = pneg %p7379_p7 }
  0x64   : > { %p7387_p3 = pnand %p7386_p1, %p7380_p9 }
  0x66   : > { %7390 = shalt.err (!%p7387_p3)
}
  0x67   : > { %s8394_s19 = smov 64   ;;  %s7683_s2 = smov 4  }
  0x68   : > { %6363 = dma.hbm_to_vmem [thread:$0]  (!%p7829_p6), %s8375_s7, 1024, %s500_s21, [#allocation12], %s8394_s19, %s8394_s19, %s7683_s2  }
  0x69   : > { %s7684_s10 = smov [#allocation14]   ;;  %s7685_s22 = smov [#allocation7]  }
  0x6a   : > { %s531_s17 = sshll.u32 %s7684_s10, 4  ;;  %s459_s23 = sshll.u32 %s7685_s22, 4  ;;  %s532_s17 = int_to_ptr.vmem [resolvable:$true] %s531_s17  ;;  %s460_s23 = int_to_ptr.vmem [resolvable:$true] %s459_s23 }
  0x6b   : > { %s7391_s29 = scalar_lea.hbm %s8379_s11, 2048 }
  0x6c   : > { %p7392_p1 = scmp.ne.s32.totalorder %s8379_s11, %s7391_s29  ;;  %p7398_p12 = scmp.lt.u32.totalorder %s7391_s29, %s8379_s11 }
  0x6e   : > { %p7394_p3 = pnand %p7392_p1, %p7845_p8 }
  0x70   : > { %p7395_p11 = pneg %p7394_p3 }
  0x72   : > { %p7400_p13 = pnand %p7398_p12, %p7395_p11 }
  0x74   : > { %7403 = shalt.err (!%p7400_p13)
}
  0x75   : > { %s7404_s21 = scalar_lea.vmem %s532_s17, 2048  ;;  %p7412_p7 = scmp.lt.s32.totalorder %s532_s17, %s532_s17 }
  0x76   : > { %p7405_p0 = scmp.ne.s32.totalorder %s532_s17, %s7404_s21  ;;  %p7413_p9 = scmp.lt.s32.totalorder %s7404_s21, %s7404_s21 }
  0x78   : > { %p7407_p2 = pnand %p7405_p0, %p7845_p8  ;;  %p7414_p4 = por %p7413_p9, %p7412_p7 }
  0x7a   : > { %p7408_p5 = pneg %p7407_p2 }
  0x7c   : > { %p7415_p10 = pnand %p7414_p4, %p7408_p5 }
  0x7e   : > { %7418 = shalt.err (!%p7415_p10)
}
  0x7f   : > { %s7686_s16 = smov 128   ;;  %s7687_s12 = smov 8  }
  0x80   : > { %6369 = dma.hbm_to_vmem [thread:$0]  (!%p7829_p6), %s8379_s11, 2048, %s532_s17, [#allocation15], %s7686_s16, %s7686_s16, %s7687_s12  }
  0x81   : > { %s8416_s3 = sld [smem:[#allocation30_spill]] }
  0x87   : > { %s7419_s10 = scalar_lea.hbm %s8416_s3, 8192 }
  0x88   : > { %p7420_p1 = scmp.ne.s32.totalorder %s8416_s3, %s7419_s10  ;;  %p7426_p12 = scmp.lt.u32.totalorder %s7419_s10, %s8416_s3 }
  0x8a   : > { %p7422_p3 = pnand %p7420_p1, %p7845_p8 }
  0x8c   : > { %p7423_p11 = pneg %p7422_p3 }
  0x8e   : > { %p7428_p13 = pnand %p7426_p12, %p7423_p11 }
  0x90   : > { %7431 = shalt.err (!%p7428_p13)
}
  0x91   : > { %s7432_s21 = scalar_lea.vmem %s460_s23, 8192  ;;  %p7440_p7 = scmp.lt.s32.totalorder %s460_s23, %s460_s23 }
  0x92   : > { %p7433_p0 = scmp.ne.s32.totalorder %s460_s23, %s7432_s21  ;;  %p7441_p9 = scmp.lt.s32.totalorder %s7432_s21, %s7432_s21 }
  0x94   : > { %p7435_p2 = pnand %p7433_p0, %p7845_p8  ;;  %p7442_p4 = por %p7441_p9, %p7440_p7 }
  0x96   : > { %p7436_p5 = pneg %p7435_p2 }
  0x98   : > { %p7443_p10 = pnand %p7442_p4, %p7436_p5 }
  0x9a   : > { %7446 = shalt.err (!%p7443_p10)
}
  0x9b   : > { %6354 = dma.hbm_to_vmem [thread:$0]  (!%p7829_p6), %s8416_s3, 8192, %s460_s23, [#allocation6], %s7686_s16, %s7686_s16, %s7687_s12  }
  0x9c   : > { %s7688_s28 = smov [#allocation10]   ;;  %s7689_s8 = smov [#allocation13]  }
  0x9d   : > { %s483_s6 = sshll.u32 %s7688_s28, 4  ;;  %s515_s10 = sshll.u32 %s7689_s8, 4  ;;  %s484_s6 = int_to_ptr.vmem [resolvable:$true] %s483_s6  ;;  %s516_s10 = int_to_ptr.vmem [resolvable:$true] %s515_s10 }
  0x9e   : > { %s7447_s14 = scalar_lea.hbm %s8373_s5, 2048 }
  0x9f   : > { %p7448_p1 = scmp.ne.s32.totalorder %s8373_s5, %s7447_s14  ;;  %p7454_p12 = scmp.lt.u32.totalorder %s7447_s14, %s8373_s5 }
  0xa1   : > { %p7450_p3 = pnand %p7448_p1, %p7845_p8 }
  0xa3   : > { %p7451_p11 = pneg %p7450_p3 }
  0xa5   : > { %p7456_p13 = pnand %p7454_p12, %p7451_p11 }
  0xa7   : > { %7459 = shalt.err (!%p7456_p13)
}
  0xa8   : > { %s7460_s23 = scalar_lea.vmem %s484_s6, 2048  ;;  %p7468_p7 = scmp.lt.s32.totalorder %s484_s6, %s484_s6 }
  0xa9   : > { %p7461_p0 = scmp.ne.s32.totalorder %s484_s6, %s7460_s23  ;;  %p7469_p9 = scmp.lt.s32.totalorder %s7460_s23, %s7460_s23 }
  0xab   : > { %p7463_p2 = pnand %p7461_p0, %p7845_p8  ;;  %p7470_p4 = por %p7469_p9, %p7468_p7 }
  0xad   : > { %p7464_p5 = pneg %p7463_p2 }
  0xaf   : > { %p7471_p10 = pnand %p7470_p4, %p7464_p5 }
  0xb1   : > { %7474 = shalt.err (!%p7471_p10)
}
  0xb2   : > { %s8417_s16 = smov 64   ;;  %s7475_s8 = scalar_lea.hbm %s8377_s9, 1024 }
  0xb3   : > { %6360 = dma.hbm_to_vmem [thread:$0]  (!%p7829_p6), %s8373_s5, 2048, %s484_s6, [#allocation9], %s8417_s16, %s8417_s16, %s7683_s2  }
  0xb4   : > { %p7476_p1 = scmp.ne.s32.totalorder %s8377_s9, %s7475_s8  ;;  %p7482_p12 = scmp.lt.u32.totalorder %s7475_s8, %s8377_s9 }
  0xb6   : > { %p7478_p3 = pnand %p7476_p1, %p7845_p8 }
  0xb8   : > { %p7479_p11 = pneg %p7478_p3 }
  0xba   : > { %p7484_p13 = pnand %p7482_p12, %p7479_p11 }
  0xbc   : > { %7487 = shalt.err (!%p7484_p13)
}
  0xbd   : > { %s7488_s21 = scalar_lea.vmem %s516_s10, 1024  ;;  %p7496_p7 = scmp.lt.s32.totalorder %s516_s10, %s516_s10 }
  0xbe   : > { %p7489_p0 = scmp.ne.s32.totalorder %s516_s10, %s7488_s21  ;;  %p7497_p9 = scmp.lt.s32.totalorder %s7488_s21, %s7488_s21 }
  0xc0   : > { %p7491_p2 = pnand %p7489_p0, %p7845_p8  ;;  %p7498_p4 = por %p7497_p9, %p7496_p7 }
  0xc2   : > { %p7492_p5 = pneg %p7491_p2 }
  0xc4   : > { %p7499_p10 = pnand %p7498_p4, %p7492_p5 }
  0xc6   : > { %7502 = shalt.err (!%p7499_p10)
}
  0xc7   : > { %6366 = dma.hbm_to_vmem [thread:$0]  (!%p7829_p6), %s8377_s9, 1024, %s516_s10, [#allocation12], %s8417_s16, %s8417_s16, %s7683_s2  }
  0xc8   : > { %s7690_s23 = smov [#allocation16]   ;;  %s7691_s12 = smov [#allocation17]  }
  0xc9   : > { %s547_s19 = sshll.u32 %s7690_s23, 4  ;;  %s563_s4 = sshll.u32 %s7691_s12, 4  ;;  %s548_s19 = int_to_ptr.vmem [resolvable:$true] %s547_s19  ;;  %s564_s4 = int_to_ptr.vmem [resolvable:$true] %s563_s4 }
  0xca   : > { %s7503_s22 = scalar_lea.hbm %s8381_s13, 8192 }
  0xcb   : > { %p7504_p1 = scmp.ne.s32.totalorder %s8381_s13, %s7503_s22  ;;  %p7510_p12 = scmp.lt.u32.totalorder %s7503_s22, %s8381_s13 }
  0xcd   : > { %p7506_p3 = pnand %p7504_p1, %p7845_p8 }
  0xcf   : > { %p7507_p11 = pneg %p7506_p3 }
  0xd1   : > { %p7512_p13 = pnand %p7510_p12, %p7507_p11 }
  0xd3   : > { %7515 = shalt.err (!%p7512_p13)
}
  0xd4   : > { %s7516_s2 = scalar_lea.vmem %s548_s19, 8192  ;;  %p7524_p7 = scmp.lt.s32.totalorder %s548_s19, %s548_s19 }
  0xd5   : > { %p7517_p0 = scmp.ne.s32.totalorder %s548_s19, %s7516_s2  ;;  %p7525_p9 = scmp.lt.s32.totalorder %s7516_s2, %s7516_s2 }
  0xd7   : > { %p7519_p2 = pnand %p7517_p0, %p7845_p8  ;;  %p7526_p4 = por %p7525_p9, %p7524_p7 }
  0xd9   : > { %p7520_p5 = pneg %p7519_p2 }
  0xdb   : > { %p7527_p10 = pnand %p7526_p4, %p7520_p5 }
  0xdd   : > { %7530 = shalt.err (!%p7527_p10)
}
  0xde   : > { %s8418_s10 = smov 16   ;;  %s8419_s16 = smov 256  }
  0xdf   : > { %6372 = dma.hbm_to_vmem [thread:$0]  (!%p7829_p6), %s8381_s13, 8192, %s548_s19, [#allocation15], %s8419_s16, %s8419_s16, %s8418_s10  }
  0xe0   : > { %s7531_s28 = scalar_lea.hbm %s8383_s15, 24576 }
  0xe1   : > { %p7532_p1 = scmp.ne.s32.totalorder %s8383_s15, %s7531_s28  ;;  %p7538_p12 = scmp.lt.u32.totalorder %s7531_s28, %s8383_s15 }
  0xe3   : > { %p7534_p3 = pnand %p7532_p1, %p7845_p8 }
  0xe5   : > { %p7535_p11 = pneg %p7534_p3 }
  0xe7   : > { %p7540_p13 = pnand %p7538_p12, %p7535_p11 }
  0xe9   : > { %7543 = shalt.err (!%p7540_p13)
}
  0xea   : > { %s7544_s29 = scalar_lea.vmem %s564_s4, 24576  ;;  %p7552_p7 = scmp.lt.s32.totalorder %s564_s4, %s564_s4 }
  0xeb   : > { %p7545_p0 = scmp.ne.s32.totalorder %s564_s4, %s7544_s29  ;;  %p7553_p9 = scmp.lt.s32.totalorder %s7544_s29, %s7544_s29 }
  0xed   : > { %p7547_p2 = pnand %p7545_p0, %p7845_p8  ;;  %p7554_p4 = por %p7553_p9, %p7552_p7 }
  0xef   : > { %p7548_p5 = pneg %p7547_p2 }
  0xf1   : > { %p7555_p10 = pnand %p7554_p4, %p7548_p5 }
  0xf3   : > { %7558 = shalt.err (!%p7555_p10)
}
  0xf4   : > { %s8396_s19 = smov 384   ;;  %s8397_s18 = smov 24  }
  0xf5   : > { %6375 = dma.hbm_to_vmem [thread:$0]  (!%p7829_p6), %s8383_s15, 24576, %s564_s4, [#allocation18], %s8396_s19, %s8396_s19, %s8397_s18  }
  0xf6   : > { %s5586_s10 = sadd.s32 4294967294, %s7675_s27   ;;  %s8036_s16 = sadd.s32 1, %s7675_s27  }
  0xf7   : > { %s45_s6 = sadd.s32 1, %s7671_s26  ;;  %s42_s17 = ssub.s32 %s7675_s27, %s8036_s16 }
  0xf8   : > { %p52_p8 = scmp.ne.s32.totalorder %s7671_s26, %s7667_s25  ;;  %p43_p1 = scmp.eq.s32.totalorder %s42_s17, 0 }
  0xf9   : > { %p53_p3 = scmp.eq.s32.totalorder %s7675_s27, 0  ;;  %p58_p11 = scmp.ne.s32.totalorder %s7667_s25, %s7663_s24 }
  0xfa   : > { %p418_p12 = scmp.eq.s32.totalorder %s7813_s0, 1  ;;  %p8420_p0 = scmp.eq.s32.totalorder %s7813_s0, 0 }
  0xfb   : > { %s8048_s1 = scalar_select %p43_p1, %s7671_s26, %s45_s6  }
  0xfc   : > { %p54_p13 = por %p53_p3, %p52_p8  ;;  %p8052_p2 = por %p8420_p0, %p58_p11 }
  0xfd   : > { %p8056_p6 = por %p418_p12, %p52_p8  ;;  %p424_p5 = scmp.eq.s32.totalorder %s5586_s10, 1 }
  0xfe   : > { %p6393_p7 = scmp.lt.s32.totalorder %s7675_s27, 2  ;;  %s580_s12 = sand.u32 1, %s7671_s26  }
  0xff   : > { %s8422_s4 = scalar_select %p8056_p6, 1, 0 }
 0x100   : > { %p8062_p9 = por %p424_p5, %p58_p11  ;;  %s6304_s8 = smul.u32 48, %s580_s12 }
 0x101   : > { %p8066_p4 = pnand %p6393_p7, %p54_p13  ;;  %s6305_s20 = smul.u32 768, %s7675_s27 }
 0x102   : > { %s8423_s28 = scalar_select %p8062_p9, 1, 0 }
 0x103   : > { %s8425_s21 = sld [smem:[#allocation27_spill]]  ;;  %s584_s10 = scalar_lea.vmem [#allocation2], %s6304_s8 }
 0x104   : > { %s592_s6 = sshll.u32 %s584_s10, 4  ;;  %s8078_s17 = scalar_lea.sflag [#allocation3], %s580_s12  ;;  %s8076_s6 = int_to_ptr.vmem [resolvable:$true] %s592_s6 }
 0x105   : > { %p7561_p8 = pneg %p8066_p4 }
 0x109   : > { %s8074_s2 = scalar_lea.hbm %s8425_s21, %s6305_s20  ;;  %s7564_s29 = scalar_lea.hbm %s8425_s21, 1536 }
 0x10a   : > { %s7559_s19 = scalar_lea.hbm %s8074_s2, 768  ;;  %p7565_p11 = scmp.lt.u32.totalorder %s8074_s2, %s8425_s21 }
 0x10b   : > { %p7560_p10 = scmp.ne.s32.totalorder %s8074_s2, %s7559_s19  ;;  %p7566_p12 = scmp.lt.u32.totalorder %s7564_s29, %s7559_s19 }
 0x10c   : > { %p7568_p0 = scmp.lt.u32.totalorder %s7559_s19, %s8074_s2 }
 0x10d   : > { %p7562_p1 = pnand %p7561_p8, %p7560_p10  ;;  %p7567_p13 = por %p7566_p12, %p7565_p11 }
 0x10f   : > { %p7563_p3 = pneg %p7562_p1  ;;  %p7569_p5 = por %p7568_p0, %p7567_p13 }
 0x111   : > { %p7570_p7 = pnand %p7569_p5, %p7563_p3 }
 0x113   : > { %7573 = shalt.err (!%p7570_p7)
}
 0x114   : > { %s7574_s12 = scalar_lea.vmem %s8076_s6, 768  ;;  %s7694_s8 = smov [#allocation2]  }
 0x115   : > { %p7575_p10 = scmp.ne.s32.totalorder %s8076_s6, %s7574_s12  ;;  %s7579_s10 = sshll.u32 %s7694_s8, 4  ;;  %s7580_s10 = int_to_ptr.vmem [resolvable:$false] %s7579_s10 }
 0x116   : > { %s7581_s3 = scalar_lea.vmem %s7580_s10, 1536  ;;  %p7582_p6 = scmp.lt.s32.totalorder %s8076_s6, %s7580_s10 }
 0x117   : > { %p7577_p1 = pnand %p7575_p10, %p7561_p8  ;;  %p7583_p11 = scmp.lt.s32.totalorder %s7581_s3, %s7574_s12 }
 0x119   : > { %p7578_p9 = pneg %p7577_p1  ;;  %p7584_p12 = por %p7583_p11, %p7582_p6 }
 0x11b   : > { %p7585_p13 = pnand %p7584_p12, %p7578_p9 }
 0x11d   : > { %7588 = shalt.err (!%p7585_p13)
}
 0x11e   : > { %s8426_s19 = smov 24   ;;  %s8427_s18 = smov 384  }
 0x11f   : > { %6379 = dma.hbm_to_vmem [thread:$0]  (!%p8066_p4), %s8074_s2, 768, %s8076_s6, %s8078_s17, %s8427_s18, %s8427_s18, %s8426_s19  }
 0x120   : > { %p8428_p8 = scmp.ne.s32.totalorder %s8411_s30, 0 }
 0x121   : > { %s8112_s20 = sand.u32 (!%p8428_p8), 1, %s7667_s25  }
 0x122   : > { %604 = sbr.rel (%p8428_p8) target bundleno = 2562 (0xa02), region = 88  ;;  %s607_s29 = scalar_lea.sflag (!%p8428_p8), [#allocation3], %s8112_s20 }
 0x123   : > { %s6306_s14 = smul.u32 (!%p8428_p8), 48, %s8112_s20 }
 0x125   : > { %s8118_s22 = scalar_lea.vmem (!%p8428_p8), [#allocation2], %s6306_s14 }
 0x129   : > { %7634 = dma.done.wait (%p8052_p2), %s607_s29, 768  }
 0x12a   : > { %7636 = vsyncadd (%p8052_p2), %s607_s29, 4294966528  ;;  %p8429_p6 = scmp.eq.s32.totalorder %s7813_s0, 0 }
 0x12c   : > { %7638 = dma.done.wait (%p8429_p6), [#allocation6], 32768   ;;  %p8430_p9 = pmov %p8429_p6 }
 0x12d   : > { %p8431_p4 = pmov %p8429_p6 }
 0x12e   : > { %7640 = vsyncadd (%p8430_p9), [#allocation6], 4294934528 }
 0x12f   : > { %7642 = dma.done.wait (%p8431_p4), [#allocation9], 2080   ;;  %p8432_p3 = pmov %p8431_p4 }
 0x131   : > { %7644 = vsyncadd (%p8432_p3), [#allocation9], 4294965216  ;;  %p8433_p0 = pmov %p8432_p3 }
 0x133   : > { %7646 = dma.done.wait (%p8433_p0), [#allocation12], 2048   ;;  %p8434_p5 = pmov %p8433_p0 }
 0x134   : > { %p8435_p2 = pmov %p8433_p0 }
 0x135   : > { %7648 = vsyncadd (%p8434_p5), [#allocation12], 4294965248 }
 0x136   : > { %7650 = dma.done.wait (%p8435_p2), [#allocation15], 10240   ;;  %p8436_p7 = pmov %p8433_p0 }
 0x137   : > { %p8437_p10 = pmov %p8433_p0 }
 0x138   : > { %7652 = vsyncadd (%p8436_p7), [#allocation15], 4294957056 }
 0x139   : > { %7654 = dma.done.wait (%p8437_p10), [#allocation18], 24576   ;;  %p8438_p1 = pmov %p8433_p0 }
 0x13a   : > { %v6459_v0 = vld [vmem:[#allocation5 + $0x4] ss:$16 sps:$4 sm:$0xff]   ;;  %v6463_v2 = vld [vmem:[#allocation5] ss:$16 sps:$4 sm:$0xff]   ;;  %s8439_s2 = sld [smem:[#allocation29_spill]]  ;;  %vm7698_vm0 = vmmov 0  }
 0x13b   : > { %7656 = vsyncadd (%p8438_p1), [#allocation18], 4294942720  ;;  %v6461_v1 = vld [vmem:[#allocation5 + $0x204] ss:$16 sps:$4 sm:$0xff]   ;;  %1889 = vmatprep.subr.bf16.mxu1 %v6459_v0  ;;  %v6464_v3 = vld [vmem:[#allocation5 + $0x200] ss:$16 sps:$4 sm:$0xff]  }
 0x13c   : > { %1932 = vmatprep.subr.bf16.mxu0 %v6461_v1  ;;  %v6465_v4 = vld [vmem:[#allocation5 + $0x24] ss:$16 sps:$4 sm:$0xff]   ;;  %1890 = vmatpush1.bf16.msra.mxu1 %v6463_v2  ;;  %v6469_v6 = vld [vmem:[#allocation5 + $0x20] ss:$16 sps:$4 sm:$0xff]   ;;  %s8440_s12 = sld [smem:[#allocation32_spill]]  ;;  %s8441_s3 = sld [smem:[#allocation33_spill]] }
 0x13d   : > { %1933 = vmatpush1.bf16.msra.mxu0 %v6464_v3  ;;  %v6467_v5 = vld [vmem:[#allocation5 + $0x224] ss:$16 sps:$4 sm:$0xff]   ;;  %1891 = vmatprep.subr.bf16.mxu1 %v6465_v4  ;;  %v6470_v7 = vld [vmem:[#allocation5 + $0x220] ss:$16 sps:$4 sm:$0xff]   ;;  %v6566_v3 = vld [vmem:[#allocation5 + $0xc] ss:$16 sps:$4 sm:$0xff]  }
 0x13e   : > { %1934 = vmatprep.subr.bf16.mxu0 %v6467_v5  ;;  %v6471_v8 = vld [vmem:[#allocation5 + $0x44] ss:$16 sps:$4 sm:$0xff]   ;;  %v6475_v10 = vld [vmem:[#allocation5 + $0x40] ss:$16 sps:$4 sm:$0xff]   ;;  %s8442_s29 = sld [smem:[#allocation34_spill]]  ;;  %s8443_s23 = sld [smem:[#allocation35_spill]] }
 0x13f   : > { %v6473_v9 = vld [vmem:[#allocation5 + $0x244] ss:$16 sps:$4 sm:$0xff]   ;;  %v6476_v11 = vld [vmem:[#allocation5 + $0x240] ss:$16 sps:$4 sm:$0xff]   ;;  %s8444_s17 = sld [smem:[#allocation36_spill]]  ;;  %s8445_s10 = sld [smem:[#allocation37_spill]] }
 0x140   : > { %1892 = vmatpush1.bf16.msra.mxu1 %v6469_v6  ;;  %v6477_v12 = vld [vmem:[#allocation5 + $0x64] ss:$16 sps:$4 sm:$0xff]   ;;  %v6481_v14 = vld [vmem:[#allocation5 + $0x60] ss:$16 sps:$4 sm:$0xff]   ;;  %p8447_p12 = scmp.ne.s32.totalorder %s8422_s4, 0 }
 0x141   : > { %1935 = vmatpush1.bf16.msra.mxu0 %v6470_v7  ;;  %1893 = vmatprep.subr.bf16.mxu1 %v6471_v8  ;;  %v6479_v13 = vld [vmem:[#allocation5 + $0x264] ss:$16 sps:$4 sm:$0xff]   ;;  %v6482_v15 = vld [vmem:[#allocation5 + $0x260] ss:$16 sps:$4 sm:$0xff]   ;;  %v6564_v7 = vld [vmem:[#allocation5 + $0x8] ss:$16 sps:$4 sm:$0xff]  }
 0x142   : > { %1936 = vmatprep.subr.bf16.mxu0 %v6473_v9  ;;  %v6483_v16 = vld [vmem:[#allocation5 + $0x84] ss:$16 sps:$4 sm:$0xff]   ;;  %v6487_v18 = vld [vmem:[#allocation5 + $0x80] ss:$16 sps:$4 sm:$0xff]   ;;  %v6572_v9 = vld [vmem:[#allocation5 + $0x2c] ss:$16 sps:$4 sm:$0xff]  }
 0x143   : > { %v6485_v17 = vld [vmem:[#allocation5 + $0x284] ss:$16 sps:$4 sm:$0xff]   ;;  %v6488_v19 = vld [vmem:[#allocation5 + $0x280] ss:$16 sps:$4 sm:$0xff]  }
 0x144   : > { %1894 = vmatpush1.bf16.msra.mxu1 %v6475_v10  ;;  %v6489_v20 = vld [vmem:[#allocation5 + $0xa4] ss:$16 sps:$4 sm:$0xff]   ;;  %v6493_v22 = vld [vmem:[#allocation5 + $0xa0] ss:$16 sps:$4 sm:$0xff]  }
 0x145   : > { %1937 = vmatpush1.bf16.msra.mxu0 %v6476_v11  ;;  %1895 = vmatprep.subr.bf16.mxu1 %v6477_v12  ;;  %v6491_v21 = vld [vmem:[#allocation5 + $0x2a4] ss:$16 sps:$4 sm:$0xff]   ;;  %v6494_v23 = vld [vmem:[#allocation5 + $0x2a0] ss:$16 sps:$4 sm:$0xff]   ;;  %v6570_v11 = vld [vmem:[#allocation5 + $0x28] ss:$16 sps:$4 sm:$0xff]  }
 0x146   : > { %1938 = vmatprep.subr.bf16.mxu0 %v6479_v13  ;;  %v6495_v24 = vld [vmem:[#allocation5 + $0xc4] ss:$16 sps:$4 sm:$0xff]   ;;  %v6499_v26 = vld [vmem:[#allocation5 + $0xc0] ss:$16 sps:$4 sm:$0xff]   ;;  %v6578_v13 = vld [vmem:[#allocation5 + $0x4c] ss:$16 sps:$4 sm:$0xff]  }
 0x147   : > { %v6497_v25 = vld [vmem:[#allocation5 + $0x2c4] ss:$16 sps:$4 sm:$0xff]   ;;  %v6500_v27 = vld [vmem:[#allocation5 + $0x2c0] ss:$16 sps:$4 sm:$0xff]  }
 0x148   : > { %1896 = vmatpush1.bf16.msra.mxu1 %v6481_v14  ;;  %v6501_v28 = vld [vmem:[#allocation5 + $0xe4] ss:$16 sps:$4 sm:$0xff]   ;;  %v6505_v30 = vld [vmem:[#allocation5 + $0xe0] ss:$16 sps:$4 sm:$0xff]  }
 0x149   : > { %1939 = vmatpush1.bf16.msra.mxu0 %v6482_v15  ;;  %1897 = vmatprep.subr.bf16.mxu1 %v6483_v16  ;;  %v6503_v29 = vld [vmem:[#allocation5 + $0x2e4] ss:$16 sps:$4 sm:$0xff]   ;;  %v6506_v31 = vld [vmem:[#allocation5 + $0x2e0] ss:$16 sps:$4 sm:$0xff]   ;;  %v6576_v15 = vld [vmem:[#allocation5 + $0x48] ss:$16 sps:$4 sm:$0xff]  }
 0x14a   : > { %1940 = vmatprep.subr.bf16.mxu0 %v6485_v17  ;;  %v6507_v32 = vld [vmem:[#allocation5 + $0x104] ss:$16 sps:$4 sm:$0xff]   ;;  %v6511_v34 = vld [vmem:[#allocation5 + $0x100] ss:$16 sps:$4 sm:$0xff]   ;;  %v6584_v17 = vld [vmem:[#allocation5 + $0x6c] ss:$16 sps:$4 sm:$0xff]  }
 0x14b   : > { %v6509_v33 = vld [vmem:[#allocation5 + $0x304] ss:$16 sps:$4 sm:$0xff]   ;;  %v6512_v35 = vld [vmem:[#allocation5 + $0x300] ss:$16 sps:$4 sm:$0xff]  }
 0x14c   : > { %1898 = vmatpush1.bf16.msra.mxu1 %v6487_v18  ;;  %v6513_v36 = vld [vmem:[#allocation5 + $0x124] ss:$16 sps:$4 sm:$0xff]   ;;  %v6517_v38 = vld [vmem:[#allocation5 + $0x120] ss:$16 sps:$4 sm:$0xff]  }
 0x14d   : > { %1941 = vmatpush1.bf16.msra.mxu0 %v6488_v19  ;;  %1899 = vmatprep.subr.bf16.mxu1 %v6489_v20  ;;  %v6515_v37 = vld [vmem:[#allocation5 + $0x324] ss:$16 sps:$4 sm:$0xff]   ;;  %v6518_v39 = vld [vmem:[#allocation5 + $0x320] ss:$16 sps:$4 sm:$0xff]   ;;  %v6582_v19 = vld [vmem:[#allocation5 + $0x68] ss:$16 sps:$4 sm:$0xff]  }
 0x14e   : > { %1942 = vmatprep.subr.bf16.mxu0 %v6491_v21  ;;  %v6519_v40 = vld [vmem:[#allocation5 + $0x144] ss:$16 sps:$4 sm:$0xff]   ;;  %v6523_v42 = vld [vmem:[#allocation5 + $0x140] ss:$16 sps:$4 sm:$0xff]   ;;  %v6590_v21 = vld [vmem:[#allocation5 + $0x8c] ss:$16 sps:$4 sm:$0xff]  }
 0x14f   : > { %v6521_v41 = vld [vmem:[#allocation5 + $0x344] ss:$16 sps:$4 sm:$0xff]   ;;  %v6524_v43 = vld [vmem:[#allocation5 + $0x340] ss:$16 sps:$4 sm:$0xff]  }
 0x150   : > { %1900 = vmatpush1.bf16.msra.mxu1 %v6493_v22  ;;  %v6525_v44 = vld [vmem:[#allocation5 + $0x164] ss:$16 sps:$4 sm:$0xff]   ;;  %v6529_v46 = vld [vmem:[#allocation5 + $0x160] ss:$16 sps:$4 sm:$0xff]  }
 0x151   : > { %1943 = vmatpush1.bf16.msra.mxu0 %v6494_v23  ;;  %1901 = vmatprep.subr.bf16.mxu1 %v6495_v24  ;;  %v6527_v45 = vld [vmem:[#allocation5 + $0x364] ss:$16 sps:$4 sm:$0xff]   ;;  %v6530_v47 = vld [vmem:[#allocation5 + $0x360] ss:$16 sps:$4 sm:$0xff]   ;;  %v6588_v23 = vld [vmem:[#allocation5 + $0x88] ss:$16 sps:$4 sm:$0xff]  }
 0x152   : > { %1944 = vmatprep.subr.bf16.mxu0 %v6497_v25  ;;  %v6531_v48 = vld [vmem:[#allocation5 + $0x184] ss:$16 sps:$4 sm:$0xff]   ;;  %v6535_v52 = vld [vmem:[#allocation5 + $0x180] ss:$16 sps:$4 sm:$0xff]   ;;  %v6596_v25 = vld [vmem:[#allocation5 + $0xac] ss:$16 sps:$4 sm:$0xff]  }
 0x153   : > { %v6557_v49 = vld [vmem:[%s8118_s22 + $0x4] ss:$24 sps:$4 sm:$0xff]   ;;  %v6536_v53 = vld [vmem:[#allocation5 + $0x380] ss:$16 sps:$4 sm:$0xff]  }
 0x154   : > { %1902 = vmatpush1.bf16.msra.mxu1 %v6499_v26  ;;  %v6533_v50 = vld [vmem:[#allocation5 + $0x384] ss:$16 sps:$4 sm:$0xff]   ;;  %1921 = vmatprep.mubr.bf16.mxu1 %v6557_v49  ;;  %v6541_v56 = vld [vmem:[#allocation5 + $0x1a0] ss:$16 sps:$4 sm:$0xff]  }
 0x155   : > { %1945 = vmatpush1.bf16.msra.mxu0 %v6500_v27  ;;  %1903 = vmatprep.subr.bf16.mxu1 %v6501_v28  ;;  %v8146_v51 = vld [vmem:[%s8118_s22 + $0xc] ss:$24 sps:$4 sm:$0xff]   ;;  %v6542_v57 = vld [vmem:[#allocation5 + $0x3a0] ss:$16 sps:$4 sm:$0xff]   ;;  %v6594_v27 = vld [vmem:[#allocation5 + $0xa8] ss:$16 sps:$4 sm:$0xff]  }
 0x156   : > { %1946 = vmatprep.subr.bf16.mxu0 %v6503_v29  ;;  %1964 = vmatprep.mubr.bf16.mxu0 %v8146_v51  ;;  %v6537_v54 = vld [vmem:[#allocation5 + $0x1a4] ss:$16 sps:$4 sm:$0xff]   ;;  %v6547_v60 = vld [vmem:[#allocation5 + $0x1c0] ss:$16 sps:$4 sm:$0xff]   ;;  %v6602_v29 = vld [vmem:[#allocation5 + $0xcc] ss:$16 sps:$4 sm:$0xff]  }
 0x157   : > { %v6539_v55 = vld [vmem:[#allocation5 + $0x3a4] ss:$16 sps:$4 sm:$0xff]   ;;  %v6548_v61 = vld [vmem:[#allocation5 + $0x3c0] ss:$16 sps:$4 sm:$0xff]  }
 0x158   : > { %1904 = vmatpush1.bf16.msra.mxu1 %v6505_v30  ;;  %v6543_v58 = vld [vmem:[#allocation5 + $0x1c4] ss:$16 sps:$4 sm:$0xff]   ;;  %v6553_v0 = vld [vmem:[#allocation5 + $0x1e0] ss:$16 sps:$4 sm:$0xff]  }
 0x159   : > { %1947 = vmatpush1.bf16.msra.mxu0 %v6506_v31  ;;  %1905 = vmatprep.subr.bf16.mxu1 %v6507_v32  ;;  %v6545_v59 = vld [vmem:[#allocation5 + $0x3c4] ss:$16 sps:$4 sm:$0xff]   ;;  %v6554_v1 = vld [vmem:[#allocation5 + $0x3e0] ss:$16 sps:$4 sm:$0xff]   ;;  %v6600_v31 = vld [vmem:[#allocation5 + $0xc8] ss:$16 sps:$4 sm:$0xff]  }
 0x15a   : > { %1948 = vmatprep.subr.bf16.mxu0 %v6509_v33  ;;  %v6549_v62 = vld [vmem:[#allocation5 + $0x1e4] ss:$16 sps:$4 sm:$0xff]   ;;  %v8150_v4 = vld [vmem:[%s8118_s22] ss:$24 sps:$4 sm:$0xff]   ;;  %v6608_v33 = vld [vmem:[#allocation5 + $0xec] ss:$16 sps:$4 sm:$0xff]  }
 0x15b   : > { %v6551_v63 = vld [vmem:[#allocation5 + $0x3e4] ss:$16 sps:$4 sm:$0xff]   ;;  %v6558_v5 = vld [vmem:[%s8118_s22 + $0x8] ss:$24 sps:$4 sm:$0xff]  }
 0x15c   : > { %1906 = vmatpush1.bf16.msra.mxu1 %v6511_v34  ;;  %v6563_v2 = vld [vmem:[#allocation5 + $0x404] ss:$16 sps:$4 sm:$0xff]   ;;  %v6561_v6 = vld [vmem:[#allocation5 + $0x400] ss:$16 sps:$4 sm:$0xff]  }
 0x15d   : > { %1949 = vmatpush1.bf16.msra.mxu0 %v6512_v35  ;;  %1907 = vmatprep.subr.bf16.mxu1 %v6513_v36  ;;  %v6569_v8 = vld [vmem:[#allocation5 + $0x424] ss:$16 sps:$4 sm:$0xff]   ;;  %v6567_v10 = vld [vmem:[#allocation5 + $0x420] ss:$16 sps:$4 sm:$0xff]   ;;  %v6606_v36 = vld [vmem:[#allocation5 + $0xe8] ss:$16 sps:$4 sm:$0xff]  }
 0x15e   : > { %1950 = vmatprep.subr.bf16.mxu0 %v6515_v37  ;;  %v6575_v12 = vld [vmem:[#allocation5 + $0x444] ss:$16 sps:$4 sm:$0xff]   ;;  %v6573_v14 = vld [vmem:[#allocation5 + $0x440] ss:$16 sps:$4 sm:$0xff]  }
 0x15f   : > { %v6581_v16 = vld [vmem:[#allocation5 + $0x464] ss:$16 sps:$4 sm:$0xff]   ;;  %v6579_v18 = vld [vmem:[#allocation5 + $0x460] ss:$16 sps:$4 sm:$0xff]  }
 0x160   : > { %1908 = vmatpush1.bf16.msra.mxu1 %v6517_v38  ;;  %v6587_v20 = vld [vmem:[#allocation5 + $0x484] ss:$16 sps:$4 sm:$0xff]   ;;  %v6585_v22 = vld [vmem:[#allocation5 + $0x480] ss:$16 sps:$4 sm:$0xff]   ;;  %v6614_v38 = vld [vmem:[#allocation5 + $0x10c] ss:$16 sps:$4 sm:$0xff]  }
 0x161   : > { %1951 = vmatpush1.bf16.msra.mxu0 %v6518_v39  ;;  %1909 = vmatprep.subr.bf16.mxu1 %v6519_v40  ;;  %v6593_v24 = vld [vmem:[#allocation5 + $0x4a4] ss:$16 sps:$4 sm:$0xff]   ;;  %v6591_v26 = vld [vmem:[#allocation5 + $0x4a0] ss:$16 sps:$4 sm:$0xff]   ;;  %v6612_v40 = vld [vmem:[#allocation5 + $0x108] ss:$16 sps:$4 sm:$0xff]  }
 0x162   : > { %1952 = vmatprep.subr.bf16.mxu0 %v6521_v41  ;;  %v6599_v28 = vld [vmem:[#allocation5 + $0x4c4] ss:$16 sps:$4 sm:$0xff]   ;;  %v6597_v30 = vld [vmem:[#allocation5 + $0x4c0] ss:$16 sps:$4 sm:$0xff]  }
 0x163   : > { %v6605_v32 = vld [vmem:[#allocation5 + $0x4e4] ss:$16 sps:$4 sm:$0xff]   ;;  %v6603_v35 = vld [vmem:[#allocation5 + $0x4e0] ss:$16 sps:$4 sm:$0xff]  }
 0x164   : > { %1910 = vmatpush1.bf16.msra.mxu1 %v6523_v42  ;;  %v8155_v34 = vld [vmem:[%s8118_s22 + $0x14] ss:$24 sps:$4 sm:$0xff]   ;;  %v6609_v39 = vld [vmem:[#allocation5 + $0x500] ss:$16 sps:$4 sm:$0xff]  }
 0x165   : > { %1953 = vmatpush1.bf16.msra.mxu0 %v6524_v43  ;;  %1911 = vmatprep.subr.bf16.mxu1 %v6525_v44  ;;  %v6611_v37 = vld [vmem:[#allocation5 + $0x504] ss:$16 sps:$4 sm:$0xff]   ;;  %v6620_v42 = vld [vmem:[#allocation5 + $0x12c] ss:$16 sps:$4 sm:$0xff]   ;;  %v6615_v43 = vld [vmem:[#allocation5 + $0x520] ss:$16 sps:$4 sm:$0xff]  }
 0x166   : > { %1954 = vmatprep.subr.bf16.mxu0 %v6527_v45  ;;  %v6617_v41 = vld [vmem:[#allocation5 + $0x524] ss:$16 sps:$4 sm:$0xff]   ;;  %v6618_v44 = vld [vmem:[#allocation5 + $0x128] ss:$16 sps:$4 sm:$0xff]  }
 0x167   : > { %v6623_v45 = vld [vmem:[#allocation5 + $0x544] ss:$16 sps:$4 sm:$0xff]  }
 0x168   : > { %1912 = vmatpush1.bf16.msra.mxu1 %v6529_v46  ;;  %v6626_v46 = vld [vmem:[#allocation5 + $0x14c] ss:$16 sps:$4 sm:$0xff]  }
 0x169   : > { %1955 = vmatpush1.bf16.msra.mxu0 %v6530_v47  ;;  %1913 = vmatprep.subr.bf16.mxu1 %v6531_v48  ;;  %v6621_v47 = vld [vmem:[#allocation5 + $0x540] ss:$16 sps:$4 sm:$0xff]   ;;  %v6624_v48 = vld [vmem:[#allocation5 + $0x148] ss:$16 sps:$4 sm:$0xff]  }
 0x16a   : > { %1956 = vmatprep.subr.bf16.mxu0 %v6533_v50  ;;  %v6632_v50 = vld [vmem:[#allocation5 + $0x16c] ss:$16 sps:$4 sm:$0xff]  }
 0x16c   : > { %1914 = vmatpush1.bf16.msra.mxu1 %v6535_v52  ;;  %v6627_v52 = vld [vmem:[#allocation5 + $0x560] ss:$16 sps:$4 sm:$0xff]  }
 0x16d   : > { %1957 = vmatpush1.bf16.msra.mxu0 %v6536_v53  ;;  %1915 = vmatprep.subr.bf16.mxu1 %v6537_v54  ;;  %v6630_v53 = vld [vmem:[#allocation5 + $0x168] ss:$16 sps:$4 sm:$0xff]   ;;  %v6635_v54 = vld [vmem:[#allocation5 + $0x584] ss:$16 sps:$4 sm:$0xff]  }
 0x16e   : > { %1958 = vmatprep.subr.bf16.mxu0 %v6539_v55  ;;  %v6638_v55 = vld [vmem:[#allocation5 + $0x18c] ss:$16 sps:$4 sm:$0xff]  }
 0x170   : > { %1916 = vmatpush1.bf16.msra.mxu1 %v6541_v56  ;;  %v6633_v56 = vld [vmem:[#allocation5 + $0x580] ss:$16 sps:$4 sm:$0xff]  }
 0x171   : > { %1959 = vmatpush1.bf16.msra.mxu0 %v6542_v57  ;;  %1917 = vmatprep.subr.bf16.mxu1 %v6543_v58  ;;  %v6636_v57 = vld [vmem:[#allocation5 + $0x188] ss:$16 sps:$4 sm:$0xff]   ;;  %v6641_v58 = vld [vmem:[#allocation5 + $0x5a4] ss:$16 sps:$4 sm:$0xff]  }
 0x172   : > { %1960 = vmatprep.subr.bf16.mxu0 %v6545_v59  ;;  %v6644_v59 = vld [vmem:[#allocation5 + $0x1ac] ss:$16 sps:$4 sm:$0xff]  }
 0x174   : > { %1918 = vmatpush1.bf16.msra.mxu1 %v6547_v60  ;;  %v6639_v60 = vld [vmem:[#allocation5 + $0x5a0] ss:$16 sps:$4 sm:$0xff]  }
 0x175   : > { %1961 = vmatpush1.bf16.msra.mxu0 %v6548_v61  ;;  %1919 = vmatprep.subr.bf16.mxu1 %v6549_v62  ;;  %v6642_v61 = vld [vmem:[#allocation5 + $0x1a8] ss:$16 sps:$4 sm:$0xff]   ;;  %v6647_v62 = vld [vmem:[#allocation5 + $0x5c4] ss:$16 sps:$4 sm:$0xff]  }
 0x176   : > { %1962 = vmatprep.subr.bf16.mxu0 %v6551_v63  ;;  %v6650_v63 = vld [vmem:[#allocation5 + $0x1cc] ss:$16 sps:$4 sm:$0xff]  }
 0x178   : > { %1920 = vmatpush1.bf16.msra.mxu1 %v6553_v0  ;;  %v6645_v0 = vld [vmem:[#allocation5 + $0x5c0] ss:$16 sps:$4 sm:$0xff]  }
 0x179   : > { %1963 = vmatpush1.bf16.msra.mxu0 %v6554_v1  ;;  %2018 = vmatprep.subr.bf16.mxu1 %v6566_v3  ;;  %v6648_v1 = vld [vmem:[#allocation5 + $0x1c8] ss:$16 sps:$4 sm:$0xff]   ;;  %v6656_v3 = vld [vmem:[#allocation5 + $0x1ec] ss:$16 sps:$4 sm:$0xff]  }
 0x17a   : > { %1975 = vmatprep.subr.bf16.mxu0 %v6563_v2  ;;  %v6653_v2 = vld [vmem:[#allocation5 + $0x5e4] ss:$16 sps:$4 sm:$0xff]  }
 0x17b   : > { %1922 = vmatmul.mubr.bf16.vlgmr.msra.gmra.mrb[0].mxu1 %v8150_v4 }
 0x17c   : > { %1965 = vmatmul.mubr.bf16.vlgmr.msra.gmra.mrb[0].mxu0 %v6558_v5  ;;  %2019 = vmatpush1.bf16.msra.mxu1 %v6564_v7  ;;  %v6651_v5 = vld [vmem:[#allocation5 + $0x5e0] ss:$16 sps:$4 sm:$0xff]   ;;  %v6662_v7 = vld [vmem:[#allocation5 + $0x20c] ss:$16 sps:$4 sm:$0xff]  }
 0x17d   : > { %1976 = vmatpush1.bf16.msra.mxu0 %v6561_v6  ;;  %2020 = vmatprep.subr.bf16.mxu1 %v6572_v9  ;;  %v6654_v6 = vld [vmem:[#allocation5 + $0x1e8] ss:$16 sps:$4 sm:$0xff]  }
 0x17e   : > { %1977 = vmatprep.subr.bf16.mxu0 %v6569_v8  ;;  %2050 = vmatprep.mubr.bf16.mxu1 %v6557_v49  ;;  %v6629_v49 = vld [vmem:[#allocation5 + $0x564] ss:$16 sps:$4 sm:$0xff]   ;;  %v6657_v8 = vld [vmem:[%s8118_s22 + $0x10] ss:$24 sps:$4 sm:$0xff]  }
 0x17f   : > { %2007 = vmatprep.mubr.bf16.mxu0 %v8155_v34  ;;  %v6660_v9 = vld [vmem:[#allocation5 + $0x208] ss:$16 sps:$4 sm:$0xff]  }
 0x180   : > { %2021 = vmatpush1.bf16.msra.mxu1 %v6570_v11  ;;  %v6663_v11 = vld [vmem:[#allocation5 + $0x228] ss:$16 sps:$4 sm:$0xff]  }
 0x181   : > { %1978 = vmatpush1.bf16.msra.mxu0 %v6567_v10  ;;  %2022 = vmatprep.subr.bf16.mxu1 %v6578_v13  ;;  %v6665_v10 = vld [vmem:[#allocation5 + $0x22c] ss:$16 sps:$4 sm:$0xff]   ;;  %v6666_v13 = vld [vmem:[#allocation5 + $0x248] ss:$16 sps:$4 sm:$0xff]  }
 0x182   : > { %1979 = vmatprep.subr.bf16.mxu0 %v6575_v12  ;;  %v6668_v12 = vld [vmem:[#allocation5 + $0x24c] ss:$16 sps:$4 sm:$0xff]  }
 0x184   : > { %2023 = vmatpush1.bf16.msra.mxu1 %v6576_v15  ;;  %v6669_v15 = vld [vmem:[#allocation5 + $0x268] ss:$16 sps:$4 sm:$0xff]  }
 0x185   : > { %1980 = vmatpush1.bf16.msra.mxu0 %v6573_v14  ;;  %2024 = vmatprep.subr.bf16.mxu1 %v6584_v17  ;;  %v6671_v14 = vld [vmem:[#allocation5 + $0x26c] ss:$16 sps:$4 sm:$0xff]   ;;  %v6672_v17 = vld [vmem:[#allocation5 + $0x288] ss:$16 sps:$4 sm:$0xff]  }
 0x186   : > { %1981 = vmatprep.subr.bf16.mxu0 %v6581_v16  ;;  %v6674_v16 = vld [vmem:[#allocation5 + $0x28c] ss:$16 sps:$4 sm:$0xff]  }
 0x188   : > { %2025 = vmatpush1.bf16.msra.mxu1 %v6582_v19  ;;  %v6675_v19 = vld [vmem:[#allocation5 + $0x2a8] ss:$16 sps:$4 sm:$0xff]  }
 0x189   : > { %1982 = vmatpush1.bf16.msra.mxu0 %v6579_v18  ;;  %2026 = vmatprep.subr.bf16.mxu1 %v6590_v21  ;;  %v6677_v18 = vld [vmem:[#allocation5 + $0x2ac] ss:$16 sps:$4 sm:$0xff]   ;;  %v6756_v21 = vld [vmem:[#allocation7] ss:$8 sps:$4 sm:$0xff]  }
 0x18a   : > { %1983 = vmatprep.subr.bf16.mxu0 %v6587_v20  ;;  %v6678_v20 = vld [vmem:[#allocation5 + $0x2c8] ss:$16 sps:$4 sm:$0xff]  }
 0x18c   : > { %2027 = vmatpush1.bf16.msra.mxu1 %v6588_v23  ;;  %v6761_v23 = vld [vmem:[#allocation7 + $0x14] ss:$8 sps:$4 sm:$0xff]  }
 0x18d   : > { %1984 = vmatpush1.bf16.msra.mxu0 %v6585_v22  ;;  %2028 = vmatprep.subr.bf16.mxu1 %v6596_v25  ;;  %v6758_v22 = vld [vmem:[#allocation7 + $0x4] ss:$8 sps:$4 sm:$0xff]   ;;  %v6759_v25 = vld [vmem:[#allocation7 + $0x10] ss:$8 sps:$4 sm:$0xff]  }
 0x18e   : > { %1985 = vmatprep.subr.bf16.mxu0 %v6593_v24  ;;  %v6681_v24 = vld [vmem:[#allocation5 + $0x2e8] ss:$16 sps:$4 sm:$0xff]  }
 0x190   : > { %2029 = vmatpush1.bf16.msra.mxu1 %v6594_v27  ;;  %v6764_v27 = vld [vmem:[#allocation7 + $0x24] ss:$8 sps:$4 sm:$0xff]  }
 0x191   : > { %1986 = vmatpush1.bf16.msra.mxu0 %v6591_v26  ;;  %2030 = vmatprep.subr.bf16.mxu1 %v6602_v29  ;;  %v6686_v26 = vld [vmem:[#allocation5 + $0x30c] ss:$16 sps:$4 sm:$0xff]   ;;  %v6762_v29 = vld [vmem:[#allocation7 + $0x20] ss:$8 sps:$4 sm:$0xff]  }
 0x192   : > { %1987 = vmatprep.subr.bf16.mxu0 %v6599_v28  ;;  %v6684_v28 = vld [vmem:[#allocation5 + $0x308] ss:$16 sps:$4 sm:$0xff]  }
 0x194   : > { %2031 = vmatpush1.bf16.msra.mxu1 %v6600_v31  ;;  %v6767_v31 = vld [vmem:[#allocation7 + $0x34] ss:$8 sps:$4 sm:$0xff]  }
 0x195   : > { %1988 = vmatpush1.bf16.msra.mxu0 %v6597_v30  ;;  %2032 = vmatprep.subr.bf16.mxu1 %v6608_v33  ;;  %v6689_v30 = vld [vmem:[#allocation5 + $0x32c] ss:$16 sps:$4 sm:$0xff]   ;;  %v6765_v33 = vld [vmem:[#allocation7 + $0x30] ss:$8 sps:$4 sm:$0xff]  }
 0x196   : > { %1989 = vmatprep.subr.bf16.mxu0 %v6605_v32  ;;  %v6687_v32 = vld [vmem:[#allocation5 + $0x328] ss:$16 sps:$4 sm:$0xff]  }
 0x198   : > { %2033 = vmatpush1.bf16.msra.mxu1 %v6606_v36  ;;  %v6770_v36 = vld [vmem:[#allocation7 + $0x44] ss:$8 sps:$4 sm:$0xff]  }
 0x199   : > { %1990 = vmatpush1.bf16.msra.mxu0 %v6603_v35  ;;  %2034 = vmatprep.subr.bf16.mxu1 %v6614_v38  ;;  %v6692_v35 = vld [vmem:[#allocation5 + $0x34c] ss:$16 sps:$4 sm:$0xff]   ;;  %v6768_v38 = vld [vmem:[#allocation7 + $0x40] ss:$8 sps:$4 sm:$0xff]  }
 0x19a   : > { %1991 = vmatprep.subr.bf16.mxu0 %v6611_v37  ;;  %v6690_v37 = vld [vmem:[#allocation5 + $0x348] ss:$16 sps:$4 sm:$0xff]  }
 0x19c   : > { %2035 = vmatpush1.bf16.msra.mxu1 %v6612_v40  ;;  %v6773_v40 = vld [vmem:[#allocation7 + $0x54] ss:$8 sps:$4 sm:$0xff]  }
 0x19d   : > { %1992 = vmatpush1.bf16.msra.mxu0 %v6609_v39  ;;  %2036 = vmatprep.subr.bf16.mxu1 %v6620_v42  ;;  %v6695_v39 = vld [vmem:[#allocation5 + $0x36c] ss:$16 sps:$4 sm:$0xff]   ;;  %v6771_v42 = vld [vmem:[#allocation7 + $0x50] ss:$8 sps:$4 sm:$0xff]  }
 0x19e   : > { %1993 = vmatprep.subr.bf16.mxu0 %v6617_v41  ;;  %v6693_v41 = vld [vmem:[#allocation5 + $0x368] ss:$16 sps:$4 sm:$0xff]  }
 0x1a0   : > { %2037 = vmatpush1.bf16.msra.mxu1 %v6618_v44  ;;  %v6776_v44 = vld [vmem:[#allocation7 + $0x64] ss:$8 sps:$4 sm:$0xff]  }
 0x1a1   : > { %1994 = vmatpush1.bf16.msra.mxu0 %v6615_v43  ;;  %2038 = vmatprep.subr.bf16.mxu1 %v6626_v46  ;;  %v6698_v43 = vld [vmem:[#allocation5 + $0x38c] ss:$16 sps:$4 sm:$0xff]   ;;  %v6774_v46 = vld [vmem:[#allocation7 + $0x60] ss:$8 sps:$4 sm:$0xff]  }
 0x1a2   : > { %1995 = vmatprep.subr.bf16.mxu0 %v6623_v45  ;;  %v6696_v45 = vld [vmem:[#allocation5 + $0x388] ss:$16 sps:$4 sm:$0xff]  }
 0x1a4   : > { %2039 = vmatpush1.bf16.msra.mxu1 %v6624_v48  ;;  %v6779_v48 = vld [vmem:[#allocation7 + $0x74] ss:$8 sps:$4 sm:$0xff]  }
 0x1a5   : > { %1996 = vmatpush1.bf16.msra.mxu0 %v6621_v47  ;;  %2040 = vmatprep.subr.bf16.mxu1 %v6632_v50  ;;  %v6701_v47 = vld [vmem:[#allocation5 + $0x3ac] ss:$16 sps:$4 sm:$0xff]   ;;  %v6777_v50 = vld [vmem:[#allocation7 + $0x70] ss:$8 sps:$4 sm:$0xff]  }
 0x1a6   : > { %1997 = vmatprep.subr.bf16.mxu0 %v6629_v49  ;;  %v6699_v49 = vld [vmem:[#allocation5 + $0x3a8] ss:$16 sps:$4 sm:$0xff]  }
 0x1a8   : > { %2041 = vmatpush1.bf16.msra.mxu1 %v6630_v53  ;;  %v6782_v53 = vld [vmem:[#allocation7 + $0x84] ss:$8 sps:$4 sm:$0xff]  }
 0x1a9   : > { %1998 = vmatpush1.bf16.msra.mxu0 %v6627_v52  ;;  %2042 = vmatprep.subr.bf16.mxu1 %v6638_v55  ;;  %v6704_v52 = vld [vmem:[#allocation5 + $0x3cc] ss:$16 sps:$4 sm:$0xff]   ;;  %v6780_v55 = vld [vmem:[#allocation7 + $0x80] ss:$8 sps:$4 sm:$0xff]  }
 0x1aa   : > { %1999 = vmatprep.subr.bf16.mxu0 %v6635_v54  ;;  %v6702_v54 = vld [vmem:[#allocation5 + $0x3c8] ss:$16 sps:$4 sm:$0xff]  }
 0x1ac   : > { %2043 = vmatpush1.bf16.msra.mxu1 %v6636_v57  ;;  %v6785_v57 = vld [vmem:[#allocation7 + $0x94] ss:$8 sps:$4 sm:$0xff]  }
 0x1ad   : > { %2000 = vmatpush1.bf16.msra.mxu0 %v6633_v56  ;;  %2044 = vmatprep.subr.bf16.mxu1 %v6644_v59  ;;  %v6707_v56 = vld [vmem:[#allocation5 + $0x3ec] ss:$16 sps:$4 sm:$0xff]   ;;  %v6783_v59 = vld [vmem:[#allocation7 + $0x90] ss:$8 sps:$4 sm:$0xff]  }
 0x1ae   : > { %2001 = vmatprep.subr.bf16.mxu0 %v6641_v58  ;;  %v6705_v58 = vld [vmem:[#allocation5 + $0x3e8] ss:$16 sps:$4 sm:$0xff]  }
 0x1b0   : > { %2045 = vmatpush1.bf16.msra.mxu1 %v6642_v61  ;;  %v6788_v61 = vld [vmem:[#allocation7 + $0xa4] ss:$8 sps:$4 sm:$0xff]  }
 0x1b1   : > { %2002 = vmatpush1.bf16.msra.mxu0 %v6639_v60  ;;  %2046 = vmatprep.subr.bf16.mxu1 %v6650_v63  ;;  %v6710_v60 = vld [vmem:[#allocation5 + $0x40c] ss:$16 sps:$4 sm:$0xff]  }
 0x1b2   : > { %2003 = vmatprep.subr.bf16.mxu0 %v6647_v62  ;;  %v6708_v62 = vld [vmem:[#allocation5 + $0x408] ss:$16 sps:$4 sm:$0xff]   ;;  %v6713_v63 = vld [vmem:[#allocation5 + $0x42c] ss:$16 sps:$4 sm:$0xff]  }
 0x1b4   : > { %2047 = vmatpush1.bf16.msra.mxu1 %v6648_v1  ;;  %v6791_v1 = vld [vmem:[#allocation7 + $0xb4] ss:$8 sps:$4 sm:$0xff]  }
 0x1b5   : > { %2004 = vmatpush1.bf16.msra.mxu0 %v6645_v0  ;;  %2048 = vmatprep.subr.bf16.mxu1 %v6656_v3  ;;  %v6786_v0 = vld [vmem:[#allocation7 + $0xa0] ss:$8 sps:$4 sm:$0xff]  }
 0x1b6   : > { %2005 = vmatprep.subr.bf16.mxu0 %v6653_v2  ;;  %v6711_v2 = vld [vmem:[#allocation5 + $0x428] ss:$16 sps:$4 sm:$0xff]  }
 0x1b7   : > { %v7305_v3 = vld [vmem:[%s8118_s22 + $0x8] ss:$24 sps:$4 sm:$0xff]  }
 0x1b8   : > { %2049 = vmatpush1.bf16.msra.mxu1 %v6654_v6  ;;  %v6789_v6 = vld [vmem:[#allocation7 + $0xb0] ss:$8 sps:$4 sm:$0xff]  }
 0x1b9   : > { %2006 = vmatpush1.bf16.msra.mxu0 %v6651_v5  ;;  %2061 = vmatprep.subr.bf16.mxu1 %v6662_v7  ;;  %v6716_v5 = vld [vmem:[#allocation5 + $0x44c] ss:$16 sps:$4 sm:$0xff]  }
 0x1ba   : > { %2597 = vmatprep.subr.bf16.mxu0 %v6758_v22  ;;  %v6794_v7 = vld [vmem:[#allocation7 + $0xc4] ss:$8 sps:$4 sm:$0xff]   ;;  %v6803_v22 = vld [vmem:[#allocation7 + $0xf4] ss:$8 sps:$4 sm:$0xff]  }
 0x1bb   : > { %2051 = vmatmul.mubr.bf16.vlgmr.msra.gmra.mrb[4].mxu1 %v8150_v4  ;;  %v6680_v4 = vld [vmem:[#allocation5 + $0x2cc] ss:$16 sps:$4 sm:$0xff]  }
 0x1bc   : > { %2008 = vmatmul.mubr.bf16.vlgmr.msra.gmra.mrb[0].mxu0 %v6657_v8  ;;  %2062 = vmatpush1.bf16.msra.mxu1 %v6660_v9  ;;  %v6714_v8 = vld [vmem:[#allocation5 + $0x448] ss:$16 sps:$4 sm:$0xff]   ;;  %v6719_v9 = vld [vmem:[#allocation5 + $0x46c] ss:$16 sps:$4 sm:$0xff]  }
 0x1bd   : > { %2093 = vmatprep.mubr.bf16.mxu1 %v8146_v51  ;;  %2063 = vmatprep.subr.bf16.mxu1 %v6665_v10  ;;  %v6683_v51 = vld [vmem:[#allocation5 + $0x2ec] ss:$16 sps:$4 sm:$0xff]   ;;  %v6792_v10 = vld [vmem:[#allocation7 + $0xc0] ss:$8 sps:$4 sm:$0xff]  }
 0x1be   : > { %2598 = vmatpush1.bf16.msra.mxu0 %v6756_v21  ;;  %v6734_v21 = vld [vmem:[#allocation5 + $0x50c] ss:$16 sps:$4 sm:$0xff]  }
 0x1bf   : > { %2599 = vmatprep.subr.bf16.mxu0 %v6761_v23  ;;  %v6732_v23 = vld [vmem:[#allocation5 + $0x508] ss:$16 sps:$4 sm:$0xff]  }
 0x1c0   : > { %2064 = vmatpush1.bf16.msra.mxu1 %v6663_v11  ;;  %v6717_v11 = vld [vmem:[#allocation5 + $0x468] ss:$16 sps:$4 sm:$0xff]  }
 0x1c1   : > { %2065 = vmatprep.subr.bf16.mxu1 %v6668_v12  ;;  %v6722_v12 = vld [vmem:[#allocation5 + $0x48c] ss:$16 sps:$4 sm:$0xff]  }
 0x1c2   : > { %2600 = vmatpush1.bf16.msra.mxu0 %v6759_v25  ;;  %v6737_v25 = vld [vmem:[#allocation5 + $0x52c] ss:$16 sps:$4 sm:$0xff]  }
 0x1c3   : > { %2601 = vmatprep.subr.bf16.mxu0 %v6764_v27  ;;  %v6735_v27 = vld [vmem:[#allocation5 + $0x528] ss:$16 sps:$4 sm:$0xff]  }
 0x1c4   : > { %2066 = vmatpush1.bf16.msra.mxu1 %v6666_v13  ;;  %v6720_v13 = vld [vmem:[#allocation5 + $0x488] ss:$16 sps:$4 sm:$0xff]  }
 0x1c5   : > { %2067 = vmatprep.subr.bf16.mxu1 %v6671_v14  ;;  %v6725_v14 = vld [vmem:[#allocation5 + $0x4ac] ss:$16 sps:$4 sm:$0xff]  }
 0x1c6   : > { %2602 = vmatpush1.bf16.msra.mxu0 %v6762_v29  ;;  %v6738_v29 = vld [vmem:[#allocation5 + $0x548] ss:$16 sps:$4 sm:$0xff]  }
 0x1c7   : > { %2603 = vmatprep.subr.bf16.mxu0 %v6767_v31  ;;  %v6741_v31 = vld [vmem:[#allocation5 + $0x568] ss:$16 sps:$4 sm:$0xff]  }
 0x1c8   : > { %2068 = vmatpush1.bf16.msra.mxu1 %v6669_v15  ;;  %v6728_v15 = vld [vmem:[#allocation5 + $0x4cc] ss:$16 sps:$4 sm:$0xff]  }
 0x1c9   : > { %2069 = vmatprep.subr.bf16.mxu1 %v6674_v16  ;;  %v6797_v16 = vld [vmem:[#allocation7 + $0xd4] ss:$8 sps:$4 sm:$0xff]  }
 0x1ca   : > { %2604 = vmatpush1.bf16.msra.mxu0 %v6765_v33  ;;  %v6744_v33 = vld [vmem:[#allocation5 + $0x588] ss:$16 sps:$4 sm:$0xff]  }
 0x1cb   : > { %2605 = vmatprep.subr.bf16.mxu0 %v6770_v36  ;;  %v6747_v36 = vld [vmem:[#allocation5 + $0x5a8] ss:$16 sps:$4 sm:$0xff]  }
 0x1cc   : > { %2070 = vmatpush1.bf16.msra.mxu1 %v6672_v17  ;;  %v6726_v17 = vld [vmem:[#allocation5 + $0x4c8] ss:$16 sps:$4 sm:$0xff]  }
 0x1cd   : > { %2071 = vmatprep.subr.bf16.mxu1 %v6677_v18  ;;  %v6795_v18 = vld [vmem:[#allocation7 + $0xd0] ss:$8 sps:$4 sm:$0xff]  }
 0x1ce   : > { %2606 = vmatpush1.bf16.msra.mxu0 %v6768_v38  ;;  %v6750_v38 = vld [vmem:[#allocation5 + $0x5c8] ss:$16 sps:$4 sm:$0xff]  }
 0x1cf   : > { %2607 = vmatprep.subr.bf16.mxu0 %v6773_v40  ;;  %v6753_v40 = vld [vmem:[#allocation5 + $0x5e8] ss:$16 sps:$4 sm:$0xff]  }
 0x1d0   : > { %2072 = vmatpush1.bf16.msra.mxu1 %v6675_v19  ;;  %v6731_v19 = vld [vmem:[#allocation5 + $0x4ec] ss:$16 sps:$4 sm:$0xff]  }
 0x1d1   : > { %2073 = vmatprep.subr.bf16.mxu1 %v6680_v4  ;;  %v6800_v4 = vld [vmem:[#allocation7 + $0xe4] ss:$8 sps:$4 sm:$0xff]  }
 0x1d2   : > { %2608 = vmatpush1.bf16.msra.mxu0 %v6771_v42 }
 0x1d3   : > { %2609 = vmatprep.subr.bf16.mxu0 %v6776_v44 }
 0x1d4   : > { %2074 = vmatpush1.bf16.msra.mxu1 %v6678_v20  ;;  %v6729_v20 = vld [vmem:[#allocation5 + $0x4e8] ss:$16 sps:$4 sm:$0xff]  }
 0x1d5   : > { %2075 = vmatprep.subr.bf16.mxu1 %v6683_v51  ;;  %v6798_v51 = vld [vmem:[#allocation7 + $0xe0] ss:$8 sps:$4 sm:$0xff]  }
 0x1d6   : > { %2610 = vmatpush1.bf16.msra.mxu0 %v6774_v46  ;;  %v7695_v46 = vmov 1966171168  }
 0x1d7   : > { %2611 = vmatprep.subr.bf16.mxu0 %v6779_v48  ;;  %v2163_v48 = vlaneseq }
 0x1d8   : > { %2076 = vmatpush1.bf16.msra.mxu1 %v6681_v24  ;;  %v6801_v24 = vld [vmem:[#allocation7 + $0xf0] ss:$8 sps:$4 sm:$0xff]  }
 0x1d9   : > { %2077 = vmatprep.subr.bf16.mxu1 %v6686_v26  ;;  %v6806_v26 = vld [vmem:[#allocation7 + $0x104] ss:$8 sps:$4 sm:$0xff]  }
 0x1da   : > { %2612 = vmatpush1.bf16.msra.mxu0 %v6777_v50  ;;  %v2164_v50 = vshrl.u32 %v2163_v48, 7  ;;  %v6845_v48 = vld [vmem:[#allocation7 + $0x1d4] ss:$8 sps:$4 sm:$0xff]  }
 0x1db   : > { %2613 = vmatprep.subr.bf16.mxu0 %v6782_v53 }
 0x1dc   : > { %2078 = vmatpush1.bf16.msra.mxu1 %v6684_v28  ;;  %v6740_v28 = vld [vmem:[#allocation5 + $0x54c] ss:$16 sps:$4 sm:$0xff]  }
 0x1dd   : > { %2079 = vmatprep.subr.bf16.mxu1 %v6689_v30  ;;  %v6743_v30 = vld [vmem:[#allocation5 + $0x56c] ss:$16 sps:$4 sm:$0xff]  }
 0x1de   : > { %2614 = vmatpush1.bf16.msra.mxu0 %v6780_v55 }
 0x1df   : > { %2615 = vmatprep.subr.bf16.mxu0 %v6785_v57 }
 0x1e0   : > { %2080 = vmatpush1.bf16.msra.mxu1 %v6687_v32  ;;  %v6746_v32 = vld [vmem:[#allocation5 + $0x58c] ss:$16 sps:$4 sm:$0xff]  }
 0x1e1   : > { %2081 = vmatprep.subr.bf16.mxu1 %v6692_v35  ;;  %v6749_v35 = vld [vmem:[#allocation5 + $0x5ac] ss:$16 sps:$4 sm:$0xff]  }
 0x1e2   : > { %2616 = vmatpush1.bf16.msra.mxu0 %v6783_v59 }
 0x1e3   : > { %2617 = vmatprep.subr.bf16.mxu0 %v6788_v61 }
 0x1e4   : > { %2082 = vmatpush1.bf16.msra.mxu1 %v6690_v37  ;;  %v6752_v37 = vld [vmem:[#allocation5 + $0x5cc] ss:$16 sps:$4 sm:$0xff]  }
 0x1e5   : > { %2083 = vmatprep.subr.bf16.mxu1 %v6695_v39  ;;  %v6755_v39 = vld [vmem:[#allocation5 + $0x5ec] ss:$16 sps:$4 sm:$0xff]  }
 0x1e6   : > { %2618 = vmatpush1.bf16.msra.mxu0 %v6786_v0 }
 0x1e7   : > { %2619 = vmatprep.subr.bf16.mxu0 %v6791_v1 }
 0x1e8   : > { %2084 = vmatpush1.bf16.msra.mxu1 %v6693_v41  ;;  %v7306_v41 = vld [vmem:[%s8118_s22 + $0x10] ss:$24 sps:$4 sm:$0xff]   ;;  %s8446_s22 = sld [smem:[#allocation38_spill]] }
 0x1e9   : > { %2085 = vmatprep.subr.bf16.mxu1 %v6698_v43 }
 0x1ea   : > { %2620 = vmatpush1.bf16.msra.mxu0 %v6789_v6 }
 0x1eb   : > { %2621 = vmatprep.subr.bf16.mxu0 %v6794_v7 }
 0x1ec   : > { %2086 = vmatpush1.bf16.msra.mxu1 %v6696_v45 }
 0x1ed   : > { %2087 = vmatprep.subr.bf16.mxu1 %v6701_v47  ;;  %v2161_v47 = vunpack.c.l.s4 %v7695_v46  ;;  %v6842_v46 = vld [vmem:[#allocation7 + $0x1c4] ss:$8 sps:$4 sm:$0xff]  }
 0x1ee   : > { %2622 = vmatpush1.bf16.msra.mxu0 %v6792_v10 }
 0x1ef   : > { %2623 = vmatprep.subr.bf16.mxu0 %v6797_v16  ;;  %v6853_v16 = vld [vmem:[#allocation10] sm:$0xff]  }
 0x1f0   : > { %2088 = vmatpush1.bf16.msra.mxu1 %v6699_v49  ;;  %v2162_v49 = vunpack.c.0.s8 %v2161_v47  ;;  %v6840_v47 = vld [vmem:[#allocation7 + $0x1c0] ss:$8 sps:$4 sm:$0xff]  }
 0x1f1   : > { %2089 = vmatprep.subr.bf16.mxu1 %v6704_v52  ;;  %v5809_v52 = vld.sshfl [vmem:[%s8439_s2] sm:$0x33 pattern:$0x75316420] }
 0x1f2   : > { %2624 = vmatpush1.bf16.msra.mxu0 %v6795_v18  ;;  %v8167_v53 = vsub.s32 %v2162_v49, %v2164_v50  ;;  %v6807_v18 = vld [vmem:[#allocation7 + $0x110] ss:$8 sps:$4 sm:$0xff]  }
 0x1f3   : > { %2625 = vmatprep.subr.bf16.mxu0 %v6800_v4  ;;  %v6812_v4 = vld [vmem:[#allocation7 + $0x124] ss:$8 sps:$4 sm:$0xff]   ;;  %v6843_v49 = vld [vmem:[#allocation7 + $0x1d0] ss:$8 sps:$4 sm:$0xff]  }
 0x1f4   : > { %2090 = vmatpush1.bf16.msra.mxu1 %v6702_v54  ;;  %v2159_v54 = vcombine.high %v5809_v52, %v5809_v52  ;;  %v8170_v55 = vrot.slane %v5809_v52, %v8167_v53  ;;  %v6846_v52 = vld [vmem:[#allocation7 + $0x1e0] ss:$8 sps:$4 sm:$0xff]  }
 0x1f5   : > { %2091 = vmatprep.subr.bf16.mxu1 %v6707_v56 }
 0x1f6   : > { %2626 = vmatpush1.bf16.msra.mxu0 %v6798_v51  ;;  %v8173_v56 = vrot.slane %v2159_v54, %v8167_v53  ;;  %v2177_v57 = vpack.i.b16 %v8170_v55, %v8170_v55  ;;  %v6810_v51 = vld [vmem:[#allocation7 + $0x120] ss:$8 sps:$4 sm:$0xff]   ;;  %v6851_v54 = vld [vmem:[#allocation7 + $0x1f4] ss:$8 sps:$4 sm:$0xff]  }
 0x1f7   : > { %2627 = vmatprep.subr.bf16.mxu0 %v6803_v22  ;;  %v6815_v22 = vld [vmem:[#allocation7 + $0x134] ss:$8 sps:$4 sm:$0xff]  }
 0x1f8   : > { %2092 = vmatpush1.bf16.msra.mxu1 %v6705_v58  ;;  %v8177_v58 = vsub.s32 0, %v2164_v50  ;;  %v6848_v50 = vld [vmem:[#allocation7 + $0x1e4] ss:$8 sps:$4 sm:$0xff]  }
 0x1f9   : > { %2104 = vmatprep.subr.bf16.mxu1 %v6710_v60  ;;  %v2184_v60 = vpack.i.b16 %v8173_v56, %v8173_v56 }
 0x1fa   : > { %2628 = vmatpush1.bf16.msra.mxu0 %v6801_v24  ;;  %v6813_v24 = vld [vmem:[#allocation7 + $0x130] ss:$8 sps:$4 sm:$0xff]  }
 0x1fb   : > { %2094 = vmatmul.mubr.bf16.vlgmr.msra.gmra.mrb[4].mxu1 %v7305_v3  ;;  %2640 = vmatprep.subr.bf16.mxu0 %v6806_v26  ;;  %v2189_v6 = vrot.slane %v2184_v60, %v8177_v58  ;;  %v6818_v26 = vld [vmem:[#allocation7 + $0x144] ss:$8 sps:$4 sm:$0xff]   ;;  %v2175_v60 = vcombine.high %v8173_v56, %v8173_v56 }
 0x1fc   : > { %2105 = vmatpush1.bf16.msra.mxu1 %v6708_v62  ;;  %2136 = vmatprep.mubr.bf16.mxu1 %v8155_v34  ;;  %v6723_v34 = vld [vmem:[#allocation5 + $0x4a8] ss:$16 sps:$4 sm:$0xff]  }
 0x1fd   : > { %2106 = vmatprep.subr.bf16.mxu1 %v6713_v63  ;;  %v6863_v56 = vld [vmem:[#allocation10 + $0x28] sm:$0xff]  }
 0x200   : > { %2107 = vmatpush1.bf16.msra.mxu1 %v6711_v2  ;;  %v2182_v2 = vrot.slane %v2177_v57, %v8177_v58  ;;  %v6849_v57 = vld [vmem:[#allocation7 + $0x1f0] ss:$8 sps:$4 sm:$0xff]  }
 0x201   : > { %2108 = vmatprep.subr.bf16.mxu1 %v6716_v5 }
 0x204   : > { %2109 = vmatpush1.bf16.msra.mxu1 %v6714_v8 }
 0x205   : > { %2110 = vmatprep.subr.bf16.mxu1 %v6719_v9 }
 0x208   : > { %2111 = vmatpush1.bf16.msra.mxu1 %v6717_v11  ;;  %v7696_v11 = vmov 0  }
 0x209   : > { %2112 = vmatprep.subr.bf16.mxu1 %v6722_v12 }
 0x20c   : > { %2113 = vmatpush1.bf16.msra.mxu1 %v6720_v13  ;;  %v6804_v13 = vld [vmem:[#allocation7 + $0x100] ss:$8 sps:$4 sm:$0xff]  }
 0x20d   : > { %2114 = vmatprep.subr.bf16.mxu1 %v6725_v14  ;;  %v6809_v14 = vld [vmem:[#allocation7 + $0x114] ss:$8 sps:$4 sm:$0xff]  }
 0x210   : > { %2115 = vmatpush1.bf16.msra.mxu1 %v6723_v34 }
 0x211   : > { %2116 = vmatprep.subr.bf16.mxu1 %v6728_v15  ;;  %v6852_v15 = vld [vmem:[#allocation10 + $0x40] sm:$0xff]  }
 0x214   : > { %2117 = vmatpush1.bf16.msra.mxu1 %v6726_v17  ;;  %v6854_v17 = vld [vmem:[#allocation10 + $0x48] sm:$0xff]  }
 0x215   : > { %2118 = vmatprep.subr.bf16.mxu1 %v6731_v19  ;;  %v6855_v19 = vld [vmem:[#allocation10 + $0x8] sm:$0xff]  }
 0x218   : > { %2119 = vmatpush1.bf16.msra.mxu1 %v6729_v20  ;;  %v6856_v20 = vld [vmem:[#allocation10 + $0x50] sm:$0xff]  }
 0x219   : > { %2120 = vmatprep.subr.bf16.mxu1 %v6734_v21  ;;  %v6857_v21 = vld [vmem:[#allocation10 + $0x10] sm:$0xff]  }
 0x21c   : > { %2121 = vmatpush1.bf16.msra.mxu1 %v6732_v23  ;;  %v6858_v23 = vld [vmem:[#allocation10 + $0x58] sm:$0xff]  }
 0x21d   : > { %2122 = vmatprep.subr.bf16.mxu1 %v6737_v25  ;;  %v6859_v25 = vld [vmem:[#allocation10 + $0x18] sm:$0xff]  }
 0x220   : > { %2123 = vmatpush1.bf16.msra.mxu1 %v6735_v27  ;;  %v6860_v27 = vld [vmem:[#allocation10 + $0x60] sm:$0xff]  }
 0x221   : > { %2124 = vmatprep.subr.bf16.mxu1 %v6740_v28  ;;  %v6816_v28 = vld [vmem:[#allocation7 + $0x140] ss:$8 sps:$4 sm:$0xff]  }
 0x224   : > { %2125 = vmatpush1.bf16.msra.mxu1 %v6738_v29  ;;  %v6861_v29 = vld [vmem:[#allocation10 + $0x20] sm:$0xff]  }
 0x225   : > { %2126 = vmatprep.subr.bf16.mxu1 %v6743_v30  ;;  %v6821_v30 = vld [vmem:[#allocation7 + $0x154] ss:$8 sps:$4 sm:$0xff]  }
 0x228   : > { %2127 = vmatpush1.bf16.msra.mxu1 %v6741_v31  ;;  %v6862_v31 = vld [vmem:[#allocation10 + $0x68] sm:$0xff]  }
 0x229   : > { %2128 = vmatprep.subr.bf16.mxu1 %v6746_v32  ;;  %v6819_v32 = vld [vmem:[#allocation7 + $0x150] ss:$8 sps:$4 sm:$0xff]  }
 0x22c   : > { %2129 = vmatpush1.bf16.msra.mxu1 %v6744_v33  ;;  %v6824_v33 = vld [vmem:[#allocation7 + $0x164] ss:$8 sps:$4 sm:$0xff]  }
 0x22d   : > { %2130 = vmatprep.subr.bf16.mxu1 %v6749_v35  ;;  %v6822_v35 = vld [vmem:[#allocation7 + $0x160] ss:$8 sps:$4 sm:$0xff]  }
 0x230   : > { %2131 = vmatpush1.bf16.msra.mxu1 %v6747_v36  ;;  %v6827_v36 = vld [vmem:[#allocation7 + $0x174] ss:$8 sps:$4 sm:$0xff]  }
 0x231   : > { %2132 = vmatprep.subr.bf16.mxu1 %v6752_v37  ;;  %v6825_v37 = vld [vmem:[#allocation7 + $0x170] ss:$8 sps:$4 sm:$0xff]  }
 0x234   : > { %2133 = vmatpush1.bf16.msra.mxu1 %v6750_v38  ;;  %v6830_v38 = vld [vmem:[#allocation7 + $0x184] ss:$8 sps:$4 sm:$0xff]  }
 0x235   : > { %2134 = vmatprep.subr.bf16.mxu1 %v6755_v39  ;;  %v6828_v39 = vld [vmem:[#allocation7 + $0x180] ss:$8 sps:$4 sm:$0xff]  }
 0x238   : > { %2135 = vmatpush1.bf16.msra.mxu1 %v6753_v40  ;;  %v6833_v40 = vld [vmem:[#allocation7 + $0x194] ss:$8 sps:$4 sm:$0xff]  }
 0x239   : > { %6192 = vmatprep.subr.bf16.mxu1 %v6852_v15  ;;  %v7697_v15 = vmov 0.0  }
 0x23b   : > { %2137 = vmatmul.mubr.bf16.vlgmr.msra.gmra.mrb[4].mxu1 %v7306_v41  ;;  %v6831_v41 = vld [vmem:[#allocation7 + $0x190] ss:$8 sps:$4 sm:$0xff]  }
 0x23c   : > { %6193 = vmatpush3.bf16.msra.mxu1 %v6853_v16  ;;  %v5874_v16 = vld.sshfl [vmem:[#allocation8] sm:$0x11 pattern:$0x75316420] }
 0x23d   : > { %6194 = vmatprep.subr.bf16.mxu1 %v6854_v17  ;;  %v2693_v17 = vcombine.high %v5874_v16, %v5874_v16 }
 0x240   : > { %6195 = vmatpush3.bf16.msra.mxu1 %v6855_v19  ;;  %v2707_v19 = vrot.slane %v2693_v17, %v8167_v53  ;;  %v6895_v17 = vld [vmem:[#allocation14 + $0x34] ss:$8 sps:$4 sm:$0xff]  }
 0x241   : > { %6196 = vmatprep.subr.bf16.mxu1 %v6856_v20 }
 0x242   : > { %v2716_v20 = vpack.i.b16 %v2707_v19, %v2707_v19  ;;  %v6898_v19 = vld [vmem:[#allocation14 + $0x44] ss:$8 sps:$4 sm:$0xff]  }
 0x244   : > { %6197 = vmatpush3.bf16.msra.mxu1 %v6857_v21 }
 0x245   : > { %6198 = vmatprep.subr.bf16.mxu1 %v6858_v23 }
 0x248   : > { %6199 = vmatpush3.bf16.msra.mxu1 %v6859_v25 }
 0x249   : > { %6200 = vmatprep.subr.bf16.mxu1 %v6860_v27 }
 0x24c   : > { %6201 = vmatpush3.bf16.msra.mxu1 %v6861_v29 }
 0x24d   : > { %6202 = vmatprep.subr.bf16.mxu1 %v6862_v31  ;;  %v6868_v31 = vld [vmem:[#allocation11] sm:$0xff]  }
 0x24e   : > { %v1923_v42 = vpop.f32.mrb[0].mxu1 }
 0x24f   : > { %v1925_v43 = vpop.f32.mrb[1].mxu1 }
 0x250   : > { %v1927_v44 = vpop.f32.mrb[2].mxu1  ;;  %6203 = vmatpush3.bf16.msra.mxu1 %v6863_v56 }
 0x251   : > { %v1929_v45 = vpop.f32.mrb[3].mxu1 }
 0x28f   : > { %v2009_v59 = vpop.f32.mrb[0].mxu0 }
 0x290   : > { %v6272_v61 = vadd.f32 %v2009_v59, %v1923_v42  ;;  %v2011_v62 = vpop.f32.mrb[1].mxu0  ;;  %v6836_v42 = vld [vmem:[#allocation7 + $0x1a4] ss:$8 sps:$4 sm:$0xff]   ;;  %v2174_v59 = vcombine.high %v8170_v55, %v8170_v55 }
 0x291   : > { %v6273_v63 = vadd.f32 %v2011_v62, %v1925_v43  ;;  %v2013_v0 = vpop.f32.mrb[2].mxu0  ;;  %v6834_v43 = vld [vmem:[#allocation7 + $0x1a0] ss:$8 sps:$4 sm:$0xff]   ;;  %v2198_v62 = vpack.i.b16 %v2175_v60, %v2175_v60  ;;  %v6878_v60 = vld [vmem:[#allocation13 + $0x10] sm:$0xff]  }
 0x292   : > { %v6274_v1 = vadd.f32 %v2013_v0, %v1927_v44  ;;  %v2015_v3 = vpop.f32.mrb[3].mxu0  ;;  %v6839_v44 = vld [vmem:[#allocation7 + $0x1b4] ss:$8 sps:$4 sm:$0xff]  }
 0x293   : > { %v6275_v5 = vadd.f32 %v2015_v3, %v1929_v45  ;;  %v6837_v45 = vld [vmem:[#allocation7 + $0x1b0] ss:$8 sps:$4 sm:$0xff]   ;;  %v2203_v3 = vrot.slane %v2198_v62, %v8177_v58  ;;  %v6880_v62 = vld [vmem:[#allocation13 + $0x20] sm:$0xff]  }
 0x294   : > { %v2147_v7 = vpack.c.bf16 %v6274_v1, %v6272_v61  ;;  %v2191_v61 = vpack.i.b16 %v2174_v59, %v2174_v59  ;;  %v6877_v59 = vld [vmem:[#allocation13 + $0x8] sm:$0xff]  }
 0x295   : > { %v2148_v8 = vpack.c.bf16 %v6275_v5, %v6273_v63 }
 0x296   : > { %v2204_v9 = vadd.bf16 %v2182_v2, %v2147_v7  ;;  %v2196_v1 = vrot.slane %v2191_v61, %v8177_v58  ;;  %v6879_v61 = vld [vmem:[#allocation13 + $0x18] sm:$0xff]  }
 0x297   : > { %v2205_v10 = vadd.bf16 %v2189_v6, %v2148_v8 }
 0x298   : > { %v2208_v34 = vmax.bf16 %v7696_v11, %v2204_v9 }
 0x299   : > { %v2209_v12 = vmax.bf16 %v7696_v11, %v2205_v10 }
 0x29b   : > { %2629 = vmatprep.mubr.bf16.mxu0 %v2209_v12  ;;  %v6864_v12 = vld [vmem:[#allocation10 + $0x70] sm:$0xff]  }
 0x29c   : > { %2630 = vmatmul.mubr.bf16.vlgmr.msra.gmra.mrb[4].mxu0 %v2208_v34  ;;  %6204 = vmatprep.subr.bf16.mxu1 %v6864_v12  ;;  %v6867_v34 = vld [vmem:[#allocation10 + $0x38] sm:$0xff]   ;;  %v6884_v12 = vld [vmem:[#allocation14] ss:$8 sps:$4 sm:$0xff]  }
 0x29d   : > { %2641 = vmatpush1.bf16.msra.mxu0 %v6804_v13  ;;  %v6865_v13 = vld [vmem:[#allocation10 + $0x30] sm:$0xff]  }
 0x29e   : > { %2642 = vmatprep.subr.bf16.mxu0 %v6809_v14  ;;  %6205 = vmatpush3.bf16.msra.mxu1 %v6865_v13  ;;  %v6866_v14 = vld [vmem:[#allocation10 + $0x78] sm:$0xff]  }
 0x29f   : > { %6206 = vmatprep.subr.bf16.mxu1 %v6866_v14  ;;  %v6889_v14 = vld [vmem:[#allocation14 + $0x14] ss:$8 sps:$4 sm:$0xff]  }
 0x2a1   : > { %2643 = vmatpush1.bf16.msra.mxu0 %v6807_v18  ;;  %v2700_v18 = vrot.slane %v5874_v16, %v8167_v53  ;;  %v6890_v16 = vld [vmem:[#allocation14 + $0x20] ss:$8 sps:$4 sm:$0xff]  }
 0x2a2   : > { %2644 = vmatprep.subr.bf16.mxu0 %v6812_v4  ;;  %6207 = vmatpush3.bf16.msra.mxu1 %v6867_v34  ;;  %v6887_v34 = vld [vmem:[#allocation14 + $0x10] ss:$8 sps:$4 sm:$0xff]  }
 0x2a3   : > { %6232 = vmatprep.subr.bf16.mxu1 %v7697_v15  ;;  %v2709_v4 = vpack.i.b16 %v2700_v18, %v2700_v18  ;;  %v6893_v18 = vld [vmem:[#allocation14 + $0x30] ss:$8 sps:$4 sm:$0xff]  }
 0x2a5   : > { %2645 = vmatpush1.bf16.msra.mxu0 %v6810_v51 }
 0x2a6   : > { %2646 = vmatprep.subr.bf16.mxu0 %v6815_v22  ;;  %v2714_v22 = vrot.slane %v2709_v4, %v8177_v58  ;;  %v6896_v4 = vld [vmem:[#allocation14 + $0x40] ss:$8 sps:$4 sm:$0xff]  }
 0x2a9   : > { %2647 = vmatpush1.bf16.msra.mxu0 %v6813_v24  ;;  %v2721_v24 = vrot.slane %v2716_v20, %v8177_v58  ;;  %v6901_v20 = vld [vmem:[#allocation14 + $0x54] ss:$8 sps:$4 sm:$0xff]  }
 0x2aa   : > { %2648 = vmatprep.subr.bf16.mxu0 %v6818_v26 }
 0x2ad   : > { %2649 = vmatpush1.bf16.msra.mxu0 %v6816_v28 }
 0x2ae   : > { %2650 = vmatprep.subr.bf16.mxu0 %v6821_v30 }
 0x2b1   : > { %2651 = vmatpush1.bf16.msra.mxu0 %v6819_v32 }
 0x2b2   : > { %2652 = vmatprep.subr.bf16.mxu0 %v6824_v33  ;;  %v6869_v33 = vld [vmem:[#allocation11 + $0x8] sm:$0xff]  }
 0x2b5   : > { %2653 = vmatpush1.bf16.msra.mxu0 %v6822_v35  ;;  %v6870_v35 = vld [vmem:[#allocation11 + $0x10] sm:$0xff]  }
 0x2b6   : > { %2654 = vmatprep.subr.bf16.mxu0 %v6827_v36  ;;  %v6871_v36 = vld [vmem:[#allocation11 + $0x18] sm:$0xff]  }
 0x2b9   : > { %2655 = vmatpush1.bf16.msra.mxu0 %v6825_v37  ;;  %v6872_v37 = vld [vmem:[#allocation11 + $0x20] sm:$0xff]  }
 0x2ba   : > { %2656 = vmatprep.subr.bf16.mxu0 %v6830_v38  ;;  %v6873_v38 = vld [vmem:[#allocation11 + $0x28] sm:$0xff]  }
 0x2bd   : > { %2657 = vmatpush1.bf16.msra.mxu0 %v6828_v39  ;;  %v6874_v39 = vld [vmem:[#allocation11 + $0x30] sm:$0xff]  }
 0x2be   : > { %2658 = vmatprep.subr.bf16.mxu0 %v6833_v40  ;;  %v6875_v40 = vld [vmem:[#allocation11 + $0x38] sm:$0xff]  }
 0x2c1   : > { %2659 = vmatpush1.bf16.msra.mxu0 %v6831_v41  ;;  %v2758_v41 = vld [vmem:[%s8440_s12] sm:$0x1] }
 0x2c2   : > { %2660 = vmatprep.subr.bf16.mxu0 %v6836_v42 }
 0x2c5   : > { %2661 = vmatpush1.bf16.msra.mxu0 %v6834_v43  ;;  %v2898_v43 = vpack.i.b16 %v2758_v41, %v2758_v41  ;;  %v6952_v41 = vld [vmem:[#allocation16 + $0xe4] ss:$16 sps:$4 sm:$0xff]  }
 0x2c6   : > { %2662 = vmatprep.subr.bf16.mxu0 %v6839_v44 }
 0x2c9   : > { %2663 = vmatpush1.bf16.msra.mxu0 %v6837_v45 }
 0x2ca   : > { %2664 = vmatprep.subr.bf16.mxu0 %v6842_v46 }
 0x2cd   : > { %2665 = vmatpush1.bf16.msra.mxu0 %v6840_v47 }
 0x2ce   : > { %2666 = vmatprep.subr.bf16.mxu0 %v6845_v48 }
 0x2d1   : > { %2667 = vmatpush1.bf16.msra.mxu0 %v6843_v49  ;;  %v2903_v49 = vrot.slane %v2898_v43, %v8177_v58  ;;  %v6958_v43 = vld [vmem:[#allocation16 + $0x104] ss:$16 sps:$4 sm:$0xff]  }
 0x2d2   : > { %2668 = vmatprep.subr.bf16.mxu0 %v6848_v50 }
 0x2d5   : > { %2669 = vmatpush1.bf16.msra.mxu0 %v6846_v52 }
 0x2d6   : > { %2670 = vmatprep.subr.bf16.mxu0 %v6851_v54  ;;  %v6876_v54 = vld [vmem:[#allocation13] sm:$0xff]  }
 0x2d9   : > { %2671 = vmatpush1.bf16.msra.mxu0 %v6849_v57 }
 0x30e   : > { %v2138_v63 = vpop.f32.mrb[4].mxu1 }
 0x30f   : > { %v2140_v0 = vpop.f32.mrb[5].mxu1 }
 0x310   : > { %v2142_v2 = vpop.f32.mrb[6].mxu1 }
 0x311   : > { %v2149_v5 = vpack.c.bf16 %v2142_v2, %v2138_v63  ;;  %v2144_v6 = vpop.f32.mrb[7].mxu1  ;;  %v6881_v63 = vld [vmem:[#allocation13 + $0x28] sm:$0xff]  }
 0x312   : > { %v2150_v7 = vpack.c.bf16 %v2144_v6, %v2140_v0  ;;  %v6882_v0 = vld [vmem:[#allocation13 + $0x30] sm:$0xff]   ;;  %v6886_v2 = vld [vmem:[#allocation14 + $0x4] ss:$8 sps:$4 sm:$0xff]  }
 0x313   : > { %v2206_v8 = vadd.bf16 %v2196_v1, %v2149_v5  ;;  %v6883_v1 = vld [vmem:[#allocation13 + $0x38] sm:$0xff]  }
 0x314   : > { %v2207_v9 = vadd.bf16 %v2203_v3, %v2150_v7  ;;  %v2922_v3 = vld [vmem:[%s8441_s3] sm:$0x1]  ;;  %s8304_s3 = scalar_lea.vmem [#allocation19], %s6306_s14  ;;  %s6307_s14 = smul.u32 768, %s7813_s0 }
 0x315   : > { %v2210_v55 = vmax.bf16 %v7696_v11, %v2206_v8  ;;  %v3014_v5 = vpack.i.b16 %v2922_v3, %v2922_v3  ;;  %s5427_s19 = sshll.u32 %s8304_s3, 4  ;;  %s7699_s0 = smov [#allocation19]   ;;  %s8322_s19 = int_to_ptr.vmem [resolvable:$true] %s5427_s19 }
 0x316   : > { %v2211_v10 = vmax.bf16 %v7696_v11, %v2207_v9  ;;  %s8320_s30 = scalar_lea.hbm %s8446_s22, %s6307_s14  ;;  %s7589_s2 = scalar_lea.vmem %s8322_s19, 768 }
 0x317   : > { %v3019_v8 = vrot.slane %v3014_v5, %v8177_v58  ;;  %p7590_p11 = scmp.ne.s32.totalorder %s8322_s19, %s7589_s2  ;;  %s7593_s6 = sshll.u32 %s7699_s0, 4  ;;  %s7594_s6 = int_to_ptr.vmem [resolvable:$false] %s7593_s6 }
 0x318   : > { %2672 = vmatprep.mubr.bf16.mxu0 %v2211_v10  ;;  %p7596_p6 = scmp.lt.s32.totalorder %s8322_s19, %s7594_s6 }
 0x319   : > { %2673 = vmatmul.mubr.bf16.vlgmr.msra.gmra.mrb[4].mxu0 %v2210_v55  ;;  %p7591_p13 = pnand %p7590_p11, %p8447_p12 }
 0x31b   : > { %p7592_p8 = pneg %p7591_p13 }
 0x3ec   : > { %v2674_v51 = vpop.f32.mrb[4].mxu0 }
 0x3ed   : > { %v2676_v21 = vpop.f32.mrb[5].mxu0 }
 0x3ee   : > { %v2678_v23 = vpop.f32.mrb[6].mxu0 }
 0x3ef   : > { %v2683_v25 = vpack.c.bf16 %v2678_v23, %v2674_v51  ;;  %v2680_v26 = vpop.f32.mrb[7].mxu0  ;;  %v6899_v51 = vld [vmem:[#allocation14 + $0x50] ss:$8 sps:$4 sm:$0xff]   ;;  %v6907_v23 = vld [vmem:[#allocation14 + $0x74] ss:$8 sps:$4 sm:$0xff]  }
 0x3f0   : > { %v2684_v27 = vpack.c.bf16 %v2680_v26, %v2676_v21  ;;  %v6904_v21 = vld [vmem:[#allocation14 + $0x64] ss:$8 sps:$4 sm:$0xff]  }
 0x3f1   : > { %v2722_v28 = vadd.bf16 %v2714_v22, %v2683_v25  ;;  %v6902_v22 = vld [vmem:[#allocation14 + $0x60] ss:$8 sps:$4 sm:$0xff]   ;;  %v6910_v26 = vld [vmem:[#allocation16 + $0x4] ss:$16 sps:$4 sm:$0xff]  }
 0x3f2   : > { %v2723_v29 = vadd.bf16 %v2721_v24, %v2684_v27  ;;  %v6905_v24 = vld [vmem:[#allocation14 + $0x70] ss:$8 sps:$4 sm:$0xff]   ;;  %v6913_v27 = vld [vmem:[#allocation16 + $0xc] ss:$16 sps:$4 sm:$0xff]   ;;  %3706 = vmatprep.subr.bf16.mxu0 %v6910_v26 }
 0x3f3   : > { %v2724_v32 = vmax.bf16 %v7696_v11, %v2722_v28  ;;  %v6908_v25 = vld [vmem:[#allocation16] ss:$16 sps:$4 sm:$0xff]   ;;  %v6916_v28 = vld [vmem:[#allocation16 + $0x24] ss:$16 sps:$4 sm:$0xff]   ;;  %v6985_v26 = vld [vmem:[#allocation16 + $0x18c] ss:$16 sps:$4 sm:$0xff]  }
 0x3f4   : > { %v2725_v30 = vmax.bf16 %v7696_v11, %v2723_v29  ;;  %3707 = vmatpush1.bf16.msra.mxu0 %v6908_v25  ;;  %v6914_v29 = vld [vmem:[#allocation16 + $0x20] ss:$16 sps:$4 sm:$0xff]   ;;  %v6977_v25 = vld [vmem:[#allocation16 + $0x168] ss:$16 sps:$4 sm:$0xff]  }
 0x3f5   : > { %3708 = vmatprep.subr.bf16.mxu0 %v6916_v28  ;;  %v6991_v28 = vld [vmem:[#allocation16 + $0x1ac] ss:$16 sps:$4 sm:$0xff]  }
 0x3f6   : > { %2887 = vmatprep.mubr.bf16.mxu1 %v2725_v30  ;;  %v6922_v30 = vld [vmem:[#allocation16 + $0x44] ss:$16 sps:$4 sm:$0xff]  }
 0x3f7   : > { %2888 = vmatmul.mubr.bf16.vlgmr.msra.gmra.mrb[8].mxu1 %v2724_v32  ;;  %v6928_v32 = vld [vmem:[#allocation16 + $0x64] ss:$16 sps:$4 sm:$0xff]  }
 0x3f8   : > { %6233 = vmatpush3.bf16.msra.mxu1 %v6868_v31  ;;  %6248 = vmatprep.mubr.msk.bf16.mxu1 %vm7698_vm0, %v7697_v15  ;;  %v6920_v31 = vld [vmem:[#allocation16 + $0x40] ss:$16 sps:$4 sm:$0xff]  }
 0x3f9   : > { %6234 = vmatprep.subr.bf16.mxu1 %v7697_v15  ;;  %3709 = vmatpush1.bf16.msra.mxu0 %v6914_v29  ;;  %v6989_v29 = vld [vmem:[#allocation16 + $0x1a8] ss:$16 sps:$4 sm:$0xff]  }
 0x3fa   : > { %3710 = vmatprep.subr.bf16.mxu0 %v6922_v30  ;;  %v6994_v30 = vld [vmem:[#allocation16 + $0x1c4] ss:$16 sps:$4 sm:$0xff]  }
 0x3fc   : > { %6235 = vmatpush3.bf16.msra.mxu1 %v6869_v33  ;;  %v6926_v33 = vld [vmem:[#allocation16 + $0x60] ss:$16 sps:$4 sm:$0xff]  }
 0x3fd   : > { %6236 = vmatprep.subr.bf16.mxu1 %v7697_v15  ;;  %3711 = vmatpush1.bf16.msra.mxu0 %v6920_v31  ;;  %v6997_v31 = vld [vmem:[#allocation16 + $0x1cc] ss:$16 sps:$4 sm:$0xff]  }
 0x3fe   : > { %3712 = vmatprep.subr.bf16.mxu0 %v6928_v32  ;;  %v6992_v32 = vld [vmem:[#allocation16 + $0x1c0] ss:$16 sps:$4 sm:$0xff]  }
 0x400   : > { %6237 = vmatpush3.bf16.msra.mxu1 %v6870_v35  ;;  %v6934_v35 = vld [vmem:[#allocation16 + $0x84] ss:$16 sps:$4 sm:$0xff]  }
 0x401   : > { %6238 = vmatprep.subr.bf16.mxu1 %v7697_v15  ;;  %3713 = vmatpush1.bf16.msra.mxu0 %v6926_v33  ;;  %v6995_v33 = vld [vmem:[#allocation16 + $0x1c8] ss:$16 sps:$4 sm:$0xff]  }
 0x402   : > { %3714 = vmatprep.subr.bf16.mxu0 %v6934_v35  ;;  %v7000_v35 = vld [vmem:[#allocation16 + $0x1e4] ss:$16 sps:$4 sm:$0xff]  }
 0x404   : > { %6239 = vmatpush3.bf16.msra.mxu1 %v6871_v36  ;;  %v6932_v36 = vld [vmem:[#allocation16 + $0x80] ss:$16 sps:$4 sm:$0xff]  }
 0x405   : > { %6240 = vmatprep.subr.bf16.mxu1 %v7697_v15  ;;  %3715 = vmatpush1.bf16.msra.mxu0 %v6932_v36  ;;  %v7003_v36 = vld [vmem:[#allocation16 + $0x1ec] ss:$16 sps:$4 sm:$0xff]  }
 0x408   : > { %6241 = vmatpush3.bf16.msra.mxu1 %v6872_v37  ;;  %v6940_v37 = vld [vmem:[#allocation16 + $0xa4] ss:$16 sps:$4 sm:$0xff]  }
 0x409   : > { %6242 = vmatprep.subr.bf16.mxu1 %v7697_v15  ;;  %3716 = vmatprep.subr.bf16.mxu0 %v6940_v37  ;;  %v6998_v37 = vld [vmem:[#allocation16 + $0x1e0] ss:$16 sps:$4 sm:$0xff]  }
 0x40c   : > { %6243 = vmatpush3.bf16.msra.mxu1 %v6873_v38  ;;  %v6938_v38 = vld [vmem:[#allocation16 + $0xa0] ss:$16 sps:$4 sm:$0xff]  }
 0x40d   : > { %6244 = vmatprep.subr.bf16.mxu1 %v7697_v15  ;;  %3717 = vmatpush1.bf16.msra.mxu0 %v6938_v38  ;;  %v7001_v38 = vld [vmem:[#allocation16 + $0x1e8] ss:$16 sps:$4 sm:$0xff]  }
 0x410   : > { %6245 = vmatpush3.bf16.msra.mxu1 %v6874_v39  ;;  %v6946_v39 = vld [vmem:[#allocation16 + $0xc4] ss:$16 sps:$4 sm:$0xff]  }
 0x411   : > { %6246 = vmatprep.subr.bf16.mxu1 %v7697_v15  ;;  %3718 = vmatprep.subr.bf16.mxu0 %v6946_v39  ;;  %v7006_v39 = vld [vmem:[#allocation17 + $0x4] ss:$24 sps:$4 sm:$0xff]  }
 0x414   : > { %6247 = vmatpush3.bf16.msra.mxu1 %v6875_v40  ;;  %v6944_v40 = vld [vmem:[#allocation16 + $0xc0] ss:$16 sps:$4 sm:$0xff]  }
 0x415   : > { %6252 = vmatprep.subr.bf16.mxu1 %v7697_v15  ;;  %3719 = vmatpush1.bf16.msra.mxu0 %v6944_v40  ;;  %v7009_v40 = vld [vmem:[#allocation17 + $0xc] ss:$24 sps:$4 sm:$0xff]  }
 0x416   : > { %3720 = vmatprep.subr.bf16.mxu0 %v6952_v41  ;;  %v5923_v41 = vld.sshfl [vmem:[%s8443_s23] sm:$0x11 pattern:$0x75316420]  ;;  %s5413_s23 = scalar_lea.sflag [#allocation4], %s8112_s20 }
 0x4ca   : > { %v6208_v42 = vpop.f32.mrb[8].mxu1 }
 0x4cb   : > { %v6209_v44 = vpop.f32.mrb[9].mxu1 }
 0x4cc   : > { %v6210_v45 = vadd.f32 %v6209_v44, %v6208_v42  ;;  %v6211_v46 = vpop.f32.mrb[10].mxu1  ;;  %v6950_v42 = vld [vmem:[#allocation16 + $0xe0] ss:$16 sps:$4 sm:$0xff]  }
 0x4cd   : > { %v6212_v47 = vpop.f32.mrb[11].mxu1  ;;  %3721 = vmatpush1.bf16.msra.mxu0 %v6950_v42  ;;  %v6956_v44 = vld [vmem:[#allocation16 + $0x100] ss:$16 sps:$4 sm:$0xff]   ;;  %v3288_v42 = vcombine.high %v5923_v41, %v5923_v41 }
 0x4ce   : > { %v6213_v48 = vadd.f32 %v6212_v47, %v6211_v46  ;;  %3722 = vmatprep.subr.bf16.mxu0 %v6958_v43  ;;  %v6962_v46 = vld [vmem:[#allocation16 + $0x120] ss:$16 sps:$4 sm:$0xff]   ;;  %v6970_v47 = vld [vmem:[#allocation16 + $0x144] ss:$16 sps:$4 sm:$0xff]   ;;  %v3295_v43 = vrot.slane %v5923_v41, %v8167_v53 }
 0x4cf   : > { %v7075_v41 = vld [vmem:[#allocation17 + $0x21c] ss:$24 sps:$4 sm:$0xff]  }
 0x4d0   : > { %v2896_v50 = vpack.c.bf16 %v6213_v48, %v6210_v45  ;;  %v6964_v45 = vld [vmem:[#allocation16 + $0x124] ss:$16 sps:$4 sm:$0xff]   ;;  %v6968_v48 = vld [vmem:[#allocation16 + $0x140] ss:$16 sps:$4 sm:$0xff]  }
 0x4d1   : > { %3723 = vmatpush1.bf16.msra.mxu0 %v6956_v44  ;;  %v3302_v44 = vrot.slane %v3288_v42, %v8167_v53  ;;  %v7070_v42 = vld [vmem:[#allocation17 + $0x210] ss:$24 sps:$4 sm:$0xff]  }
 0x4d2   : > { %v2904_v52 = vadd.bf16 %v2903_v49, %v2896_v50  ;;  %3724 = vmatprep.subr.bf16.mxu0 %v6964_v45  ;;  %v6976_v49 = vld [vmem:[#allocation16 + $0x164] ss:$16 sps:$4 sm:$0xff]   ;;  %v6974_v50 = vld [vmem:[#allocation16 + $0x160] ss:$16 sps:$4 sm:$0xff]   ;;  %v3304_v45 = vpack.i.b16 %v3295_v43, %v3295_v43 }
 0x4d3   : > { %v7073_v43 = vld [vmem:[#allocation17 + $0x218] ss:$24 sps:$4 sm:$0xff]  }
 0x4d4   : > { %v2905_v57 = vmax.bf16 %v7696_v11, %v2904_v52  ;;  %v6982_v52 = vld [vmem:[#allocation16 + $0x184] ss:$16 sps:$4 sm:$0xff]  }
 0x4d5   : > { %3725 = vmatpush1.bf16.msra.mxu0 %v6962_v46  ;;  %v3311_v46 = vpack.i.b16 %v3302_v44, %v3302_v44  ;;  %v7078_v44 = vld [vmem:[#allocation17 + $0x244] ss:$24 sps:$4 sm:$0xff]  }
 0x4d6   : > { %6249 = vmatmul.mubr.bf16.vlgmr.msra.gmra.mrb[12].mxu1 %v2905_v57  ;;  %3726 = vmatprep.subr.bf16.mxu0 %v6970_v47  ;;  %v6988_v57 = vld [vmem:[#allocation16 + $0x1a4] ss:$16 sps:$4 sm:$0xff]  }
 0x4d7   : > { %6253 = vmatpush3.bf16.msra.mxu1 %v6876_v54  ;;  %6268 = vmatprep.mubr.msk.bf16.mxu1 %vm7698_vm0, %v7697_v15  ;;  %v6980_v54 = vld [vmem:[#allocation16 + $0x180] ss:$16 sps:$4 sm:$0xff]  }
 0x4d8   : > { %6254 = vmatprep.subr.bf16.mxu1 %v7697_v15 }
 0x4d9   : > { %3727 = vmatpush1.bf16.msra.mxu0 %v6968_v48 }
 0x4da   : > { %3728 = vmatprep.subr.bf16.mxu0 %v6976_v49  ;;  %v3309_v49 = vrot.slane %v3304_v45, %v8177_v58  ;;  %v7081_v45 = vld [vmem:[#allocation17 + $0x24c] ss:$24 sps:$4 sm:$0xff]  }
 0x4db   : > { %6255 = vmatpush3.bf16.msra.mxu1 %v6877_v59  ;;  %v6986_v59 = vld [vmem:[#allocation16 + $0x1a0] ss:$16 sps:$4 sm:$0xff]  }
 0x4dc   : > { %6256 = vmatprep.subr.bf16.mxu1 %v7697_v15 }
 0x4dd   : > { %3729 = vmatpush1.bf16.msra.mxu0 %v6974_v50 }
 0x4de   : > { %3730 = vmatprep.subr.bf16.mxu0 %v6982_v52  ;;  %v3316_v52 = vrot.slane %v3311_v46, %v8177_v58  ;;  %v7076_v46 = vld [vmem:[#allocation17 + $0x240] ss:$24 sps:$4 sm:$0xff]  }
 0x4df   : > { %6257 = vmatpush3.bf16.msra.mxu1 %v6878_v60  ;;  %v3038_v60 = vld [vmem:[%s8442_s29] sm:$0x1] }
 0x4e0   : > { %6258 = vmatprep.subr.bf16.mxu1 %v7697_v15 }
 0x4e1   : > { %3731 = vmatpush1.bf16.msra.mxu0 %v6980_v54 }
 0x4e2   : > { %3732 = vmatprep.subr.bf16.mxu0 %v6988_v57 }
 0x4e3   : > { %6259 = vmatpush3.bf16.msra.mxu1 %v6879_v61  ;;  %v3130_v61 = vpack.i.b16 %v3038_v60, %v3038_v60 }
 0x4e4   : > { %6260 = vmatprep.subr.bf16.mxu1 %v7697_v15 }
 0x4e5   : > { %3733 = vmatpush1.bf16.msra.mxu0 %v6986_v59 }
 0x4e6   : > { %3734 = vmatprep.subr.bf16.mxu0 %v6994_v30  ;;  %v7055_v30 = vld [vmem:[#allocation17 + $0x188] ss:$24 sps:$4 sm:$0xff]  }
 0x4e7   : > { %6261 = vmatpush3.bf16.msra.mxu1 %v6880_v62 }
 0x4e8   : > { %6262 = vmatprep.subr.bf16.mxu1 %v7697_v15 }
 0x4e9   : > { %3735 = vmatpush1.bf16.msra.mxu0 %v6992_v32  ;;  %v7063_v32 = vld [vmem:[#allocation17 + $0x1bc] ss:$24 sps:$4 sm:$0xff]  }
 0x4ea   : > { %3736 = vmatprep.subr.bf16.mxu0 %v7000_v35  ;;  %v7061_v35 = vld [vmem:[#allocation17 + $0x1b8] ss:$24 sps:$4 sm:$0xff]  }
 0x4eb   : > { %6263 = vmatpush3.bf16.msra.mxu1 %v6881_v63 }
 0x4ec   : > { %6264 = vmatprep.subr.bf16.mxu1 %v7697_v15 }
 0x4ed   : > { %3737 = vmatpush1.bf16.msra.mxu0 %v6998_v37  ;;  %v7069_v37 = vld [vmem:[#allocation17 + $0x1ec] ss:$24 sps:$4 sm:$0xff]  }
 0x4ee   : > { %5010 = vmatprep.subr.bf16.mxu0 %v7006_v39  ;;  %v7067_v39 = vld [vmem:[#allocation17 + $0x1e8] ss:$24 sps:$4 sm:$0xff]  }
 0x4ef   : > { %6265 = vmatpush3.bf16.msra.mxu1 %v6882_v0  ;;  %v3135_v0 = vrot.slane %v3130_v61, %v8177_v58 }
 0x4f0   : > { %6266 = vmatprep.subr.bf16.mxu1 %v7697_v15  ;;  %v6892_v15 = vld [vmem:[#allocation14 + $0x24] ss:$8 sps:$4 sm:$0xff]  }
 0x4f3   : > { %6267 = vmatpush3.bf16.msra.mxu1 %v6883_v1 }
 0x4f4   : > { %3235 = vmatprep.subr.bf16.mxu1 %v6886_v2 }
 0x5a9   : > { %v3005_v6 = vpop.f32.mrb[12].mxu1 }
 0x5aa   : > { %v6250_v7 = vpop.f32.mrb[13].mxu1 }
 0x5ab   : > { %v3008_v9 = vpop.f32.mrb[14].mxu1 }
 0x5ac   : > { %v3012_v10 = vpack.c.bf16 %v3008_v9, %v3005_v6  ;;  %v6251_v55 = vpop.f32.mrb[15].mxu1  ;;  %v6911_v6 = vld [vmem:[#allocation16 + $0x8] ss:$16 sps:$4 sm:$0xff]  }
 0x5ad   : > { %v6917_v9 = vld [vmem:[#allocation16 + $0x28] ss:$16 sps:$4 sm:$0xff]  }
 0x5ae   : > { %v3020_v56 = vadd.bf16 %v3019_v8, %v3012_v10  ;;  %v6919_v8 = vld [vmem:[#allocation16 + $0x2c] ss:$16 sps:$4 sm:$0xff]   ;;  %v6923_v55 = vld [vmem:[#allocation16 + $0x48] ss:$16 sps:$4 sm:$0xff]  }
 0x5af   : > { %v6925_v10 = vld [vmem:[#allocation16 + $0x4c] ss:$16 sps:$4 sm:$0xff]  }
 0x5b0   : > { %v3021_v13 = vmax.bf16 %v7696_v11, %v3020_v56  ;;  %v6931_v56 = vld [vmem:[#allocation16 + $0x6c] ss:$16 sps:$4 sm:$0xff]  }
 0x5b2   : > { %6269 = vmatmul.mubr.bf16.vlgmr.msra.gmra.mrb[16].mxu1 %v3021_v13  ;;  %v6937_v13 = vld [vmem:[#allocation16 + $0x8c] ss:$16 sps:$4 sm:$0xff]  }
 0x5b3   : > { %3236 = vmatpush1.bf16.msra.mxu1 %v6884_v12  ;;  %3267 = vmatprep.mubr.bf16.mxu1 %v7696_v11  ;;  %v6929_v12 = vld [vmem:[#allocation16 + $0x68] ss:$16 sps:$4 sm:$0xff]  }
 0x5b4   : > { %3237 = vmatprep.subr.bf16.mxu1 %v6889_v14  ;;  %v6935_v14 = vld [vmem:[#allocation16 + $0x88] ss:$16 sps:$4 sm:$0xff]  }
 0x5b7   : > { %3238 = vmatpush1.bf16.msra.mxu1 %v6887_v34  ;;  %v6943_v34 = vld [vmem:[#allocation16 + $0xac] ss:$16 sps:$4 sm:$0xff]  }
 0x5b8   : > { %3239 = vmatprep.subr.bf16.mxu1 %v6892_v15  ;;  %v6941_v15 = vld [vmem:[#allocation16 + $0xa8] ss:$16 sps:$4 sm:$0xff]  }
 0x5bb   : > { %3240 = vmatpush1.bf16.msra.mxu1 %v6890_v16  ;;  %v6949_v16 = vld [vmem:[#allocation16 + $0xcc] ss:$16 sps:$4 sm:$0xff]  }
 0x5bc   : > { %3241 = vmatprep.subr.bf16.mxu1 %v6895_v17  ;;  %v6947_v17 = vld [vmem:[#allocation16 + $0xc8] ss:$16 sps:$4 sm:$0xff]  }
 0x5bf   : > { %3242 = vmatpush1.bf16.msra.mxu1 %v6893_v18  ;;  %v6955_v18 = vld [vmem:[#allocation16 + $0xec] ss:$16 sps:$4 sm:$0xff]  }
 0x5c0   : > { %3243 = vmatprep.subr.bf16.mxu1 %v6898_v19  ;;  %v6953_v19 = vld [vmem:[#allocation16 + $0xe8] ss:$16 sps:$4 sm:$0xff]  }
 0x5c3   : > { %3244 = vmatpush1.bf16.msra.mxu1 %v6896_v4  ;;  %v6961_v4 = vld [vmem:[#allocation16 + $0x10c] ss:$16 sps:$4 sm:$0xff]  }
 0x5c4   : > { %3245 = vmatprep.subr.bf16.mxu1 %v6901_v20  ;;  %v6959_v20 = vld [vmem:[#allocation16 + $0x108] ss:$16 sps:$4 sm:$0xff]  }
 0x5c7   : > { %3246 = vmatpush1.bf16.msra.mxu1 %v6899_v51  ;;  %v6967_v51 = vld [vmem:[#allocation16 + $0x12c] ss:$16 sps:$4 sm:$0xff]  }
 0x5c8   : > { %3247 = vmatprep.subr.bf16.mxu1 %v6904_v21  ;;  %v6965_v21 = vld [vmem:[#allocation16 + $0x128] ss:$16 sps:$4 sm:$0xff]  }
 0x5cb   : > { %3248 = vmatpush1.bf16.msra.mxu1 %v6902_v22  ;;  %v6973_v22 = vld [vmem:[#allocation16 + $0x14c] ss:$16 sps:$4 sm:$0xff]  }
 0x5cc   : > { %3249 = vmatprep.subr.bf16.mxu1 %v6907_v23  ;;  %v6971_v23 = vld [vmem:[#allocation16 + $0x148] ss:$16 sps:$4 sm:$0xff]  }
 0x5cf   : > { %3250 = vmatpush1.bf16.msra.mxu1 %v6905_v24  ;;  %v6979_v24 = vld [vmem:[#allocation16 + $0x16c] ss:$16 sps:$4 sm:$0xff]  }
 0x5d0   : > { %3749 = vmatprep.subr.bf16.mxu1 %v6913_v27  ;;  %v6983_v27 = vld [vmem:[#allocation16 + $0x188] ss:$16 sps:$4 sm:$0xff]  }
 0x685   : > { %v3121_v62 = vpop.f32.mrb[16].mxu1 }
 0x686   : > { %v6270_v63 = vpop.f32.mrb[17].mxu1 }
 0x687   : > { %v3124_v1 = vpop.f32.mrb[18].mxu1  ;;  %v7004_v63 = vld [vmem:[#allocation17] ss:$24 sps:$4 sm:$0xff]  }
 0x688   : > { %v3128_v2 = vpack.c.bf16 %v3124_v1, %v3121_v62  ;;  %v6271_v3 = vpop.f32.mrb[19].mxu1 }
 0x689   : > { %v7015_v3 = vld [vmem:[#allocation17 + $0x3c] ss:$24 sps:$4 sm:$0xff]  }
 0x68a   : > { %v3136_v5 = vadd.bf16 %v3135_v0, %v3128_v2  ;;  %v7007_v0 = vld [vmem:[#allocation17 + $0x8] ss:$24 sps:$4 sm:$0xff]   ;;  %v7012_v2 = vld [vmem:[#allocation17 + $0x34] ss:$24 sps:$4 sm:$0xff]  }
 0x68c   : > { %v3137_v7 = vmax.bf16 %v7696_v11, %v3136_v5  ;;  %v7010_v5 = vld [vmem:[#allocation17 + $0x30] ss:$24 sps:$4 sm:$0xff]  }
 0x68e   : > { %3268 = vmatmul.mubr.bf16.vlgmr.msra.gmra.mrb[20].mxu1 %v3137_v7  ;;  %v7018_v7 = vld [vmem:[#allocation17 + $0x64] ss:$24 sps:$4 sm:$0xff]  }
 0x68f   : > { %3750 = vmatpush1.bf16.msra.mxu1 %v6911_v6  ;;  %v7013_v6 = vld [vmem:[#allocation17 + $0x38] ss:$24 sps:$4 sm:$0xff]  }
 0x690   : > { %3751 = vmatprep.subr.bf16.mxu1 %v6919_v8  ;;  %v7021_v8 = vld [vmem:[#allocation17 + $0x6c] ss:$24 sps:$4 sm:$0xff]  }
 0x693   : > { %3752 = vmatpush1.bf16.msra.mxu1 %v6917_v9  ;;  %v7016_v9 = vld [vmem:[#allocation17 + $0x60] ss:$24 sps:$4 sm:$0xff]  }
 0x694   : > { %3753 = vmatprep.subr.bf16.mxu1 %v6925_v10  ;;  %v7019_v10 = vld [vmem:[#allocation17 + $0x68] ss:$24 sps:$4 sm:$0xff]  }
 0x697   : > { %3754 = vmatpush1.bf16.msra.mxu1 %v6923_v55  ;;  %v7024_v55 = vld [vmem:[#allocation17 + $0x94] ss:$24 sps:$4 sm:$0xff]  }
 0x698   : > { %3755 = vmatprep.subr.bf16.mxu1 %v6931_v56  ;;  %v7027_v56 = vld [vmem:[#allocation17 + $0x9c] ss:$24 sps:$4 sm:$0xff]  }
 0x69b   : > { %3756 = vmatpush1.bf16.msra.mxu1 %v6929_v12  ;;  %v7022_v12 = vld [vmem:[#allocation17 + $0x90] ss:$24 sps:$4 sm:$0xff]  }
 0x69c   : > { %3757 = vmatprep.subr.bf16.mxu1 %v6937_v13  ;;  %v7025_v13 = vld [vmem:[#allocation17 + $0x98] ss:$24 sps:$4 sm:$0xff]  }
 0x69f   : > { %3758 = vmatpush1.bf16.msra.mxu1 %v6935_v14  ;;  %v7030_v14 = vld [vmem:[#allocation17 + $0xc4] ss:$24 sps:$4 sm:$0xff]  }
 0x6a0   : > { %3759 = vmatprep.subr.bf16.mxu1 %v6943_v34  ;;  %v7033_v34 = vld [vmem:[#allocation17 + $0xcc] ss:$24 sps:$4 sm:$0xff]  }
 0x6a3   : > { %3760 = vmatpush1.bf16.msra.mxu1 %v6941_v15  ;;  %v7028_v15 = vld [vmem:[#allocation17 + $0xc0] ss:$24 sps:$4 sm:$0xff]  }
 0x6a4   : > { %3761 = vmatprep.subr.bf16.mxu1 %v6949_v16  ;;  %v7031_v16 = vld [vmem:[#allocation17 + $0xc8] ss:$24 sps:$4 sm:$0xff]  }
 0x6a7   : > { %3762 = vmatpush1.bf16.msra.mxu1 %v6947_v17  ;;  %v7036_v17 = vld [vmem:[#allocation17 + $0xf4] ss:$24 sps:$4 sm:$0xff]  }
 0x6a8   : > { %3763 = vmatprep.subr.bf16.mxu1 %v6955_v18  ;;  %v7039_v18 = vld [vmem:[#allocation17 + $0xfc] ss:$24 sps:$4 sm:$0xff]  }
 0x6ab   : > { %3764 = vmatpush1.bf16.msra.mxu1 %v6953_v19  ;;  %v7034_v19 = vld [vmem:[#allocation17 + $0xf0] ss:$24 sps:$4 sm:$0xff]  }
 0x6ac   : > { %3765 = vmatprep.subr.bf16.mxu1 %v6961_v4  ;;  %v7037_v4 = vld [vmem:[#allocation17 + $0xf8] ss:$24 sps:$4 sm:$0xff]  }
 0x6af   : > { %3766 = vmatpush1.bf16.msra.mxu1 %v6959_v20  ;;  %v7042_v20 = vld [vmem:[#allocation17 + $0x124] ss:$24 sps:$4 sm:$0xff]  }
 0x6b0   : > { %3767 = vmatprep.subr.bf16.mxu1 %v6967_v51  ;;  %v7045_v51 = vld [vmem:[#allocation17 + $0x12c] ss:$24 sps:$4 sm:$0xff]  }
 0x6b3   : > { %3768 = vmatpush1.bf16.msra.mxu1 %v6965_v21  ;;  %v7040_v21 = vld [vmem:[#allocation17 + $0x120] ss:$24 sps:$4 sm:$0xff]  }
 0x6b4   : > { %3769 = vmatprep.subr.bf16.mxu1 %v6973_v22  ;;  %v7043_v22 = vld [vmem:[#allocation17 + $0x128] ss:$24 sps:$4 sm:$0xff]  }
 0x6b7   : > { %3770 = vmatpush1.bf16.msra.mxu1 %v6971_v23  ;;  %v7048_v23 = vld [vmem:[#allocation17 + $0x154] ss:$24 sps:$4 sm:$0xff]  }
 0x6b8   : > { %3771 = vmatprep.subr.bf16.mxu1 %v6979_v24  ;;  %v7051_v24 = vld [vmem:[#allocation17 + $0x15c] ss:$24 sps:$4 sm:$0xff]  }
 0x6bb   : > { %3772 = vmatpush1.bf16.msra.mxu1 %v6977_v25  ;;  %v7046_v25 = vld [vmem:[#allocation17 + $0x150] ss:$24 sps:$4 sm:$0xff]  }
 0x6bc   : > { %3773 = vmatprep.subr.bf16.mxu1 %v6985_v26  ;;  %v7049_v26 = vld [vmem:[#allocation17 + $0x158] ss:$24 sps:$4 sm:$0xff]  }
 0x6bf   : > { %3774 = vmatpush1.bf16.msra.mxu1 %v6983_v27  ;;  %v7054_v27 = vld [vmem:[#allocation17 + $0x184] ss:$24 sps:$4 sm:$0xff]  }
 0x6c0   : > { %3775 = vmatprep.subr.bf16.mxu1 %v6991_v28  ;;  %v7057_v28 = vld [vmem:[#allocation17 + $0x18c] ss:$24 sps:$4 sm:$0xff]  }
 0x6c3   : > { %3776 = vmatpush1.bf16.msra.mxu1 %v6989_v29  ;;  %v7052_v29 = vld [vmem:[#allocation17 + $0x180] ss:$24 sps:$4 sm:$0xff]  }
 0x6c4   : > { %3777 = vmatprep.subr.bf16.mxu1 %v6997_v31  ;;  %v7060_v31 = vld [vmem:[#allocation17 + $0x1b4] ss:$24 sps:$4 sm:$0xff]  }
 0x6c7   : > { %3778 = vmatpush1.bf16.msra.mxu1 %v6995_v33  ;;  %v7058_v33 = vld [vmem:[#allocation17 + $0x1b0] ss:$24 sps:$4 sm:$0xff]  }
 0x6c8   : > { %3779 = vmatprep.subr.bf16.mxu1 %v7003_v36  ;;  %v7066_v36 = vld [vmem:[#allocation17 + $0x1e4] ss:$24 sps:$4 sm:$0xff]  }
 0x6cb   : > { %3780 = vmatpush1.bf16.msra.mxu1 %v7001_v38  ;;  %v7064_v38 = vld [vmem:[#allocation17 + $0x1e0] ss:$24 sps:$4 sm:$0xff]  }
 0x6cc   : > { %5096 = vmatprep.subr.bf16.mxu1 %v7009_v40  ;;  %v7072_v40 = vld [vmem:[#allocation17 + $0x214] ss:$24 sps:$4 sm:$0xff]  }
 0x761   : > { %v3269_v47 = vpop.f32.mrb[20].mxu1 }
 0x762   : > { %v3271_v48 = vpop.f32.mrb[21].mxu1 }
 0x763   : > { %v3273_v50 = vpop.f32.mrb[22].mxu1 }
 0x764   : > { %v3278_v54 = vpack.c.bf16 %v3273_v50, %v3269_v47  ;;  %v3275_v57 = vpop.f32.mrb[23].mxu1  ;;  %v7079_v47 = vld [vmem:[#allocation17 + $0x248] ss:$24 sps:$4 sm:$0xff]  }
 0x765   : > { %v3279_v59 = vpack.c.bf16 %v3275_v57, %v3271_v48  ;;  %v7084_v48 = vld [vmem:[#allocation17 + $0x274] ss:$24 sps:$4 sm:$0xff]   ;;  %v7082_v50 = vld [vmem:[#allocation17 + $0x270] ss:$24 sps:$4 sm:$0xff]  }
 0x766   : > { %v3317_v60 = vadd.bf16 %v3309_v49, %v3278_v54  ;;  %v7087_v49 = vld [vmem:[#allocation17 + $0x27c] ss:$24 sps:$4 sm:$0xff]   ;;  %v7093_v57 = vld [vmem:[#allocation17 + $0x2ac] ss:$24 sps:$4 sm:$0xff]  }
 0x767   : > { %v3318_v61 = vadd.bf16 %v3316_v52, %v3279_v59  ;;  %v7085_v52 = vld [vmem:[#allocation17 + $0x278] ss:$24 sps:$4 sm:$0xff]   ;;  %v7090_v54 = vld [vmem:[#allocation17 + $0x2a4] ss:$24 sps:$4 sm:$0xff]  }
 0x768   : > { %v3319_v1 = vmax.bf16 %v7696_v11, %v3317_v60  ;;  %v7088_v59 = vld [vmem:[#allocation17 + $0x2a0] ss:$24 sps:$4 sm:$0xff]  }
 0x769   : > { %v3320_v62 = vmax.bf16 %v7696_v11, %v3318_v61  ;;  %v7091_v60 = vld [vmem:[#allocation17 + $0x2a8] ss:$24 sps:$4 sm:$0xff]   ;;  %v7096_v61 = vld [vmem:[#allocation17 + $0x2d4] ss:$24 sps:$4 sm:$0xff]  }
 0x76b   : > { %3738 = vmatprep.mubr.bf16.mxu0 %v3320_v62  ;;  %3781 = vmatprep.mubr.bf16.mxu1 %v3320_v62  ;;  %v7099_v62 = vld [vmem:[#allocation17 + $0x2dc] ss:$24 sps:$4 sm:$0xff]  }
 0x76c   : > { %3739 = vmatmul.mubr.bf16.vlgmr.msra.gmra.mrb[8].mxu0 %v3319_v1  ;;  %3782 = vmatmul.mubr.bf16.vlgmr.msra.gmra.mrb[24].mxu1 %v3319_v1  ;;  %v7102_v1 = vld [vmem:[#allocation17 + $0x304] ss:$24 sps:$4 sm:$0xff]  }
 0x76d   : > { %5011 = vmatpush1.bf16.msra.mxu0 %v7004_v63  ;;  %5097 = vmatpush1.bf16.msra.mxu1 %v7007_v0  ;;  %v7094_v63 = vld [vmem:[#allocation17 + $0x2d0] ss:$24 sps:$4 sm:$0xff]  }
 0x76e   : > { %5012 = vmatprep.subr.bf16.mxu0 %v7012_v2  ;;  %5098 = vmatprep.subr.bf16.mxu1 %v7015_v3  ;;  %v7097_v0 = vld [vmem:[#allocation17 + $0x2d8] ss:$24 sps:$4 sm:$0xff]   ;;  %v7105_v2 = vld [vmem:[#allocation17 + $0x30c] ss:$24 sps:$4 sm:$0xff]  }
 0x76f   : > { %v5988_v3 = vld.sshfl [vmem:[%s8444_s17] sm:$0x33 pattern:$0x75316420]  ;;  %s7595_s17 = scalar_lea.vmem %s7594_s6, 1536 }
 0x770   : > { %p7597_p9 = scmp.lt.s32.totalorder %s7595_s17, %s7589_s2 }
 0x771   : > { %5013 = vmatpush1.bf16.msra.mxu0 %v7010_v5  ;;  %5099 = vmatpush1.bf16.msra.mxu1 %v7013_v6  ;;  %v3804_v5 = vcombine.high %v5988_v3, %v5988_v3 }
 0x772   : > { %5014 = vmatprep.subr.bf16.mxu0 %v7018_v7  ;;  %5100 = vmatprep.subr.bf16.mxu1 %v7021_v8  ;;  %v8249_v7 = vrot.slane %v5988_v3, %v8167_v53  ;;  %v7148_v3 = vld [vmem:[#allocation17 + $0x480] ss:$24 sps:$4 sm:$0xff]   ;;  %p7598_p4 = por %p7597_p9, %p7596_p6 }
 0x773   : > { %v3818_v6 = vrot.slane %v3804_v5, %v8167_v53  ;;  %v7151_v5 = vld [vmem:[#allocation17 + $0x488] ss:$24 sps:$4 sm:$0xff]  }
 0x774   : > { %p7599_p3 = pnand %p7598_p4, %p7592_p8 }
 0x775   : > { %5015 = vmatpush1.bf16.msra.mxu0 %v7016_v9  ;;  %5101 = vmatpush1.bf16.msra.mxu1 %v7019_v10  ;;  %v3820_v8 = vcombine.high %v3818_v6, %v3818_v6  ;;  %v3822_v9 = vpack.i.b16 %v8249_v7, %v8249_v7  ;;  %v3829_v10 = vpack.i.b16 %v3818_v6, %v3818_v6  ;;  %v7156_v6 = vld [vmem:[#allocation17 + $0x4b4] ss:$24 sps:$4 sm:$0xff]  }
 0x776   : > { %5016 = vmatprep.subr.bf16.mxu0 %v7024_v55  ;;  %5102 = vmatprep.subr.bf16.mxu1 %v7027_v56 }
 0x777   : > { %v3843_v55 = vpack.i.b16 %v3820_v8, %v3820_v8  ;;  %v7159_v8 = vld [vmem:[#allocation17 + $0x4bc] ss:$24 sps:$4 sm:$0xff]  }
 0x779   : > { %5017 = vmatpush1.bf16.msra.mxu0 %v7022_v12  ;;  %5103 = vmatpush1.bf16.msra.mxu1 %v7025_v13 }
 0x77a   : > { %5018 = vmatprep.subr.bf16.mxu0 %v7030_v14  ;;  %5104 = vmatprep.subr.bf16.mxu1 %v7033_v34  ;;  %v3827_v34 = vrot.slane %v3822_v9, %v8177_v58  ;;  %v7154_v9 = vld [vmem:[#allocation17 + $0x4b0] ss:$24 sps:$4 sm:$0xff]  }
 0x77d   : > { %5019 = vmatpush1.bf16.msra.mxu0 %v7028_v15  ;;  %5105 = vmatpush1.bf16.msra.mxu1 %v7031_v16 }
 0x77e   : > { %5020 = vmatprep.subr.bf16.mxu0 %v7036_v17  ;;  %5106 = vmatprep.subr.bf16.mxu1 %v7039_v18  ;;  %v3834_v17 = vrot.slane %v3829_v10, %v8177_v58  ;;  %v7157_v10 = vld [vmem:[#allocation17 + $0x4b8] ss:$24 sps:$4 sm:$0xff]  }
 0x781   : > { %5021 = vmatpush1.bf16.msra.mxu0 %v7034_v19  ;;  %5107 = vmatpush1.bf16.msra.mxu1 %v7037_v4 }
 0x782   : > { %5022 = vmatprep.subr.bf16.mxu0 %v7042_v20  ;;  %5108 = vmatprep.subr.bf16.mxu1 %v7045_v51  ;;  %v3848_v51 = vrot.slane %v3843_v55, %v8177_v58  ;;  %v7162_v55 = vld [vmem:[#allocation17 + $0x4e4] ss:$24 sps:$4 sm:$0xff]  }
 0x785   : > { %5023 = vmatpush1.bf16.msra.mxu0 %v7040_v21  ;;  %5109 = vmatpush1.bf16.msra.mxu1 %v7043_v22 }
 0x786   : > { %5024 = vmatprep.subr.bf16.mxu0 %v7048_v23  ;;  %5110 = vmatprep.subr.bf16.mxu1 %v7051_v24 }
 0x789   : > { %5025 = vmatpush1.bf16.msra.mxu0 %v7046_v25  ;;  %5111 = vmatpush1.bf16.msra.mxu1 %v7049_v26 }
 0x78a   : > { %5026 = vmatprep.subr.bf16.mxu0 %v7054_v27  ;;  %5112 = vmatprep.subr.bf16.mxu1 %v7057_v28  ;;  %v7100_v27 = vld [vmem:[#allocation17 + $0x300] ss:$24 sps:$4 sm:$0xff]  }
 0x78b   : > { %v7103_v28 = vld [vmem:[#allocation17 + $0x308] ss:$24 sps:$4 sm:$0xff]  }
 0x78d   : > { %5027 = vmatpush1.bf16.msra.mxu0 %v7052_v29  ;;  %5113 = vmatpush1.bf16.msra.mxu1 %v7055_v30  ;;  %v7108_v30 = vld [vmem:[#allocation17 + $0x334] ss:$24 sps:$4 sm:$0xff]  }
 0x78e   : > { %5028 = vmatprep.subr.bf16.mxu0 %v7060_v31  ;;  %5114 = vmatprep.subr.bf16.mxu1 %v7063_v32  ;;  %v7111_v31 = vld [vmem:[#allocation17 + $0x33c] ss:$24 sps:$4 sm:$0xff]  }
 0x791   : > { %5029 = vmatpush1.bf16.msra.mxu0 %v7058_v33  ;;  %5115 = vmatpush1.bf16.msra.mxu1 %v7061_v35  ;;  %v7106_v33 = vld [vmem:[#allocation17 + $0x330] ss:$24 sps:$4 sm:$0xff]  }
 0x792   : > { %5030 = vmatprep.subr.bf16.mxu0 %v7066_v36  ;;  %5116 = vmatprep.subr.bf16.mxu1 %v7069_v37  ;;  %v7109_v35 = vld [vmem:[#allocation17 + $0x338] ss:$24 sps:$4 sm:$0xff]   ;;  %v7114_v36 = vld [vmem:[#allocation17 + $0x364] ss:$24 sps:$4 sm:$0xff]  }
 0x793   : > { %v7117_v37 = vld [vmem:[#allocation17 + $0x36c] ss:$24 sps:$4 sm:$0xff]  }
 0x795   : > { %5031 = vmatpush1.bf16.msra.mxu0 %v7064_v38  ;;  %5117 = vmatpush1.bf16.msra.mxu1 %v7067_v39  ;;  %v7112_v38 = vld [vmem:[#allocation17 + $0x360] ss:$24 sps:$4 sm:$0xff]  }
 0x796   : > { %5032 = vmatprep.subr.bf16.mxu0 %v7072_v40  ;;  %5118 = vmatprep.subr.bf16.mxu1 %v7075_v41  ;;  %v7115_v39 = vld [vmem:[#allocation17 + $0x368] ss:$24 sps:$4 sm:$0xff]   ;;  %v7120_v40 = vld [vmem:[#allocation17 + $0x394] ss:$24 sps:$4 sm:$0xff]  }
 0x797   : > { %v7123_v41 = vld [vmem:[#allocation17 + $0x39c] ss:$24 sps:$4 sm:$0xff]  }
 0x799   : > { %5033 = vmatpush1.bf16.msra.mxu0 %v7070_v42  ;;  %5119 = vmatpush1.bf16.msra.mxu1 %v7073_v43  ;;  %v7118_v42 = vld [vmem:[#allocation17 + $0x390] ss:$24 sps:$4 sm:$0xff]  }
 0x79a   : > { %5034 = vmatprep.subr.bf16.mxu0 %v7078_v44  ;;  %5120 = vmatprep.subr.bf16.mxu1 %v7081_v45  ;;  %v7121_v43 = vld [vmem:[#allocation17 + $0x398] ss:$24 sps:$4 sm:$0xff]   ;;  %v7126_v44 = vld [vmem:[#allocation17 + $0x3c4] ss:$24 sps:$4 sm:$0xff]  }
 0x79b   : > { %v7129_v45 = vld [vmem:[#allocation17 + $0x3cc] ss:$24 sps:$4 sm:$0xff]  }
 0x79d   : > { %5035 = vmatpush1.bf16.msra.mxu0 %v7076_v46  ;;  %5121 = vmatpush1.bf16.msra.mxu1 %v7079_v47  ;;  %v7124_v46 = vld [vmem:[#allocation17 + $0x3c0] ss:$24 sps:$4 sm:$0xff]  }
 0x79e   : > { %5036 = vmatprep.subr.bf16.mxu0 %v7084_v48  ;;  %5122 = vmatprep.subr.bf16.mxu1 %v7087_v49  ;;  %v7127_v47 = vld [vmem:[#allocation17 + $0x3c8] ss:$24 sps:$4 sm:$0xff]   ;;  %v7132_v48 = vld [vmem:[#allocation17 + $0x3f4] ss:$24 sps:$4 sm:$0xff]  }
 0x79f   : > { %v7135_v49 = vld [vmem:[#allocation17 + $0x3fc] ss:$24 sps:$4 sm:$0xff]  }
 0x7a1   : > { %5037 = vmatpush1.bf16.msra.mxu0 %v7082_v50  ;;  %5123 = vmatpush1.bf16.msra.mxu1 %v7085_v52  ;;  %v7130_v50 = vld [vmem:[#allocation17 + $0x3f0] ss:$24 sps:$4 sm:$0xff]  }
 0x7a2   : > { %5038 = vmatprep.subr.bf16.mxu0 %v7090_v54  ;;  %5124 = vmatprep.subr.bf16.mxu1 %v7093_v57  ;;  %v7133_v52 = vld [vmem:[#allocation17 + $0x3f8] ss:$24 sps:$4 sm:$0xff]   ;;  %v7138_v54 = vld [vmem:[#allocation17 + $0x424] ss:$24 sps:$4 sm:$0xff]  }
 0x7a3   : > { %v7141_v57 = vld [vmem:[#allocation17 + $0x42c] ss:$24 sps:$4 sm:$0xff]  }
 0x7a5   : > { %5039 = vmatpush1.bf16.msra.mxu0 %v7088_v59  ;;  %5125 = vmatpush1.bf16.msra.mxu1 %v7091_v60  ;;  %v7136_v59 = vld [vmem:[#allocation17 + $0x420] ss:$24 sps:$4 sm:$0xff]  }
 0x7a6   : > { %5040 = vmatprep.subr.bf16.mxu0 %v7096_v61  ;;  %5126 = vmatprep.subr.bf16.mxu1 %v7099_v62  ;;  %v7139_v60 = vld [vmem:[#allocation17 + $0x428] ss:$24 sps:$4 sm:$0xff]   ;;  %v7144_v61 = vld [vmem:[#allocation17 + $0x454] ss:$24 sps:$4 sm:$0xff]  }
 0x7a7   : > { %v7147_v62 = vld [vmem:[#allocation17 + $0x45c] ss:$24 sps:$4 sm:$0xff]  }
 0x7a9   : > { %5041 = vmatpush1.bf16.msra.mxu0 %v7094_v63  ;;  %5127 = vmatpush1.bf16.msra.mxu1 %v7097_v0  ;;  %v7142_v63 = vld [vmem:[#allocation17 + $0x450] ss:$24 sps:$4 sm:$0xff]  }
 0x7aa   : > { %5053 = vmatprep.subr.bf16.mxu0 %v7102_v1  ;;  %5139 = vmatprep.subr.bf16.mxu1 %v7105_v2  ;;  %v7145_v0 = vld [vmem:[#allocation17 + $0x458] ss:$24 sps:$4 sm:$0xff]   ;;  %v7150_v1 = vld [vmem:[#allocation17 + $0x484] ss:$24 sps:$4 sm:$0xff]  }
 0x7ab   : > { %v7153_v2 = vld [vmem:[#allocation17 + $0x48c] ss:$24 sps:$4 sm:$0xff]  }
 0x83f   : > { %v3740_v56 = vpop.f32.mrb[8].mxu0  ;;  %v8253_v12 = vpop.f32.mrb[24].mxu1 }
 0x840   : > { %v3742_v13 = vpop.f32.mrb[9].mxu0  ;;  %v3785_v14 = vpop.f32.mrb[25].mxu1 }
 0x841   : > { %v3744_v15 = vpop.f32.mrb[10].mxu0  ;;  %v8256_v16 = vpop.f32.mrb[26].mxu1 }
 0x842   : > { %v3792_v18 = vpack.c.bf16 %v3744_v15, %v3740_v56  ;;  %v3794_v19 = vpack.c.bf16 %v8256_v16, %v8253_v12  ;;  %v3746_v4 = vpop.f32.mrb[11].mxu0  ;;  %v3789_v20 = vpop.f32.mrb[27].mxu1  ;;  %v7165_v56 = vld [vmem:[#allocation17 + $0x4ec] ss:$24 sps:$4 sm:$0xff]   ;;  %v7171_v15 = vld [vmem:[#allocation17 + $0x51c] ss:$24 sps:$4 sm:$0xff]  }
 0x843   : > { %v3793_v21 = vpack.c.bf16 %v3746_v4, %v3742_v13  ;;  %v3795_v22 = vpack.c.bf16 %v3789_v20, %v3785_v14  ;;  %v7160_v13 = vld [vmem:[#allocation17 + $0x4e0] ss:$24 sps:$4 sm:$0xff]   ;;  %v7174_v4 = vld [vmem:[#allocation17 + $0x544] ss:$24 sps:$4 sm:$0xff]   ;;  %v7204_v16 = vld [vmem:[#allocation17 + $0x74] ss:$24 sps:$4 sm:$0xff]  }
 0x844   : > { %v3849_v23 = vadd.bf16 %v3827_v34, %v3792_v18  ;;  %v7163_v14 = vld [vmem:[#allocation17 + $0x4e8] ss:$24 sps:$4 sm:$0xff]   ;;  %v7168_v34 = vld [vmem:[#allocation17 + $0x514] ss:$24 sps:$4 sm:$0xff]   ;;  %v7169_v18 = vld [vmem:[#allocation17 + $0x518] ss:$24 sps:$4 sm:$0xff]  }
 0x845   : > { %v3850_v24 = vadd.bf16 %v3834_v17, %v3793_v21  ;;  %v3852_v25 = vadd.bf16 %v3848_v51, %v3795_v22  ;;  %v7166_v17 = vld [vmem:[#allocation17 + $0x510] ss:$24 sps:$4 sm:$0xff]   ;;  %v7177_v20 = vld [vmem:[#allocation17 + $0x54c] ss:$24 sps:$4 sm:$0xff]   ;;  %v7172_v51 = vld [vmem:[#allocation17 + $0x540] ss:$24 sps:$4 sm:$0xff]   ;;  %v3819_v22 = vcombine.high %v8249_v7, %v8249_v7 }
 0x846   : > { %v8266_v29 = vmax.bf16 %v7696_v11, %v3849_v23  ;;  %v7175_v21 = vld [vmem:[#allocation17 + $0x548] ss:$24 sps:$4 sm:$0xff]   ;;  %v7180_v23 = vld [vmem:[#allocation17 + $0x574] ss:$24 sps:$4 sm:$0xff]  }
 0x847   : > { %v8263_v26 = vmax.bf16 %v7696_v11, %v3850_v24  ;;  %v8273_v32 = vmax.bf16 %v7696_v11, %v3852_v25  ;;  %v7183_v24 = vld [vmem:[#allocation17 + $0x57c] ss:$24 sps:$4 sm:$0xff]   ;;  %v7178_v25 = vld [vmem:[#allocation17 + $0x570] ss:$24 sps:$4 sm:$0xff]   ;;  %v7199_v12 = vld [vmem:[#allocation17 + $0x40] ss:$24 sps:$4 sm:$0xff]  }
 0x848   : > { %v7192_v7 = vld [vmem:[#allocation17 + $0x5d4] ss:$24 sps:$4 sm:$0xff]  }
 0x849   : > { %5042 = vmatprep.mubr.bf16.mxu0 %v8263_v26  ;;  %5128 = vmatprep.mubr.bf16.mxu1 %v8263_v26 }
 0x84a   : > { %5043 = vmatmul.mubr.bf16.vlgmr.msra.gmra.mrb[12].mxu0 %v8266_v29  ;;  %5129 = vmatmul.mubr.bf16.vlgmr.msra.gmra.mrb[28].mxu1 %v8266_v29 }
 0x84b   : > { %5054 = vmatpush1.bf16.msra.mxu0 %v7100_v27  ;;  %5140 = vmatpush1.bf16.msra.mxu1 %v7103_v28  ;;  %v7181_v27 = vld [vmem:[#allocation17 + $0x578] ss:$24 sps:$4 sm:$0xff]   ;;  %v3836_v28 = vpack.i.b16 %v3819_v22, %v3819_v22  ;;  %v7264_v22 = vld [vmem:[#allocation17 + $0x434] ss:$24 sps:$4 sm:$0xff]  }
 0x84c   : > { %5085 = vmatprep.mubr.bf16.mxu0 %v8273_v32  ;;  %5171 = vmatprep.mubr.bf16.mxu1 %v8273_v32 }
 0x84d   : > { %5055 = vmatprep.subr.bf16.mxu0 %v7108_v30  ;;  %5141 = vmatprep.subr.bf16.mxu1 %v7111_v31  ;;  %v7186_v30 = vld [vmem:[#allocation17 + $0x5a4] ss:$24 sps:$4 sm:$0xff]  }
 0x84e   : > { %v7189_v31 = vld [vmem:[#allocation17 + $0x5ac] ss:$24 sps:$4 sm:$0xff]  }
 0x84f   : > { %5056 = vmatpush1.bf16.msra.mxu0 %v7106_v33  ;;  %5142 = vmatpush1.bf16.msra.mxu1 %v7109_v35  ;;  %v7184_v33 = vld [vmem:[#allocation17 + $0x5a0] ss:$24 sps:$4 sm:$0xff]  }
 0x850   : > { %5057 = vmatprep.subr.bf16.mxu0 %v7114_v36  ;;  %5143 = vmatprep.subr.bf16.mxu1 %v7117_v37  ;;  %v7187_v35 = vld [vmem:[#allocation17 + $0x5a8] ss:$24 sps:$4 sm:$0xff]   ;;  %v3841_v36 = vrot.slane %v3836_v28, %v8177_v58  ;;  %v7195_v37 = vld [vmem:[#allocation17 + $0x5dc] ss:$24 sps:$4 sm:$0xff]  }
 0x851   : > { %v7273_v28 = vld [vmem:[#allocation17 + $0x4c4] ss:$24 sps:$4 sm:$0xff]  }
 0x853   : > { %5058 = vmatpush1.bf16.msra.mxu0 %v7112_v38  ;;  %5144 = vmatpush1.bf16.msra.mxu1 %v7115_v39  ;;  %v7190_v38 = vld [vmem:[#allocation17 + $0x5d0] ss:$24 sps:$4 sm:$0xff]  }
 0x854   : > { %5059 = vmatprep.subr.bf16.mxu0 %v7120_v40  ;;  %5145 = vmatprep.subr.bf16.mxu1 %v7123_v41  ;;  %v7193_v39 = vld [vmem:[#allocation17 + $0x5d8] ss:$24 sps:$4 sm:$0xff]   ;;  %v3851_v40 = vadd.bf16 %v3841_v36, %v3794_v19  ;;  %v7198_v41 = vld [vmem:[#allocation17 + $0x14] ss:$24 sps:$4 sm:$0xff]  }
 0x855   : > { %v7202_v19 = vld [vmem:[#allocation17 + $0x70] ss:$24 sps:$4 sm:$0xff]   ;;  %v7277_v36 = vld [vmem:[#allocation17 + $0x520] ss:$24 sps:$4 sm:$0xff]  }
 0x857   : > { %5060 = vmatpush1.bf16.msra.mxu0 %v7118_v42  ;;  %5146 = vmatpush1.bf16.msra.mxu1 %v7121_v43  ;;  %v7196_v42 = vld [vmem:[#allocation17 + $0x10] ss:$24 sps:$4 sm:$0xff]   ;;  %v8284_v43 = vmax.bf16 %v7696_v11, %v3851_v40  ;;  %v7210_v11 = vld [vmem:[#allocation17 + $0xd4] ss:$24 sps:$4 sm:$0xff]  }
 0x858   : > { %5061 = vmatprep.subr.bf16.mxu0 %v7126_v44  ;;  %5147 = vmatprep.subr.bf16.mxu1 %v7129_v45  ;;  %v7201_v44 = vld [vmem:[#allocation17 + $0x44] ss:$24 sps:$4 sm:$0xff]   ;;  %v7288_v40 = vld [vmem:[#allocation17 + $0x5b4] ss:$24 sps:$4 sm:$0xff]  }
 0x859   : > { %v7207_v45 = vld [vmem:[#allocation17 + $0xa4] ss:$24 sps:$4 sm:$0xff]  }
 0x85b   : > { %5062 = vmatpush1.bf16.msra.mxu0 %v7124_v46  ;;  %5148 = vmatpush1.bf16.msra.mxu1 %v7127_v47  ;;  %v7205_v46 = vld [vmem:[#allocation17 + $0xa0] ss:$24 sps:$4 sm:$0xff]   ;;  %v7208_v47 = vld [vmem:[#allocation17 + $0xd0] ss:$24 sps:$4 sm:$0xff]  }
 0x85c   : > { %5063 = vmatprep.subr.bf16.mxu0 %v7132_v48  ;;  %5149 = vmatprep.subr.bf16.mxu1 %v7135_v49  ;;  %v7213_v48 = vld [vmem:[#allocation17 + $0x104] ss:$24 sps:$4 sm:$0xff]   ;;  %v7211_v49 = vld [vmem:[#allocation17 + $0x100] ss:$24 sps:$4 sm:$0xff]  }
 0x85f   : > { %5064 = vmatpush1.bf16.msra.mxu0 %v7130_v50  ;;  %5150 = vmatpush1.bf16.msra.mxu1 %v7133_v52  ;;  %v7216_v50 = vld [vmem:[#allocation17 + $0x134] ss:$24 sps:$4 sm:$0xff]   ;;  %v7219_v52 = vld [vmem:[#allocation17 + $0x164] ss:$24 sps:$4 sm:$0xff]  }
 0x860   : > { %5065 = vmatprep.subr.bf16.mxu0 %v7138_v54  ;;  %5151 = vmatprep.subr.bf16.mxu1 %v7141_v57  ;;  %v7217_v54 = vld [vmem:[#allocation17 + $0x160] ss:$24 sps:$4 sm:$0xff]   ;;  %v7222_v57 = vld [vmem:[#allocation17 + $0x194] ss:$24 sps:$4 sm:$0xff]  }
 0x863   : > { %5066 = vmatpush1.bf16.msra.mxu0 %v7136_v59  ;;  %5152 = vmatpush1.bf16.msra.mxu1 %v7139_v60  ;;  %v7220_v59 = vld [vmem:[#allocation17 + $0x190] ss:$24 sps:$4 sm:$0xff]   ;;  %v7225_v60 = vld [vmem:[#allocation17 + $0x1c4] ss:$24 sps:$4 sm:$0xff]  }
 0x864   : > { %5067 = vmatprep.subr.bf16.mxu0 %v7144_v61  ;;  %5153 = vmatprep.subr.bf16.mxu1 %v7147_v62  ;;  %v7223_v61 = vld [vmem:[#allocation17 + $0x1c0] ss:$24 sps:$4 sm:$0xff]   ;;  %v7228_v62 = vld [vmem:[#allocation17 + $0x1f4] ss:$24 sps:$4 sm:$0xff]  }
 0x867   : > { %5068 = vmatpush1.bf16.msra.mxu0 %v7142_v63  ;;  %5154 = vmatpush1.bf16.msra.mxu1 %v7145_v0  ;;  %v7226_v63 = vld [vmem:[#allocation17 + $0x1f0] ss:$24 sps:$4 sm:$0xff]   ;;  %v7231_v0 = vld [vmem:[#allocation17 + $0x224] ss:$24 sps:$4 sm:$0xff]  }
 0x868   : > { %5069 = vmatprep.subr.bf16.mxu0 %v7150_v1  ;;  %5155 = vmatprep.subr.bf16.mxu1 %v7153_v2  ;;  %v7229_v1 = vld [vmem:[#allocation17 + $0x220] ss:$24 sps:$4 sm:$0xff]   ;;  %v7234_v2 = vld [vmem:[#allocation17 + $0x254] ss:$24 sps:$4 sm:$0xff]  }
 0x86b   : > { %5070 = vmatpush1.bf16.msra.mxu0 %v7148_v3  ;;  %5156 = vmatpush1.bf16.msra.mxu1 %v7151_v5  ;;  %v7232_v3 = vld [vmem:[#allocation17 + $0x250] ss:$24 sps:$4 sm:$0xff]   ;;  %v7237_v5 = vld [vmem:[#allocation17 + $0x284] ss:$24 sps:$4 sm:$0xff]  }
 0x86c   : > { %5071 = vmatprep.subr.bf16.mxu0 %v7156_v6  ;;  %5157 = vmatprep.subr.bf16.mxu1 %v7159_v8  ;;  %v7235_v6 = vld [vmem:[#allocation17 + $0x280] ss:$24 sps:$4 sm:$0xff]   ;;  %v7240_v8 = vld [vmem:[#allocation17 + $0x2b4] ss:$24 sps:$4 sm:$0xff]  }
 0x86f   : > { %5072 = vmatpush1.bf16.msra.mxu0 %v7154_v9  ;;  %5158 = vmatpush1.bf16.msra.mxu1 %v7157_v10  ;;  %v7238_v9 = vld [vmem:[#allocation17 + $0x2b0] ss:$24 sps:$4 sm:$0xff]   ;;  %v7243_v10 = vld [vmem:[#allocation17 + $0x2e4] ss:$24 sps:$4 sm:$0xff]  }
 0x870   : > { %5073 = vmatprep.subr.bf16.mxu0 %v7162_v55  ;;  %5159 = vmatprep.subr.bf16.mxu1 %v7165_v56  ;;  %v7241_v55 = vld [vmem:[#allocation17 + $0x2e0] ss:$24 sps:$4 sm:$0xff]   ;;  %v7246_v56 = vld [vmem:[#allocation17 + $0x314] ss:$24 sps:$4 sm:$0xff]  }
 0x873   : > { %5074 = vmatpush1.bf16.msra.mxu0 %v7160_v13  ;;  %5160 = vmatpush1.bf16.msra.mxu1 %v7163_v14  ;;  %v7244_v13 = vld [vmem:[#allocation17 + $0x310] ss:$24 sps:$4 sm:$0xff]   ;;  %v7249_v14 = vld [vmem:[#allocation17 + $0x344] ss:$24 sps:$4 sm:$0xff]  }
 0x874   : > { %5075 = vmatprep.subr.bf16.mxu0 %v7168_v34  ;;  %5161 = vmatprep.subr.bf16.mxu1 %v7171_v15  ;;  %v7247_v34 = vld [vmem:[#allocation17 + $0x340] ss:$24 sps:$4 sm:$0xff]   ;;  %v7252_v15 = vld [vmem:[#allocation17 + $0x374] ss:$24 sps:$4 sm:$0xff]  }
 0x877   : > { %5076 = vmatpush1.bf16.msra.mxu0 %v7166_v17  ;;  %5162 = vmatpush1.bf16.msra.mxu1 %v7169_v18  ;;  %v7250_v17 = vld [vmem:[#allocation17 + $0x370] ss:$24 sps:$4 sm:$0xff]   ;;  %v7255_v18 = vld [vmem:[#allocation17 + $0x3a4] ss:$24 sps:$4 sm:$0xff]  }
 0x878   : > { %5077 = vmatprep.subr.bf16.mxu0 %v7174_v4  ;;  %5163 = vmatprep.subr.bf16.mxu1 %v7177_v20  ;;  %v7253_v4 = vld [vmem:[#allocation17 + $0x3a0] ss:$24 sps:$4 sm:$0xff]   ;;  %v7258_v20 = vld [vmem:[#allocation17 + $0x3d4] ss:$24 sps:$4 sm:$0xff]  }
 0x87b   : > { %5078 = vmatpush1.bf16.msra.mxu0 %v7172_v51  ;;  %5164 = vmatpush1.bf16.msra.mxu1 %v7175_v21  ;;  %v7256_v51 = vld [vmem:[#allocation17 + $0x3d0] ss:$24 sps:$4 sm:$0xff]   ;;  %v7261_v21 = vld [vmem:[#allocation17 + $0x404] ss:$24 sps:$4 sm:$0xff]  }
 0x87c   : > { %5079 = vmatprep.subr.bf16.mxu0 %v7180_v23  ;;  %5165 = vmatprep.subr.bf16.mxu1 %v7183_v24  ;;  %v7267_v23 = vld [vmem:[#allocation17 + $0x464] ss:$24 sps:$4 sm:$0xff]   ;;  %v7265_v24 = vld [vmem:[#allocation17 + $0x460] ss:$24 sps:$4 sm:$0xff]  }
 0x87f   : > { %5080 = vmatpush1.bf16.msra.mxu0 %v7178_v25  ;;  %5166 = vmatpush1.bf16.msra.mxu1 %v7181_v27  ;;  %v7270_v25 = vld [vmem:[#allocation17 + $0x494] ss:$24 sps:$4 sm:$0xff]   ;;  %v7268_v27 = vld [vmem:[#allocation17 + $0x490] ss:$24 sps:$4 sm:$0xff]  }
 0x880   : > { %5081 = vmatprep.subr.bf16.mxu0 %v7186_v30  ;;  %5167 = vmatprep.subr.bf16.mxu1 %v7189_v31  ;;  %v7271_v30 = vld [vmem:[#allocation17 + $0x4c0] ss:$24 sps:$4 sm:$0xff]   ;;  %v7276_v31 = vld [vmem:[#allocation17 + $0x4f4] ss:$24 sps:$4 sm:$0xff]  }
 0x883   : > { %5082 = vmatpush1.bf16.msra.mxu0 %v7184_v33  ;;  %5168 = vmatpush1.bf16.msra.mxu1 %v7187_v35  ;;  %v7274_v33 = vld [vmem:[#allocation17 + $0x4f0] ss:$24 sps:$4 sm:$0xff]   ;;  %v7279_v35 = vld [vmem:[#allocation17 + $0x524] ss:$24 sps:$4 sm:$0xff]  }
 0x884   : > { %5083 = vmatprep.subr.bf16.mxu0 %v7192_v7  ;;  %5169 = vmatprep.subr.bf16.mxu1 %v7195_v37  ;;  %v7282_v7 = vld [vmem:[#allocation17 + $0x554] ss:$24 sps:$4 sm:$0xff]   ;;  %v7280_v37 = vld [vmem:[#allocation17 + $0x550] ss:$24 sps:$4 sm:$0xff]  }
 0x887   : > { %5084 = vmatpush1.bf16.msra.mxu0 %v7190_v38  ;;  %5170 = vmatpush1.bf16.msra.mxu1 %v7193_v39  ;;  %v7285_v38 = vld [vmem:[#allocation17 + $0x584] ss:$24 sps:$4 sm:$0xff]   ;;  %v7283_v39 = vld [vmem:[#allocation17 + $0x580] ss:$24 sps:$4 sm:$0xff]  }
 0x888   : > { %5182 = vmatprep.subr.bf16.mxu0 %v7198_v41  ;;  %v7286_v41 = vld [vmem:[#allocation17 + $0x5b0] ss:$24 sps:$4 sm:$0xff]  }
 0x88a   : > { %5086 = vmatmul.mubr.bf16.vlgmr.msra.gmra.mrb[12].mxu0 %v8284_v43  ;;  %5172 = vmatmul.mubr.bf16.vlgmr.msra.gmra.mrb[28].mxu1 %v8284_v43 }
 0x88b   : > { %5183 = vmatpush1.bf16.msra.mxu0 %v7196_v42  ;;  %5214 = vmatprep.mubr.bf16.mxu0 %v8263_v26  ;;  %v7214_v26 = vld [vmem:[#allocation17 + $0x130] ss:$24 sps:$4 sm:$0xff]   ;;  %v7291_v42 = vld [vmem:[#allocation17 + $0x5e4] ss:$24 sps:$4 sm:$0xff]  }
 0x88c   : > { %5184 = vmatprep.subr.bf16.mxu0 %v7201_v44  ;;  %v7289_v44 = vld [vmem:[#allocation17 + $0x5e0] ss:$24 sps:$4 sm:$0xff]  }
 0x88f   : > { %5185 = vmatpush1.bf16.msra.mxu0 %v7199_v12  ;;  %v4049_v12 = vld [vmem:[%s8445_s10] sm:$0x3f] }
 0x890   : > { %5186 = vmatprep.subr.bf16.mxu0 %v7204_v16  ;;  %v5282_v16 = vrot.slane %v4049_v12, %v8167_v53 }
 0x893   : > { %5187 = vmatpush1.bf16.msra.mxu0 %v7202_v19  ;;  %v5290_v19 = vcombine.high %v5282_v16, %v5282_v16 }
 0x894   : > { %5188 = vmatprep.subr.bf16.mxu0 %v7207_v45  ;;  %v5298_v45 = vrot.slane %v5282_v16, %v8167_v53 }
 0x897   : > { %5189 = vmatpush1.bf16.msra.mxu0 %v7205_v46  ;;  %v5312_v46 = vrot.slane %v5290_v19, %v8167_v53 }
 0x898   : > { %5190 = vmatprep.subr.bf16.mxu0 %v7210_v11  ;;  %v5320_v11 = vcombine.high %v5298_v45, %v5298_v45 }
 0x89b   : > { %5191 = vmatpush1.bf16.msra.mxu0 %v7208_v47  ;;  %v5321_v47 = vcombine.high %v5312_v46, %v5312_v46 }
 0x89c   : > { %5192 = vmatprep.subr.bf16.mxu0 %v7213_v48  ;;  %v5323_v48 = vpack.i.b16 %v5298_v45, %v5298_v45 }
 0x89f   : > { %5193 = vmatpush1.bf16.msra.mxu0 %v7211_v49  ;;  %v5337_v49 = vpack.i.b16 %v5320_v11, %v5320_v11 }
 0x8a0   : > { %5194 = vmatprep.subr.bf16.mxu0 %v7216_v50  ;;  %v5330_v50 = vpack.i.b16 %v5312_v46, %v5312_v46 }
 0x8a3   : > { %5195 = vmatpush1.bf16.msra.mxu0 %v7214_v26  ;;  %v5344_v26 = vpack.i.b16 %v5321_v47, %v5321_v47 }
 0x8a4   : > { %5196 = vmatprep.subr.bf16.mxu0 %v7219_v52 }
 0x8a7   : > { %5197 = vmatpush1.bf16.msra.mxu0 %v7217_v54 }
 0x8a8   : > { %5198 = vmatprep.subr.bf16.mxu0 %v7222_v57 }
 0x8ab   : > { %5199 = vmatpush1.bf16.msra.mxu0 %v7220_v59  ;;  %v5328_v59 = vrot.slane %v5323_v48, %v8177_v58 }
 0x8ac   : > { %5200 = vmatprep.subr.bf16.mxu0 %v7225_v60  ;;  %v5342_v60 = vrot.slane %v5337_v49, %v8177_v58 }
 0x8af   : > { %5201 = vmatpush1.bf16.msra.mxu0 %v7223_v61 }
 0x8b0   : > { %5202 = vmatprep.subr.bf16.mxu0 %v7228_v62 }
 0x8b3   : > { %5203 = vmatpush1.bf16.msra.mxu0 %v7226_v63  ;;  %v5335_v63 = vrot.slane %v5330_v50, %v8177_v58 }
 0x8b4   : > { %5204 = vmatprep.subr.bf16.mxu0 %v7231_v0  ;;  %v5349_v0 = vrot.slane %v5344_v26, %v8177_v58 }
 0x8b7   : > { %5205 = vmatpush1.bf16.msra.mxu0 %v7229_v1 }
 0x8b8   : > { %5206 = vmatprep.subr.bf16.mxu0 %v7234_v2 }
 0x8bb   : > { %5207 = vmatpush1.bf16.msra.mxu0 %v7232_v3 }
 0x8bc   : > { %5208 = vmatprep.subr.bf16.mxu0 %v7237_v5 }
 0x8bf   : > { %5209 = vmatpush1.bf16.msra.mxu0 %v7235_v6 }
 0x8c0   : > { %5210 = vmatprep.subr.bf16.mxu0 %v7240_v8 }
 0x8c3   : > { %5211 = vmatpush1.bf16.msra.mxu0 %v7238_v9 }
 0x8c4   : > { %5212 = vmatprep.subr.bf16.mxu0 %v7243_v10 }
 0x8c7   : > { %5213 = vmatpush1.bf16.msra.mxu0 %v7241_v55 }
 0x8c8   : > { %5225 = vmatprep.subr.bf16.mxu0 %v7246_v56 }
 0x8ca   : > { %5215 = vmatmul.mubr.bf16.vlgmr.msra.gmra.mrb[16].mxu0 %v8266_v29  ;;  %v7259_v29 = vld [vmem:[#allocation17 + $0x400] ss:$24 sps:$4 sm:$0xff]  }
 0x8cb   : > { %5226 = vmatpush1.bf16.msra.mxu0 %v7244_v13  ;;  %5257 = vmatprep.mubr.bf16.mxu0 %v8273_v32  ;;  %v7262_v32 = vld [vmem:[#allocation17 + $0x430] ss:$24 sps:$4 sm:$0xff]  }
 0x8cc   : > { %5227 = vmatprep.subr.bf16.mxu0 %v7249_v14 }
 0x8cf   : > { %5228 = vmatpush1.bf16.msra.mxu0 %v7247_v34 }
 0x8d0   : > { %5229 = vmatprep.subr.bf16.mxu0 %v7252_v15 }
 0x8d3   : > { %5230 = vmatpush1.bf16.msra.mxu0 %v7250_v17 }
 0x8d4   : > { %5231 = vmatprep.subr.bf16.mxu0 %v7255_v18 }
 0x8d7   : > { %5232 = vmatpush1.bf16.msra.mxu0 %v7253_v4 }
 0x8d8   : > { %5233 = vmatprep.subr.bf16.mxu0 %v7258_v20 }
 0x8db   : > { %5234 = vmatpush1.bf16.msra.mxu0 %v7256_v51  ;;  %v5275_v51 = vcombine.high %v4049_v12, %v4049_v12 }
 0x8dc   : > { %5235 = vmatprep.subr.bf16.mxu0 %v7261_v21 }
 0x8dd   : > { %v5289_v21 = vrot.slane %v5275_v51, %v8167_v53 }
 0x8df   : > { %5236 = vmatpush1.bf16.msra.mxu0 %v7259_v29  ;;  %v5291_v29 = vcombine.high %v5289_v21, %v5289_v21 }
 0x8e0   : > { %5237 = vmatprep.subr.bf16.mxu0 %v7264_v22  ;;  %v5305_v22 = vrot.slane %v5289_v21, %v8167_v53 }
 0x8e3   : > { %5238 = vmatpush1.bf16.msra.mxu0 %v7262_v32  ;;  %v5319_v32 = vrot.slane %v5291_v29, %v8167_v53 }
 0x8e4   : > { %5239 = vmatprep.subr.bf16.mxu0 %v7267_v23  ;;  %v5351_v23 = vpack.i.b16 %v5305_v22, %v5305_v22 }
 0x8e7   : > { %5240 = vmatpush1.bf16.msra.mxu0 %v7265_v24  ;;  %v5358_v24 = vpack.i.b16 %v5319_v32, %v5319_v32 }
 0x8e8   : > { %5241 = vmatprep.subr.bf16.mxu0 %v7270_v25 }
 0x8eb   : > { %5242 = vmatpush1.bf16.msra.mxu0 %v7268_v27 }
 0x8ec   : > { %5243 = vmatprep.subr.bf16.mxu0 %v7273_v28  ;;  %v5356_v28 = vrot.slane %v5351_v23, %v8177_v58 }
 0x8ef   : > { %5244 = vmatpush1.bf16.msra.mxu0 %v7271_v30 }
 0x8f0   : > { %5245 = vmatprep.subr.bf16.mxu0 %v7276_v31  ;;  %v5363_v31 = vrot.slane %v5358_v24, %v8177_v58 }
 0x8f3   : > { %5246 = vmatpush1.bf16.msra.mxu0 %v7274_v33 }
 0x8f4   : > { %5247 = vmatprep.subr.bf16.mxu0 %v7279_v35 }
 0x8f7   : > { %5248 = vmatpush1.bf16.msra.mxu0 %v7277_v36 }
 0x8f8   : > { %5249 = vmatprep.subr.bf16.mxu0 %v7282_v7 }
 0x8fb   : > { %5250 = vmatpush1.bf16.msra.mxu0 %v7280_v37 }
 0x8fc   : > { %5251 = vmatprep.subr.bf16.mxu0 %v7285_v38 }
 0x8ff   : > { %5252 = vmatpush1.bf16.msra.mxu0 %v7283_v39 }
 0x900   : > { %5253 = vmatprep.subr.bf16.mxu0 %v7288_v40 }
 0x903   : > { %5254 = vmatpush1.bf16.msra.mxu0 %v7286_v41 }
 0x904   : > { %5255 = vmatprep.subr.bf16.mxu0 %v7291_v42 }
 0x907   : > { %5256 = vmatpush1.bf16.msra.mxu0 %v7289_v44 }
 0x90a   : > { %5258 = vmatmul.mubr.bf16.vlgmr.msra.gmra.mrb[16].mxu0 %v8284_v43 }
 0x95d   : > { %v5087_v52 = vpop.f32.mrb[12].mxu0  ;;  %v5173_v54 = vpop.f32.mrb[28].mxu1 }
 0x95e   : > { %v5089_v43 = vpop.f32.mrb[13].mxu0  ;;  %v5175_v57 = vpop.f32.mrb[29].mxu1 }
 0x95f   : > { %v5091_v61 = vpop.f32.mrb[14].mxu0  ;;  %v5177_v62 = vpop.f32.mrb[30].mxu1 }
 0x960   : > { %v5268_v1 = vpack.c.bf16 %v5091_v61, %v5087_v52  ;;  %v5270_v2 = vpack.c.bf16 %v5177_v62, %v5173_v54  ;;  %v5093_v3 = vpop.f32.mrb[15].mxu0  ;;  %v5179_v5 = vpop.f32.mrb[31].mxu1 }
 0x961   : > { %v5269_v6 = vpack.c.bf16 %v5093_v3, %v5089_v43  ;;  %v5271_v8 = vpack.c.bf16 %v5179_v5, %v5175_v57 }
 0x962   : > { %v5364_v9 = vadd.bf16 %v5328_v59, %v5268_v1  ;;  %v5366_v10 = vadd.bf16 %v5342_v60, %v5270_v2 }
 0x963   : > { %v5365_v55 = vadd.bf16 %v5335_v63, %v5269_v6  ;;  %v5367_v56 = vadd.bf16 %v5349_v0, %v5271_v8 }
 0x964   : > { %7293 = vtanh.bf16 %v5364_v9 }
 0x965   : > { %7295 = vtanh.bf16 %v5366_v10 }
 0x966   : > { %7297 = vtanh.bf16 %v5365_v55 }
 0x967   : > { %7299 = vtanh.bf16 %v5367_v56 }
 0x96f   : > { %v7294_v13 = vpop.eup %7293 }
 0x970   : > { %v7296_v14 = vpop.eup %7295 }
 0x971   : > { %v7298_v34 = vpop.eup %7297 }
 0x972   : > { %v7300_v15 = vpop.eup %7299  ;;  %v6181_v17 = vcombine.low %v7294_v13, %v7298_v34  ;;  %v6184_v18 = vcombine.high %v7294_v13, %v7298_v34 }
 0x973   : > { %v6182_v4 = vcombine.low %v7296_v14, %v7300_v15  ;;  %v6185_v20 = vcombine.high %v7296_v14, %v7300_v15 }
 0x974   : > { %5406 = vst [vmem:[%s8304_s3] sm:$0xff] %v6181_v17  ;;  %5409 = vst [vmem:[%s8304_s3 + $0x18] sm:$0xff] %v6184_v18 }
 0x975   : > { %5407 = vst [vmem:[%s8304_s3 + $0x8] sm:$0xff] %v6182_v4  ;;  %5410 = vst [vmem:[%s8304_s3 + $0x20] sm:$0xff] %v6185_v20 }
 0x9dd   : > { %v5259_v25 = vpop.f32.mrb[16].mxu0 }
 0x9de   : > { %v5261_v27 = vpop.f32.mrb[17].mxu0 }
 0x9df   : > { %v5263_v30 = vpop.f32.mrb[18].mxu0 }
 0x9e0   : > { %v5272_v33 = vpack.c.bf16 %v5263_v30, %v5259_v25  ;;  %v5265_v35 = vpop.f32.mrb[19].mxu0 }
 0x9e1   : > { %v5273_v36 = vpack.c.bf16 %v5265_v35, %v5261_v27 }
 0x9e2   : > { %v5368_v7 = vadd.bf16 %v5356_v28, %v5272_v33 }
 0x9e3   : > { %v5369_v37 = vadd.bf16 %v5363_v31, %v5273_v36 }
 0x9e4   : > { %7301 = vtanh.bf16 %v5368_v7 }
 0x9e5   : > { %7303 = vtanh.bf16 %v5369_v37 }
 0x9ef   : > { %v7302_v53 = vpop.eup %7301 }
 0x9f0   : > { %v7304_v38 = vpop.eup %7303 }
 0x9f1   : > { %v6183_v58 = vcombine.low %v7302_v53, %v7304_v38  ;;  %v6186_v39 = vcombine.high %v7302_v53, %v7304_v38 }
 0x9f3   : > { %5408 = vst [vmem:[%s8304_s3 + $0x10] sm:$0xff] %v6183_v58  ;;  %5411 = vst [vmem:[%s8304_s3 + $0x28] sm:$0xff] %v6186_v39 }
 0x9f4   : > { %7602 = shalt.err (!%p7599_p3)
}
 0x9f5   : > { %s7603_s12 = scalar_lea.hbm %s8320_s30, 768  ;;  %s7607_s3 = scalar_lea.hbm %s8446_s22, 1536 }
 0x9f6   : > { %p7604_p0 = scmp.ne.s32.totalorder %s8320_s30, %s7603_s12  ;;  %p7608_p7 = scmp.lt.u32.totalorder %s8320_s30, %s8446_s22 }
 0x9f7   : > { %p7609_p10 = scmp.lt.u32.totalorder %s7607_s3, %s7603_s12  ;;  %p7611_p11 = scmp.lt.u32.totalorder %s7603_s12, %s8320_s30 }
 0x9f8   : > { %p7605_p5 = pnand %p7604_p0, %p8447_p12 }
 0x9f9   : > { %p7610_p1 = por %p7609_p10, %p7608_p7 }
 0x9fa   : > { %p7606_p2 = pneg %p7605_p5 }
 0x9fb   : > { %p7612_p13 = por %p7611_p11, %p7610_p1 }
 0x9fd   : > { %p7613_p8 = pnand %p7612_p13, %p7606_p2 }
 0x9ff   : > { %7616 = shalt.err (!%p7613_p8)
}
 0xa00   : > { %s7700_s29 = smov 384   ;;  %s7701_s2 = smov 24  }
 0xa01   : > { %6346 = dma.vmem_to_hbm [thread:$0]  (%p8447_p12), %s8322_s19, 768, %s8320_s30, %s5413_s23, %s7700_s29, %s7700_s29, %s7701_s2  }
 0xa02 PF: > { %s5442_s0 = sand.u32 1, %s7663_s24   ;;  %p8448_p6 = scmp.ne.s32.totalorder %s8423_s28, 0 }
 0xa03   : > { %p8449_p9 = scmp.ge.s32.totalorder %s7675_s27, 2  ;;  %s5443_s6 = scalar_lea.sflag [#allocation4], %s5442_s0 }
 0xa05   : > { %p6381_p4 = pnand %p8449_p9, %p8448_p6 }
 0xa07   : > { %7658 = dma.done.wait (!%p6381_p4), %s5443_s6, 768  }
 0xa08   : > { %7660 = vsyncadd (!%p6381_p4), %s5443_s6, 4294966528  ;;  %p35_p3 = scmp.ge.s32.totalorder %s8036_s16, 4   ;;  %s8450_s24 = smov %s7667_s25 }
 0xa09   : > { %s8451_s25 = smov %s7671_s26  ;;  %s8452_s26 = smov %s8048_s1 }
 0xa0a   : > { %s8453_s27 = smov %s8036_s16  ;;  %37 = sbr.rel (!%p35_p3) target bundleno = 23 (0x17), region = 169 }
 0xa11   :  { %5448 = vsyncpa [#allocation3], 1 }
 0xa12   :  { %5450 = vsyncpa [#allocation3 + $0x1], 1 }
 0xa13   :  { %5451 = vsyncpa [#allocation6], 1 }
 0xa14   :  { %5452 = vsyncpa [#allocation9], 1 }
 0xa15   :  { %5453 = vsyncpa [#allocation12], 1 }
 0xa16   :  { %5454 = vsyncpa [#allocation15], 1 }
 0xa17   :  { %5455 = vsyncpa [#allocation18], 1 }
 0xa18   :  { %5456 = vsyncpa [#allocation4], 1 }
 0xa19   :  { %5458 = vsyncpa [#allocation4 + $0x1], 1 }

</bundles_post_ra>
